<compile_context>
chip_gen: v7x
topology: tpu7x:2x2x1
jax: 0.10.0
libtpu: 0.0.40
codegen_flags: <defaults>
</compile_context>

<pallas_src>
import functools
import math

import jax
import jax.numpy as jnp
from jax.experimental import pallas as pl
from jax.experimental.pallas import tpu as pltpu

_H1 = 4096  # layer-1 width
_H2 = 3072  # layer-2 width


def _gelu_exact(x):
    # PyTorch nn.GELU() default: 0.5 * x * (1 + erf(x / sqrt(2)))
    return 0.5 * x * (1.0 + jax.lax.erf(x * (1.0 / math.sqrt(2.0))))


def _round_up(x, m):
    return (x + m - 1) // m * m


# --------------------------------------------------------------------------
# Kernel bodies
# --------------------------------------------------------------------------
def _mlp_kernel_stream_w1(x_ref, w0_ref, b0_ref, w1_ref, b1_ref, w2_ref,
                          b2_ref, o_ref, h1_ref, acc_ref):
    """Small-M path: grid = (H2 // tn,), W1/W2/b1 streamed along H2 columns."""
    n = pl.program_id(0)
    last = pl.num_programs(0) - 1

    @pl.when(n == 0)
    def _():
        # Layer 1 once per call (W0 resident): h1 = gelu(x @ W0 + b0).
        y = jnp.dot(x_ref[...], w0_ref[...], preferred_element_type=jnp.float32)
        y = y + b0_ref[...].astype(jnp.float32)
        h1_ref[...] = _gelu_exact(y).astype(h1_ref.dtype)

    # Column block of layer 2 (+GELU), folded straight into layer 3 so the
    # erf work overlaps the next W1-block DMA.
    h2 = _gelu_exact(
        jnp.dot(h1_ref[...], w1_ref[...], preferred_element_type=jnp.float32)
        + b1_ref[...].astype(jnp.float32)
    ).astype(w2_ref.dtype)
    partial = jnp.dot(h2, w2_ref[...], preferred_element_type=jnp.float32)

    @pl.when(n == 0)
    def _():
        acc_ref[...] = partial          # skip the zero-fill

    @pl.when(n > 0)
    def _():
        acc_ref[...] += partial

    @pl.when(n == last)
    def _():
        o_ref[...] = (acc_ref[...]
                      + b2_ref[...].astype(jnp.float32)).astype(o_ref.dtype)


def _mlp_kernel_resident_w1(x_ref, w0_ref, b0_ref, w1_ref, b1_ref, w2_ref,
                            b2_ref, o_ref):
    """Large-M path: grid = (token tiles,), all weights VMEM-resident."""
    h1 = _gelu_exact(
        jnp.dot(x_ref[...], w0_ref[...], preferred_element_type=jnp.float32)
        + b0_ref[...].astype(jnp.float32)
    ).astype(x_ref.dtype)
    h2 = _gelu_exact(
        jnp.dot(h1, w1_ref[...], preferred_element_type=jnp.float32)
        + b1_ref[...].astype(jnp.float32)
    ).astype(x_ref.dtype)
    y = jnp.dot(h2, w2_ref[...], preferred_element_type=jnp.float32)
    o_ref[...] = (y + b2_ref[...].astype(jnp.float32)).astype(o_ref.dtype)


# --------------------------------------------------------------------------
# Wrapper
# --------------------------------------------------------------------------
def _vmem_capacity_bytes():
    try:
        return int(pltpu.get_tpu_info().vmem_capacity_bytes)
    except Exception:
        return None


def _resident_block_spec(shape, index_map, single_buffer):
    """Constant-index BlockSpec; single-buffered when requested & supported.

    Returns (spec, buffer_count) so the VMEM estimate stays honest."""
    if single_buffer:
        buffered = getattr(pl, "Buffered", None)
        if buffered is not None:
            try:
                return pl.BlockSpec(shape, index_map,
                                    pipeline_mode=buffered(1)), 1
            except (TypeError, ValueError):
                pass
    return pl.BlockSpec(shape, index_map), 2


def mlp_embedding_pallas(x2d, params, *, tm=None, tn=512):
    """Fused y = W2·gelu(W1·gelu(W0·x+b0)+b1)+b2 for token-major x2d (M, K)."""
    (w0, b0), (w1, b1), (w2, b2) = params
    M, input_dim = x2d.shape
    H1, H2 = w1.shape
    E = w2.shape[1]
    assert w0.shape == (input_dim, H1) and b0.shape == (H1,)
    assert b1.shape == (H2,)
    assert w2.shape == (H2, E) and b2.shape == (E,)
    assert H2 % tn == 0 and tn % 128 == 0

    bf16 = 2
    cap = _vmem_capacity_bytes()
    headroom = 8 << 20

    # Token tile: bf16 packs 16 sublanes, so round to 16.  For large M on
    # big-VMEM chips (v5e/v6e, 128 MiB) use 512-row tiles to halve per-step
    # bookkeeping once W1 is resident; keep 256 on VMEM-tight chips.
    if tm is None:
        tm = 512 if (cap is not None and cap >= (96 << 20) and M > 256) else 256
    tm = min(tm, _round_up(M, 16))
    m_pad = _round_up(M, tm)
    if m_pad != M:
        x2d = jnp.pad(x2d, ((0, m_pad - M), (0, 0)))
    n_i = m_pad // tm

    b0r = b0.reshape(1, H1)
    b1r = b1.reshape(1, H2)
    b2r = b2.reshape(1, E)

    # Pieces common to both paths (all double-buffered by default).
    base_bytes = (
        2 * input_dim * H1 * bf16          # W0 (constant index)
        + 2 * (H1 + E) * bf16              # b0, b2
        + 2 * tm * input_dim * bf16        # x tiles
        + 2 * tm * E * bf16                # output tiles
    )

    if n_i > 1:
        # ---- W1-resident path: W1 fetched from HBM exactly once, not once
        # ---- per token tile.  Grid is the token-tile axis only.
        resident_double = base_bytes + 2 * (H1 * H2 + H2 * E + H2) * bf16
        single = cap is not None and resident_double > cap // 2
        w1_spec, c1 = _resident_block_spec((H1, H2), lambda i: (0, 0), single)
        b1_spec, _ = _resident_block_spec((1, H2), lambda i: (0, 0), single)
        w2_spec, c2 = _resident_block_spec((H2, E), lambda i: (0, 0), single)
        vmem_est = (base_bytes
                    + (c1 * H1 * H2 + c2 * H2 * E + 2 * H2) * bf16
                    + tm * (H1 + H2) * 4)   # f32 activation temporaries

        grid_spec = pltpu.PrefetchScalarGridSpec(
            num_scalar_prefetch=0,
            grid=(n_i,),
            in_specs=[
                pl.BlockSpec((tm, input_dim), lambda i: (i, 0)),   # x
                pl.BlockSpec((input_dim, H1), lambda i: (0, 0)),   # W0
                pl.BlockSpec((1, H1), lambda i: (0, 0)),           # b0
                w1_spec,                                           # W1 (resident)
                b1_spec,                                           # b1
                w2_spec,                                           # W2 (resident)
                pl.BlockSpec((1, E), lambda i: (0, 0)),            # b2
            ],
            out_specs=pl.BlockSpec((tm, E), lambda i: (i, 0)),
        )
        kernel = _mlp_kernel_resident_w1
        dims = ("parallel",)
    else:
        # ---- W1-streamed path (single token tile): stream W1 along its H2
        # ---- (column) axis so the layer-2 GELU + layer-3 matmul overlap the
        # ---- W1 DMA; accumulator is only (tm, E) f32.
        n_n = H2 // tn
        vmem_est = (base_bytes
                    + 2 * (H1 * tn + tn * E + tn) * bf16   # W1/W2/b1 blocks
                    + tm * H1 * bf16                       # h1 scratch
                    + tm * E * 4)                          # f32 accumulator

        grid_spec = pltpu.PrefetchScalarGridSpec(
            num_scalar_prefetch=0,
            grid=(n_n,),
            in_specs=[
                pl.BlockSpec((tm, input_dim), lambda n: (0, 0)),   # x
                pl.BlockSpec((input_dim, H1), lambda n: (0, 0)),   # W0 (resident)
                pl.BlockSpec((1, H1), lambda n: (0, 0)),           # b0
                pl.BlockSpec((H1, tn), lambda n: (0, n)),          # W1 (streamed)
                pl.BlockSpec((1, tn), lambda n: (0, n)),           # b1 (streamed)
                pl.BlockSpec((tn, E), lambda n: (n, 0)),           # W2 (streamed)
                pl.BlockSpec((1, E), lambda n: (0, 0)),            # b2
            ],
            out_specs=pl.BlockSpec((tm, E), lambda n: (0, 0)),
            scratch_shapes=[
                pltpu.VMEM((tm, H1), jnp.bfloat16),   # h1 = gelu(layer 1)
                pltpu.VMEM((tm, E), jnp.float32),     # layer-3 accumulator
            ],
        )
        kernel = _mlp_kernel_stream_w1
        dims = ("arbitrary",)

    # Scoped-VMEM limit: above v5e's 16 MiB default, below physical capacity
    # minus compiler headroom (v7x: 64 MiB physical).
    ceiling = (cap - headroom) if cap is not None else (56 << 20)
    vmem_limit = max(min(int(vmem_est * 1.4) + (16 << 20), ceiling), 32 << 20)

    out = pl.pallas_call(
        kernel,
        out_shape=jax.ShapeDtypeStruct((m_pad, E), jnp.bfloat16),
        grid_spec=grid_spec,
        compiler_params=pltpu.CompilerParams(
            dimension_semantics=dims,
            vmem_limit_bytes=int(vmem_limit),
        ),
    )(x2d, w0, b0r, w1, b1r, w2, b2r)

    return out[:M]


def init_mlp_params(key, input_dim, embedding_dim):
    """Deterministic bf16 params, shapes matching the PyTorch module."""
    dims = [(input_dim, _H1), (_H1, _H2), (_H2, embedding_dim)]
    params = []
    for fan_in, fan_out in dims:
        key, kw, kb = jax.random.split(key, 3)
        bound = 1.0 / math.sqrt(fan_in)
        w = jax.random.uniform(
            kw, (fan_in, fan_out), jnp.float32, -bound, bound
        ).astype(jnp.bfloat16)
        b = jax.random.uniform(
            kb, (fan_out,), jnp.float32, -bound, bound
        ).astype(jnp.bfloat16)
        params.append((w, b))
    return params


def mlp_embedding_forward(x, params):
    """Mirrors MLPEmbedding.forward: view(B, S, -1) then the 3-layer bf16 MLP."""
    batch_size, num_seconds = x.shape[0], x.shape[1]
    x2 = x.reshape(batch_size, num_seconds, -1).astype(jnp.bfloat16)
    flat = x2.reshape(batch_size * num_seconds, x2.shape[-1])
    out = mlp_embedding_pallas(flat, params)
    return out.reshape(batch_size, num_seconds, -1)


if __name__ == "__main__":
    key = jax.random.PRNGKey(0)
    k_x, k_p = jax.random.split(key)

    # Small example: batch=2, num_seconds=8, per-second features 64*2 -> 128.
    batch, seconds = 2, 8
    x = jax.random.normal(k_x, (batch, seconds, 64, 2), jnp.float32).astype(
        jnp.bfloat16)

    input_dim, embedding_dim = 64 * 2, 256
    params = init_mlp_params(k_p, input_dim, embedding_dim)

    # f32 reference for both paths.
    def ref_mlp(h2d):
        h = h2d.astype(jnp.float32)
        for i, (w, b) in enumerate(params):
            h = h @ w.astype(jnp.float32) + b.astype(jnp.float32)
            if i < 2:
                h = 0.5 * h * (1.0 + jax.lax.erf(h / math.sqrt(2.0)))
        return h

    # --- Path 1: small M (single token tile -> W1 streamed along H2). ---
    out = mlp_embedding_forward(x, params)
    out = jax.block_until_ready(out)
    assert out.shape == (batch, seconds, embedding_dim), out.shape
    assert out.dtype == jnp.bfloat16, out.dtype

    x2d = x.reshape(batch * seconds, -1).astype(jnp.bfloat16)
    ref1 = ref_mlp(x2d).reshape(batch, seconds, -1)
    err1 = float(jnp.max(jnp.abs(out.astype(jnp.float32) - ref1)))
    assert err1 < 0.5, f"streamed-path max abs err too large: {err1}"

    # --- Path 2: multi-tile (W1-resident) path, exercised at tiny shapes by
    # --- forcing a 16-row token tile.  Skipped only on very small-VMEM chips.
    cap = _vmem_capacity_bytes()
    if cap is None or cap >= (48 << 20):
        x_big = jax.random.normal(
            jax.random.PRNGKey(1), (32, input_dim), jnp.float32
        ).astype(jnp.bfloat16)
        out2 = mlp_embedding_pallas(x_big, params, tm=16)
        out2 = jax.block_until_ready(out2)
        ref2 = ref_mlp(x_big)
        err2 = float(jnp.max(jnp.abs(out2.astype(jnp.float32) - ref2)))
        assert err2 < 0.5, f"resident-path max abs err too large: {err2}"

    print("KERNEL_OK")
</pallas_src>

<mosaic_0001>
module attributes {stable_mosaic.version = 11 : i64} {
  func.func @_mlp_kernel_stream_w1(%arg0: i32, %arg1: memref<16x128xbf16, #tpu.memory_space<vmem>>, %arg2: memref<128x4096xbf16, #tpu.memory_space<vmem>>, %arg3: memref<1x4096xbf16, #tpu.memory_space<vmem>>, %arg4: memref<4096x512xbf16, #tpu.memory_space<vmem>>, %arg5: memref<1x512xbf16, #tpu.memory_space<vmem>>, %arg6: memref<512x256xbf16, #tpu.memory_space<vmem>>, %arg7: memref<1x256xbf16, #tpu.memory_space<vmem>>, %arg8: memref<16x256xbf16, #tpu.memory_space<vmem>>, %arg9: memref<16x4096xbf16, #tpu.memory_space<vmem>>, %arg10: memref<16x256xf32, #tpu.memory_space<vmem>>) attributes {dimension_semantics = [#tpu.dimension_semantics<arbitrary>], iteration_bounds = array<i64: 6>, scalar_prefetch = 0 : i64, scratch_operands = 2 : i64, tpu.core_type = #tpu.core_type<tc>, window_params = [{pipeline_mode = #tpu.pipeline_mode<synchronous>, transform_indices = @transform_0, window_bounds = array<i64: 16, 128>}, {pipeline_mode = #tpu.pipeline_mode<synchronous>, transform_indices = @transform_1, window_bounds = array<i64: 128, 4096>}, {pipeline_mode = #tpu.pipeline_mode<synchronous>, transform_indices = @transform_2, window_bounds = array<i64: 1, 4096>}, {transform_indices = @transform_3, window_bounds = array<i64: 4096, 512>}, {transform_indices = @transform_4, window_bounds = array<i64: 1, 512>}, {transform_indices = @transform_5, window_bounds = array<i64: 512, 256>}, {pipeline_mode = #tpu.pipeline_mode<synchronous>, transform_indices = @transform_6, window_bounds = array<i64: 1, 256>}, {pipeline_mode = #tpu.pipeline_mode<synchronous>, transform_indices = @transform_7, window_bounds = array<i64: 16, 256>}]} {
    %c0_i32 = arith.constant 0 : i32
    %0 = arith.cmpi eq, %arg0, %c0_i32 : i32
    %1 = arith.extui %0 : i1 to i32
    %c0_i32_0 = arith.constant 0 : i32
    %2 = arith.cmpi ne, %1, %c0_i32_0 : i32
    scf.if %2 {
      %c0_17 = arith.constant 0 : index
      %c0_18 = arith.constant 0 : index
      %30 = vector.load %arg1[%c0_17, %c0_18] : memref<16x128xbf16, #tpu.memory_space<vmem>>, vector<16x128xbf16>
      %c0_19 = arith.constant 0 : index
      %c0_20 = arith.constant 0 : index
      %31 = vector.load %arg2[%c0_19, %c0_20] : memref<128x4096xbf16, #tpu.memory_space<vmem>>, vector<128x4096xbf16>
      %cst_21 = arith.constant dense<0.000000e+00> : vector<16x4096xf32>
      %32 = tpu.matmul %30, %31, %cst_21 {dimension_numbers = #tpu.dot_dimension_numbers<[1], [0], [0], [1], [0, 0, 1, 1], [], []>} : vector<16x128xbf16>, vector<128x4096xbf16>, vector<16x4096xf32> -> vector<16x4096xf32>
      %c0_22 = arith.constant 0 : index
      %c0_23 = arith.constant 0 : index
      %33 = vector.load %arg3[%c0_22, %c0_23] : memref<1x4096xbf16, #tpu.memory_space<vmem>>, vector<1x4096xbf16>
      %34 = arith.extf %33 : vector<1x4096xbf16> to vector<1x4096xf32>
      %35 = vector.broadcast %34 : vector<1x4096xf32> to vector<16x4096xf32>
      %36 = arith.addf %32, %35 : vector<16x4096xf32>
      %cst_24 = arith.constant 5.000000e-01 : f32
      %37 = vector.broadcast %cst_24 : f32 to vector<16x4096xf32>
      %38 = arith.mulf %37, %36 : vector<16x4096xf32>
      %cst_25 = arith.constant 0.707106769 : f32
      %39 = vector.broadcast %cst_25 : f32 to vector<16x4096xf32>
      %40 = arith.mulf %36, %39 : vector<16x4096xf32>
      %41 = math.erf %40 : vector<16x4096xf32>
      %cst_26 = arith.constant 1.000000e+00 : f32
      %42 = vector.broadcast %cst_26 : f32 to vector<16x4096xf32>
      %43 = arith.addf %42, %41 : vector<16x4096xf32>
      %44 = arith.mulf %38, %43 : vector<16x4096xf32>
      %45 = arith.truncf %44 : vector<16x4096xf32> to vector<16x4096xbf16>
      %c0_27 = arith.constant 0 : index
      %c0_28 = arith.constant 0 : index
      %46 = vector.load %arg9[%c0_27, %c0_28] : memref<16x4096xbf16, #tpu.memory_space<vmem>>, vector<16x4096xbf16>
      tpu.vector_store %arg9[%c0_27, %c0_28], %45 {strides = array<i32>} : memref<16x4096xbf16, #tpu.memory_space<vmem>>, vector<16x4096xbf16>,
    } else {
    }
    %c0 = arith.constant 0 : index
    %c0_1 = arith.constant 0 : index
    %3 = vector.load %arg9[%c0, %c0_1] : memref<16x4096xbf16, #tpu.memory_space<vmem>>, vector<16x4096xbf16>
    %c0_2 = arith.constant 0 : index
    %c0_3 = arith.constant 0 : index
    %4 = vector.load %arg4[%c0_2, %c0_3] : memref<4096x512xbf16, #tpu.memory_space<vmem>>, vector<4096x512xbf16>
    %cst = arith.constant dense<0.000000e+00> : vector<16x512xf32>
    %5 = tpu.matmul %3, %4, %cst {dimension_numbers = #tpu.dot_dimension_numbers<[1], [0], [0], [1], [0, 0, 1, 1], [], []>} : vector<16x4096xbf16>, vector<4096x512xbf16>, vector<16x512xf32> -> vector<16x512xf32>
    %c0_4 = arith.constant 0 : index
    %c0_5 = arith.constant 0 : index
    %6 = vector.load %arg5[%c0_4, %c0_5] : memref<1x512xbf16, #tpu.memory_space<vmem>>, vector<1x512xbf16>
    %7 = arith.extf %6 : vector<1x512xbf16> to vector<1x512xf32>
    %8 = vector.broadcast %7 : vector<1x512xf32> to vector<16x512xf32>
    %9 = arith.addf %5, %8 : vector<16x512xf32>
    %cst_6 = arith.constant 5.000000e-01 : f32
    %10 = vector.broadcast %cst_6 : f32 to vector<16x512xf32>
    %11 = arith.mulf %10, %9 : vector<16x512xf32>
    %cst_7 = arith.constant 0.707106769 : f32
    %12 = vector.broadcast %cst_7 : f32 to vector<16x512xf32>
    %13 = arith.mulf %9, %12 : vector<16x512xf32>
    %14 = math.erf %13 : vector<16x512xf32>
    %cst_8 = arith.constant 1.000000e+00 : f32
    %15 = vector.broadcast %cst_8 : f32 to vector<16x512xf32>
    %16 = arith.addf %15, %14 : vector<16x512xf32>
    %17 = arith.mulf %11, %16 : vector<16x512xf32>
    %18 = arith.truncf %17 : vector<16x512xf32> to vector<16x512xbf16>
    %c0_9 = arith.constant 0 : index
    %c0_10 = arith.constant 0 : index
    %19 = vector.load %arg6[%c0_9, %c0_10] : memref<512x256xbf16, #tpu.memory_space<vmem>>, vector<512x256xbf16>
    %cst_11 = arith.constant dense<0.000000e+00> : vector<16x256xf32>
    %20 = tpu.matmul %18, %19, %cst_11 {dimension_numbers = #tpu.dot_dimension_numbers<[1], [0], [0], [1], [0, 0, 1, 1], [], []>} : vector<16x512xbf16>, vector<512x256xbf16>, vector<16x256xf32> -> vector<16x256xf32>
    %c0_i32_12 = arith.constant 0 : i32
    %21 = arith.cmpi eq, %arg0, %c0_i32_12 : i32
    %22 = arith.extui %21 : i1 to i32
    %c0_i32_13 = arith.constant 0 : i32
    %23 = arith.cmpi ne, %22, %c0_i32_13 : i32
    scf.if %23 {
      %c0_17 = arith.constant 0 : index
      %c0_18 = arith.constant 0 : index
      %30 = vector.load %arg10[%c0_17, %c0_18] : memref<16x256xf32, #tpu.memory_space<vmem>>, vector<16x256xf32>
      tpu.vector_store %arg10[%c0_17, %c0_18], %20 {strides = array<i32>} : memref<16x256xf32, #tpu.memory_space<vmem>>, vector<16x256xf32>,
    } else {
    }
    %c0_i32_14 = arith.constant 0 : i32
    %24 = arith.cmpi sgt, %arg0, %c0_i32_14 : i32
    %25 = arith.extui %24 : i1 to i32
    %c0_i32_15 = arith.constant 0 : i32
    %26 = arith.cmpi ne, %25, %c0_i32_15 : i32
    scf.if %26 {
      %c0_17 = arith.constant 0 : index
      %c0_18 = arith.constant 0 : index
      %30 = vector.load %arg10[%c0_17, %c0_18] : memref<16x256xf32, #tpu.memory_space<vmem>>, vector<16x256xf32>
      %31 = arith.addf %30, %20 : vector<16x256xf32>
      %c0_19 = arith.constant 0 : index
      %c0_20 = arith.constant 0 : index
      %32 = vector.load %arg10[%c0_19, %c0_20] : memref<16x256xf32, #tpu.memory_space<vmem>>, vector<16x256xf32>
      tpu.vector_store %arg10[%c0_19, %c0_20], %31 {strides = array<i32>} : memref<16x256xf32, #tpu.memory_space<vmem>>, vector<16x256xf32>,
    } else {
    }
    %c5_i32 = arith.constant 5 : i32
    %27 = arith.cmpi eq, %arg0, %c5_i32 : i32
    %28 = arith.extui %27 : i1 to i32
    %c0_i32_16 = arith.constant 0 : i32
    %29 = arith.cmpi ne, %28, %c0_i32_16 : i32
    scf.if %29 {
      %c0_17 = arith.constant 0 : index
      %c0_18 = arith.constant 0 : index
      %30 = vector.load %arg10[%c0_17, %c0_18] : memref<16x256xf32, #tpu.memory_space<vmem>>, vector<16x256xf32>
      %c0_19 = arith.constant 0 : index
      %c0_20 = arith.constant 0 : index
      %31 = vector.load %arg7[%c0_19, %c0_20] : memref<1x256xbf16, #tpu.memory_space<vmem>>, vector<1x256xbf16>
      %32 = arith.extf %31 : vector<1x256xbf16> to vector<1x256xf32>
      %33 = vector.broadcast %32 : vector<1x256xf32> to vector<16x256xf32>
      %34 = arith.addf %30, %33 : vector<16x256xf32>
      %35 = arith.truncf %34 : vector<16x256xf32> to vector<16x256xbf16>
      %c0_21 = arith.constant 0 : index
      %c0_22 = arith.constant 0 : index
      %36 = vector.load %arg8[%c0_21, %c0_22] : memref<16x256xbf16, #tpu.memory_space<vmem>>, vector<16x256xbf16>
      tpu.vector_store %arg8[%c0_21, %c0_22], %35 {strides = array<i32>} : memref<16x256xbf16, #tpu.memory_space<vmem>>, vector<16x256xbf16>,
    } else {
    }
    return
  }
  func.func @transform_0(%arg0: i32) -> (i32, i32) {
    %c0_i32 = arith.constant 0 : i32
    %c0_i32_0 = arith.constant 0 : i32
    %c0_i32_1 = arith.constant 0 : i32
    return %c0_i32, %c0_i32_0 : i32, i32
  }
  func.func @transform_1(%arg0: i32) -> (i32, i32) {
    %c0_i32 = arith.constant 0 : i32
    %c0_i32_0 = arith.constant 0 : i32
    %c0_i32_1 = arith.constant 0 : i32
    return %c0_i32, %c0_i32_0 : i32, i32
  }
  func.func @transform_2(%arg0: i32) -> (i32, i32) {
    %c0_i32 = arith.constant 0 : i32
    %c0_i32_0 = arith.constant 0 : i32
    %c0_i32_1 = arith.constant 0 : i32
    return %c0_i32, %c0_i32_0 : i32, i32
  }
  func.func @transform_3(%arg0: i32) -> (i32, i32) {
    %c0_i32 = arith.constant 0 : i32
    %c0_i32_0 = arith.constant 0 : i32
    return %c0_i32, %arg0 : i32, i32
  }
  func.func @transform_4(%arg0: i32) -> (i32, i32) {
    %c0_i32 = arith.constant 0 : i32
    %c0_i32_0 = arith.constant 0 : i32
    return %c0_i32, %arg0 : i32, i32
  }
  func.func @transform_5(%arg0: i32) -> (i32, i32) {
    %c0_i32 = arith.constant 0 : i32
    %c0_i32_0 = arith.constant 0 : i32
    return %arg0, %c0_i32 : i32, i32
  }
  func.func @transform_6(%arg0: i32) -> (i32, i32) {
    %c0_i32 = arith.constant 0 : i32
    %c0_i32_0 = arith.constant 0 : i32
    %c0_i32_1 = arith.constant 0 : i32
    return %c0_i32, %c0_i32_0 : i32, i32
  }
  func.func @transform_7(%arg0: i32) -> (i32, i32) {
    %c0_i32 = arith.constant 0 : i32
    %c0_i32_0 = arith.constant 0 : i32
    %c0_i32_1 = arith.constant 0 : i32
    return %c0_i32, %c0_i32_0 : i32, i32
  }
}

</mosaic_0001>

<bundles_post_ra>
// kernel: tpu_custom_call.1
= control target key start
LH: loop header
LB: loop body
LE: loop exit
PB: predicated region body
PF: predicated region fallthrough
CT: control target
= control target key end

     0   :  { %s17085_s0 = inlined_call_operand.hbm [shape: bf16[16,128], index: 0, kind: input, shape index: {}]   ;;  %s17086_s1 = inlined_call_operand.hbm [shape: bf16[128,4096], index: 1, kind: input, shape index: {}]   ;;  %s17087_s2 = inlined_call_operand.hbm [shape: bf16[1,4096], index: 2, kind: input, shape index: {}]   ;;  %s17088_s3 = inlined_call_operand.hbm [shape: bf16[4096,3072], index: 3, kind: input, shape index: {}]   ;;  %s17089_s4 = inlined_call_operand.hbm [shape: bf16[1,3072], index: 4, kind: input, shape index: {}]   ;;  %s17090_s5 = inlined_call_operand.hbm [shape: bf16[3072,256], index: 5, kind: input, shape index: {}]   ;;  %s17091_s6 = inlined_call_operand.hbm [shape: bf16[1,256], index: 6, kind: input, shape index: {}]   ;;  %s17092_s7 = inlined_call_operand.hbm [shape: bf16[16,256], index: 7, kind: output, shape index: {}]  }
   0x1   :  { %17109 = sst [smem:[#allocation26_spill]] %s17086_s1 }
   0x2   :  { %17110 = sst [smem:[#allocation27_spill]] %s17088_s3 }
   0x3   :  { %17111 = sst [smem:[#allocation28_spill]] %s17091_s6 }
   0x4   :  { %12 = vsyncpa [#allocation5], 0 }
   0x5   :  { %13 = vsyncpa [#allocation8], 0 }
   0x6   :  { %14 = vsyncpa [#allocation11], 0 }
   0x7   :  { %16 = vsyncpa [#allocation11 + $0x1], 0 }
   0x8   :  { %17 = vsyncpa [#allocation14], 0 }
   0x9   :  { %19 = vsyncpa [#allocation14 + $0x1], 0 }
   0xa   :  { %20 = vsyncpa [#allocation6], 0  ;;  %s15419_s24 = smov 0   ;;  %s15421_s25 = smov 0  }
   0xb   :  { %s15423_s26 = smov 0   ;;  %s15425_s27 = smov 0  }
   0xc LB: > { %17112 = sst [smem:[#allocation23_spill]] %s15354_s26  ;;  %s15438_s28 = sadd.s32 4294967295, %s15358_s27   ;;  %s15358_s27 = sphi %s15425_s27, %s17140_s27   ;;  %s15354_s26 = sphi %s15423_s26, %s17142_s26   ;;  %s15350_s25 = sphi %s15421_s25, %s17144_s25   ;;  %s15346_s24 = sphi %s15419_s24, %s17143_s24  }
   0xd   : > { %p109_p0 = scmp.ne.s32.totalorder %s15350_s25, %s15346_s24  ;;  %p17093_p1 = scmp.eq.s32.totalorder %s15438_s28, 0 }
   0xe   : > { %p11665_p2 = scmp.ge.s32.totalorder %s15358_s27, 1  ;;  %p214_p3 = scmp.lt.s32.totalorder %s15358_s27, 7 }
   0xf   : > { %p15447_p5 = por %p17093_p1, %p109_p0  ;;  %s15360_s8 = smov [#allocation7]  }
  0x10   : > { %p15451_p6 = pnand %p11665_p2, %p214_p3  ;;  %s239_s9 = sshll.u32 %s15360_s8, 4  ;;  %s240_s9 = int_to_ptr.vmem [resolvable:$true] %s239_s9 }
  0x11   : > { %s17113_s29 = scalar_select %p15447_p5, 1, 0 }
  0x12   : > { %s17114_s30 = scalar_select %p15451_p6, 1, 0 }
  0x13   : > { %p13208_p7 = pneg %p15451_p6  ;;  %s15361_s11 = smov [#allocation15]  }
  0x14   : > { %s264_s12 = sshll.u32 %s15361_s11, 4  ;;  %s17116_s1 = sld [smem:[#allocation26_spill]]  ;;  %s15463_s12 = int_to_ptr.vmem [resolvable:$true] %s264_s12 }
  0x15   : > { %p15459_p8 = pnand %p13208_p7, %p17093_p1 }
  0x17   : > { %s17115_s10 = scalar_select %p15459_p8, 1, 0 }
  0x18   : > { %p15473_p10 = pneg %p15459_p8 }
  0x1a   : > { %s15076_s15 = scalar_lea.hbm %s17116_s1, 32768 }
  0x1b   : > { %p15077_p9 = scmp.ne.s32.totalorder %s17116_s1, %s15076_s15  ;;  %p15083_p13 = scmp.lt.u32.totalorder %s15076_s15, %s17116_s1 }
  0x1c   : > { %s17117_s18 = scalar_select %p15473_p10, 1, 0 }
  0x1d   : > { %p15079_p11 = pnand %p15473_p10, %p15077_p9 }
  0x1f   : > { %p15080_p12 = pneg %p15079_p11 }
  0x21   : > { %p15085_p0 = pnand %p15083_p13, %p15080_p12 }
  0x23   : > { %15088 = shalt.err (!%p15085_p0)
}
  0x24   : > { %s15089_s21 = scalar_lea.vmem %s240_s9, 32768  ;;  %p15097_p4 = scmp.lt.s32.totalorder %s240_s9, %s240_s9 }
  0x25   : > { %p15090_p2 = scmp.ne.s32.totalorder %s240_s9, %s15089_s21  ;;  %p15098_p1 = scmp.lt.s32.totalorder %s15089_s21, %s15089_s21 }
  0x27   : > { %p15092_p3 = pnand %p15090_p2, %p15473_p10  ;;  %p15099_p5 = por %p15098_p1, %p15097_p4 }
  0x29   : > { %p15093_p7 = pneg %p15092_p3 }
  0x2b   : > { %p15100_p6 = pnand %p15099_p5, %p15093_p7 }
  0x2d   : > { %15103 = shalt.err (!%p15100_p6)
}
  0x2e   : > { %s15362_s22 = smov 2048   ;;  %s17096_s23 = smov 128  }
  0x2f   : > { %13214 = dma.hbm_to_vmem [thread:$0]  (!%p15459_p8), %s17116_s1, 32768, %s240_s9, [#allocation8], %s15362_s22, %s15362_s22, %s17096_s23  }
  0x30   : > { %s17118_s6 = sld [smem:[#allocation28_spill]] }
  0x36   : > { %s15104_s14 = scalar_lea.hbm %s17118_s6, 32 }
  0x37   : > { %p15105_p1 = scmp.ne.s32.totalorder %s17118_s6, %s15104_s14  ;;  %p15111_p6 = scmp.lt.u32.totalorder %s15104_s14, %s17118_s6 }
  0x39   : > { %p15107_p4 = pnand %p15105_p1, %p15473_p10 }
  0x3b   : > { %p15108_p5 = pneg %p15107_p4 }
  0x3d   : > { %p15113_p9 = pnand %p15111_p6, %p15108_p5 }
  0x3f   : > { %15116 = shalt.err (!%p15113_p9)
}
  0x40   : > { %s15117_s9 = scalar_lea.vmem %s15463_s12, 32  ;;  %p15125_p0 = scmp.lt.s32.totalorder %s15463_s12, %s15463_s12 }
  0x41   : > { %p15118_p11 = scmp.ne.s32.totalorder %s15463_s12, %s15117_s9  ;;  %p15126_p2 = scmp.lt.s32.totalorder %s15117_s9, %s15117_s9 }
  0x43   : > { %p15120_p12 = pnand %p15118_p11, %p15473_p10  ;;  %p15127_p3 = por %p15126_p2, %p15125_p0 }
  0x45   : > { %p15121_p13 = pneg %p15120_p12 }
  0x47   : > { %p15128_p7 = pnand %p15127_p3, %p15121_p13 }
  0x49   : > { %15131 = shalt.err (!%p15128_p7)
}
  0x4a   : > { %13220 = dma.hbm_to_vmem [thread:$0]  (!%p15459_p8), %s17118_s6, 32, %s15463_s12, [#allocation14]  }
  0x4b   : > { %s15514_s22 = sadd.s32 1, %s15358_s27   ;;  %s96_s24 = sadd.s32 1, %s15354_s26 }
  0x4c   : > { %17119 = sst [smem:[#allocation24_spill]] %s15514_s22  ;;  %s93_s8 = ssub.s32 %s15358_s27, %s15514_s22 }
  0x4d   : > { %p103_p1 = scmp.ne.s32.totalorder %s15354_s26, %s15350_s25  ;;  %p94_p4 = scmp.eq.s32.totalorder %s93_s8, 0 }
  0x4e   : > { %p104_p5 = scmp.eq.s32.totalorder %s15358_s27, 0  ;;  %p13235_p6 = scmp.lt.s32.totalorder %s15358_s27, 6 }
  0x4f   : > { %s17097_s11 = sand.u32 1, %s15358_s27   ;;  %s15528_s14 = sand.u32 1, %s15354_s26  }
  0x50   : > { %s15525_s13 = scalar_select %p94_p4, %s15354_s26, %s96_s24  }
  0x51   : > { %p105_p9 = por %p104_p5, %p103_p1  ;;  %s13044_s15 = sshll.u32 %s15358_s27, 8 }
  0x52   : > { %17120 = sst [smem:[#allocation25_spill]] %s15525_s13  ;;  %s11671_s16 = sshll.u32 %s15528_s14, 13 }
  0x53   : > { %s17121_s3 = sld [smem:[#allocation27_spill]]  ;;  %p15537_p11 = pnand %p13235_p6, %p105_p9 }
  0x54   : > { %s279_s20 = scalar_lea.vmem [#allocation10], %s11671_s16  ;;  %s15545_s24 = scalar_lea.sflag [#allocation11], %s17097_s11 }
  0x55   : > { %s17122_s9 = scalar_select %p15537_p11, 1, 0 }
  0x56   : > { %s286_s21 = sshll.u32 %s279_s20, 4  ;;  %p15551_p13 = pneg %p15537_p11  ;;  %s15541_s21 = int_to_ptr.vmem [resolvable:$true] %s286_s21 }
  0x59   : > { %s15535_s19 = scalar_lea.hbm %s17121_s3, %s13044_s15  ;;  %s15137_s16 = scalar_lea.hbm %s17121_s3, 786432 }
  0x5a   : > { %s15132_s8 = scalar_lea.hbm %s15535_s19, 131072  ;;  %p15138_p3 = scmp.lt.u32.totalorder %s15535_s19, %s17121_s3 }
  0x5b   : > { %p15133_p12 = scmp.ne.s32.totalorder %s15535_s19, %s15132_s8  ;;  %p15139_p7 = scmp.lt.u32.totalorder %s15137_s16, %s15132_s8 }
  0x5c   : > { %s17123_s15 = scalar_select %p15551_p13, 1, 0 }
  0x5d   : > { %p15135_p0 = pnand %p15551_p13, %p15133_p12  ;;  %p15140_p1 = por %p15139_p7, %p15138_p3 }
  0x5e   : > { %p15141_p4 = scmp.lt.u32.totalorder %s15132_s8, %s15535_s19 }
  0x5f   : > { %p15136_p2 = pneg %p15135_p0 }
  0x60   : > { %p15142_p5 = por %p15141_p4, %p15140_p1 }
  0x62   : > { %p15143_p6 = pnand %p15142_p5, %p15136_p2 }
  0x64   : > { %15146 = shalt.err (!%p15143_p6)
}
  0x65   : > { %s15147_s11 = scalar_lea.vmem %s15541_s21, 131072  ;;  %s15364_s12 = smov [#allocation10]  }
  0x66   : > { %p15148_p9 = scmp.ne.s32.totalorder %s15541_s21, %s15147_s11  ;;  %s15152_s17 = sshll.u32 %s15364_s12, 4  ;;  %s15153_s17 = int_to_ptr.vmem [resolvable:$false] %s15152_s17 }
  0x67   : > { %s15154_s23 = scalar_lea.vmem %s15153_s17, 262144  ;;  %p15155_p8 = scmp.lt.s32.totalorder %s15541_s21, %s15153_s17 }
  0x68   : > { %p15150_p12 = pnand %p15148_p9, %p15551_p13  ;;  %p15156_p10 = scmp.lt.s32.totalorder %s15154_s23, %s15147_s11 }
  0x6a   : > { %p15151_p0 = pneg %p15150_p12  ;;  %p15157_p3 = por %p15156_p10, %p15155_p8 }
  0x6c   : > { %p15158_p7 = pnand %p15157_p3, %p15151_p0 }
  0x6e   : > { %15161 = shalt.err (!%p15158_p7)
}
  0x6f   : > { %s15365_s8 = smov 1536   ;;  %s15366_s16 = smov 256  }
  0x70   : > { %s15367_s20 = smov 16   ;;  %s15368_s1 = smov [#allocation4]  }
  0x71   : > { %13224 = dma.hbm_to_vmem [thread:$0]  (!%p15537_p11), %s15535_s19, 131072, %s15541_s21, %s15545_s24, %s15365_s8, %s15366_s16, %s15367_s20  }
  0x72   : > { %s226_s3 = sshll.u32 %s15368_s1, 4  ;;  %s15162_s11 = scalar_lea.hbm %s17085_s0, 128  ;;  %s227_s3 = int_to_ptr.vmem [resolvable:$true] %s226_s3 }
  0x73   : > { %p15163_p8 = scmp.ne.s32.totalorder %s17085_s0, %s15162_s11  ;;  %p17124_p10 = scmp.ne.s32.totalorder %s17117_s18, 0 }
  0x74   : > { %p15169_p4 = scmp.lt.u32.totalorder %s15162_s11, %s17085_s0 }
  0x75   : > { %p15165_p2 = pnand %p15163_p8, %p17124_p10 }
  0x77   : > { %p15166_p1 = pneg %p15165_p2 }
  0x79   : > { %p15171_p5 = pnand %p15169_p4, %p15166_p1 }
  0x7b   : > { %15174 = shalt.err (!%p15171_p5)
}
  0x7c   : > { %s15175_s19 = scalar_lea.vmem %s227_s3, 128  ;;  %p15183_p0 = scmp.lt.s32.totalorder %s227_s3, %s227_s3 }
  0x7d   : > { %p15176_p6 = scmp.ne.s32.totalorder %s227_s3, %s15175_s19  ;;  %p15184_p3 = scmp.lt.s32.totalorder %s15175_s19, %s15175_s19 }
  0x7f   : > { %p15178_p9 = pnand %p15176_p6, %p17124_p10  ;;  %p15185_p7 = por %p15184_p3, %p15183_p0 }
  0x81   : > { %p15179_p12 = pneg %p15178_p9 }
  0x83   : > { %p15186_p11 = pnand %p15185_p7, %p15179_p12 }
  0x85   : > { %15189 = shalt.err (!%p15186_p11)
}
  0x86   : > { %s15369_s1 = smov 64   ;;  %s15370_s6 = smov 4  }
  0x87   : > { %p17125_p8 = scmp.ne.s32.totalorder %s17115_s10, 0  ;;  %s15371_s21 = smov [#allocation9]  }
  0x88   : > { %s253_s8 = sshll.u32 %s15371_s21, 4  ;;  %s11674_s16 = sshll.u32 %s15528_s14, 2  ;;  %s254_s8 = int_to_ptr.vmem [resolvable:$true] %s253_s8 }
  0x89   : > { %13211 = dma.hbm_to_vmem [thread:$0]  (!%p17125_p8), %s17085_s0, 128, %s227_s3, [#allocation5], %s15369_s1, %s15369_s1, %s15370_s6  }
  0x8a   : > { %s15190_s11 = scalar_lea.hbm %s17087_s2, 512 }
  0x8b   : > { %p15191_p11 = scmp.ne.s32.totalorder %s17087_s2, %s15190_s11  ;;  %p15197_p4 = scmp.lt.u32.totalorder %s15190_s11, %s17087_s2 }
  0x8d   : > { %p15193_p2 = pnand %p15191_p11, %p17124_p10 }
  0x8f   : > { %p15194_p1 = pneg %p15193_p2 }
  0x91   : > { %p15199_p5 = pnand %p15197_p4, %p15194_p1 }
  0x93   : > { %15202 = shalt.err (!%p15199_p5)
}
  0x94   : > { %s15203_s3 = scalar_lea.vmem %s254_s8, 512  ;;  %p15211_p0 = scmp.lt.s32.totalorder %s254_s8, %s254_s8 }
  0x95   : > { %p15204_p6 = scmp.ne.s32.totalorder %s254_s8, %s15203_s3  ;;  %p15212_p3 = scmp.lt.s32.totalorder %s15203_s3, %s15203_s3 }
  0x97   : > { %p15206_p9 = pnand %p15204_p6, %p17124_p10  ;;  %p15213_p7 = por %p15212_p3, %p15211_p0 }
  0x99   : > { %p15207_p12 = pneg %p15206_p9 }
  0x9b   : > { %p15214_p13 = pnand %p15213_p7, %p15207_p12 }
  0x9d   : > { %15217 = shalt.err (!%p15214_p13)
}
  0x9e   : > { %13217 = dma.hbm_to_vmem [thread:$0]  (!%p17125_p8), %s17087_s2, 512, %s254_s8, [#allocation8]  }
  0x9f   : > { %s13045_s22 = sshll.u32 %s15358_s27, 6  ;;  %s300_s26 = scalar_lea.vmem [#allocation12], %s11674_s16 }
  0xa0   : > { %s308_s13 = sshll.u32 %s300_s26, 4  ;;  %s306_s20 = scalar_lea.hbm %s17089_s4, %s13045_s22  ;;  %s309_s13 = int_to_ptr.vmem [resolvable:$true] %s308_s13 }
  0xa1   : > { %s15218_s12 = scalar_lea.hbm %s306_s20, 64  ;;  %p17126_p11 = scmp.ne.s32.totalorder %s17123_s15, 0 }
  0xa2   : > { %p15219_p10 = scmp.ne.s32.totalorder %s306_s20, %s15218_s12  ;;  %s15223_s17 = scalar_lea.hbm %s17089_s4, 384 }
  0xa3   : > { %p15224_p8 = scmp.lt.u32.totalorder %s306_s20, %s17089_s4  ;;  %p15225_p1 = scmp.lt.u32.totalorder %s15223_s17, %s15218_s12 }
  0xa4   : > { %p15221_p13 = pnand %p15219_p10, %p17126_p11  ;;  %p15227_p5 = scmp.lt.u32.totalorder %s15218_s12, %s306_s20 }
  0xa5   : > { %p15226_p4 = por %p15225_p1, %p15224_p8 }
  0xa6   : > { %p15222_p2 = pneg %p15221_p13 }
  0xa7   : > { %p15228_p6 = por %p15227_p5, %p15226_p4 }
  0xa9   : > { %p15229_p9 = pnand %p15228_p6, %p15222_p2 }
  0xab   : > { %15232 = shalt.err (!%p15229_p9)
}
  0xac   : > { %s15233_s8 = scalar_lea.vmem %s309_s13, 64  ;;  %s15372_s16 = smov [#allocation12]  }
  0xad   : > { %p15234_p12 = scmp.ne.s32.totalorder %s309_s13, %s15233_s8  ;;  %s15238_s3 = sshll.u32 %s15372_s16, 4  ;;  %s15239_s3 = int_to_ptr.vmem [resolvable:$false] %s15238_s3 }
  0xae   : > { %s15240_s1 = scalar_lea.vmem %s15239_s3, 128  ;;  %p15241_p7 = scmp.lt.s32.totalorder %s309_s13, %s15239_s3 }
  0xaf   : > { %p15236_p0 = pnand %p15234_p12, %p17126_p11  ;;  %p15242_p10 = scmp.lt.s32.totalorder %s15240_s1, %s15233_s8 }
  0xb1   : > { %p15237_p3 = pneg %p15236_p0  ;;  %p15243_p13 = por %p15242_p10, %p15241_p7 }
  0xb3   : > { %p15244_p1 = pnand %p15243_p13, %p15237_p3 }
  0xb5   : > { %15247 = shalt.err (!%p15244_p1)
}
  0xb6   : > { %p17127_p8 = scmp.ne.s32.totalorder %s17122_s9, 0  ;;  %s11677_s6 = sshll.u32 %s15528_s14, 9 }
  0xb7   : > { %s13047_s22 = sshll.u32 %s15358_s27, 13  ;;  %s319_s12 = scalar_lea.vmem [#allocation13], %s11677_s6 }
  0xb8   : > { %13227 = dma.hbm_to_vmem [thread:$0]  (!%p17127_p8), %s306_s20, 64, %s309_s13, %s15545_s24  }
  0xb9   : > { %s15634_s18 = scalar_lea.hbm %s17090_s5, %s13047_s22  ;;  %s327_s10 = sshll.u32 %s319_s12, 4  ;;  %s15636_s10 = int_to_ptr.vmem [resolvable:$true] %s327_s10 }
  0xba   : > { %s17128_s11 = sand.u32 1, %s15358_s27   ;;  %s15248_s23 = scalar_lea.hbm %s15634_s18, 8192 }
  0xbb   : > { %s15640_s17 = scalar_lea.sflag [#allocation14], %s17128_s11  ;;  %p15249_p2 = scmp.ne.s32.totalorder %s15634_s18, %s15248_s23 }
  0xbc   : > { %s15253_s13 = scalar_lea.hbm %s17090_s5, 49152  ;;  %p15254_p6 = scmp.lt.u32.totalorder %s15634_s18, %s17090_s5 }
  0xbd   : > { %p15251_p4 = pnand %p15249_p2, %p17126_p11  ;;  %p15255_p9 = scmp.lt.u32.totalorder %s15253_s13, %s15248_s23 }
  0xbe   : > { %p15257_p0 = scmp.lt.u32.totalorder %s15248_s23, %s15634_s18 }
  0xbf   : > { %p15252_p5 = pneg %p15251_p4  ;;  %p15256_p12 = por %p15255_p9, %p15254_p6 }
  0xc1   : > { %p15258_p3 = por %p15257_p0, %p15256_p12 }
  0xc3   : > { %p15259_p7 = pnand %p15258_p3, %p15252_p5 }
  0xc5   : > { %15262 = shalt.err (!%p15259_p7)
}
  0xc6   : > { %s15263_s27 = scalar_lea.vmem %s15636_s10, 8192  ;;  %s15373_s8 = smov [#allocation13]  }
  0xc7   : > { %p15264_p10 = scmp.ne.s32.totalorder %s15636_s10, %s15263_s27  ;;  %s15268_s16 = sshll.u32 %s15373_s8, 4  ;;  %s15269_s16 = int_to_ptr.vmem [resolvable:$false] %s15268_s16 }
  0xc8   : > { %s15270_s3 = scalar_lea.vmem %s15269_s16, 16384  ;;  %p15271_p2 = scmp.lt.s32.totalorder %s15636_s10, %s15269_s16 }
  0xc9   : > { %p15266_p13 = pnand %p15264_p10, %p17126_p11  ;;  %p15272_p4 = scmp.lt.s32.totalorder %s15270_s3, %s15263_s27 }
  0xcb   : > { %p15267_p1 = pneg %p15266_p13  ;;  %p15273_p6 = por %p15272_p4, %p15271_p2 }
  0xcd   : > { %p15274_p9 = pnand %p15273_p6, %p15267_p1 }
  0xcf   : > { %15277 = shalt.err (!%p15274_p9)
}
  0xd0   : > { %s15374_s1 = smov 8   ;;  %s17129_s6 = smov 128  }
  0xd1   : > { %13230 = dma.hbm_to_vmem [thread:$0]  (!%p17127_p8), %s15634_s18, 8192, %s15636_s10, %s15640_s17, %s17129_s6, %s17129_s6, %s15374_s1  }
  0xd2   : > { %p17130_p11 = scmp.ne.s32.totalorder %s17114_s30, 0 }
  0xd3   : > { %p17131_p5 = scmp.eq.s32.totalorder (!%p17130_p11), %s15438_s28, 0 }
  0xd4   : > { %339 = sbr.rel (%p17130_p11) target bundleno = 2328 (0x918), region = 48 }
  0xdb   : > { %15321 = dma.done.wait (%p17131_p5), [#allocation5], 128   ;;  %p17132_p12 = pmov %p17131_p5 }
  0xdc   : > { %p17133_p0 = pmov %p17131_p5 }
  0xdd   : > { %15323 = vsyncadd (%p17132_p12), [#allocation5], 4294967168 }
  0xde   : > { %15325 = dma.done.wait (%p17133_p0), [#allocation8], 33280   ;;  %p17134_p3 = pmov %p17133_p0 }
  0xdf   : > { %s353_s9 = sand.u32 1, %s15438_s28   ;;  %s355_s15 = sand.u32 1, %s15350_s25  }
  0xe0   : > { %15327 = vsyncadd (%p17134_p3), [#allocation8], 4294934016  ;;  %s11685_s22 = sshll.u32 %s355_s15, 13  ;;  %s354_s30 = scalar_lea.sflag [#allocation11], %s353_s9 }
  0xe1   : > { %s15678_s26 = scalar_lea.vmem [#allocation10], %s11685_s22  ;;  %p17135_p8 = scmp.ne.s32.totalorder %s17113_s29, 0 }
  0xe3   : > { %15329 = dma.done.wait (%p17135_p8), %s354_s30, 131136  }
  0xe4   : > { %15331 = vsyncadd (%p17135_p8), %s354_s30, 4294836160  ;;  %s11686_s21 = sshll.u32 %s355_s15, 2  ;;  %s11687_s18 = sshll.u32 %s355_s15, 9 }
  0xe5   : > { %s15684_s12 = scalar_lea.vmem [#allocation12], %s11686_s21  ;;  %s372_s10 = scalar_lea.sflag [#allocation14], %s353_s9 }
  0xe6   : > { %s15686_s11 = scalar_lea.vmem [#allocation13], %s11687_s18 }
  0xe7   : > { %15333 = dma.done.wait (%p17135_p8), %s372_s10, 8192  }
  0xe8   : > { %15335 = vsyncadd (%p17135_p8), %s372_s10, 4294959104  ;;  %p17136_p7 = pmov %p17133_p0 }
  0xe9   : > { %p17137_p10 = pmov %p17133_p0 }
  0xea   : > { %15337 = dma.done.wait (%p17136_p7), [#allocation14], 32  }
  0xeb   : > { %15339 = vsyncadd (%p17137_p10), [#allocation14], 4294967264  ;;  %p17138_p13 = scmp.ne.s32.totalorder %s15438_s28, 0 }
  0xec   : > { %v425_v0 = vld [vmem:[#allocation7] sm:$0xff] (!%p17138_p13)  ;;  %v426_v2 = vld [vmem:[#allocation7 + $0x8] sm:$0xff] (!%p17138_p13)  ;;  %v15375_v8 = vmov (!%p17138_p13), 0   ;;  %v427_v63 = vld [vmem:[#allocation7 + $0x10] sm:$0xff] (!%p17138_p13) }
  0xed   : > { %422 = sbr.rel (%p17138_p13) target bundleno = 737 (0x2e1), region = 80  ;;  %v441_v1 = vld [vmem:[#allocation7 + $0x80] sm:$0xff] (!%p17138_p13)  ;;  %v442_v4 = vld [vmem:[#allocation7 + $0x88] sm:$0xff] (!%p17138_p13)  ;;  %2307 = vmatprep.mubr.bf16.mxu0 (!%p17138_p13), %v15375_v8  ;;  %2350 = vmatprep.mubr.bf16.mxu1 (!%p17138_p13), %v15375_v8 }
  0xee   : > { %v11692_v3 = vcombine.high (!%p17138_p13), %v425_v0, %v441_v1  ;;  %v11691_v5 = vcombine.low (!%p17138_p13), %v425_v0, %v441_v1  ;;  %v457_v6 = vld [vmem:[#allocation7 + $0x100] sm:$0xff] (!%p17138_p13)  ;;  %v11694_v9 = vcombine.high (!%p17138_p13), %v426_v2, %v442_v4  ;;  %v11693_v10 = vcombine.low (!%p17138_p13), %v426_v2, %v442_v4  ;;  %v458_v12 = vld [vmem:[#allocation7 + $0x108] sm:$0xff] (!%p17138_p13)  ;;  %v443_v0 = vld [vmem:[#allocation7 + $0x90] sm:$0xff] (!%p17138_p13) }
  0xef   : > { %v473_v7 = vld [vmem:[#allocation7 + $0x180] sm:$0xff] (!%p17138_p13)  ;;  %v474_v13 = vld [vmem:[#allocation7 + $0x188] sm:$0xff] (!%p17138_p13)  ;;  %v428_v1 = vld [vmem:[#allocation7 + $0x18] sm:$0xff] (!%p17138_p13) }
  0xf0   : > { %v11724_v11 = vcombine.high (!%p17138_p13), %v457_v6, %v473_v7  ;;  %v489_v14 = vld [vmem:[#allocation7 + $0x200] sm:$0xff] (!%p17138_p13)  ;;  %2275 = vmatprep.subr.bf16.mxu0 (!%p17138_p13), %v11692_v3  ;;  %v11726_v15 = vcombine.high (!%p17138_p13), %v458_v12, %v474_v13  ;;  %v490_v17 = vld [vmem:[#allocation7 + $0x208] sm:$0xff] (!%p17138_p13)  ;;  %2318 = vmatprep.subr.bf16.mxu1 (!%p17138_p13), %v11694_v9  ;;  %v11723_v19 = vcombine.low (!%p17138_p13), %v457_v6, %v473_v7  ;;  %v444_v2 = vld [vmem:[#allocation7 + $0x98] sm:$0xff] (!%p17138_p13) }
  0xf1   : > { %v505_v16 = vld [vmem:[#allocation7 + $0x280] sm:$0xff] (!%p17138_p13)  ;;  %v506_v18 = vld [vmem:[#allocation7 + $0x288] sm:$0xff] (!%p17138_p13)  ;;  %2276 = vmatpush1.bf16.msra.mxu0 (!%p17138_p13), %v11691_v5  ;;  %2319 = vmatpush1.bf16.msra.mxu1 (!%p17138_p13), %v11693_v10  ;;  %v11725_v20 = vcombine.low (!%p17138_p13), %v458_v12, %v474_v13  ;;  %v11696_v5 = vcombine.high (!%p17138_p13), %v427_v63, %v443_v0  ;;  %v11698_v6 = vcombine.high (!%p17138_p13), %v428_v1, %v444_v2  ;;  %v459_v7 = vld [vmem:[#allocation7 + $0x110] sm:$0xff] (!%p17138_p13) }
  0xf2   : > { %2277 = vmatprep.subr.bf16.mxu0 (!%p17138_p13), %v11724_v11  ;;  %v11756_v21 = vcombine.high (!%p17138_p13), %v489_v14, %v505_v16  ;;  %2320 = vmatprep.subr.bf16.mxu1 (!%p17138_p13), %v11726_v15  ;;  %v11758_v22 = vcombine.high (!%p17138_p13), %v490_v17, %v506_v18  ;;  %v521_v23 = vld [vmem:[#allocation7 + $0x300] sm:$0xff] (!%p17138_p13)  ;;  %v522_v25 = vld [vmem:[#allocation7 + $0x308] sm:$0xff] (!%p17138_p13)  ;;  %v11755_v27 = vcombine.low (!%p17138_p13), %v489_v14, %v505_v16  ;;  %v475_v9 = vld [vmem:[#allocation7 + $0x190] sm:$0xff] (!%p17138_p13) }
  0xf3   : > { %v537_v24 = vld [vmem:[#allocation7 + $0x380] sm:$0xff] (!%p17138_p13)  ;;  %v538_v26 = vld [vmem:[#allocation7 + $0x388] sm:$0xff] (!%p17138_p13)  ;;  %v11757_v28 = vcombine.low (!%p17138_p13), %v490_v17, %v506_v18  ;;  %v15700_v10 = vld [vmem:[#allocation4] sm:$0xff] (!%p17138_p13)   ;;  %v11695_v13 = vcombine.low (!%p17138_p13), %v427_v63, %v443_v0  ;;  %v11697_v14 = vcombine.low (!%p17138_p13), %v428_v1, %v444_v2  ;;  %v11728_v15 = vcombine.high (!%p17138_p13), %v459_v7, %v475_v9 }
  0xf4   : > { %v11788_v29 = vcombine.high %v521_v23, %v537_v24  ;;  %v11790_v30 = vcombine.high %v522_v25, %v538_v26  ;;  %v553_v31 = vld [vmem:[#allocation7 + $0x400] sm:$0xff]  ;;  %v554_v33 = vld [vmem:[#allocation7 + $0x408] sm:$0xff]  ;;  %v11787_v35 = vcombine.low %v521_v23, %v537_v24  ;;  %v11789_v36 = vcombine.low %v522_v25, %v538_v26  ;;  %v460_v11 = vld [vmem:[#allocation7 + $0x118] sm:$0xff] }
  0xf5   : > { %2278 = vmatpush1.bf16.msra.mxu0 %v11723_v19  ;;  %2321 = vmatpush1.bf16.msra.mxu1 %v11725_v20  ;;  %v569_v32 = vld [vmem:[#allocation7 + $0x480] sm:$0xff]  ;;  %v570_v34 = vld [vmem:[#allocation7 + $0x488] sm:$0xff]  ;;  %v476_v12 = vld [vmem:[#allocation7 + $0x198] sm:$0xff] }
  0xf6   : > { %2279 = vmatprep.subr.bf16.mxu0 %v11756_v21  ;;  %2322 = vmatprep.subr.bf16.mxu1 %v11758_v22  ;;  %v11820_v37 = vcombine.high %v553_v31, %v569_v32  ;;  %v11822_v38 = vcombine.high %v554_v33, %v570_v34  ;;  %v585_v39 = vld [vmem:[#allocation7 + $0x500] sm:$0xff]  ;;  %v586_v41 = vld [vmem:[#allocation7 + $0x508] sm:$0xff]  ;;  %v11819_v43 = vcombine.low %v553_v31, %v569_v32  ;;  %v491_v17 = vld [vmem:[#allocation7 + $0x210] sm:$0xff] }
  0xf7   : > { %v601_v40 = vld [vmem:[#allocation7 + $0x580] sm:$0xff]  ;;  %v602_v42 = vld [vmem:[#allocation7 + $0x588] sm:$0xff]  ;;  %v11821_v44 = vcombine.low %v554_v33, %v570_v34  ;;  %v11730_v16 = vcombine.high %v460_v11, %v476_v12  ;;  %v507_v18 = vld [vmem:[#allocation7 + $0x290] sm:$0xff]  ;;  %v11727_v21 = vcombine.low %v459_v7, %v475_v9  ;;  %v11729_v22 = vcombine.low %v460_v11, %v476_v12 }
  0xf8   : > { %v11852_v45 = vcombine.high %v585_v39, %v601_v40  ;;  %v11854_v46 = vcombine.high %v586_v41, %v602_v42  ;;  %v617_v47 = vld [vmem:[#allocation7 + $0x600] sm:$0xff]  ;;  %v618_v49 = vld [vmem:[#allocation7 + $0x608] sm:$0xff]  ;;  %v11851_v51 = vcombine.low %v585_v39, %v601_v40  ;;  %v11853_v52 = vcombine.low %v586_v41, %v602_v42  ;;  %v492_v19 = vld [vmem:[#allocation7 + $0x218] sm:$0xff] }
  0xf9   : > { %2280 = vmatpush1.bf16.msra.mxu0 %v11755_v27  ;;  %2323 = vmatpush1.bf16.msra.mxu1 %v11757_v28  ;;  %v633_v48 = vld [vmem:[#allocation7 + $0x680] sm:$0xff]  ;;  %v634_v50 = vld [vmem:[#allocation7 + $0x688] sm:$0xff]  ;;  %v508_v20 = vld [vmem:[#allocation7 + $0x298] sm:$0xff]  ;;  %v11760_v23 = vcombine.high %v491_v17, %v507_v18 }
  0xfa   : > { %2281 = vmatprep.subr.bf16.mxu0 %v11788_v29  ;;  %2324 = vmatprep.subr.bf16.mxu1 %v11790_v30  ;;  %v11884_v53 = vcombine.high %v617_v47, %v633_v48  ;;  %v11886_v54 = vcombine.high %v618_v49, %v634_v50  ;;  %v649_v55 = vld [vmem:[#allocation7 + $0x700] sm:$0xff]  ;;  %v650_v57 = vld [vmem:[#allocation7 + $0x708] sm:$0xff]  ;;  %v11883_v59 = vcombine.low %v617_v47, %v633_v48  ;;  %v523_v25 = vld [vmem:[#allocation7 + $0x310] sm:$0xff] }
  0xfb   : > { %v665_v56 = vld [vmem:[#allocation7 + $0x780] sm:$0xff]  ;;  %v666_v58 = vld [vmem:[#allocation7 + $0x788] sm:$0xff]  ;;  %v11885_v60 = vcombine.low %v618_v49, %v634_v50  ;;  %v11762_v24 = vcombine.high %v492_v19, %v508_v20  ;;  %v539_v26 = vld [vmem:[#allocation7 + $0x390] sm:$0xff]  ;;  %v11759_v29 = vcombine.low %v491_v17, %v507_v18  ;;  %v11761_v30 = vcombine.low %v492_v19, %v508_v20 }
  0xfc   : > { %v11916_v61 = vcombine.high %v649_v55, %v665_v56  ;;  %v11918_v62 = vcombine.high %v650_v57, %v666_v58  ;;  %v11915_v3 = vcombine.low %v649_v55, %v665_v56  ;;  %v11917_v4 = vcombine.low %v650_v57, %v666_v58  ;;  %v524_v27 = vld [vmem:[#allocation7 + $0x318] sm:$0xff]  ;;  %v555_v33 = vld [vmem:[#allocation7 + $0x410] sm:$0xff]  ;;  %v429_v1 = vld [vmem:[#allocation7 + $0x20] sm:$0xff] }
  0xfd   : > { %2282 = vmatpush1.bf16.msra.mxu0 %v11787_v35  ;;  %2325 = vmatpush1.bf16.msra.mxu1 %v11789_v36  ;;  %v540_v28 = vld [vmem:[#allocation7 + $0x398] sm:$0xff]  ;;  %v11792_v31 = vcombine.high %v523_v25, %v539_v26  ;;  %v571_v34 = vld [vmem:[#allocation7 + $0x490] sm:$0xff]  ;;  %v445_v2 = vld [vmem:[#allocation7 + $0xa0] sm:$0xff] }
  0xfe   : > { %2283 = vmatprep.subr.bf16.mxu0 %v11820_v37  ;;  %2326 = vmatprep.subr.bf16.mxu1 %v11822_v38  ;;  %v11794_v32 = vcombine.high %v524_v27, %v540_v28  ;;  %v556_v35 = vld [vmem:[#allocation7 + $0x418] sm:$0xff]  ;;  %v11791_v37 = vcombine.low %v523_v25, %v539_v26  ;;  %v11793_v38 = vcombine.low %v524_v27, %v540_v28  ;;  %v587_v41 = vld [vmem:[#allocation7 + $0x510] sm:$0xff]  ;;  %v461_v11 = vld [vmem:[#allocation7 + $0x120] sm:$0xff] }
  0xff   : > { %v572_v36 = vld [vmem:[#allocation7 + $0x498] sm:$0xff]  ;;  %v11824_v39 = vcombine.high %v555_v33, %v571_v34  ;;  %v603_v42 = vld [vmem:[#allocation7 + $0x590] sm:$0xff]  ;;  %v11700_v7 = vcombine.high %v429_v1, %v445_v2  ;;  %v477_v12 = vld [vmem:[#allocation7 + $0x1a0] sm:$0xff] }
 0x100   : > { %v11826_v40 = vcombine.high %v556_v35, %v572_v36  ;;  %v11856_v47 = vcombine.high %v587_v41, %v603_v42  ;;  %v619_v49 = vld [vmem:[#allocation7 + $0x610] sm:$0xff]  ;;  %v11732_v17 = vcombine.high %v461_v11, %v477_v12  ;;  %v493_v19 = vld [vmem:[#allocation7 + $0x220] sm:$0xff] }
 0x101   : > { %2284 = vmatpush1.bf16.msra.mxu0 %v11819_v43  ;;  %2327 = vmatpush1.bf16.msra.mxu1 %v11821_v44  ;;  %v588_v43 = vld [vmem:[#allocation7 + $0x518] sm:$0xff]  ;;  %v635_v50 = vld [vmem:[#allocation7 + $0x690] sm:$0xff]  ;;  %v509_v20 = vld [vmem:[#allocation7 + $0x2a0] sm:$0xff] }
 0x102   : > { %2285 = vmatprep.subr.bf16.mxu0 %v11852_v45  ;;  %2328 = vmatprep.subr.bf16.mxu1 %v11854_v46  ;;  %v604_v44 = vld [vmem:[#allocation7 + $0x598] sm:$0xff]  ;;  %v11823_v45 = vcombine.low %v555_v33, %v571_v34  ;;  %v11825_v46 = vcombine.low %v556_v35, %v572_v36  ;;  %v11888_v55 = vcombine.high %v619_v49, %v635_v50  ;;  %v651_v57 = vld [vmem:[#allocation7 + $0x710] sm:$0xff]  ;;  %v525_v27 = vld [vmem:[#allocation7 + $0x320] sm:$0xff] }
 0x103   : > { %v11858_v48 = vcombine.high %v588_v43, %v604_v44  ;;  %v667_v58 = vld [vmem:[#allocation7 + $0x790] sm:$0xff]  ;;  %v11764_v25 = vcombine.high %v493_v19, %v509_v20  ;;  %v541_v28 = vld [vmem:[#allocation7 + $0x3a0] sm:$0xff] }
 0x104   : > { %v11920_v63 = vcombine.high %v651_v57, %v667_v58  ;;  %v11796_v33 = vcombine.high %v525_v27, %v541_v28  ;;  %v557_v35 = vld [vmem:[#allocation7 + $0x420] sm:$0xff] }
 0x105   : > { %2286 = vmatpush1.bf16.msra.mxu0 %v11851_v51  ;;  %2329 = vmatpush1.bf16.msra.mxu1 %v11853_v52  ;;  %v620_v51 = vld [vmem:[#allocation7 + $0x618] sm:$0xff]  ;;  %v573_v36 = vld [vmem:[#allocation7 + $0x4a0] sm:$0xff] }
 0x106   : > { %2287 = vmatprep.subr.bf16.mxu0 %v11884_v53  ;;  %2330 = vmatprep.subr.bf16.mxu1 %v11886_v54  ;;  %v636_v52 = vld [vmem:[#allocation7 + $0x698] sm:$0xff]  ;;  %v11855_v53 = vcombine.low %v587_v41, %v603_v42  ;;  %v11857_v54 = vcombine.low %v588_v43, %v604_v44  ;;  %v11828_v41 = vcombine.high %v557_v35, %v573_v36  ;;  %v589_v43 = vld [vmem:[#allocation7 + $0x520] sm:$0xff] }
 0x107   : > { %v11890_v56 = vcombine.high %v620_v51, %v636_v52  ;;  %v605_v44 = vld [vmem:[#allocation7 + $0x5a0] sm:$0xff] }
 0x109   : > { %2288 = vmatpush1.bf16.msra.mxu0 %v11883_v59  ;;  %2331 = vmatpush1.bf16.msra.mxu1 %v11885_v60  ;;  %v652_v59 = vld [vmem:[#allocation7 + $0x718] sm:$0xff] }
 0x10a   : > { %2289 = vmatprep.subr.bf16.mxu0 %v11916_v61  ;;  %2332 = vmatprep.subr.bf16.mxu1 %v11918_v62  ;;  %v668_v60 = vld [vmem:[#allocation7 + $0x798] sm:$0xff]  ;;  %v11887_v61 = vcombine.low %v619_v49, %v635_v50  ;;  %v11889_v62 = vcombine.low %v620_v51, %v636_v52  ;;  %v11860_v49 = vcombine.high %v589_v43, %v605_v44  ;;  %v621_v51 = vld [vmem:[#allocation7 + $0x620] sm:$0xff] }
 0x10b   : > { %v11922_v0 = vcombine.high %v652_v59, %v668_v60  ;;  %v637_v52 = vld [vmem:[#allocation7 + $0x6a0] sm:$0xff] }
 0x10d   : > { %2290 = vmatpush1.bf16.msra.mxu0 %v11915_v3  ;;  %2333 = vmatpush1.bf16.msra.mxu1 %v11917_v4  ;;  %v430_v3 = vld [vmem:[#allocation7 + $0x28] sm:$0xff] }
 0x10e   : > { %2361 = vmatprep.subr.bf16.mxu0 %v11696_v5  ;;  %2404 = vmatprep.subr.bf16.mxu1 %v11698_v6  ;;  %v446_v4 = vld [vmem:[#allocation7 + $0xa8] sm:$0xff]  ;;  %v11919_v5 = vcombine.low %v651_v57, %v667_v58  ;;  %v11921_v6 = vcombine.low %v652_v59, %v668_v60  ;;  %v11892_v57 = vcombine.high %v621_v51, %v637_v52  ;;  %v653_v59 = vld [vmem:[#allocation7 + $0x720] sm:$0xff] }
 0x10f   : > { %v11702_v9 = vcombine.high %v430_v3, %v446_v4  ;;  %v669_v60 = vld [vmem:[#allocation7 + $0x7a0] sm:$0xff] }
 0x110   : > { %2308 = vmatmul.mubr.bf16.vlgmr.msra.gmra.mrb[0].mxu0 %v15700_v10  ;;  %2351 = vmatmul.mubr.bf16.vlgmr.msra.gmra.mrb[0].mxu1 %v15700_v10 }
 0x111   : > { %2362 = vmatpush1.bf16.msra.mxu0 %v11695_v13  ;;  %2405 = vmatpush1.bf16.msra.mxu1 %v11697_v14  ;;  %v462_v13 = vld [vmem:[#allocation7 + $0x128] sm:$0xff] }
 0x112   : > { %2363 = vmatprep.subr.bf16.mxu0 %v11728_v15  ;;  %2406 = vmatprep.subr.bf16.mxu1 %v11730_v16  ;;  %v478_v14 = vld [vmem:[#allocation7 + $0x1a8] sm:$0xff]  ;;  %v11699_v15 = vcombine.low %v429_v1, %v445_v2  ;;  %v11701_v16 = vcombine.low %v430_v3, %v446_v4  ;;  %v11924_v1 = vcombine.high %v653_v59, %v669_v60  ;;  %v431_v3 = vld [vmem:[#allocation7 + $0x30] sm:$0xff] }
 0x113   : > { %2393 = vmatprep.mubr.bf16.mxu0 %v15375_v8  ;;  %2436 = vmatprep.mubr.bf16.mxu1 %v15375_v8  ;;  %v11734_v18 = vcombine.high %v462_v13, %v478_v14  ;;  %v447_v4 = vld [vmem:[#allocation7 + $0xb0] sm:$0xff] }
 0x115   : > { %2364 = vmatpush1.bf16.msra.mxu0 %v11727_v21  ;;  %2407 = vmatpush1.bf16.msra.mxu1 %v11729_v22  ;;  %v494_v21 = vld [vmem:[#allocation7 + $0x228] sm:$0xff] }
 0x116   : > { %2365 = vmatprep.subr.bf16.mxu0 %v11760_v23  ;;  %2408 = vmatprep.subr.bf16.mxu1 %v11762_v24  ;;  %v510_v22 = vld [vmem:[#allocation7 + $0x2a8] sm:$0xff]  ;;  %v11731_v23 = vcombine.low %v461_v11, %v477_v12  ;;  %v11733_v24 = vcombine.low %v462_v13, %v478_v14  ;;  %v11704_v11 = vcombine.high %v431_v3, %v447_v4  ;;  %v463_v13 = vld [vmem:[#allocation7 + $0x130] sm:$0xff] }
 0x117   : > { %v11766_v26 = vcombine.high %v494_v21, %v510_v22  ;;  %v479_v14 = vld [vmem:[#allocation7 + $0x1b0] sm:$0xff] }
 0x119   : > { %2366 = vmatpush1.bf16.msra.mxu0 %v11759_v29  ;;  %2409 = vmatpush1.bf16.msra.mxu1 %v11761_v30  ;;  %v526_v29 = vld [vmem:[#allocation7 + $0x328] sm:$0xff] }
 0x11a   : > { %2367 = vmatprep.subr.bf16.mxu0 %v11792_v31  ;;  %2410 = vmatprep.subr.bf16.mxu1 %v11794_v32  ;;  %v542_v30 = vld [vmem:[#allocation7 + $0x3a8] sm:$0xff]  ;;  %v11763_v31 = vcombine.low %v493_v19, %v509_v20  ;;  %v11765_v32 = vcombine.low %v494_v21, %v510_v22  ;;  %v11736_v19 = vcombine.high %v463_v13, %v479_v14  ;;  %v495_v21 = vld [vmem:[#allocation7 + $0x230] sm:$0xff] }
 0x11b   : > { %v11798_v34 = vcombine.high %v526_v29, %v542_v30  ;;  %v511_v22 = vld [vmem:[#allocation7 + $0x2b0] sm:$0xff] }
 0x11d   : > { %2368 = vmatpush1.bf16.msra.mxu0 %v11791_v37  ;;  %2411 = vmatpush1.bf16.msra.mxu1 %v11793_v38  ;;  %v558_v37 = vld [vmem:[#allocation7 + $0x428] sm:$0xff] }
 0x11e   : > { %2369 = vmatprep.subr.bf16.mxu0 %v11824_v39  ;;  %2412 = vmatprep.subr.bf16.mxu1 %v11826_v40  ;;  %v574_v38 = vld [vmem:[#allocation7 + $0x4a8] sm:$0xff]  ;;  %v11795_v39 = vcombine.low %v525_v27, %v541_v28  ;;  %v11797_v40 = vcombine.low %v526_v29, %v542_v30  ;;  %v11768_v27 = vcombine.high %v495_v21, %v511_v22  ;;  %v527_v29 = vld [vmem:[#allocation7 + $0x330] sm:$0xff] }
 0x11f   : > { %v11830_v42 = vcombine.high %v558_v37, %v574_v38  ;;  %v543_v30 = vld [vmem:[#allocation7 + $0x3b0] sm:$0xff] }
 0x121   : > { %2370 = vmatpush1.bf16.msra.mxu0 %v11823_v45  ;;  %2413 = vmatpush1.bf16.msra.mxu1 %v11825_v46  ;;  %v590_v45 = vld [vmem:[#allocation7 + $0x528] sm:$0xff] }
 0x122   : > { %2371 = vmatprep.subr.bf16.mxu0 %v11856_v47  ;;  %2414 = vmatprep.subr.bf16.mxu1 %v11858_v48  ;;  %v606_v46 = vld [vmem:[#allocation7 + $0x5a8] sm:$0xff]  ;;  %v11827_v47 = vcombine.low %v557_v35, %v573_v36  ;;  %v11829_v48 = vcombine.low %v558_v37, %v574_v38  ;;  %v11800_v35 = vcombine.high %v527_v29, %v543_v30  ;;  %v559_v37 = vld [vmem:[#allocation7 + $0x430] sm:$0xff] }
 0x123   : > { %v11862_v50 = vcombine.high %v590_v45, %v606_v46  ;;  %v575_v38 = vld [vmem:[#allocation7 + $0x4b0] sm:$0xff] }
 0x125   : > { %2372 = vmatpush1.bf16.msra.mxu0 %v11855_v53  ;;  %2415 = vmatpush1.bf16.msra.mxu1 %v11857_v54  ;;  %v622_v53 = vld [vmem:[#allocation7 + $0x628] sm:$0xff] }
 0x126   : > { %2373 = vmatprep.subr.bf16.mxu0 %v11888_v55  ;;  %2416 = vmatprep.subr.bf16.mxu1 %v11890_v56  ;;  %v638_v54 = vld [vmem:[#allocation7 + $0x6a8] sm:$0xff]  ;;  %v11859_v55 = vcombine.low %v589_v43, %v605_v44  ;;  %v11861_v56 = vcombine.low %v590_v45, %v606_v46  ;;  %v11832_v43 = vcombine.high %v559_v37, %v575_v38  ;;  %v591_v45 = vld [vmem:[#allocation7 + $0x530] sm:$0xff] }
 0x127   : > { %v11894_v58 = vcombine.high %v622_v53, %v638_v54  ;;  %v607_v46 = vld [vmem:[#allocation7 + $0x5b0] sm:$0xff] }
 0x129   : > { %2374 = vmatpush1.bf16.msra.mxu0 %v11887_v61  ;;  %2417 = vmatpush1.bf16.msra.mxu1 %v11889_v62  ;;  %v654_v61 = vld [vmem:[#allocation7 + $0x728] sm:$0xff] }
 0x12a   : > { %2375 = vmatprep.subr.bf16.mxu0 %v11920_v63  ;;  %2418 = vmatprep.subr.bf16.mxu1 %v11922_v0  ;;  %v670_v62 = vld [vmem:[#allocation7 + $0x7a8] sm:$0xff]  ;;  %v11891_v63 = vcombine.low %v621_v51, %v637_v52  ;;  %v11893_v0 = vcombine.low %v622_v53, %v638_v54  ;;  %v11864_v51 = vcombine.high %v591_v45, %v607_v46  ;;  %v623_v53 = vld [vmem:[#allocation7 + $0x630] sm:$0xff] }
 0x12b   : > { %v11926_v2 = vcombine.high %v654_v61, %v670_v62  ;;  %v639_v54 = vld [vmem:[#allocation7 + $0x6b0] sm:$0xff] }
 0x12d   : > { %2376 = vmatpush1.bf16.msra.mxu0 %v11919_v5  ;;  %2419 = vmatpush1.bf16.msra.mxu1 %v11921_v6  ;;  %v432_v5 = vld [vmem:[#allocation7 + $0x38] sm:$0xff] }
 0x12e   : > { %2447 = vmatprep.subr.bf16.mxu0 %v11700_v7  ;;  %2490 = vmatprep.subr.bf16.mxu1 %v11702_v9  ;;  %v448_v6 = vld [vmem:[#allocation7 + $0xb8] sm:$0xff]  ;;  %v11923_v7 = vcombine.low %v653_v59, %v669_v60  ;;  %v11925_v9 = vcombine.low %v654_v61, %v670_v62  ;;  %v11896_v59 = vcombine.high %v623_v53, %v639_v54  ;;  %v655_v61 = vld [vmem:[#allocation7 + $0x730] sm:$0xff] }
 0x12f   : > { %v11706_v12 = vcombine.high %v432_v5, %v448_v6  ;;  %v671_v62 = vld [vmem:[#allocation7 + $0x7b0] sm:$0xff] }
 0x130   : > { %2394 = vmatmul.mubr.bf16.vlgmr.msra.gmra.mrb[4].mxu0 %v15700_v10  ;;  %2437 = vmatmul.mubr.bf16.vlgmr.msra.gmra.mrb[4].mxu1 %v15700_v10 }
 0x131   : > { %2448 = vmatpush1.bf16.msra.mxu0 %v11699_v15  ;;  %2491 = vmatpush1.bf16.msra.mxu1 %v11701_v16  ;;  %v464_v15 = vld [vmem:[#allocation7 + $0x138] sm:$0xff] }
 0x132   : > { %2449 = vmatprep.subr.bf16.mxu0 %v11732_v17  ;;  %2492 = vmatprep.subr.bf16.mxu1 %v11734_v18  ;;  %v480_v16 = vld [vmem:[#allocation7 + $0x1b8] sm:$0xff]  ;;  %v11703_v17 = vcombine.low %v431_v3, %v447_v4  ;;  %v11705_v18 = vcombine.low %v432_v5, %v448_v6  ;;  %v11928_v3 = vcombine.high %v655_v61, %v671_v62  ;;  %v433_v5 = vld [vmem:[#allocation7 + $0x40] sm:$0xff] }
 0x133   : > { %2479 = vmatprep.mubr.bf16.mxu0 %v15375_v8  ;;  %2522 = vmatprep.mubr.bf16.mxu1 %v15375_v8  ;;  %v11738_v20 = vcombine.high %v464_v15, %v480_v16  ;;  %v449_v6 = vld [vmem:[#allocation7 + $0xc0] sm:$0xff] }
 0x135   : > { %2450 = vmatpush1.bf16.msra.mxu0 %v11731_v23  ;;  %2493 = vmatpush1.bf16.msra.mxu1 %v11733_v24  ;;  %v496_v23 = vld [vmem:[#allocation7 + $0x238] sm:$0xff] }
 0x136   : > { %2451 = vmatprep.subr.bf16.mxu0 %v11764_v25  ;;  %2494 = vmatprep.subr.bf16.mxu1 %v11766_v26  ;;  %v512_v24 = vld [vmem:[#allocation7 + $0x2b8] sm:$0xff]  ;;  %v11735_v25 = vcombine.low %v463_v13, %v479_v14  ;;  %v11737_v26 = vcombine.low %v464_v15, %v480_v16  ;;  %v11708_v13 = vcombine.high %v433_v5, %v449_v6  ;;  %v465_v15 = vld [vmem:[#allocation7 + $0x140] sm:$0xff] }
 0x137   : > { %v11770_v28 = vcombine.high %v496_v23, %v512_v24  ;;  %v481_v16 = vld [vmem:[#allocation7 + $0x1c0] sm:$0xff] }
 0x139   : > { %2452 = vmatpush1.bf16.msra.mxu0 %v11763_v31  ;;  %2495 = vmatpush1.bf16.msra.mxu1 %v11765_v32  ;;  %v528_v31 = vld [vmem:[#allocation7 + $0x338] sm:$0xff] }
 0x13a   : > { %2453 = vmatprep.subr.bf16.mxu0 %v11796_v33  ;;  %2496 = vmatprep.subr.bf16.mxu1 %v11798_v34  ;;  %v544_v32 = vld [vmem:[#allocation7 + $0x3b8] sm:$0xff]  ;;  %v11767_v33 = vcombine.low %v495_v21, %v511_v22  ;;  %v11769_v34 = vcombine.low %v496_v23, %v512_v24  ;;  %v11740_v21 = vcombine.high %v465_v15, %v481_v16  ;;  %v497_v23 = vld [vmem:[#allocation7 + $0x240] sm:$0xff] }
 0x13b   : > { %v11802_v36 = vcombine.high %v528_v31, %v544_v32  ;;  %v513_v24 = vld [vmem:[#allocation7 + $0x2c0] sm:$0xff] }
 0x13d   : > { %2454 = vmatpush1.bf16.msra.mxu0 %v11795_v39  ;;  %2497 = vmatpush1.bf16.msra.mxu1 %v11797_v40  ;;  %v560_v39 = vld [vmem:[#allocation7 + $0x438] sm:$0xff] }
 0x13e   : > { %2455 = vmatprep.subr.bf16.mxu0 %v11828_v41  ;;  %2498 = vmatprep.subr.bf16.mxu1 %v11830_v42  ;;  %v576_v40 = vld [vmem:[#allocation7 + $0x4b8] sm:$0xff]  ;;  %v11799_v41 = vcombine.low %v527_v29, %v543_v30  ;;  %v11801_v42 = vcombine.low %v528_v31, %v544_v32  ;;  %v11772_v29 = vcombine.high %v497_v23, %v513_v24  ;;  %v529_v31 = vld [vmem:[#allocation7 + $0x340] sm:$0xff] }
 0x13f   : > { %v11834_v44 = vcombine.high %v560_v39, %v576_v40  ;;  %v545_v32 = vld [vmem:[#allocation7 + $0x3c0] sm:$0xff] }
 0x141   : > { %2456 = vmatpush1.bf16.msra.mxu0 %v11827_v47  ;;  %2499 = vmatpush1.bf16.msra.mxu1 %v11829_v48  ;;  %v592_v47 = vld [vmem:[#allocation7 + $0x538] sm:$0xff] }
 0x142   : > { %2457 = vmatprep.subr.bf16.mxu0 %v11860_v49  ;;  %2500 = vmatprep.subr.bf16.mxu1 %v11862_v50  ;;  %v608_v48 = vld [vmem:[#allocation7 + $0x5b8] sm:$0xff]  ;;  %v11831_v49 = vcombine.low %v559_v37, %v575_v38  ;;  %v11833_v50 = vcombine.low %v560_v39, %v576_v40  ;;  %v11804_v37 = vcombine.high %v529_v31, %v545_v32  ;;  %v561_v39 = vld [vmem:[#allocation7 + $0x440] sm:$0xff] }
 0x143   : > { %v11866_v52 = vcombine.high %v592_v47, %v608_v48  ;;  %v577_v40 = vld [vmem:[#allocation7 + $0x4c0] sm:$0xff] }
 0x145   : > { %2458 = vmatpush1.bf16.msra.mxu0 %v11859_v55  ;;  %2501 = vmatpush1.bf16.msra.mxu1 %v11861_v56  ;;  %v624_v55 = vld [vmem:[#allocation7 + $0x638] sm:$0xff] }
 0x146   : > { %2459 = vmatprep.subr.bf16.mxu0 %v11892_v57  ;;  %2502 = vmatprep.subr.bf16.mxu1 %v11894_v58  ;;  %v640_v56 = vld [vmem:[#allocation7 + $0x6b8] sm:$0xff]  ;;  %v11863_v57 = vcombine.low %v591_v45, %v607_v46  ;;  %v11865_v58 = vcombine.low %v592_v47, %v608_v48  ;;  %v11836_v45 = vcombine.high %v561_v39, %v577_v40  ;;  %v593_v47 = vld [vmem:[#allocation7 + $0x540] sm:$0xff] }
 0x147   : > { %v11898_v60 = vcombine.high %v624_v55, %v640_v56  ;;  %v609_v48 = vld [vmem:[#allocation7 + $0x5c0] sm:$0xff] }
 0x149   : > { %2460 = vmatpush1.bf16.msra.mxu0 %v11891_v63  ;;  %2503 = vmatpush1.bf16.msra.mxu1 %v11893_v0  ;;  %v656_v63 = vld [vmem:[#allocation7 + $0x738] sm:$0xff] }
 0x14a   : > { %2461 = vmatprep.subr.bf16.mxu0 %v11924_v1  ;;  %2504 = vmatprep.subr.bf16.mxu1 %v11926_v2  ;;  %v672_v0 = vld [vmem:[#allocation7 + $0x7b8] sm:$0xff]  ;;  %v11895_v1 = vcombine.low %v623_v53, %v639_v54  ;;  %v11897_v2 = vcombine.low %v624_v55, %v640_v56  ;;  %v11868_v53 = vcombine.high %v593_v47, %v609_v48  ;;  %v625_v55 = vld [vmem:[#allocation7 + $0x640] sm:$0xff] }
 0x14b   : > { %v11930_v4 = vcombine.high %v656_v63, %v672_v0  ;;  %v641_v56 = vld [vmem:[#allocation7 + $0x6c0] sm:$0xff] }
 0x14d   : > { %2462 = vmatpush1.bf16.msra.mxu0 %v11923_v7  ;;  %2505 = vmatpush1.bf16.msra.mxu1 %v11925_v9  ;;  %v434_v7 = vld [vmem:[#allocation7 + $0x48] sm:$0xff] }
 0x14e   : > { %2533 = vmatprep.subr.bf16.mxu0 %v11704_v11  ;;  %2576 = vmatprep.subr.bf16.mxu1 %v11706_v12  ;;  %v450_v9 = vld [vmem:[#allocation7 + $0xc8] sm:$0xff]  ;;  %v11927_v11 = vcombine.low %v655_v61, %v671_v62  ;;  %v11929_v12 = vcombine.low %v656_v63, %v672_v0  ;;  %v11900_v61 = vcombine.high %v625_v55, %v641_v56  ;;  %v657_v63 = vld [vmem:[#allocation7 + $0x740] sm:$0xff] }
 0x14f   : > { %v11710_v14 = vcombine.high %v434_v7, %v450_v9  ;;  %v673_v0 = vld [vmem:[#allocation7 + $0x7c0] sm:$0xff] }
 0x150   : > { %2480 = vmatmul.mubr.bf16.vlgmr.msra.gmra.mrb[8].mxu0 %v15700_v10  ;;  %2523 = vmatmul.mubr.bf16.vlgmr.msra.gmra.mrb[8].mxu1 %v15700_v10 }
 0x151   : > { %2534 = vmatpush1.bf16.msra.mxu0 %v11703_v17  ;;  %2577 = vmatpush1.bf16.msra.mxu1 %v11705_v18  ;;  %v466_v17 = vld [vmem:[#allocation7 + $0x148] sm:$0xff] }
 0x152   : > { %2535 = vmatprep.subr.bf16.mxu0 %v11736_v19  ;;  %2578 = vmatprep.subr.bf16.mxu1 %v11738_v20  ;;  %v482_v18 = vld [vmem:[#allocation7 + $0x1c8] sm:$0xff]  ;;  %v11707_v19 = vcombine.low %v433_v5, %v449_v6  ;;  %v11709_v20 = vcombine.low %v434_v7, %v450_v9  ;;  %v11932_v5 = vcombine.high %v657_v63, %v673_v0  ;;  %v435_v7 = vld [vmem:[#allocation7 + $0x50] sm:$0xff] }
 0x153   : > { %2565 = vmatprep.mubr.bf16.mxu0 %v15375_v8  ;;  %2608 = vmatprep.mubr.bf16.mxu1 %v15375_v8  ;;  %v11742_v22 = vcombine.high %v466_v17, %v482_v18  ;;  %v451_v9 = vld [vmem:[#allocation7 + $0xd0] sm:$0xff] }
 0x155   : > { %2536 = vmatpush1.bf16.msra.mxu0 %v11735_v25  ;;  %2579 = vmatpush1.bf16.msra.mxu1 %v11737_v26  ;;  %v498_v25 = vld [vmem:[#allocation7 + $0x248] sm:$0xff] }
 0x156   : > { %2537 = vmatprep.subr.bf16.mxu0 %v11768_v27  ;;  %2580 = vmatprep.subr.bf16.mxu1 %v11770_v28  ;;  %v514_v26 = vld [vmem:[#allocation7 + $0x2c8] sm:$0xff]  ;;  %v11739_v27 = vcombine.low %v465_v15, %v481_v16  ;;  %v11741_v28 = vcombine.low %v466_v17, %v482_v18  ;;  %v11712_v15 = vcombine.high %v435_v7, %v451_v9  ;;  %v467_v17 = vld [vmem:[#allocation7 + $0x150] sm:$0xff] }
 0x157   : > { %v11774_v30 = vcombine.high %v498_v25, %v514_v26  ;;  %v483_v18 = vld [vmem:[#allocation7 + $0x1d0] sm:$0xff] }
 0x159   : > { %2538 = vmatpush1.bf16.msra.mxu0 %v11767_v33  ;;  %2581 = vmatpush1.bf16.msra.mxu1 %v11769_v34  ;;  %v530_v33 = vld [vmem:[#allocation7 + $0x348] sm:$0xff] }
 0x15a   : > { %2539 = vmatprep.subr.bf16.mxu0 %v11800_v35  ;;  %2582 = vmatprep.subr.bf16.mxu1 %v11802_v36  ;;  %v546_v34 = vld [vmem:[#allocation7 + $0x3c8] sm:$0xff]  ;;  %v11771_v35 = vcombine.low %v497_v23, %v513_v24  ;;  %v11773_v36 = vcombine.low %v498_v25, %v514_v26  ;;  %v11744_v23 = vcombine.high %v467_v17, %v483_v18  ;;  %v499_v25 = vld [vmem:[#allocation7 + $0x250] sm:$0xff] }
 0x15b   : > { %v11806_v38 = vcombine.high %v530_v33, %v546_v34  ;;  %v515_v26 = vld [vmem:[#allocation7 + $0x2d0] sm:$0xff] }
 0x15d   : > { %2540 = vmatpush1.bf16.msra.mxu0 %v11799_v41  ;;  %2583 = vmatpush1.bf16.msra.mxu1 %v11801_v42  ;;  %v562_v41 = vld [vmem:[#allocation7 + $0x448] sm:$0xff] }
 0x15e   : > { %2541 = vmatprep.subr.bf16.mxu0 %v11832_v43  ;;  %2584 = vmatprep.subr.bf16.mxu1 %v11834_v44  ;;  %v578_v42 = vld [vmem:[#allocation7 + $0x4c8] sm:$0xff]  ;;  %v11803_v43 = vcombine.low %v529_v31, %v545_v32  ;;  %v11805_v44 = vcombine.low %v530_v33, %v546_v34  ;;  %v11776_v31 = vcombine.high %v499_v25, %v515_v26  ;;  %v531_v33 = vld [vmem:[#allocation7 + $0x350] sm:$0xff] }
 0x15f   : > { %v11838_v46 = vcombine.high %v562_v41, %v578_v42  ;;  %v547_v34 = vld [vmem:[#allocation7 + $0x3d0] sm:$0xff] }
 0x161   : > { %2542 = vmatpush1.bf16.msra.mxu0 %v11831_v49  ;;  %2585 = vmatpush1.bf16.msra.mxu1 %v11833_v50  ;;  %v594_v49 = vld [vmem:[#allocation7 + $0x548] sm:$0xff] }
 0x162   : > { %2543 = vmatprep.subr.bf16.mxu0 %v11864_v51  ;;  %2586 = vmatprep.subr.bf16.mxu1 %v11866_v52  ;;  %v610_v50 = vld [vmem:[#allocation7 + $0x5c8] sm:$0xff]  ;;  %v11835_v51 = vcombine.low %v561_v39, %v577_v40  ;;  %v11837_v52 = vcombine.low %v562_v41, %v578_v42  ;;  %v563_v40 = vld [vmem:[#allocation7 + $0x450] sm:$0xff]  ;;  %v564_v42 = vld [vmem:[#allocation7 + $0x458] sm:$0xff] }
 0x163   : > { %v11870_v54 = vcombine.high %v594_v49, %v610_v50  ;;  %v579_v41 = vld [vmem:[#allocation7 + $0x4d0] sm:$0xff] }
 0x165   : > { %2544 = vmatpush1.bf16.msra.mxu0 %v11863_v57  ;;  %2587 = vmatpush1.bf16.msra.mxu1 %v11865_v58  ;;  %v626_v57 = vld [vmem:[#allocation7 + $0x648] sm:$0xff] }
 0x166   : > { %2545 = vmatprep.subr.bf16.mxu0 %v11896_v59  ;;  %2588 = vmatprep.subr.bf16.mxu1 %v11898_v60  ;;  %v642_v58 = vld [vmem:[#allocation7 + $0x6c8] sm:$0xff]  ;;  %v11867_v59 = vcombine.low %v593_v47, %v609_v48  ;;  %v11869_v60 = vcombine.low %v594_v49, %v610_v50  ;;  %v595_v48 = vld [vmem:[#allocation7 + $0x550] sm:$0xff]  ;;  %v596_v50 = vld [vmem:[#allocation7 + $0x558] sm:$0xff] }
 0x167   : > { %v11902_v62 = vcombine.high %v626_v57, %v642_v58  ;;  %v611_v49 = vld [vmem:[#allocation7 + $0x5d0] sm:$0xff] }
 0x169   : > { %2546 = vmatpush1.bf16.msra.mxu0 %v11895_v1  ;;  %2589 = vmatpush1.bf16.msra.mxu1 %v11897_v2  ;;  %v658_v1 = vld [vmem:[#allocation7 + $0x748] sm:$0xff] }
 0x16a   : > { %2547 = vmatprep.subr.bf16.mxu0 %v11928_v3  ;;  %2590 = vmatprep.subr.bf16.mxu1 %v11930_v4  ;;  %v674_v2 = vld [vmem:[#allocation7 + $0x7c8] sm:$0xff]  ;;  %v11899_v3 = vcombine.low %v625_v55, %v641_v56  ;;  %v11901_v4 = vcombine.low %v626_v57, %v642_v58  ;;  %v627_v56 = vld [vmem:[#allocation7 + $0x650] sm:$0xff]  ;;  %v628_v58 = vld [vmem:[#allocation7 + $0x658] sm:$0xff] }
 0x16b   : > { %v11934_v6 = vcombine.high %v658_v1, %v674_v2  ;;  %v643_v57 = vld [vmem:[#allocation7 + $0x6d0] sm:$0xff] }
 0x16d   : > { %2548 = vmatpush1.bf16.msra.mxu0 %v11927_v11  ;;  %2591 = vmatpush1.bf16.msra.mxu1 %v11929_v12  ;;  %v436_v11 = vld [vmem:[#allocation7 + $0x58] sm:$0xff] }
 0x16e   : > { %2619 = vmatprep.subr.bf16.mxu0 %v11708_v13  ;;  %2662 = vmatprep.subr.bf16.mxu1 %v11710_v14  ;;  %v452_v12 = vld [vmem:[#allocation7 + $0xd8] sm:$0xff]  ;;  %v11931_v13 = vcombine.low %v657_v63, %v673_v0  ;;  %v11933_v14 = vcombine.low %v658_v1, %v674_v2  ;;  %v659_v0 = vld [vmem:[#allocation7 + $0x750] sm:$0xff] }
 0x16f   : > { %v11714_v16 = vcombine.high %v436_v11, %v452_v12  ;;  %v675_v1 = vld [vmem:[#allocation7 + $0x7d0] sm:$0xff]  ;;  %v660_v2 = vld [vmem:[#allocation7 + $0x758] sm:$0xff] }
 0x170   : > { %2566 = vmatmul.mubr.bf16.vlgmr.msra.gmra.mrb[12].mxu0 %v15700_v10  ;;  %2609 = vmatmul.mubr.bf16.vlgmr.msra.gmra.mrb[12].mxu1 %v15700_v10 }
 0x171   : > { %2620 = vmatpush1.bf16.msra.mxu0 %v11707_v19  ;;  %2663 = vmatpush1.bf16.msra.mxu1 %v11709_v20  ;;  %v468_v19 = vld [vmem:[#allocation7 + $0x158] sm:$0xff] }
 0x172   : > { %2621 = vmatprep.subr.bf16.mxu0 %v11740_v21  ;;  %2664 = vmatprep.subr.bf16.mxu1 %v11742_v22  ;;  %v484_v20 = vld [vmem:[#allocation7 + $0x1d8] sm:$0xff]  ;;  %v11711_v21 = vcombine.low %v435_v7, %v451_v9  ;;  %v11713_v22 = vcombine.low %v436_v11, %v452_v12  ;;  %v437_v9 = vld [vmem:[#allocation7 + $0x60] sm:$0xff]  ;;  %v438_v12 = vld [vmem:[#allocation7 + $0x68] sm:$0xff] }
 0x173   : > { %2651 = vmatprep.mubr.bf16.mxu0 %v15375_v8  ;;  %2694 = vmatprep.mubr.bf16.mxu1 %v15375_v8  ;;  %v11746_v24 = vcombine.high %v468_v19, %v484_v20  ;;  %v453_v11 = vld [vmem:[#allocation7 + $0xe0] sm:$0xff] }
 0x175   : > { %2622 = vmatpush1.bf16.msra.mxu0 %v11739_v27  ;;  %2665 = vmatpush1.bf16.msra.mxu1 %v11741_v28  ;;  %v500_v27 = vld [vmem:[#allocation7 + $0x258] sm:$0xff] }
 0x176   : > { %2623 = vmatprep.subr.bf16.mxu0 %v11772_v29  ;;  %2666 = vmatprep.subr.bf16.mxu1 %v11774_v30  ;;  %v516_v28 = vld [vmem:[#allocation7 + $0x2d8] sm:$0xff]  ;;  %v11743_v29 = vcombine.low %v467_v17, %v483_v18  ;;  %v11745_v30 = vcombine.low %v468_v19, %v484_v20  ;;  %v469_v18 = vld [vmem:[#allocation7 + $0x160] sm:$0xff]  ;;  %v470_v20 = vld [vmem:[#allocation7 + $0x168] sm:$0xff] }
 0x177   : > { %v11778_v32 = vcombine.high %v500_v27, %v516_v28  ;;  %v485_v19 = vld [vmem:[#allocation7 + $0x1e0] sm:$0xff] }
 0x179   : > { %2624 = vmatpush1.bf16.msra.mxu0 %v11771_v35  ;;  %2667 = vmatpush1.bf16.msra.mxu1 %v11773_v36  ;;  %v532_v35 = vld [vmem:[#allocation7 + $0x358] sm:$0xff] }
 0x17a   : > { %2625 = vmatprep.subr.bf16.mxu0 %v11804_v37  ;;  %2668 = vmatprep.subr.bf16.mxu1 %v11806_v38  ;;  %v548_v36 = vld [vmem:[#allocation7 + $0x3d8] sm:$0xff]  ;;  %v11775_v37 = vcombine.low %v499_v25, %v515_v26  ;;  %v11808_v38 = vcombine.high %v531_v33, %v547_v34  ;;  %v501_v26 = vld [vmem:[#allocation7 + $0x260] sm:$0xff] }
 0x17b   : > { %v11810_v39 = vcombine.high %v532_v35, %v548_v36 }
 0x17d   : > { %2626 = vmatpush1.bf16.msra.mxu0 %v11803_v43  ;;  %2669 = vmatpush1.bf16.msra.mxu1 %v11805_v44  ;;  %v580_v43 = vld [vmem:[#allocation7 + $0x4d8] sm:$0xff]  ;;  %v11807_v44 = vcombine.low %v531_v33, %v547_v34 }
 0x17e   : > { %2627 = vmatprep.subr.bf16.mxu0 %v11836_v45  ;;  %2670 = vmatprep.subr.bf16.mxu1 %v11838_v46  ;;  %v11809_v45 = vcombine.low %v532_v35, %v548_v36  ;;  %v11840_v46 = vcombine.high %v563_v40, %v579_v41  ;;  %v11842_v47 = vcombine.high %v564_v42, %v580_v43  ;;  %v533_v35 = vld [vmem:[#allocation7 + $0x360] sm:$0xff] }
 0x17f   : > { %v549_v36 = vld [vmem:[#allocation7 + $0x3e0] sm:$0xff] }
 0x181   : > { %2628 = vmatpush1.bf16.msra.mxu0 %v11835_v51  ;;  %2671 = vmatpush1.bf16.msra.mxu1 %v11837_v52  ;;  %v612_v51 = vld [vmem:[#allocation7 + $0x5d8] sm:$0xff]  ;;  %v11839_v52 = vcombine.low %v563_v40, %v579_v41  ;;  %v11812_v40 = vcombine.high %v533_v35, %v549_v36 }
 0x182   : > { %2629 = vmatprep.subr.bf16.mxu0 %v11868_v53  ;;  %2672 = vmatprep.subr.bf16.mxu1 %v11870_v54  ;;  %v11841_v53 = vcombine.low %v564_v42, %v580_v43  ;;  %v11872_v54 = vcombine.high %v595_v48, %v611_v49  ;;  %v11874_v55 = vcombine.high %v596_v50, %v612_v51  ;;  %v565_v42 = vld [vmem:[#allocation7 + $0x460] sm:$0xff] }
 0x183   : > { %v581_v43 = vld [vmem:[#allocation7 + $0x4e0] sm:$0xff] }
 0x185   : > { %2630 = vmatpush1.bf16.msra.mxu0 %v11867_v59  ;;  %2673 = vmatpush1.bf16.msra.mxu1 %v11869_v60  ;;  %v644_v59 = vld [vmem:[#allocation7 + $0x6d8] sm:$0xff]  ;;  %v11871_v60 = vcombine.low %v595_v48, %v611_v49  ;;  %v11844_v48 = vcombine.high %v565_v42, %v581_v43 }
 0x186   : > { %2631 = vmatprep.subr.bf16.mxu0 %v11900_v61  ;;  %2674 = vmatprep.subr.bf16.mxu1 %v11902_v62  ;;  %v11873_v61 = vcombine.low %v596_v50, %v612_v51  ;;  %v11904_v62 = vcombine.high %v627_v56, %v643_v57  ;;  %v11906_v63 = vcombine.high %v628_v58, %v644_v59  ;;  %v597_v50 = vld [vmem:[#allocation7 + $0x560] sm:$0xff] }
 0x187   : > { %v613_v51 = vld [vmem:[#allocation7 + $0x5e0] sm:$0xff] }
 0x189   : > { %2632 = vmatpush1.bf16.msra.mxu0 %v11899_v3  ;;  %2675 = vmatpush1.bf16.msra.mxu1 %v11901_v4  ;;  %v676_v3 = vld [vmem:[#allocation7 + $0x7d8] sm:$0xff]  ;;  %v11903_v4 = vcombine.low %v627_v56, %v643_v57  ;;  %v11876_v56 = vcombine.high %v597_v50, %v613_v51 }
 0x18a   : > { %2633 = vmatprep.subr.bf16.mxu0 %v11932_v5  ;;  %2676 = vmatprep.subr.bf16.mxu1 %v11934_v6  ;;  %v11905_v5 = vcombine.low %v628_v58, %v644_v59  ;;  %v11936_v6 = vcombine.high %v659_v0, %v675_v1  ;;  %v11938_v7 = vcombine.high %v660_v2, %v676_v3  ;;  %v629_v58 = vld [vmem:[#allocation7 + $0x660] sm:$0xff] }
 0x18b   : > { %v645_v59 = vld [vmem:[#allocation7 + $0x6e0] sm:$0xff] }
 0x18d   : > { %2634 = vmatpush1.bf16.msra.mxu0 %v11931_v13  ;;  %2677 = vmatpush1.bf16.msra.mxu1 %v11933_v14  ;;  %v454_v13 = vld [vmem:[#allocation7 + $0xe8] sm:$0xff]  ;;  %v11935_v14 = vcombine.low %v659_v0, %v675_v1  ;;  %v11908_v0 = vcombine.high %v629_v58, %v645_v59 }
 0x18e   : > { %2705 = vmatprep.subr.bf16.mxu0 %v11712_v15  ;;  %2748 = vmatprep.subr.bf16.mxu1 %v11714_v16  ;;  %v11937_v15 = vcombine.low %v660_v2, %v676_v3  ;;  %v11716_v16 = vcombine.high %v437_v9, %v453_v11  ;;  %v11718_v17 = vcombine.high %v438_v12, %v454_v13  ;;  %v661_v2 = vld [vmem:[#allocation7 + $0x760] sm:$0xff] }
 0x18f   : > { %v677_v3 = vld [vmem:[#allocation7 + $0x7e0] sm:$0xff] }
 0x190   : > { %2652 = vmatmul.mubr.bf16.vlgmr.msra.gmra.mrb[16].mxu0 %v15700_v10  ;;  %2695 = vmatmul.mubr.bf16.vlgmr.msra.gmra.mrb[16].mxu1 %v15700_v10  ;;  %v11777_v10 = vcombine.low %v500_v27, %v516_v28  ;;  %v517_v27 = vld [vmem:[#allocation7 + $0x2e0] sm:$0xff]  ;;  %v15722_v28 = vld [vmem:[#allocation4] sm:$0xff]  }
 0x191   : > { %2706 = vmatpush1.bf16.msra.mxu0 %v11711_v21  ;;  %2749 = vmatpush1.bf16.msra.mxu1 %v11713_v22  ;;  %v486_v21 = vld [vmem:[#allocation7 + $0x1e8] sm:$0xff]  ;;  %v11715_v22 = vcombine.low %v437_v9, %v453_v11  ;;  %v11780_v33 = vcombine.high %v501_v26, %v517_v27  ;;  %v11940_v9 = vcombine.high %v661_v2, %v677_v3 }
 0x192   : > { %2707 = vmatprep.subr.bf16.mxu0 %v11744_v23  ;;  %2750 = vmatprep.subr.bf16.mxu1 %v11746_v24  ;;  %v11717_v23 = vcombine.low %v438_v12, %v454_v13  ;;  %v11748_v24 = vcombine.high %v469_v18, %v485_v19  ;;  %v11750_v25 = vcombine.high %v470_v20, %v486_v21  ;;  %v439_v12 = vld [vmem:[#allocation7 + $0x70] sm:$0xff] }
 0x193   : > { %2737 = vmatprep.mubr.bf16.mxu0 %v15375_v8  ;;  %2780 = vmatprep.mubr.bf16.mxu1 %v15375_v8  ;;  %v455_v13 = vld [vmem:[#allocation7 + $0xf0] sm:$0xff] }
 0x195   : > { %2708 = vmatpush1.bf16.msra.mxu0 %v11743_v29  ;;  %2751 = vmatpush1.bf16.msra.mxu1 %v11745_v30  ;;  %v502_v29 = vld [vmem:[#allocation7 + $0x268] sm:$0xff] }
 0x196   : > { %2709 = vmatprep.subr.bf16.mxu0 %v11776_v31  ;;  %2752 = vmatprep.subr.bf16.mxu1 %v11778_v32  ;;  %v518_v30 = vld [vmem:[#allocation7 + $0x2e8] sm:$0xff]  ;;  %v11747_v31 = vcombine.low %v469_v18, %v485_v19  ;;  %v11749_v32 = vcombine.low %v470_v20, %v486_v21  ;;  %v11720_v18 = vcombine.high %v439_v12, %v455_v13  ;;  %v471_v20 = vld [vmem:[#allocation7 + $0x170] sm:$0xff] }
 0x197   : > { %v11782_v34 = vcombine.high %v502_v29, %v518_v30  ;;  %v487_v21 = vld [vmem:[#allocation7 + $0x1f0] sm:$0xff] }
 0x199   : > { %2710 = vmatpush1.bf16.msra.mxu0 %v11775_v37  ;;  %2753 = vmatpush1.bf16.msra.mxu1 %v11777_v10  ;;  %v534_v37 = vld [vmem:[#allocation7 + $0x368] sm:$0xff] }
 0x19a   : > { %2711 = vmatprep.subr.bf16.mxu0 %v11808_v38  ;;  %2754 = vmatprep.subr.bf16.mxu1 %v11810_v39  ;;  %v550_v10 = vld [vmem:[#allocation7 + $0x3e8] sm:$0xff]  ;;  %v11779_v38 = vcombine.low %v501_v26, %v517_v27  ;;  %v11781_v39 = vcombine.low %v502_v29, %v518_v30  ;;  %v11752_v26 = vcombine.high %v471_v20, %v487_v21  ;;  %v503_v29 = vld [vmem:[#allocation7 + $0x270] sm:$0xff] }
 0x19b   : > { %v11814_v41 = vcombine.high %v534_v37, %v550_v10  ;;  %v519_v30 = vld [vmem:[#allocation7 + $0x2f0] sm:$0xff] }
 0x19d   : > { %2712 = vmatpush1.bf16.msra.mxu0 %v11807_v44  ;;  %2755 = vmatpush1.bf16.msra.mxu1 %v11809_v45  ;;  %v566_v44 = vld [vmem:[#allocation7 + $0x468] sm:$0xff] }
 0x19e   : > { %2713 = vmatprep.subr.bf16.mxu0 %v11840_v46  ;;  %2756 = vmatprep.subr.bf16.mxu1 %v11842_v47  ;;  %v582_v45 = vld [vmem:[#allocation7 + $0x4e8] sm:$0xff]  ;;  %v11811_v46 = vcombine.low %v533_v35, %v549_v36  ;;  %v11813_v47 = vcombine.low %v534_v37, %v550_v10  ;;  %v11784_v36 = vcombine.high %v503_v29, %v519_v30  ;;  %v535_v10 = vld [vmem:[#allocation7 + $0x370] sm:$0xff] }
 0x19f   : > { %v11846_v49 = vcombine.high %v566_v44, %v582_v45 }
 0x1a1   : > { %2714 = vmatpush1.bf16.msra.mxu0 %v11839_v52  ;;  %2757 = vmatpush1.bf16.msra.mxu1 %v11841_v53  ;;  %v598_v52 = vld [vmem:[#allocation7 + $0x568] sm:$0xff] }
 0x1a2   : > { %2715 = vmatprep.subr.bf16.mxu0 %v11872_v54  ;;  %2758 = vmatprep.subr.bf16.mxu1 %v11874_v55  ;;  %v614_v53 = vld [vmem:[#allocation7 + $0x5e8] sm:$0xff]  ;;  %v11843_v54 = vcombine.low %v565_v42, %v581_v43  ;;  %v11845_v55 = vcombine.low %v566_v44, %v582_v45  ;;  %v11783_v42 = vcombine.low %v503_v29, %v519_v30  ;;  %v15732_v43 = vld [vmem:[#allocation9] sm:$0xff]  ;;  %v680_v29 = vld [vmem:[#allocation7 + $0x7f8] sm:$0xff] }
 0x1a3   : > { %v11878_v57 = vcombine.high %v598_v52, %v614_v53 }
 0x1a5   : > { %2716 = vmatpush1.bf16.msra.mxu0 %v11871_v60  ;;  %2759 = vmatpush1.bf16.msra.mxu1 %v11873_v61  ;;  %v630_v60 = vld [vmem:[#allocation7 + $0x668] sm:$0xff] }
 0x1a6   : > { %2717 = vmatprep.subr.bf16.mxu0 %v11904_v62  ;;  %2760 = vmatprep.subr.bf16.mxu1 %v11906_v63  ;;  %v646_v61 = vld [vmem:[#allocation7 + $0x6e8] sm:$0xff]  ;;  %v11875_v62 = vcombine.low %v597_v50, %v613_v51  ;;  %v11877_v63 = vcombine.low %v598_v52, %v614_v53  ;;  %v584_v50 = vld [vmem:[#allocation7 + $0x4f8] sm:$0xff]  ;;  %v685_v51 = vunpack.c.l.bf16 %v15732_v43 }
 0x1a7   : > { %v11910_v1 = vcombine.high %v630_v60, %v646_v61 }
 0x1a9   : > { %2718 = vmatpush1.bf16.msra.mxu0 %v11903_v4  ;;  %2761 = vmatpush1.bf16.msra.mxu1 %v11905_v5  ;;  %v662_v4 = vld [vmem:[#allocation7 + $0x768] sm:$0xff] }
 0x1aa   : > { %2719 = vmatprep.subr.bf16.mxu0 %v11936_v6  ;;  %2762 = vmatprep.subr.bf16.mxu1 %v11938_v7  ;;  %v678_v5 = vld [vmem:[#allocation7 + $0x7e8] sm:$0xff]  ;;  %v11907_v6 = vcombine.low %v629_v58, %v645_v59  ;;  %v11909_v7 = vcombine.low %v630_v60, %v646_v61  ;;  %v599_v59 = vld [vmem:[#allocation7 + $0x570] sm:$0xff] }
 0x1ab   : > { %v11942_v11 = vcombine.high %v662_v4, %v678_v5  ;;  %v615_v60 = vld [vmem:[#allocation7 + $0x5f0] sm:$0xff] }
 0x1ad   : > { %2720 = vmatpush1.bf16.msra.mxu0 %v11935_v14  ;;  %2763 = vmatpush1.bf16.msra.mxu1 %v11937_v15  ;;  %v440_v14 = vld [vmem:[#allocation7 + $0x78] sm:$0xff] }
 0x1ae   : > { %2791 = vmatprep.subr.bf16.mxu0 %v11716_v16  ;;  %2834 = vmatprep.subr.bf16.mxu1 %v11718_v17  ;;  %v456_v15 = vld [vmem:[#allocation7 + $0xf8] sm:$0xff]  ;;  %v11939_v16 = vcombine.low %v661_v2, %v677_v3  ;;  %v11941_v17 = vcombine.low %v662_v4, %v678_v5  ;;  %v11880_v5 = vcombine.high %v599_v59, %v615_v60 }
 0x1af   : > { %v11722_v19 = vcombine.high %v440_v14, %v456_v15 }
 0x1b0   : > { %2738 = vmatmul.mubr.bf16.vlgmr.msra.gmra.mrb[20].mxu0 %v15722_v28  ;;  %2781 = vmatmul.mubr.bf16.vlgmr.msra.gmra.mrb[20].mxu1 %v15722_v28 }
 0x1b1   : > { %2792 = vmatpush1.bf16.msra.mxu0 %v11715_v22  ;;  %2835 = vmatpush1.bf16.msra.mxu1 %v11717_v23  ;;  %v472_v22 = vld [vmem:[#allocation7 + $0x178] sm:$0xff] }
 0x1b2   : > { %2793 = vmatprep.subr.bf16.mxu0 %v11748_v24  ;;  %2836 = vmatprep.subr.bf16.mxu1 %v11750_v25  ;;  %v488_v23 = vld [vmem:[#allocation7 + $0x1f8] sm:$0xff]  ;;  %v11719_v24 = vcombine.low %v439_v12, %v455_v13  ;;  %v11721_v25 = vcombine.low %v440_v14, %v456_v15 }
 0x1b3   : > { %2823 = vmatprep.mubr.bf16.mxu0 %v15375_v8  ;;  %2866 = vmatprep.mubr.bf16.mxu1 %v15375_v8  ;;  %v11754_v27 = vcombine.high %v472_v22, %v488_v23  ;;  %v11753_v35 = vcombine.low %v472_v22, %v488_v23  ;;  %v632_v12 = vld [vmem:[#allocation7 + $0x678] sm:$0xff]  ;;  %v663_v22 = vld [vmem:[#allocation7 + $0x770] sm:$0xff] }
 0x1b4   : > { %v648_v13 = vld [vmem:[#allocation7 + $0x6f8] sm:$0xff]  ;;  %v679_v23 = vld [vmem:[#allocation7 + $0x7f0] sm:$0xff] }
 0x1b5   : > { %2794 = vmatpush1.bf16.msra.mxu0 %v11747_v31  ;;  %2837 = vmatpush1.bf16.msra.mxu1 %v11749_v32  ;;  %v504_v31 = vld [vmem:[#allocation7 + $0x278] sm:$0xff] }
 0x1b6   : > { %2795 = vmatprep.subr.bf16.mxu0 %v11780_v33  ;;  %2838 = vmatprep.subr.bf16.mxu1 %v11782_v34  ;;  %v520_v32 = vld [vmem:[#allocation7 + $0x2f8] sm:$0xff]  ;;  %v701_v33 = vlaneseq  ;;  %v11751_v34 = vcombine.low %v471_v20, %v487_v21  ;;  %v11914_v21 = vcombine.high %v632_v12, %v648_v13 }
 0x1b7   : > { %v11786_v37 = vcombine.high %v504_v31, %v520_v32  ;;  %v11785_v44 = vcombine.low %v504_v31, %v520_v32 }
 0x1b9   : > { %2796 = vmatpush1.bf16.msra.mxu0 %v11779_v38  ;;  %2839 = vmatpush1.bf16.msra.mxu1 %v11781_v39  ;;  %v551_v38 = vld [vmem:[#allocation7 + $0x3f0] sm:$0xff]  ;;  %v536_v39 = vld [vmem:[#allocation7 + $0x378] sm:$0xff] }
 0x1ba   : > { %2797 = vmatprep.subr.bf16.mxu0 %v11812_v40  ;;  %2840 = vmatprep.subr.bf16.mxu1 %v11814_v41  ;;  %v552_v40 = vld [vmem:[#allocation7 + $0x3f8] sm:$0xff]  ;;  %v702_v41 = vshrl.u32 %v701_v33, 7  ;;  %v11816_v45 = vcombine.high %v535_v10, %v551_v38 }
 0x1bc   : > { %v15735_v52 = vsub.s32 0, %v702_v41  ;;  %v15737_v53 = vsub.s32 4, %v702_v41 }
 0x1bd   : > { %2798 = vmatpush1.bf16.msra.mxu0 %v11811_v46  ;;  %2841 = vmatpush1.bf16.msra.mxu1 %v11813_v47  ;;  %v11818_v46 = vcombine.high %v536_v39, %v552_v40  ;;  %v567_v47 = vld [vmem:[#allocation7 + $0x470] sm:$0xff] }
 0x1be   : > { %2799 = vmatprep.subr.bf16.mxu0 %v11844_v48  ;;  %2842 = vmatprep.subr.bf16.mxu1 %v11846_v49  ;;  %v583_v48 = vld [vmem:[#allocation7 + $0x4f0] sm:$0xff]  ;;  %v568_v49 = vld [vmem:[#allocation7 + $0x478] sm:$0xff]  ;;  %v704_v61 = vrot.slane %v685_v51, %v15735_v52 }
 0x1bf   : > { %v11850_v58 = vcombine.high %v568_v49, %v584_v50  ;;  %v11849_v3 = vcombine.low %v568_v49, %v584_v50 }
 0x1c1   : > { %2800 = vmatpush1.bf16.msra.mxu0 %v11843_v54  ;;  %2843 = vmatpush1.bf16.msra.mxu1 %v11845_v55  ;;  %v15739_v54 = vsub.s32 2, %v702_v41  ;;  %v11817_v55 = vcombine.low %v536_v39, %v552_v40  ;;  %v11944_v40 = vcombine.high %v663_v22, %v679_v23 }
 0x1c2   : > { %2801 = vmatprep.subr.bf16.mxu0 %v11876_v56  ;;  %2844 = vmatprep.subr.bf16.mxu1 %v11878_v57  ;;  %v11848_v56 = vcombine.high %v567_v47, %v583_v48  ;;  %v15741_v57 = vsub.s32 6, %v702_v41 }
 0x1c3   : > { %v708_v2 = vrot.slane %v685_v51, %v15739_v54 }
 0x1c4   : > { %v716_v4 = vrot.slane %v685_v51, %v15741_v57 }
 0x1c5   : > { %2802 = vmatpush1.bf16.msra.mxu0 %v11875_v62  ;;  %2845 = vmatpush1.bf16.msra.mxu1 %v11877_v63  ;;  %v600_v62 = vld [vmem:[#allocation7 + $0x578] sm:$0xff]  ;;  %v868_v15 = vrot.slane %v708_v2, %v15735_v52 }
 0x1c6   : > { %2803 = vmatprep.subr.bf16.mxu0 %v11908_v0  ;;  %2846 = vmatprep.subr.bf16.mxu1 %v11910_v1  ;;  %v616_v63 = vld [vmem:[#allocation7 + $0x5f8] sm:$0xff]  ;;  %v11847_v0 = vcombine.low %v567_v47, %v583_v48  ;;  %v712_v1 = vrot.slane %v685_v51, %v15737_v53  ;;  %v11943_v47 = vcombine.low %v663_v22, %v679_v23 }
 0x1c8   : > { %v872_v14 = vrot.slane %v712_v1, %v15735_v52 }
 0x1c9   : > { %2804 = vmatpush1.bf16.msra.mxu0 %v11907_v6  ;;  %2847 = vmatpush1.bf16.msra.mxu1 %v11909_v7  ;;  %v11882_v6 = vcombine.high %v600_v62, %v616_v63  ;;  %v631_v7 = vld [vmem:[#allocation7 + $0x670] sm:$0xff] }
 0x1ca   : > { %2805 = vmatprep.subr.bf16.mxu0 %v11940_v9  ;;  %2848 = vmatprep.subr.bf16.mxu1 %v11942_v11  ;;  %v647_v9 = vld [vmem:[#allocation7 + $0x6f0] sm:$0xff]  ;;  %v864_v11 = vrot.slane %v704_v61, %v15735_v52 }
 0x1cd   : > { %2806 = vmatpush1.bf16.msra.mxu0 %v11939_v16  ;;  %2849 = vmatpush1.bf16.msra.mxu1 %v11941_v17  ;;  %v11879_v16 = vcombine.low %v599_v59, %v615_v60  ;;  %v876_v17 = vrot.slane %v716_v4, %v15735_v52  ;;  %v686_v4 = vunpack.c.h.bf16 %v15732_v43 }
 0x1ce   : > { %2877 = vmatprep.subr.bf16.mxu0 %v11720_v18  ;;  %2920 = vmatprep.subr.bf16.mxu1 %v11722_v19  ;;  %v11881_v18 = vcombine.low %v600_v62, %v616_v63  ;;  %v11912_v19 = vcombine.high %v631_v7, %v647_v9 }
 0x1d0   : > { %2824 = vmatmul.mubr.bf16.vlgmr.msra.gmra.mrb[24].mxu0 %v15722_v28  ;;  %2867 = vmatmul.mubr.bf16.vlgmr.msra.gmra.mrb[24].mxu1 %v15722_v28 }
 0x1d1   : > { %2878 = vmatpush1.bf16.msra.mxu0 %v11719_v24  ;;  %2921 = vmatpush1.bf16.msra.mxu1 %v11721_v25 }
 0x1d2   : > { %2879 = vmatprep.subr.bf16.mxu0 %v11752_v26  ;;  %2922 = vmatprep.subr.bf16.mxu1 %v11754_v27  ;;  %v664_v27 = vld [vmem:[#allocation7 + $0x778] sm:$0xff] }
 0x1d3   : > { %2909 = vmatprep.mubr.bf16.mxu0 %v15375_v8  ;;  %2952 = vmatprep.mubr.bf16.mxu1 %v15375_v8  ;;  %v11815_v8 = vcombine.low %v535_v10, %v551_v38 }
 0x1d5   : > { %2880 = vmatpush1.bf16.msra.mxu0 %v11751_v34  ;;  %2923 = vmatpush1.bf16.msra.mxu1 %v11753_v35  ;;  %v11911_v34 = vcombine.low %v631_v7, %v647_v9  ;;  %v11913_v35 = vcombine.low %v632_v12, %v648_v13 }
 0x1d6   : > { %2881 = vmatprep.subr.bf16.mxu0 %v11784_v36  ;;  %2924 = vmatprep.subr.bf16.mxu1 %v11786_v37 }
 0x1d9   : > { %2882 = vmatpush1.bf16.msra.mxu0 %v11783_v42  ;;  %2925 = vmatpush1.bf16.msra.mxu1 %v11785_v44  ;;  %v11946_v44 = vcombine.high %v664_v27, %v680_v29 }
 0x1da   : > { %2883 = vmatprep.subr.bf16.mxu0 %v11816_v45  ;;  %2926 = vmatprep.subr.bf16.mxu1 %v11818_v46 }
 0x1dd   : > { %2884 = vmatpush1.bf16.msra.mxu0 %v11815_v8  ;;  %2927 = vmatpush1.bf16.msra.mxu1 %v11817_v55  ;;  %v11945_v8 = vcombine.low %v664_v27, %v680_v29 }
 0x1de   : > { %2885 = vmatprep.subr.bf16.mxu0 %v11848_v56  ;;  %2928 = vmatprep.subr.bf16.mxu1 %v11850_v58 }
 0x1e1   : > { %2886 = vmatpush1.bf16.msra.mxu0 %v11847_v0  ;;  %2929 = vmatpush1.bf16.msra.mxu1 %v11849_v3 }
 0x1e2   : > { %2887 = vmatprep.subr.bf16.mxu0 %v11880_v5  ;;  %2930 = vmatprep.subr.bf16.mxu1 %v11882_v6 }
 0x1e3   : > { %v2309_v20 = vpop.f32.mrb[0].mxu0  ;;  %v2352_v25 = vpop.f32.mrb[0].mxu1 }
 0x1e4   : > { %v2310_v24 = vadd.f32 %v2309_v20, %v864_v11  ;;  %v2311_v26 = vpop.f32.mrb[1].mxu0  ;;  %v2353_v30 = vadd.f32 %v2352_v25, %v872_v14  ;;  %v2354_v32 = vpop.f32.mrb[1].mxu1 }
 0x1e5   : > { %v2312_v31 = vadd.f32 %v2311_v26, %v868_v15  ;;  %v2313_v33 = vpop.f32.mrb[2].mxu0  ;;  %2888 = vmatpush1.bf16.msra.mxu0 %v11879_v16  ;;  %v2355_v37 = vadd.f32 %v2354_v32, %v876_v17  ;;  %v2356_v38 = vpop.f32.mrb[2].mxu1  ;;  %2931 = vmatpush1.bf16.msra.mxu1 %v11881_v18 }
 0x1e6   : > { %v3027_v36 = vmul.f32 0.70710677, %v2310_v24  ;;  %v2314_v10 = vadd.f32 %v2313_v33, %v864_v11  ;;  %v2315_v39 = vpop.f32.mrb[3].mxu0  ;;  %2889 = vmatprep.subr.bf16.mxu0 %v11912_v19  ;;  %v3029_v41 = vmul.f32 0.70710677, %v2353_v30  ;;  %2932 = vmatprep.subr.bf16.mxu1 %v11914_v21  ;;  %v2358_v46 = vpop.f32.mrb[3].mxu1  ;;  %v2357_v49 = vadd.f32 %v2356_v38, %v872_v14 }
 0x1e7   : > { %v3028_v42 = vmul.f32 0.70710677, %v2312_v31  ;;  %v3030_v45 = vmul.f32 0.70710677, %v2355_v37  ;;  %v2316_v50 = vadd.f32 %v2315_v39, %v868_v15  ;;  %v2359_v51 = vadd.f32 %v2358_v46, %v876_v17 }
 0x1e8   : > { %13291 = verf.f32 %v3027_v36  ;;  %v3059_v48 = vmul.f32 0.70710677, %v2314_v10  ;;  %v3061_v55 = vmul.f32 0.70710677, %v2357_v49  ;;  %v2963_v1 = vmul.f32 0.5, %v2310_v24 }
 0x1e9   : > { %13293 = verf.f32 %v3029_v41  ;;  %2890 = vmatpush1.bf16.msra.mxu0 %v11911_v34  ;;  %2933 = vmatpush1.bf16.msra.mxu1 %v11913_v35  ;;  %v3060_v56 = vmul.f32 0.70710677, %v2316_v50  ;;  %v3062_v58 = vmul.f32 0.70710677, %v2359_v51  ;;  %v2965_v2 = vmul.f32 0.5, %v2353_v30 }
 0x1ea   : > { %13295 = verf.f32 %v3028_v42  ;;  %2891 = vmatprep.subr.bf16.mxu0 %v11944_v40  ;;  %2934 = vmatprep.subr.bf16.mxu1 %v11946_v44  ;;  %v2964_v6 = vmul.f32 0.5, %v2312_v31  ;;  %v2995_v9 = vmul.f32 0.5, %v2314_v10  ;;  %v2966_v13 = vmul.f32 0.5, %v2355_v37 }
 0x1eb   : > { %13297 = verf.f32 %v3030_v45  ;;  %v2996_v19 = vmul.f32 0.5, %v2316_v50  ;;  %v2998_v23 = vmul.f32 0.5, %v2359_v51  ;;  %v720_v31 = vrot.slane %v686_v4, %v15735_v52 }
 0x1ec   : > { %13299 = verf.f32 %v3059_v48  ;;  %v728_v33 = vrot.slane %v686_v4, %v15737_v53  ;;  %v724_v34 = vrot.slane %v686_v4, %v15739_v54  ;;  %v732_v36 = vrot.slane %v686_v4, %v15741_v57 }
 0x1ed   : > { %13301 = verf.f32 %v3061_v55  ;;  %2892 = vmatpush1.bf16.msra.mxu0 %v11943_v47  ;;  %2935 = vmatpush1.bf16.msra.mxu1 %v11945_v8  ;;  %v880_v37 = vrot.slane %v720_v31, %v15735_v52 }
 0x1ee   : > { %13303 = verf.f32 %v3060_v56  ;;  %v888_v10 = vrot.slane %v728_v33, %v15735_v52  ;;  %v884_v38 = vrot.slane %v724_v34, %v15735_v52  ;;  %v892_v39 = vrot.slane %v732_v36, %v15735_v52 }
 0x1ef   : > { %13305 = verf.f32 %v3062_v58 }
 0x1f0   : > { %2910 = vmatmul.mubr.bf16.vlgmr.msra.gmra.mrb[28].mxu0 %v15722_v28  ;;  %2953 = vmatmul.mubr.bf16.vlgmr.msra.gmra.mrb[28].mxu1 %v15722_v28  ;;  %v2997_v28 = vmul.f32 0.5, %v2357_v49 }
 0x1f2   : > { %v13292_v59 = vpop.eup %13291 }
 0x1f3   : > { %v13294_v60 = vpop.eup %13293  ;;  %v3155_v63 = vadd.f32 1.0, %v13292_v59 }
 0x1f4   : > { %v13296_v61 = vpop.eup %13295  ;;  %v3157_v3 = vadd.f32 1.0, %v13294_v60 }
 0x1f5   : > { %v13298_v62 = vpop.eup %13297  ;;  %v3156_v7 = vadd.f32 1.0, %v13296_v61  ;;  %v3219_v17 = vmul.f32 %v3155_v63, %v2963_v1 }
 0x1f6   : > { %v13300_v0 = vpop.eup %13299  ;;  %v3158_v14 = vadd.f32 1.0, %v13298_v62  ;;  %v3221_v21 = vmul.f32 %v3157_v3, %v2965_v2 }
 0x1f7   : > { %v13302_v5 = vpop.eup %13301  ;;  %v3187_v11 = vadd.f32 1.0, %v13300_v0  ;;  %v3220_v43 = vmul.f32 %v3156_v7, %v2964_v6  ;;  %v15762_v6 = vld [vmem:[#allocation9 + $0x8] sm:$0xff] }
 0x1f8   : > { %v13304_v12 = vpop.eup %13303  ;;  %v3189_v15 = vadd.f32 1.0, %v13302_v5  ;;  %v3222_v27 = vmul.f32 %v3158_v14, %v2966_v13 }
 0x1f9   : > { %v13306_v16 = vpop.eup %13305  ;;  %v3251_v18 = vmul.f32 %v3187_v11, %v2995_v9  ;;  %v3188_v20 = vadd.f32 1.0, %v13304_v12 }
 0x1fa   : > { %v3253_v22 = vmul.f32 %v3189_v15, %v2997_v28  ;;  %v3190_v24 = vadd.f32 1.0, %v13306_v16  ;;  %v687_v15 = vunpack.c.l.bf16 %v15762_v6 }
 0x1fb   : > { %v3283_v25 = vpack.c.bf16 %v3251_v18, %v3219_v17  ;;  %v3252_v26 = vmul.f32 %v3188_v20, %v2996_v19 }
 0x1fc   : > { %v3285_v29 = vpack.c.bf16 %v3253_v22, %v3221_v21  ;;  %v3254_v30 = vmul.f32 %v3190_v24, %v2998_v23 }
 0x1fd   : > { %3315 = vst [vmem:[#allocation2] sm:$0xff] %v3283_v25  ;;  %v3284_v32 = vpack.c.bf16 %v3252_v26, %v3220_v43 }
 0x1fe   : > { %3317 = vst [vmem:[#allocation2 + $0x10] sm:$0xff] %v3285_v29  ;;  %v3286_v35 = vpack.c.bf16 %v3254_v30, %v3222_v27 }
 0x1ff   : > { %3316 = vst [vmem:[#allocation2 + $0x8] sm:$0xff] %v3284_v32 }
 0x200   : > { %3318 = vst [vmem:[#allocation2 + $0x18] sm:$0xff] %v3286_v35 }
 0x203   : > { %v2395_v40 = vpop.f32.mrb[4].mxu0  ;;  %v2438_v42 = vpop.f32.mrb[4].mxu1 }
 0x204   : > { %v2396_v41 = vadd.f32 %v2395_v40, %v880_v37  ;;  %v2397_v44 = vpop.f32.mrb[5].mxu0  ;;  %v2439_v45 = vadd.f32 %v2438_v42, %v888_v10  ;;  %v2440_v47 = vpop.f32.mrb[5].mxu1  ;;  %v736_v40 = vrot.slane %v687_v15, %v15735_v52  ;;  %v744_v42 = vrot.slane %v687_v15, %v15737_v53 }
 0x205   : > { %v2398_v46 = vadd.f32 %v2397_v44, %v884_v38  ;;  %v2399_v48 = vpop.f32.mrb[6].mxu0  ;;  %v2441_v50 = vadd.f32 %v2440_v47, %v892_v39  ;;  %v2442_v8 = vpop.f32.mrb[6].mxu1  ;;  %v740_v44 = vrot.slane %v687_v15, %v15739_v54 }
 0x206   : > { %v3031_v49 = vmul.f32 0.70710677, %v2396_v41  ;;  %v2400_v51 = vadd.f32 %v2399_v48, %v880_v37  ;;  %v2401_v55 = vpop.f32.mrb[7].mxu0  ;;  %v3033_v56 = vmul.f32 0.70710677, %v2439_v45  ;;  %v2444_v60 = vpop.f32.mrb[7].mxu1  ;;  %v2443_v62 = vadd.f32 %v2442_v8, %v888_v10 }
 0x207   : > { %v3032_v58 = vmul.f32 0.70710677, %v2398_v46  ;;  %v3034_v59 = vmul.f32 0.70710677, %v2441_v50  ;;  %v2402_v63 = vadd.f32 %v2401_v55, %v884_v38  ;;  %v2445_v0 = vadd.f32 %v2444_v60, %v892_v39 }
 0x208   : > { %13307 = verf.f32 %v3031_v49  ;;  %v3063_v61 = vmul.f32 0.70710677, %v2400_v51  ;;  %v3065_v1 = vmul.f32 0.70710677, %v2443_v62  ;;  %v2967_v13 = vmul.f32 0.5, %v2396_v41 }
 0x209   : > { %13309 = verf.f32 %v3033_v56  ;;  %v3064_v2 = vmul.f32 0.70710677, %v2402_v63  ;;  %v3066_v3 = vmul.f32 0.70710677, %v2445_v0  ;;  %v2969_v14 = vmul.f32 0.5, %v2439_v45 }
 0x20a   : > { %13311 = verf.f32 %v3032_v58  ;;  %v2968_v17 = vmul.f32 0.5, %v2398_v46  ;;  %v2999_v19 = vmul.f32 0.5, %v2400_v51  ;;  %v2970_v22 = vmul.f32 0.5, %v2441_v50 }
 0x20b   : > { %13313 = verf.f32 %v3034_v59  ;;  %v3001_v24 = vmul.f32 0.5, %v2443_v62  ;;  %v3000_v29 = vmul.f32 0.5, %v2402_v63  ;;  %v3002_v33 = vmul.f32 0.5, %v2445_v0 }
 0x20c   : > { %13315 = verf.f32 %v3063_v61  ;;  %v748_v46 = vrot.slane %v687_v15, %v15741_v57  ;;  %v896_v47 = vrot.slane %v736_v40, %v15735_v52  ;;  %v904_v48 = vrot.slane %v744_v42, %v15735_v52 }
 0x20d   : > { %13317 = verf.f32 %v3065_v1  ;;  %v900_v49 = vrot.slane %v740_v44, %v15735_v52 }
 0x20e   : > { %13319 = verf.f32 %v3064_v2  ;;  %v908_v50 = vrot.slane %v748_v46, %v15735_v52 }
 0x20f   : > { %13321 = verf.f32 %v3066_v3 }
 0x212   : > { %v13308_v4 = vpop.eup %13307 }
 0x213   : > { %v13310_v5 = vpop.eup %13309  ;;  %v3159_v11 = vadd.f32 1.0, %v13308_v4 }
 0x214   : > { %v13312_v7 = vpop.eup %13311  ;;  %v3161_v28 = vadd.f32 1.0, %v13310_v5 }
 0x215   : > { %v13314_v9 = vpop.eup %13313  ;;  %v3160_v18 = vadd.f32 1.0, %v13312_v7  ;;  %v3223_v26 = vmul.f32 %v3159_v11, %v2967_v13 }
 0x216   : > { %v13316_v12 = vpop.eup %13315  ;;  %v3162_v23 = vadd.f32 1.0, %v13314_v9  ;;  %v3225_v31 = vmul.f32 %v3161_v28, %v2969_v14 }
 0x217   : > { %v13318_v16 = vpop.eup %13317  ;;  %v3191_v20 = vadd.f32 1.0, %v13316_v12  ;;  %v3224_v35 = vmul.f32 %v3160_v18, %v2968_v17 }
 0x218   : > { %v13320_v21 = vpop.eup %13319  ;;  %v3193_v43 = vadd.f32 1.0, %v13318_v16  ;;  %v3226_v10 = vmul.f32 %v3162_v23, %v2970_v22 }
 0x219   : > { %v13322_v25 = vpop.eup %13321  ;;  %v3255_v27 = vmul.f32 %v3191_v20, %v2999_v19  ;;  %v3192_v30 = vadd.f32 1.0, %v13320_v21 }
 0x21a   : > { %v3257_v32 = vmul.f32 %v3193_v43, %v3001_v24  ;;  %v3194_v34 = vadd.f32 1.0, %v13322_v25  ;;  %v688_v43 = vunpack.c.h.bf16 %v15762_v6 }
 0x21b   : > { %v3287_v36 = vpack.c.bf16 %v3255_v27, %v3223_v26  ;;  %v3256_v37 = vmul.f32 %v3192_v30, %v3000_v29 }
 0x21c   : > { %v3289_v38 = vpack.c.bf16 %v3257_v32, %v3225_v31  ;;  %v3258_v39 = vmul.f32 %v3194_v34, %v3002_v33 }
 0x21d   : > { %3319 = vst [vmem:[#allocation2 + $0x20] sm:$0xff] %v3287_v36  ;;  %v3288_v41 = vpack.c.bf16 %v3256_v37, %v3224_v35 }
 0x21e   : > { %3321 = vst [vmem:[#allocation2 + $0x30] sm:$0xff] %v3289_v38  ;;  %v3290_v45 = vpack.c.bf16 %v3258_v39, %v3226_v10 }
 0x21f   : > { %3320 = vst [vmem:[#allocation2 + $0x28] sm:$0xff] %v3288_v41 }
 0x220   : > { %3322 = vst [vmem:[#allocation2 + $0x38] sm:$0xff] %v3290_v45 }
 0x223   : > { %v2481_v51 = vpop.f32.mrb[8].mxu0  ;;  %v2524_v55 = vpop.f32.mrb[8].mxu1 }
 0x224   : > { %v2482_v8 = vadd.f32 %v2481_v51, %v896_v47  ;;  %v2483_v56 = vpop.f32.mrb[9].mxu0  ;;  %v2525_v58 = vadd.f32 %v2524_v55, %v904_v48  ;;  %v2526_v60 = vpop.f32.mrb[9].mxu1  ;;  %v756_v55 = vrot.slane %v688_v43, %v15739_v54 }
 0x225   : > { %v2484_v59 = vadd.f32 %v2483_v56, %v900_v49  ;;  %v2485_v61 = vpop.f32.mrb[10].mxu0  ;;  %v2527_v63 = vadd.f32 %v2526_v60, %v908_v50  ;;  %v2528_v1 = vpop.f32.mrb[10].mxu1 }
 0x226   : > { %v3035_v62 = vmul.f32 0.70710677, %v2482_v8  ;;  %v2486_v0 = vadd.f32 %v2485_v61, %v896_v47  ;;  %v2487_v2 = vpop.f32.mrb[11].mxu0  ;;  %v3037_v3 = vmul.f32 0.70710677, %v2525_v58  ;;  %v2530_v7 = vpop.f32.mrb[11].mxu1  ;;  %v2529_v11 = vadd.f32 %v2528_v1, %v904_v48 }
 0x227   : > { %v3036_v4 = vmul.f32 0.70710677, %v2484_v59  ;;  %v3038_v5 = vmul.f32 0.70710677, %v2527_v63  ;;  %v2488_v12 = vadd.f32 %v2487_v2, %v900_v49  ;;  %v2531_v13 = vadd.f32 %v2530_v7, %v908_v50 }
 0x228   : > { %13323 = verf.f32 %v3035_v62  ;;  %v3067_v9 = vmul.f32 0.70710677, %v2486_v0  ;;  %v3069_v14 = vmul.f32 0.70710677, %v2529_v11  ;;  %v2971_v22 = vmul.f32 0.5, %v2482_v8 }
 0x229   : > { %13325 = verf.f32 %v3037_v3  ;;  %v3068_v28 = vmul.f32 0.70710677, %v2488_v12  ;;  %v3070_v15 = vmul.f32 0.70710677, %v2531_v13  ;;  %v2973_v23 = vmul.f32 0.5, %v2525_v58 }
 0x22a   : > { %13327 = verf.f32 %v3036_v4  ;;  %v2972_v26 = vmul.f32 0.5, %v2484_v59  ;;  %v3003_v29 = vmul.f32 0.5, %v2486_v0  ;;  %v2974_v32 = vmul.f32 0.5, %v2527_v63 }
 0x22b   : > { %13329 = verf.f32 %v3038_v5  ;;  %v3005_v34 = vmul.f32 0.5, %v2529_v11  ;;  %v3004_v38 = vmul.f32 0.5, %v2488_v12  ;;  %v3006_v42 = vmul.f32 0.5, %v2531_v13 }
 0x22c   : > { %13331 = verf.f32 %v3067_v9  ;;  %v752_v50 = vrot.slane %v688_v43, %v15735_v52  ;;  %v760_v8 = vrot.slane %v688_v43, %v15737_v53  ;;  %v764_v58 = vrot.slane %v688_v43, %v15741_v57 }
 0x22d   : > { %13333 = verf.f32 %v3069_v14  ;;  %v916_v61 = vrot.slane %v756_v55, %v15735_v52 }
 0x22e   : > { %13335 = verf.f32 %v3068_v28  ;;  %v912_v59 = vrot.slane %v752_v50, %v15735_v52  ;;  %v920_v60 = vrot.slane %v760_v8, %v15735_v52  ;;  %v924_v62 = vrot.slane %v764_v58, %v15735_v52 }
 0x22f   : > { %13337 = verf.f32 %v3070_v15 }
 0x232   : > { %v13324_v16 = vpop.eup %13323 }
 0x233   : > { %v13326_v17 = vpop.eup %13325  ;;  %v3163_v20 = vadd.f32 1.0, %v13324_v16 }
 0x234   : > { %v13328_v18 = vpop.eup %13327  ;;  %v3165_v24 = vadd.f32 1.0, %v13326_v17 }
 0x235   : > { %v13330_v19 = vpop.eup %13329  ;;  %v3164_v27 = vadd.f32 1.0, %v13328_v18  ;;  %v3227_v37 = vmul.f32 %v3163_v20, %v2971_v22 }
 0x236   : > { %v13332_v21 = vpop.eup %13331  ;;  %v3166_v33 = vadd.f32 1.0, %v13330_v19  ;;  %v3229_v40 = vmul.f32 %v3165_v24, %v2973_v23 }
 0x237   : > { %v13334_v25 = vpop.eup %13333  ;;  %v3195_v30 = vadd.f32 1.0, %v13332_v21  ;;  %v3228_v6 = vmul.f32 %v3164_v27, %v2972_v26  ;;  %v15782_v26 = vld [vmem:[#allocation9 + $0x10] sm:$0xff] }
 0x238   : > { %v13336_v31 = vpop.eup %13335  ;;  %v3197_v35 = vadd.f32 1.0, %v13334_v25  ;;  %v3230_v47 = vmul.f32 %v3166_v33, %v2974_v32 }
 0x239   : > { %v13338_v36 = vpop.eup %13337  ;;  %v3259_v10 = vmul.f32 %v3195_v30, %v3003_v29  ;;  %v3196_v39 = vadd.f32 1.0, %v13336_v31 }
 0x23a   : > { %v3261_v41 = vmul.f32 %v3197_v35, %v3005_v34  ;;  %v3198_v44 = vadd.f32 1.0, %v13338_v36  ;;  %v689_v35 = vunpack.c.l.bf16 %v15782_v26 }
 0x23b   : > { %v3291_v45 = vpack.c.bf16 %v3259_v10, %v3227_v37  ;;  %v3260_v46 = vmul.f32 %v3196_v39, %v3004_v38 }
 0x23c   : > { %v3293_v48 = vpack.c.bf16 %v3261_v41, %v3229_v40  ;;  %v3262_v49 = vmul.f32 %v3198_v44, %v3006_v42 }
 0x23d   : > { %3323 = vst [vmem:[#allocation2 + $0x40] sm:$0xff] %v3291_v45  ;;  %v3292_v51 = vpack.c.bf16 %v3260_v46, %v3228_v6 }
 0x23e   : > { %3325 = vst [vmem:[#allocation2 + $0x50] sm:$0xff] %v3293_v48  ;;  %v3294_v56 = vpack.c.bf16 %v3262_v49, %v3230_v47 }
 0x23f   : > { %3324 = vst [vmem:[#allocation2 + $0x48] sm:$0xff] %v3292_v51 }
 0x240   : > { %3326 = vst [vmem:[#allocation2 + $0x58] sm:$0xff] %v3294_v56 }
 0x243   : > { %v2567_v63 = vpop.f32.mrb[12].mxu0  ;;  %v2610_v1 = vpop.f32.mrb[12].mxu1 }
 0x244   : > { %v2568_v0 = vadd.f32 %v2567_v63, %v912_v59  ;;  %v2569_v2 = vpop.f32.mrb[13].mxu0  ;;  %v2611_v3 = vadd.f32 %v2610_v1, %v920_v60  ;;  %v2612_v5 = vpop.f32.mrb[13].mxu1  ;;  %v768_v63 = vrot.slane %v689_v35, %v15735_v52  ;;  %v776_v1 = vrot.slane %v689_v35, %v15737_v53 }
 0x245   : > { %v2570_v4 = vadd.f32 %v2569_v2, %v916_v61  ;;  %v2571_v7 = vpop.f32.mrb[14].mxu0  ;;  %v2613_v11 = vadd.f32 %v2612_v5, %v924_v62  ;;  %v2614_v13 = vpop.f32.mrb[14].mxu1  ;;  %v772_v2 = vrot.slane %v689_v35, %v15739_v54 }
 0x246   : > { %v3039_v9 = vmul.f32 0.70710677, %v2568_v0  ;;  %v2572_v12 = vadd.f32 %v2571_v7, %v912_v59  ;;  %v2573_v14 = vpop.f32.mrb[15].mxu0  ;;  %v3041_v28 = vmul.f32 0.70710677, %v2611_v3  ;;  %v2616_v17 = vpop.f32.mrb[15].mxu1  ;;  %v2615_v19 = vadd.f32 %v2614_v13, %v920_v60 }
 0x247   : > { %v3040_v15 = vmul.f32 0.70710677, %v2570_v4  ;;  %v3042_v16 = vmul.f32 0.70710677, %v2613_v11  ;;  %v2574_v20 = vadd.f32 %v2573_v14, %v916_v61  ;;  %v2617_v21 = vadd.f32 %v2616_v17, %v924_v62 }
 0x248   : > { %13339 = verf.f32 %v3039_v9  ;;  %v3071_v18 = vmul.f32 0.70710677, %v2572_v12  ;;  %v3073_v22 = vmul.f32 0.70710677, %v2615_v19  ;;  %v2975_v32 = vmul.f32 0.5, %v2568_v0 }
 0x249   : > { %13341 = verf.f32 %v3041_v28  ;;  %v3072_v23 = vmul.f32 0.70710677, %v2574_v20  ;;  %v3074_v24 = vmul.f32 0.70710677, %v2617_v21  ;;  %v2977_v33 = vmul.f32 0.5, %v2611_v3 }
 0x24a   : > { %13343 = verf.f32 %v3040_v15  ;;  %v2976_v37 = vmul.f32 0.5, %v2570_v4  ;;  %v3007_v38 = vmul.f32 0.5, %v2572_v12  ;;  %v2978_v41 = vmul.f32 0.5, %v2613_v11 }
 0x24b   : > { %13345 = verf.f32 %v3042_v16  ;;  %v3009_v44 = vmul.f32 0.5, %v2615_v19  ;;  %v3008_v48 = vmul.f32 0.5, %v2574_v20  ;;  %v3010_v8 = vmul.f32 0.5, %v2617_v21 }
 0x24c   : > { %13347 = verf.f32 %v3071_v18  ;;  %v780_v4 = vrot.slane %v689_v35, %v15741_v57  ;;  %v928_v5 = vrot.slane %v768_v63, %v15735_v52  ;;  %v936_v7 = vrot.slane %v776_v1, %v15735_v52 }
 0x24d   : > { %13349 = verf.f32 %v3073_v22  ;;  %v932_v9 = vrot.slane %v772_v2, %v15735_v52 }
 0x24e   : > { %13351 = verf.f32 %v3072_v23  ;;  %v940_v11 = vrot.slane %v780_v4, %v15735_v52 }
 0x24f   : > { %13353 = verf.f32 %v3074_v24 }
 0x252   : > { %v13340_v43 = vpop.eup %13339 }
 0x253   : > { %v13342_v25 = vpop.eup %13341  ;;  %v3167_v30 = vadd.f32 1.0, %v13340_v43 }
 0x254   : > { %v13344_v27 = vpop.eup %13343  ;;  %v3169_v34 = vadd.f32 1.0, %v13342_v25 }
 0x255   : > { %v13346_v29 = vpop.eup %13345  ;;  %v3168_v10 = vadd.f32 1.0, %v13344_v27  ;;  %v3231_v46 = vmul.f32 %v3167_v30, %v2975_v32 }
 0x256   : > { %v13348_v31 = vpop.eup %13347  ;;  %v3170_v42 = vadd.f32 1.0, %v13346_v29  ;;  %v3233_v50 = vmul.f32 %v3169_v34, %v2977_v33 }
 0x257   : > { %v13350_v36 = vpop.eup %13349  ;;  %v3199_v39 = vadd.f32 1.0, %v13348_v31  ;;  %v3232_v56 = vmul.f32 %v3168_v10, %v2976_v37 }
 0x258   : > { %v13352_v40 = vpop.eup %13351  ;;  %v3201_v6 = vadd.f32 1.0, %v13350_v36  ;;  %v3234_v60 = vmul.f32 %v3170_v42, %v2978_v41 }
 0x259   : > { %v13354_v45 = vpop.eup %13353  ;;  %v3263_v47 = vmul.f32 %v3199_v39, %v3007_v38  ;;  %v3200_v49 = vadd.f32 1.0, %v13352_v40 }
 0x25a   : > { %v3265_v51 = vmul.f32 %v3201_v6, %v3009_v44  ;;  %v3202_v55 = vadd.f32 1.0, %v13354_v45  ;;  %v690_v6 = vunpack.c.h.bf16 %v15782_v26 }
 0x25b   : > { %v3295_v58 = vpack.c.bf16 %v3263_v47, %v3231_v46  ;;  %v3264_v59 = vmul.f32 %v3200_v49, %v3008_v48 }
 0x25c   : > { %v3297_v61 = vpack.c.bf16 %v3265_v51, %v3233_v50  ;;  %v3266_v62 = vmul.f32 %v3202_v55, %v3010_v8 }
 0x25d   : > { %3327 = vst [vmem:[#allocation2 + $0x60] sm:$0xff] %v3295_v58  ;;  %v3296_v0 = vpack.c.bf16 %v3264_v59, %v3232_v56 }
 0x25e   : > { %3329 = vst [vmem:[#allocation2 + $0x70] sm:$0xff] %v3297_v61  ;;  %v3298_v3 = vpack.c.bf16 %v3266_v62, %v3234_v60 }
 0x25f   : > { %3328 = vst [vmem:[#allocation2 + $0x68] sm:$0xff] %v3296_v0 }
 0x260   : > { %3330 = vst [vmem:[#allocation2 + $0x78] sm:$0xff] %v3298_v3 }
 0x263   : > { %v2653_v12 = vpop.f32.mrb[16].mxu0  ;;  %v2696_v14 = vpop.f32.mrb[16].mxu1 }
 0x264   : > { %v2654_v13 = vadd.f32 %v2653_v12, %v928_v5  ;;  %v2655_v28 = vpop.f32.mrb[17].mxu0  ;;  %v2697_v15 = vadd.f32 %v2696_v14, %v936_v7  ;;  %v2698_v17 = vpop.f32.mrb[17].mxu1  ;;  %v788_v14 = vrot.slane %v690_v6, %v15739_v54 }
 0x265   : > { %v2656_v16 = vadd.f32 %v2655_v28, %v932_v9  ;;  %v2657_v18 = vpop.f32.mrb[18].mxu0  ;;  %v2699_v20 = vadd.f32 %v2698_v17, %v940_v11  ;;  %v2700_v22 = vpop.f32.mrb[18].mxu1 }
 0x266   : > { %v3043_v19 = vmul.f32 0.70710677, %v2654_v13  ;;  %v2658_v21 = vadd.f32 %v2657_v18, %v928_v5  ;;  %v2659_v23 = vpop.f32.mrb[19].mxu0  ;;  %v3045_v24 = vmul.f32 0.70710677, %v2697_v15  ;;  %v2702_v27 = vpop.f32.mrb[19].mxu1  ;;  %v2701_v30 = vadd.f32 %v2700_v22, %v936_v7 }
 0x267   : > { %v3044_v43 = vmul.f32 0.70710677, %v2656_v16  ;;  %v3046_v25 = vmul.f32 0.70710677, %v2699_v20  ;;  %v2660_v31 = vadd.f32 %v2659_v23, %v932_v9  ;;  %v2703_v32 = vadd.f32 %v2702_v27, %v940_v11 }
 0x268   : > { %13355 = verf.f32 %v3043_v19  ;;  %v3075_v29 = vmul.f32 0.70710677, %v2658_v21  ;;  %v3077_v33 = vmul.f32 0.70710677, %v2701_v30  ;;  %v2979_v41 = vmul.f32 0.5, %v2654_v13 }
 0x269   : > { %13357 = verf.f32 %v3045_v24  ;;  %v3076_v34 = vmul.f32 0.70710677, %v2660_v31  ;;  %v3078_v35 = vmul.f32 0.70710677, %v2703_v32  ;;  %v2981_v42 = vmul.f32 0.5, %v2697_v15 }
 0x26a   : > { %13359 = verf.f32 %v3044_v43  ;;  %v2980_v46 = vmul.f32 0.5, %v2656_v16  ;;  %v3011_v48 = vmul.f32 0.5, %v2658_v21  ;;  %v2982_v51 = vmul.f32 0.5, %v2699_v20 }
 0x26b   : > { %13361 = verf.f32 %v3046_v25  ;;  %v3013_v55 = vmul.f32 0.5, %v2701_v30  ;;  %v3012_v61 = vmul.f32 0.5, %v2660_v31  ;;  %v3014_v1 = vmul.f32 0.5, %v2703_v32 }
 0x26c   : > { %13363 = verf.f32 %v3075_v29  ;;  %v784_v11 = vrot.slane %v690_v6, %v15735_v52  ;;  %v792_v13 = vrot.slane %v690_v6, %v15737_v53  ;;  %v796_v15 = vrot.slane %v690_v6, %v15741_v57 }
 0x26d   : > { %13365 = verf.f32 %v3077_v33  ;;  %v948_v18 = vrot.slane %v788_v14, %v15735_v52 }
 0x26e   : > { %13367 = verf.f32 %v3076_v34  ;;  %v944_v16 = vrot.slane %v784_v11, %v15735_v52  ;;  %v952_v17 = vrot.slane %v792_v13, %v15735_v52  ;;  %v956_v19 = vrot.slane %v796_v15, %v15735_v52 }
 0x26f   : > { %13369 = verf.f32 %v3078_v35 }
 0x272   : > { %v13356_v36 = vpop.eup %13355 }
 0x273   : > { %v13358_v37 = vpop.eup %13357  ;;  %v3171_v39 = vadd.f32 1.0, %v13356_v36 }
 0x274   : > { %v13360_v10 = vpop.eup %13359  ;;  %v3173_v44 = vadd.f32 1.0, %v13358_v37 }
 0x275   : > { %v13362_v38 = vpop.eup %13361  ;;  %v3172_v47 = vadd.f32 1.0, %v13360_v10  ;;  %v3235_v59 = vmul.f32 %v3171_v39, %v2979_v41 }
 0x276   : > { %v13364_v40 = vpop.eup %13363  ;;  %v3174_v8 = vadd.f32 1.0, %v13362_v38  ;;  %v3237_v63 = vmul.f32 %v3173_v44, %v2981_v42 }
 0x277   : > { %v13366_v45 = vpop.eup %13365  ;;  %v3203_v49 = vadd.f32 1.0, %v13364_v40  ;;  %v3236_v26 = vmul.f32 %v3172_v47, %v2980_v46  ;;  %v15802_v46 = vld [vmem:[#allocation9 + $0x18] sm:$0xff] }
 0x278   : > { %v13368_v50 = vpop.eup %13367  ;;  %v3205_v56 = vadd.f32 1.0, %v13366_v45  ;;  %v3238_v5 = vmul.f32 %v3174_v8, %v2982_v51 }
 0x279   : > { %v13370_v58 = vpop.eup %13369  ;;  %v3267_v60 = vmul.f32 %v3203_v49, %v3011_v48  ;;  %v3204_v62 = vadd.f32 1.0, %v13368_v50 }
 0x27a   : > { %v3269_v0 = vmul.f32 %v3205_v56, %v3013_v55  ;;  %v3206_v2 = vadd.f32 1.0, %v13370_v58  ;;  %v691_v56 = vunpack.c.l.bf16 %v15802_v46 }
 0x27b   : > { %v3299_v3 = vpack.c.bf16 %v3267_v60, %v3235_v59  ;;  %v3268_v4 = vmul.f32 %v3204_v62, %v3012_v61 }
 0x27c   : > { %v3301_v7 = vpack.c.bf16 %v3269_v0, %v3237_v63  ;;  %v3270_v9 = vmul.f32 %v3206_v2, %v3014_v1 }
 0x27d   : > { %3331 = vst [vmem:[#allocation2 + $0x80] sm:$0xff] %v3299_v3  ;;  %v3300_v12 = vpack.c.bf16 %v3268_v4, %v3236_v26 }
 0x27e   : > { %3333 = vst [vmem:[#allocation2 + $0x90] sm:$0xff] %v3301_v7  ;;  %v3302_v28 = vpack.c.bf16 %v3270_v9, %v3238_v5 }
 0x27f   : > { %3332 = vst [vmem:[#allocation2 + $0x88] sm:$0xff] %v3300_v12 }
 0x280   : > { %3334 = vst [vmem:[#allocation2 + $0x98] sm:$0xff] %v3302_v28 }
 0x283   : > { %v2739_v20 = vpop.f32.mrb[20].mxu0  ;;  %v2782_v22 = vpop.f32.mrb[20].mxu1 }
 0x284   : > { %v2740_v21 = vadd.f32 %v2739_v20, %v944_v16  ;;  %v2741_v23 = vpop.f32.mrb[21].mxu0  ;;  %v2783_v24 = vadd.f32 %v2782_v22, %v952_v17  ;;  %v2784_v25 = vpop.f32.mrb[21].mxu1  ;;  %v800_v20 = vrot.slane %v691_v56, %v15735_v52  ;;  %v808_v22 = vrot.slane %v691_v56, %v15737_v53 }
 0x285   : > { %v2742_v43 = vadd.f32 %v2741_v23, %v948_v18  ;;  %v2743_v27 = vpop.f32.mrb[22].mxu0  ;;  %v2785_v30 = vadd.f32 %v2784_v25, %v956_v19  ;;  %v2786_v32 = vpop.f32.mrb[22].mxu1  ;;  %v804_v23 = vrot.slane %v691_v56, %v15739_v54 }
 0x286   : > { %v3047_v29 = vmul.f32 0.70710677, %v2740_v21  ;;  %v2744_v31 = vadd.f32 %v2743_v27, %v944_v16  ;;  %v2745_v33 = vpop.f32.mrb[23].mxu0  ;;  %v3049_v34 = vmul.f32 0.70710677, %v2783_v24  ;;  %v2788_v37 = vpop.f32.mrb[23].mxu1  ;;  %v2787_v38 = vadd.f32 %v2786_v32, %v952_v17 }
 0x287   : > { %v3048_v35 = vmul.f32 0.70710677, %v2742_v43  ;;  %v3050_v36 = vmul.f32 0.70710677, %v2785_v30  ;;  %v2746_v39 = vadd.f32 %v2745_v33, %v948_v18  ;;  %v2789_v40 = vadd.f32 %v2788_v37, %v956_v19 }
 0x288   : > { %13371 = verf.f32 %v3047_v29  ;;  %v3079_v10 = vmul.f32 0.70710677, %v2744_v31  ;;  %v3081_v41 = vmul.f32 0.70710677, %v2787_v38  ;;  %v2983_v51 = vmul.f32 0.5, %v2740_v21 }
 0x289   : > { %13373 = verf.f32 %v3049_v34  ;;  %v3080_v42 = vmul.f32 0.70710677, %v2746_v39  ;;  %v3082_v44 = vmul.f32 0.70710677, %v2789_v40  ;;  %v2985_v8 = vmul.f32 0.5, %v2783_v24 }
 0x28a   : > { %13375 = verf.f32 %v3048_v35  ;;  %v2984_v59 = vmul.f32 0.5, %v2742_v43  ;;  %v3015_v61 = vmul.f32 0.5, %v2744_v31  ;;  %v2986_v0 = vmul.f32 0.5, %v2785_v30 }
 0x28b   : > { %13377 = verf.f32 %v3050_v36  ;;  %v3017_v2 = vmul.f32 0.5, %v2787_v38  ;;  %v3016_v7 = vmul.f32 0.5, %v2746_v39  ;;  %v3018_v13 = vmul.f32 0.5, %v2789_v40 }
 0x28c   : > { %13379 = verf.f32 %v3079_v10  ;;  %v812_v43 = vrot.slane %v691_v56, %v15741_v57  ;;  %v960_v25 = vrot.slane %v800_v20, %v15735_v52  ;;  %v968_v27 = vrot.slane %v808_v22, %v15735_v52 }
 0x28d   : > { %13381 = verf.f32 %v3081_v41  ;;  %v964_v29 = vrot.slane %v804_v23, %v15735_v52 }
 0x28e   : > { %13383 = verf.f32 %v3080_v42  ;;  %v972_v30 = vrot.slane %v812_v43, %v15735_v52 }
 0x28f   : > { %13385 = verf.f32 %v3082_v44 }
 0x292   : > { %v13372_v6 = vpop.eup %13371 }
 0x293   : > { %v13374_v45 = vpop.eup %13373  ;;  %v3175_v49 = vadd.f32 1.0, %v13372_v6 }
 0x294   : > { %v13376_v47 = vpop.eup %13375  ;;  %v3177_v55 = vadd.f32 1.0, %v13374_v45 }
 0x295   : > { %v13378_v48 = vpop.eup %13377  ;;  %v3176_v60 = vadd.f32 1.0, %v13376_v47  ;;  %v3239_v4 = vmul.f32 %v3175_v49, %v2983_v51 }
 0x296   : > { %v13380_v50 = vpop.eup %13379  ;;  %v3178_v1 = vadd.f32 1.0, %v13378_v48  ;;  %v3241_v11 = vmul.f32 %v3177_v55, %v2985_v8 }
 0x297   : > { %v13382_v58 = vpop.eup %13381  ;;  %v3207_v62 = vadd.f32 1.0, %v13380_v50  ;;  %v3240_v28 = vmul.f32 %v3176_v60, %v2984_v59 }
 0x298   : > { %v13384_v63 = vpop.eup %13383  ;;  %v3209_v26 = vadd.f32 1.0, %v13382_v58  ;;  %v3242_v17 = vmul.f32 %v3178_v1, %v2986_v0 }
 0x299   : > { %v13386_v3 = vpop.eup %13385  ;;  %v3271_v5 = vmul.f32 %v3207_v62, %v3015_v61  ;;  %v3208_v9 = vadd.f32 1.0, %v13384_v63 }
 0x29a   : > { %v3273_v12 = vmul.f32 %v3209_v26, %v3017_v2  ;;  %v3210_v14 = vadd.f32 1.0, %v13386_v3  ;;  %v692_v26 = vunpack.c.h.bf16 %v15802_v46 }
 0x29b   : > { %v3303_v15 = vpack.c.bf16 %v3271_v5, %v3239_v4  ;;  %v3272_v16 = vmul.f32 %v3208_v9, %v3016_v7 }
 0x29c   : > { %v3305_v18 = vpack.c.bf16 %v3273_v12, %v3241_v11  ;;  %v3274_v19 = vmul.f32 %v3210_v14, %v3018_v13 }
 0x29d   : > { %3335 = vst [vmem:[#allocation2 + $0xa0] sm:$0xff] %v3303_v15  ;;  %v3304_v21 = vpack.c.bf16 %v3272_v16, %v3240_v28 }
 0x29e   : > { %3337 = vst [vmem:[#allocation2 + $0xb0] sm:$0xff] %v3305_v18  ;;  %v3306_v24 = vpack.c.bf16 %v3274_v19, %v3242_v17 }
 0x29f   : > { %3336 = vst [vmem:[#allocation2 + $0xa8] sm:$0xff] %v3304_v21 }
 0x2a0   : > { %3338 = vst [vmem:[#allocation2 + $0xb8] sm:$0xff] %v3306_v24 }
 0x2a3   : > { %v2825_v31 = vpop.f32.mrb[24].mxu0  ;;  %v2868_v33 = vpop.f32.mrb[24].mxu1 }
 0x2a4   : > { %v2826_v32 = vadd.f32 %v2825_v31, %v960_v25  ;;  %v2827_v34 = vpop.f32.mrb[25].mxu0  ;;  %v2869_v35 = vadd.f32 %v2868_v33, %v968_v27  ;;  %v2870_v37 = vpop.f32.mrb[25].mxu1  ;;  %v820_v33 = vrot.slane %v692_v26, %v15739_v54 }
 0x2a5   : > { %v2828_v36 = vadd.f32 %v2827_v34, %v964_v29  ;;  %v2829_v10 = vpop.f32.mrb[26].mxu0  ;;  %v2871_v39 = vadd.f32 %v2870_v37, %v972_v30  ;;  %v2872_v41 = vpop.f32.mrb[26].mxu1 }
 0x2a6   : > { %v3051_v38 = vmul.f32 0.70710677, %v2826_v32  ;;  %v2830_v40 = vadd.f32 %v2829_v10, %v960_v25  ;;  %v2831_v42 = vpop.f32.mrb[27].mxu0  ;;  %v3053_v44 = vmul.f32 0.70710677, %v2869_v35  ;;  %v2874_v47 = vpop.f32.mrb[27].mxu1  ;;  %v2873_v49 = vadd.f32 %v2872_v41, %v968_v27 }
 0x2a7   : > { %v3052_v6 = vmul.f32 0.70710677, %v2828_v36  ;;  %v3054_v45 = vmul.f32 0.70710677, %v2871_v39  ;;  %v2832_v50 = vadd.f32 %v2831_v42, %v964_v29  ;;  %v2875_v51 = vadd.f32 %v2874_v47, %v972_v30 }
 0x2a8   : > { %13387 = verf.f32 %v3051_v38  ;;  %v3083_v48 = vmul.f32 0.70710677, %v2830_v40  ;;  %v3085_v8 = vmul.f32 0.70710677, %v2873_v49  ;;  %v2987_v0 = vmul.f32 0.5, %v2826_v32 }
 0x2a9   : > { %13389 = verf.f32 %v3053_v44  ;;  %v3084_v55 = vmul.f32 0.70710677, %v2832_v50  ;;  %v3086_v56 = vmul.f32 0.70710677, %v2875_v51  ;;  %v2989_v1 = vmul.f32 0.5, %v2869_v35 }
 0x2aa   : > { %13391 = verf.f32 %v3052_v6  ;;  %v2988_v4 = vmul.f32 0.5, %v2828_v36  ;;  %v3019_v7 = vmul.f32 0.5, %v2830_v40  ;;  %v2990_v12 = vmul.f32 0.5, %v2871_v39 }
 0x2ab   : > { %13393 = verf.f32 %v3054_v45  ;;  %v3021_v14 = vmul.f32 0.5, %v2873_v49  ;;  %v3020_v18 = vmul.f32 0.5, %v2832_v50  ;;  %v3022_v22 = vmul.f32 0.5, %v2875_v51 }
 0x2ac   : > { %13395 = verf.f32 %v3083_v48  ;;  %v816_v30 = vrot.slane %v692_v26, %v15735_v52  ;;  %v824_v32 = vrot.slane %v692_v26, %v15737_v53  ;;  %v828_v35 = vrot.slane %v692_v26, %v15741_v57 }
 0x2ad   : > { %13397 = verf.f32 %v3085_v8  ;;  %v980_v10 = vrot.slane %v820_v33, %v15735_v52 }
 0x2ae   : > { %13399 = verf.f32 %v3084_v55  ;;  %v976_v36 = vrot.slane %v816_v30, %v15735_v52  ;;  %v984_v37 = vrot.slane %v824_v32, %v15735_v52  ;;  %v988_v38 = vrot.slane %v828_v35, %v15735_v52 }
 0x2af   : > { %13401 = verf.f32 %v3086_v56 }
 0x2b2   : > { %v13388_v58 = vpop.eup %13387 }
 0x2b3   : > { %v13390_v59 = vpop.eup %13389  ;;  %v3179_v62 = vadd.f32 1.0, %v13388_v58 }
 0x2b4   : > { %v13392_v60 = vpop.eup %13391  ;;  %v3181_v2 = vadd.f32 1.0, %v13390_v59 }
 0x2b5   : > { %v13394_v61 = vpop.eup %13393  ;;  %v3180_v5 = vadd.f32 1.0, %v13392_v60  ;;  %v3243_v16 = vmul.f32 %v3179_v62, %v2987_v0 }
 0x2b6   : > { %v13396_v63 = vpop.eup %13395  ;;  %v3182_v13 = vadd.f32 1.0, %v13394_v61  ;;  %v3245_v20 = vmul.f32 %v3181_v2, %v2989_v1 }
 0x2b7   : > { %v13398_v3 = vpop.eup %13397  ;;  %v3211_v9 = vadd.f32 1.0, %v13396_v63  ;;  %v3244_v46 = vmul.f32 %v3180_v5, %v2988_v4 }
 0x2b8   : > { %v13400_v11 = vpop.eup %13399  ;;  %v3213_v28 = vadd.f32 1.0, %v13398_v3  ;;  %v3246_v25 = vmul.f32 %v3182_v13, %v2990_v12 }
 0x2b9   : > { %v13402_v15 = vpop.eup %13401  ;;  %v3275_v17 = vmul.f32 %v3211_v9, %v3019_v7  ;;  %v3212_v19 = vadd.f32 1.0, %v13400_v11 }
 0x2ba   : > { %v3277_v21 = vmul.f32 %v3213_v28, %v3021_v14  ;;  %v3214_v23 = vadd.f32 1.0, %v13402_v15 }
 0x2bb   : > { %v3307_v24 = vpack.c.bf16 %v3275_v17, %v3243_v16  ;;  %v3276_v43 = vmul.f32 %v3212_v19, %v3020_v18 }
 0x2bc   : > { %v3309_v27 = vpack.c.bf16 %v3277_v21, %v3245_v20  ;;  %v3278_v29 = vmul.f32 %v3214_v23, %v3022_v22 }
 0x2bd   : > { %3339 = vst [vmem:[#allocation2 + $0xc0] sm:$0xff] %v3307_v24  ;;  %v3308_v31 = vpack.c.bf16 %v3276_v43, %v3244_v46 }
 0x2be   : > { %3341 = vst [vmem:[#allocation2 + $0xd0] sm:$0xff] %v3309_v27  ;;  %v3310_v34 = vpack.c.bf16 %v3278_v29, %v3246_v25 }
 0x2bf   : > { %3340 = vst [vmem:[#allocation2 + $0xc8] sm:$0xff] %v3308_v31 }
 0x2c0   : > { %3342 = vst [vmem:[#allocation2 + $0xd8] sm:$0xff] %v3310_v34 }
 0x2c3   : > { %v2911_v39 = vpop.f32.mrb[28].mxu0  ;;  %v2954_v41 = vpop.f32.mrb[28].mxu1 }
 0x2c4   : > { %v2912_v40 = vadd.f32 %v2911_v39, %v976_v36  ;;  %v2913_v53 = vpop.f32.mrb[29].mxu0  ;;  %v2955_v42 = vadd.f32 %v2954_v41, %v984_v37  ;;  %v2956_v44 = vpop.f32.mrb[29].mxu1 }
 0x2c5   : > { %v2914_v54 = vadd.f32 %v2913_v53, %v980_v10  ;;  %v2915_v6 = vpop.f32.mrb[30].mxu0  ;;  %v2957_v57 = vadd.f32 %v2956_v44, %v988_v38  ;;  %v2958_v48 = vpop.f32.mrb[30].mxu1 }
 0x2c6   : > { %v3055_v45 = vmul.f32 0.70710677, %v2912_v40  ;;  %v2916_v47 = vadd.f32 %v2915_v6, %v976_v36  ;;  %v2917_v49 = vpop.f32.mrb[31].mxu0  ;;  %v3057_v50 = vmul.f32 0.70710677, %v2955_v42  ;;  %v2960_v55 = vpop.f32.mrb[31].mxu1  ;;  %v2959_v56 = vadd.f32 %v2958_v48, %v984_v37 }
 0x2c7   : > { %v3056_v51 = vmul.f32 0.70710677, %v2914_v54  ;;  %v3058_v8 = vmul.f32 0.70710677, %v2957_v57  ;;  %v2918_v58 = vadd.f32 %v2917_v49, %v980_v10  ;;  %v2961_v59 = vadd.f32 %v2960_v55, %v988_v38 }
 0x2c8   : > { %13403 = verf.f32 %v3055_v45  ;;  %v3087_v52 = vmul.f32 0.70710677, %v2916_v47  ;;  %v3089_v60 = vmul.f32 0.70710677, %v2959_v56  ;;  %v2991_v4 = vmul.f32 0.5, %v2912_v40 }
 0x2c9   : > { %13405 = verf.f32 %v3057_v50  ;;  %v3088_v61 = vmul.f32 0.70710677, %v2918_v58  ;;  %v3090_v62 = vmul.f32 0.70710677, %v2961_v59  ;;  %v2993_v5 = vmul.f32 0.5, %v2955_v42 }
 0x2ca   : > { %13407 = verf.f32 %v3056_v51  ;;  %v2992_v11 = vmul.f32 0.5, %v2914_v54  ;;  %v3023_v13 = vmul.f32 0.5, %v2916_v47  ;;  %v2994_v15 = vmul.f32 0.5, %v2957_v57 }
 0x2cb   : > { %13409 = verf.f32 %v3058_v8  ;;  %v3025_v17 = vmul.f32 0.5, %v2959_v56  ;;  %v3024_v22 = vmul.f32 0.5, %v2918_v58  ;;  %v3026_v43 = vmul.f32 0.5, %v2961_v59 }
 0x2cc   : > { %13411 = verf.f32 %v3087_v52 }
 0x2cd   : > { %13413 = verf.f32 %v3089_v60 }
 0x2ce   : > { %13415 = verf.f32 %v3088_v61 }
 0x2cf   : > { %13417 = verf.f32 %v3090_v62 }
 0x2d2   : > { %v13404_v63 = vpop.eup %13403 }
 0x2d3   : > { %v13406_v0 = vpop.eup %13405  ;;  %v3183_v26 = vadd.f32 1.0, %v13404_v63 }
 0x2d4   : > { %v13408_v1 = vpop.eup %13407  ;;  %v3185_v7 = vadd.f32 1.0, %v13406_v0 }
 0x2d5   : > { %v13410_v2 = vpop.eup %13409  ;;  %v3184_v12 = vadd.f32 1.0, %v13408_v1  ;;  %v3247_v20 = vmul.f32 %v3183_v26, %v2991_v4 }
 0x2d6   : > { %v13412_v3 = vpop.eup %13411  ;;  %v3186_v16 = vadd.f32 1.0, %v13410_v2  ;;  %v3249_v46 = vmul.f32 %v3185_v7, %v2993_v5 }
 0x2d7   : > { %v13414_v9 = vpop.eup %13413  ;;  %v3215_v14 = vadd.f32 1.0, %v13412_v3  ;;  %v3248_v27 = vmul.f32 %v3184_v12, %v2992_v11 }
 0x2d8   : > { %v13416_v28 = vpop.eup %13415  ;;  %v3217_v18 = vadd.f32 1.0, %v13414_v9  ;;  %v3250_v31 = vmul.f32 %v3186_v16, %v2994_v15 }
 0x2d9   : > { %v13418_v19 = vpop.eup %13417  ;;  %v3279_v21 = vmul.f32 %v3215_v14, %v3023_v13  ;;  %v3216_v23 = vadd.f32 1.0, %v13416_v28 }
 0x2da   : > { %v3281_v24 = vmul.f32 %v3217_v18, %v3025_v17  ;;  %v3218_v25 = vadd.f32 1.0, %v13418_v19 }
 0x2db   : > { %v3311_v29 = vpack.c.bf16 %v3279_v21, %v3247_v20  ;;  %v3280_v30 = vmul.f32 %v3216_v23, %v3024_v22 }
 0x2dc   : > { %v3313_v32 = vpack.c.bf16 %v3281_v24, %v3249_v46  ;;  %v3282_v33 = vmul.f32 %v3218_v25, %v3026_v43 }
 0x2dd   : > { %3343 = vst [vmem:[#allocation2 + $0xe0] sm:$0xff] %v3311_v29  ;;  %v3312_v34 = vpack.c.bf16 %v3280_v30, %v3248_v27 }
 0x2de   : > { %3345 = vst [vmem:[#allocation2 + $0xf0] sm:$0xff] %v3313_v32  ;;  %v3314_v35 = vpack.c.bf16 %v3282_v33, %v3250_v31 }
 0x2df   : > { %3344 = vst [vmem:[#allocation2 + $0xe8] sm:$0xff] %v3312_v34 }
 0x2e0   : > { %3346 = vst [vmem:[#allocation2 + $0xf8] sm:$0xff] %v3314_v35 }
 0x2e1 PF: > { %v13420_v36 = vld [vmem:[%s15678_s26 + $0x4] ss:$16 sps:$4 sm:$0xff]   ;;  %v13424_v10 = vld [vmem:[%s15678_s26] ss:$16 sps:$4 sm:$0xff]   ;;  %p17139_p1 = scmp.ne.s32.totalorder %s15438_s28, 0 }
 0x2e2   : > { %v13422_v37 = vld [vmem:[%s15678_s26 + $0x204] ss:$16 sps:$4 sm:$0xff]   ;;  %9562 = vmatprep.subr.bf16.mxu1 %v13420_v36  ;;  %v13425_v38 = vld [vmem:[%s15678_s26 + $0x200] ss:$16 sps:$4 sm:$0xff]  }
 0x2e3   : > { %9605 = vmatprep.subr.bf16.mxu0 %v13422_v37  ;;  %v13426_v39 = vld [vmem:[%s15678_s26 + $0x24] ss:$16 sps:$4 sm:$0xff]   ;;  %9563 = vmatpush1.bf16.msra.mxu1 %v13424_v10  ;;  %v13430_v41 = vld [vmem:[%s15678_s26 + $0x20] ss:$16 sps:$4 sm:$0xff]  }
 0x2e4   : > { %9606 = vmatpush1.bf16.msra.mxu0 %v13425_v38  ;;  %v13428_v40 = vld [vmem:[%s15678_s26 + $0x224] ss:$16 sps:$4 sm:$0xff]   ;;  %9564 = vmatprep.subr.bf16.mxu1 %v13426_v39  ;;  %v13431_v53 = vld [vmem:[%s15678_s26 + $0x220] ss:$16 sps:$4 sm:$0xff]   ;;  %v13521_v38 = vld [vmem:[%s15678_s26 + $0xc] ss:$16 sps:$4 sm:$0xff]  }
 0x2e5   : > { %9607 = vmatprep.subr.bf16.mxu0 %v13428_v40  ;;  %v13432_v42 = vld [vmem:[%s15678_s26 + $0x44] ss:$16 sps:$4 sm:$0xff]   ;;  %v13436_v44 = vld [vmem:[%s15678_s26 + $0x40] ss:$16 sps:$4 sm:$0xff]   ;;  %v15894_v39 = vld [vmem:[#allocation2] sm:$0xff] }
 0x2e6   : > { %v13434_v54 = vld [vmem:[%s15678_s26 + $0x244] ss:$16 sps:$4 sm:$0xff]   ;;  %v13437_v6 = vld [vmem:[%s15678_s26 + $0x240] ss:$16 sps:$4 sm:$0xff]  }
 0x2e7   : > { %9565 = vmatpush1.bf16.msra.mxu1 %v13430_v41  ;;  %v13438_v45 = vld [vmem:[%s15678_s26 + $0x64] ss:$16 sps:$4 sm:$0xff]   ;;  %v13442_v47 = vld [vmem:[%s15678_s26 + $0x60] ss:$16 sps:$4 sm:$0xff]   ;;  %v13519_v41 = vld [vmem:[%s15678_s26 + $0x8] ss:$16 sps:$4 sm:$0xff]  }
 0x2e8   : > { %9608 = vmatpush1.bf16.msra.mxu0 %v13431_v53  ;;  %9566 = vmatprep.subr.bf16.mxu1 %v13432_v42  ;;  %v13440_v57 = vld [vmem:[%s15678_s26 + $0x264] ss:$16 sps:$4 sm:$0xff]   ;;  %v13443_v48 = vld [vmem:[%s15678_s26 + $0x260] ss:$16 sps:$4 sm:$0xff]   ;;  %v15898_v53 = vld [vmem:[#allocation2 + $0x10] sm:$0xff] }
 0x2e9   : > { %9609 = vmatprep.subr.bf16.mxu0 %v13434_v54  ;;  %v13444_v49 = vld [vmem:[%s15678_s26 + $0x84] ss:$16 sps:$4 sm:$0xff]   ;;  %v13448_v51 = vld [vmem:[%s15678_s26 + $0x80] ss:$16 sps:$4 sm:$0xff]   ;;  %v13527_v54 = vld [vmem:[%s15678_s26 + $0x2c] ss:$16 sps:$4 sm:$0xff]  }
 0x2ea   : > { %v13446_v50 = vld [vmem:[%s15678_s26 + $0x284] ss:$16 sps:$4 sm:$0xff]   ;;  %v13449_v8 = vld [vmem:[%s15678_s26 + $0x280] ss:$16 sps:$4 sm:$0xff]  }
 0x2eb   : > { %9567 = vmatpush1.bf16.msra.mxu1 %v13436_v44  ;;  %v13450_v55 = vld [vmem:[%s15678_s26 + $0xa4] ss:$16 sps:$4 sm:$0xff]   ;;  %v13454_v56 = vld [vmem:[%s15678_s26 + $0xa0] ss:$16 sps:$4 sm:$0xff]  }
 0x2ec   : > { %9610 = vmatpush1.bf16.msra.mxu0 %v13437_v6  ;;  %9568 = vmatprep.subr.bf16.mxu1 %v13438_v45  ;;  %v13452_v52 = vld [vmem:[%s15678_s26 + $0x2a4] ss:$16 sps:$4 sm:$0xff]   ;;  %v13455_v58 = vld [vmem:[%s15678_s26 + $0x2a0] ss:$16 sps:$4 sm:$0xff]   ;;  %v13525_v6 = vld [vmem:[%s15678_s26 + $0x28] ss:$16 sps:$4 sm:$0xff]  }
 0x2ed   : > { %9611 = vmatprep.subr.bf16.mxu0 %v13440_v57  ;;  %v13456_v59 = vld [vmem:[%s15678_s26 + $0xc4] ss:$16 sps:$4 sm:$0xff]   ;;  %v13460_v61 = vld [vmem:[%s15678_s26 + $0xc0] ss:$16 sps:$4 sm:$0xff]   ;;  %v13533_v57 = vld [vmem:[%s15678_s26 + $0x4c] ss:$16 sps:$4 sm:$0xff]  }
 0x2ee   : > { %v13458_v60 = vld [vmem:[%s15678_s26 + $0x2c4] ss:$16 sps:$4 sm:$0xff]   ;;  %v13461_v62 = vld [vmem:[%s15678_s26 + $0x2c0] ss:$16 sps:$4 sm:$0xff]  }
 0x2ef   : > { %9569 = vmatpush1.bf16.msra.mxu1 %v13442_v47  ;;  %v13462_v63 = vld [vmem:[%s15678_s26 + $0xe4] ss:$16 sps:$4 sm:$0xff]   ;;  %v13466_v1 = vld [vmem:[%s15678_s26 + $0xe0] ss:$16 sps:$4 sm:$0xff]  }
 0x2f0   : > { %9612 = vmatpush1.bf16.msra.mxu0 %v13443_v48  ;;  %9570 = vmatprep.subr.bf16.mxu1 %v13444_v49  ;;  %v13464_v0 = vld [vmem:[%s15678_s26 + $0x2e4] ss:$16 sps:$4 sm:$0xff]   ;;  %v13467_v2 = vld [vmem:[%s15678_s26 + $0x2e0] ss:$16 sps:$4 sm:$0xff]   ;;  %v13531_v48 = vld [vmem:[%s15678_s26 + $0x48] ss:$16 sps:$4 sm:$0xff]  }
 0x2f1   : > { %9613 = vmatprep.subr.bf16.mxu0 %v13446_v50  ;;  %v13468_v26 = vld [vmem:[%s15678_s26 + $0x104] ss:$16 sps:$4 sm:$0xff]   ;;  %v13472_v4 = vld [vmem:[%s15678_s26 + $0x100] ss:$16 sps:$4 sm:$0xff]   ;;  %v13539_v50 = vld [vmem:[%s15678_s26 + $0x6c] ss:$16 sps:$4 sm:$0xff]  }
 0x2f2   : > { %v13470_v3 = vld [vmem:[%s15678_s26 + $0x304] ss:$16 sps:$4 sm:$0xff]   ;;  %v13473_v5 = vld [vmem:[%s15678_s26 + $0x300] ss:$16 sps:$4 sm:$0xff]  }
 0x2f3   : > { %9571 = vmatpush1.bf16.msra.mxu1 %v13448_v51  ;;  %v13474_v7 = vld [vmem:[%s15678_s26 + $0x124] ss:$16 sps:$4 sm:$0xff]   ;;  %v13478_v11 = vld [vmem:[%s15678_s26 + $0x120] ss:$16 sps:$4 sm:$0xff]  }
 0x2f4   : > { %9614 = vmatpush1.bf16.msra.mxu0 %v13449_v8  ;;  %9572 = vmatprep.subr.bf16.mxu1 %v13450_v55  ;;  %v13476_v9 = vld [vmem:[%s15678_s26 + $0x324] ss:$16 sps:$4 sm:$0xff]   ;;  %v13479_v12 = vld [vmem:[%s15678_s26 + $0x320] ss:$16 sps:$4 sm:$0xff]   ;;  %v13537_v8 = vld [vmem:[%s15678_s26 + $0x68] ss:$16 sps:$4 sm:$0xff]  }
 0x2f5   : > { %9615 = vmatprep.subr.bf16.mxu0 %v13452_v52  ;;  %v13480_v13 = vld [vmem:[%s15678_s26 + $0x144] ss:$16 sps:$4 sm:$0xff]   ;;  %v13484_v28 = vld [vmem:[%s15678_s26 + $0x140] ss:$16 sps:$4 sm:$0xff]   ;;  %v13545_v52 = vld [vmem:[%s15678_s26 + $0x8c] ss:$16 sps:$4 sm:$0xff]  }
 0x2f6   : > { %v13482_v14 = vld [vmem:[%s15678_s26 + $0x344] ss:$16 sps:$4 sm:$0xff]   ;;  %v13485_v15 = vld [vmem:[%s15678_s26 + $0x340] ss:$16 sps:$4 sm:$0xff]  }
 0x2f7   : > { %9573 = vmatpush1.bf16.msra.mxu1 %v13454_v56  ;;  %v13486_v16 = vld [vmem:[%s15678_s26 + $0x164] ss:$16 sps:$4 sm:$0xff]   ;;  %v13490_v19 = vld [vmem:[%s15678_s26 + $0x160] ss:$16 sps:$4 sm:$0xff]  }
 0x2f8   : > { %9616 = vmatpush1.bf16.msra.mxu0 %v13455_v58  ;;  %9574 = vmatprep.subr.bf16.mxu1 %v13456_v59  ;;  %v13488_v17 = vld [vmem:[%s15678_s26 + $0x364] ss:$16 sps:$4 sm:$0xff]   ;;  %v13491_v21 = vld [vmem:[%s15678_s26 + $0x360] ss:$16 sps:$4 sm:$0xff]   ;;  %v13543_v58 = vld [vmem:[%s15678_s26 + $0x88] ss:$16 sps:$4 sm:$0xff]  }
 0x2f9   : > { %9617 = vmatprep.subr.bf16.mxu0 %v13458_v60  ;;  %v15868_v18 = vld [vmem:[#allocation2 + $0x8] sm:$0xff]  ;;  %v15872_v20 = vld [vmem:[#allocation2 + $0x18] sm:$0xff]  ;;  %v13551_v60 = vld [vmem:[%s15678_s26 + $0xac] ss:$16 sps:$4 sm:$0xff]  }
 0x2fa   : > { %9594 = vmatprep.mubr.bf16.mxu1 %v15868_v18  ;;  %v13492_v22 = vld [vmem:[%s15678_s26 + $0x184] ss:$16 sps:$4 sm:$0xff]   ;;  %9637 = vmatprep.mubr.bf16.mxu0 %v15872_v20  ;;  %v13496_v46 = vld [vmem:[%s15678_s26 + $0x180] ss:$16 sps:$4 sm:$0xff]  }
 0x2fb   : > { %9575 = vmatpush1.bf16.msra.mxu1 %v13460_v61  ;;  %v13494_v23 = vld [vmem:[%s15678_s26 + $0x384] ss:$16 sps:$4 sm:$0xff]   ;;  %v13497_v24 = vld [vmem:[%s15678_s26 + $0x380] ss:$16 sps:$4 sm:$0xff]  }
 0x2fc   : > { %9618 = vmatpush1.bf16.msra.mxu0 %v13461_v62  ;;  %9576 = vmatprep.subr.bf16.mxu1 %v13462_v63  ;;  %v13498_v43 = vld [vmem:[%s15678_s26 + $0x1a4] ss:$16 sps:$4 sm:$0xff]   ;;  %v13502_v27 = vld [vmem:[%s15678_s26 + $0x1a0] ss:$16 sps:$4 sm:$0xff]   ;;  %v13549_v62 = vld [vmem:[%s15678_s26 + $0xa8] ss:$16 sps:$4 sm:$0xff]  }
 0x2fd   : > { %9619 = vmatprep.subr.bf16.mxu0 %v13464_v0  ;;  %v13500_v25 = vld [vmem:[%s15678_s26 + $0x3a4] ss:$16 sps:$4 sm:$0xff]   ;;  %v13503_v29 = vld [vmem:[%s15678_s26 + $0x3a0] ss:$16 sps:$4 sm:$0xff]   ;;  %v13557_v0 = vld [vmem:[%s15678_s26 + $0xcc] ss:$16 sps:$4 sm:$0xff]  }
 0x2fe   : > { %v13504_v30 = vld [vmem:[%s15678_s26 + $0x1c4] ss:$16 sps:$4 sm:$0xff]   ;;  %v13508_v32 = vld [vmem:[%s15678_s26 + $0x1c0] ss:$16 sps:$4 sm:$0xff]  }
 0x2ff   : > { %9577 = vmatpush1.bf16.msra.mxu1 %v13466_v1  ;;  %v13506_v31 = vld [vmem:[%s15678_s26 + $0x3c4] ss:$16 sps:$4 sm:$0xff]   ;;  %v13509_v33 = vld [vmem:[%s15678_s26 + $0x3c0] ss:$16 sps:$4 sm:$0xff]  }
 0x300   : > { %9620 = vmatpush1.bf16.msra.mxu0 %v13467_v2  ;;  %9578 = vmatprep.subr.bf16.mxu1 %v13468_v26  ;;  %v13510_v34 = vld [vmem:[%s15678_s26 + $0x1e4] ss:$16 sps:$4 sm:$0xff]   ;;  %v13514_v36 = vld [vmem:[%s15678_s26 + $0x1e0] ss:$16 sps:$4 sm:$0xff]   ;;  %v13555_v26 = vld [vmem:[%s15678_s26 + $0xc8] ss:$16 sps:$4 sm:$0xff]  }
 0x301   : > { %9621 = vmatprep.subr.bf16.mxu0 %v13470_v3  ;;  %v13512_v35 = vld [vmem:[%s15678_s26 + $0x3e4] ss:$16 sps:$4 sm:$0xff]   ;;  %v13515_v37 = vld [vmem:[%s15678_s26 + $0x3e0] ss:$16 sps:$4 sm:$0xff]  }
 0x302   : > { %v13518_v10 = vld [vmem:[%s15678_s26 + $0x404] ss:$16 sps:$4 sm:$0xff]   ;;  %v13516_v40 = vld [vmem:[%s15678_s26 + $0x400] ss:$16 sps:$4 sm:$0xff]  }
 0x303   : > { %9579 = vmatpush1.bf16.msra.mxu1 %v13472_v4  ;;  %v13524_v42 = vld [vmem:[%s15678_s26 + $0x424] ss:$16 sps:$4 sm:$0xff]   ;;  %v13522_v44 = vld [vmem:[%s15678_s26 + $0x420] ss:$16 sps:$4 sm:$0xff]   ;;  %v13563_v4 = vld [vmem:[%s15678_s26 + $0xec] ss:$16 sps:$4 sm:$0xff]  }
 0x304   : > { %9622 = vmatpush1.bf16.msra.mxu0 %v13473_v5  ;;  %9580 = vmatprep.subr.bf16.mxu1 %v13474_v7  ;;  %v13530_v45 = vld [vmem:[%s15678_s26 + $0x444] ss:$16 sps:$4 sm:$0xff]   ;;  %v13528_v47 = vld [vmem:[%s15678_s26 + $0x440] ss:$16 sps:$4 sm:$0xff]   ;;  %v13561_v7 = vld [vmem:[%s15678_s26 + $0xe8] ss:$16 sps:$4 sm:$0xff]  }
 0x305   : > { %9623 = vmatprep.subr.bf16.mxu0 %v13476_v9  ;;  %v13536_v49 = vld [vmem:[%s15678_s26 + $0x464] ss:$16 sps:$4 sm:$0xff]   ;;  %v13534_v51 = vld [vmem:[%s15678_s26 + $0x460] ss:$16 sps:$4 sm:$0xff]  }
 0x306   : > { %v13542_v55 = vld [vmem:[%s15678_s26 + $0x484] ss:$16 sps:$4 sm:$0xff]   ;;  %v13540_v56 = vld [vmem:[%s15678_s26 + $0x480] ss:$16 sps:$4 sm:$0xff]  }
 0x307   : > { %9581 = vmatpush1.bf16.msra.mxu1 %v13478_v11  ;;  %v13548_v59 = vld [vmem:[%s15678_s26 + $0x4a4] ss:$16 sps:$4 sm:$0xff]   ;;  %v13546_v61 = vld [vmem:[%s15678_s26 + $0x4a0] ss:$16 sps:$4 sm:$0xff]   ;;  %v13569_v11 = vld [vmem:[%s15678_s26 + $0x10c] ss:$16 sps:$4 sm:$0xff]  }
 0x308   : > { %9624 = vmatpush1.bf16.msra.mxu0 %v13479_v12  ;;  %9582 = vmatprep.subr.bf16.mxu1 %v13480_v13  ;;  %v13554_v63 = vld [vmem:[%s15678_s26 + $0x4c4] ss:$16 sps:$4 sm:$0xff]   ;;  %v13552_v2 = vld [vmem:[%s15678_s26 + $0x4c0] ss:$16 sps:$4 sm:$0xff]   ;;  %v13567_v13 = vld [vmem:[%s15678_s26 + $0x108] ss:$16 sps:$4 sm:$0xff]  }
 0x309   : > { %9625 = vmatprep.subr.bf16.mxu0 %v13482_v14  ;;  %v15925_v1 = vld [vmem:[#allocation2 + $0x28] sm:$0xff] }
 0x30a   : > { %v13560_v3 = vld [vmem:[%s15678_s26 + $0x4e4] ss:$16 sps:$4 sm:$0xff]   ;;  %v13558_v5 = vld [vmem:[%s15678_s26 + $0x4e0] ss:$16 sps:$4 sm:$0xff]  }
 0x30b   : > { %9583 = vmatpush1.bf16.msra.mxu1 %v13484_v28  ;;  %v13566_v9 = vld [vmem:[%s15678_s26 + $0x504] ss:$16 sps:$4 sm:$0xff]   ;;  %v13564_v12 = vld [vmem:[%s15678_s26 + $0x500] ss:$16 sps:$4 sm:$0xff]   ;;  %v13575_v28 = vld [vmem:[%s15678_s26 + $0x12c] ss:$16 sps:$4 sm:$0xff]  }
 0x30c   : > { %9626 = vmatpush1.bf16.msra.mxu0 %v13485_v15  ;;  %9584 = vmatprep.subr.bf16.mxu1 %v13486_v16  ;;  %v13572_v14 = vld [vmem:[%s15678_s26 + $0x524] ss:$16 sps:$4 sm:$0xff]   ;;  %v13570_v15 = vld [vmem:[%s15678_s26 + $0x520] ss:$16 sps:$4 sm:$0xff]   ;;  %v13573_v16 = vld [vmem:[%s15678_s26 + $0x128] ss:$16 sps:$4 sm:$0xff]  }
 0x30d   : > { %9627 = vmatprep.subr.bf16.mxu0 %v13488_v17  ;;  %v13578_v17 = vld [vmem:[%s15678_s26 + $0x544] ss:$16 sps:$4 sm:$0xff]  }
 0x30f   : > { %9585 = vmatpush1.bf16.msra.mxu1 %v13490_v19  ;;  %v13576_v19 = vld [vmem:[%s15678_s26 + $0x540] ss:$16 sps:$4 sm:$0xff]  }
 0x310   : > { %9628 = vmatpush1.bf16.msra.mxu0 %v13491_v21  ;;  %9586 = vmatprep.subr.bf16.mxu1 %v13492_v22  ;;  %v13579_v21 = vld [vmem:[%s15678_s26 + $0x148] ss:$16 sps:$4 sm:$0xff]   ;;  %v13584_v22 = vld [vmem:[%s15678_s26 + $0x564] ss:$16 sps:$4 sm:$0xff]  }
 0x311   : > { %9629 = vmatprep.subr.bf16.mxu0 %v13494_v23  ;;  %v13587_v23 = vld [vmem:[%s15678_s26 + $0x16c] ss:$16 sps:$4 sm:$0xff]  }
 0x313   : > { %9587 = vmatpush1.bf16.msra.mxu1 %v13496_v46  ;;  %v13582_v46 = vld [vmem:[%s15678_s26 + $0x560] ss:$16 sps:$4 sm:$0xff]  }
 0x314   : > { %9630 = vmatpush1.bf16.msra.mxu0 %v13497_v24  ;;  %9588 = vmatprep.subr.bf16.mxu1 %v13498_v43  ;;  %v13585_v24 = vld [vmem:[%s15678_s26 + $0x168] ss:$16 sps:$4 sm:$0xff]   ;;  %v13590_v43 = vld [vmem:[%s15678_s26 + $0x584] ss:$16 sps:$4 sm:$0xff]  }
 0x315   : > { %9631 = vmatprep.subr.bf16.mxu0 %v13500_v25  ;;  %v13593_v25 = vld [vmem:[%s15678_s26 + $0x18c] ss:$16 sps:$4 sm:$0xff]  }
 0x317   : > { %9589 = vmatpush1.bf16.msra.mxu1 %v13502_v27  ;;  %v13588_v27 = vld [vmem:[%s15678_s26 + $0x580] ss:$16 sps:$4 sm:$0xff]  }
 0x318   : > { %9632 = vmatpush1.bf16.msra.mxu0 %v13503_v29  ;;  %9590 = vmatprep.subr.bf16.mxu1 %v13504_v30  ;;  %v13591_v29 = vld [vmem:[%s15678_s26 + $0x188] ss:$16 sps:$4 sm:$0xff]   ;;  %v13596_v30 = vld [vmem:[%s15678_s26 + $0x5a4] ss:$16 sps:$4 sm:$0xff]  }
 0x319   : > { %9633 = vmatprep.subr.bf16.mxu0 %v13506_v31  ;;  %v13599_v31 = vld [vmem:[%s15678_s26 + $0x1ac] ss:$16 sps:$4 sm:$0xff]  }
 0x31b   : > { %9591 = vmatpush1.bf16.msra.mxu1 %v13508_v32  ;;  %v13594_v32 = vld [vmem:[%s15678_s26 + $0x5a0] ss:$16 sps:$4 sm:$0xff]  }
 0x31c   : > { %9634 = vmatpush1.bf16.msra.mxu0 %v13509_v33  ;;  %9592 = vmatprep.subr.bf16.mxu1 %v13510_v34  ;;  %v13597_v33 = vld [vmem:[%s15678_s26 + $0x1a8] ss:$16 sps:$4 sm:$0xff]   ;;  %v13602_v34 = vld [vmem:[%s15678_s26 + $0x5c4] ss:$16 sps:$4 sm:$0xff]  }
 0x31d   : > { %9635 = vmatprep.subr.bf16.mxu0 %v13512_v35  ;;  %v13605_v35 = vld [vmem:[%s15678_s26 + $0x1cc] ss:$16 sps:$4 sm:$0xff]  }
 0x31f   : > { %9593 = vmatpush1.bf16.msra.mxu1 %v13514_v36  ;;  %v13600_v36 = vld [vmem:[%s15678_s26 + $0x5c0] ss:$16 sps:$4 sm:$0xff]  }
 0x320   : > { %9636 = vmatpush1.bf16.msra.mxu0 %v13515_v37  ;;  %10250 = vmatprep.subr.bf16.mxu1 %v13521_v38  ;;  %v13603_v37 = vld [vmem:[%s15678_s26 + $0x1c8] ss:$16 sps:$4 sm:$0xff]   ;;  %v13611_v38 = vld [vmem:[%s15678_s26 + $0x1ec] ss:$16 sps:$4 sm:$0xff]  }
 0x321   : > { %9648 = vmatprep.subr.bf16.mxu0 %v13518_v10  ;;  %v13608_v10 = vld [vmem:[%s15678_s26 + $0x5e4] ss:$16 sps:$4 sm:$0xff]  }
 0x322   : > { %9595 = vmatmul.mubr.bf16.vlgmr.msra.gmra.mrb[0].mxu1 %v15894_v39 }
 0x323   : > { %9638 = vmatmul.mubr.bf16.vlgmr.msra.gmra.mrb[0].mxu0 %v15898_v53  ;;  %10251 = vmatpush1.bf16.msra.mxu1 %v13519_v41  ;;  %v13609_v41 = vld [vmem:[%s15678_s26 + $0x1e8] ss:$16 sps:$4 sm:$0xff]  }
 0x324   : > { %9649 = vmatpush1.bf16.msra.mxu0 %v13516_v40  ;;  %10252 = vmatprep.subr.bf16.mxu1 %v13527_v54  ;;  %v13606_v40 = vld [vmem:[%s15678_s26 + $0x5e0] ss:$16 sps:$4 sm:$0xff]   ;;  %v13617_v54 = vld [vmem:[%s15678_s26 + $0x20c] ss:$16 sps:$4 sm:$0xff]  }
 0x325   : > { %9650 = vmatprep.subr.bf16.mxu0 %v13524_v42  ;;  %10282 = vmatprep.mubr.bf16.mxu1 %v15868_v18  ;;  %v13581_v18 = vld [vmem:[%s15678_s26 + $0x14c] ss:$16 sps:$4 sm:$0xff]   ;;  %v13614_v42 = vld [vmem:[%s15678_s26 + $0x604] ss:$16 sps:$4 sm:$0xff]  }
 0x326   : > { %9680 = vmatprep.mubr.bf16.mxu0 %v15925_v1 }
 0x327   : > { %10253 = vmatpush1.bf16.msra.mxu1 %v13525_v6  ;;  %v13615_v6 = vld [vmem:[%s15678_s26 + $0x208] ss:$16 sps:$4 sm:$0xff]  }
 0x328   : > { %9651 = vmatpush1.bf16.msra.mxu0 %v13522_v44  ;;  %10254 = vmatprep.subr.bf16.mxu1 %v13533_v57  ;;  %v13612_v44 = vld [vmem:[%s15678_s26 + $0x600] ss:$16 sps:$4 sm:$0xff]   ;;  %v13620_v57 = vld [vmem:[%s15678_s26 + $0x624] ss:$16 sps:$4 sm:$0xff]  }
 0x329   : > { %9652 = vmatprep.subr.bf16.mxu0 %v13530_v45  ;;  %v15970_v45 = vld [vmem:[#allocation2 + $0x20] sm:$0xff] }
 0x32b   : > { %10255 = vmatpush1.bf16.msra.mxu1 %v13531_v48  ;;  %v13618_v48 = vld [vmem:[%s15678_s26 + $0x620] ss:$16 sps:$4 sm:$0xff]  }
 0x32c   : > { %9653 = vmatpush1.bf16.msra.mxu0 %v13528_v47  ;;  %10256 = vmatprep.subr.bf16.mxu1 %v13539_v50  ;;  %v13623_v47 = vld [vmem:[%s15678_s26 + $0x22c] ss:$16 sps:$4 sm:$0xff]   ;;  %v13621_v50 = vld [vmem:[%s15678_s26 + $0x228] ss:$16 sps:$4 sm:$0xff]  }
 0x32d   : > { %9654 = vmatprep.subr.bf16.mxu0 %v13536_v49  ;;  %v15977_v49 = vld [vmem:[#allocation2 + $0x38] sm:$0xff] }
 0x32f   : > { %10257 = vmatpush1.bf16.msra.mxu1 %v13537_v8  ;;  %v13629_v8 = vld [vmem:[%s15678_s26 + $0x24c] ss:$16 sps:$4 sm:$0xff]  }
 0x330   : > { %9655 = vmatpush1.bf16.msra.mxu0 %v13534_v51  ;;  %10258 = vmatprep.subr.bf16.mxu1 %v13545_v52  ;;  %v13626_v51 = vld [vmem:[%s15678_s26 + $0x644] ss:$16 sps:$4 sm:$0xff]  }
 0x331   : > { %9656 = vmatprep.subr.bf16.mxu0 %v13542_v55  ;;  %v13627_v55 = vld [vmem:[%s15678_s26 + $0x248] ss:$16 sps:$4 sm:$0xff]   ;;  %v13632_v52 = vld [vmem:[%s15678_s26 + $0x664] ss:$16 sps:$4 sm:$0xff]  }
 0x333   : > { %10259 = vmatpush1.bf16.msra.mxu1 %v13543_v58  ;;  %v13630_v58 = vld [vmem:[%s15678_s26 + $0x660] ss:$16 sps:$4 sm:$0xff]  }
 0x334   : > { %9657 = vmatpush1.bf16.msra.mxu0 %v13540_v56  ;;  %10260 = vmatprep.subr.bf16.mxu1 %v13551_v60  ;;  %v13635_v56 = vld [vmem:[%s15678_s26 + $0x26c] ss:$16 sps:$4 sm:$0xff]  }
 0x335   : > { %9658 = vmatprep.subr.bf16.mxu0 %v13548_v59  ;;  %v13633_v59 = vld [vmem:[%s15678_s26 + $0x268] ss:$16 sps:$4 sm:$0xff]   ;;  %v13641_v60 = vld [vmem:[%s15678_s26 + $0x28c] ss:$16 sps:$4 sm:$0xff]  }
 0x337   : > { %10261 = vmatpush1.bf16.msra.mxu1 %v13549_v62  ;;  %v13639_v62 = vld [vmem:[%s15678_s26 + $0x288] ss:$16 sps:$4 sm:$0xff]  }
 0x338   : > { %9659 = vmatpush1.bf16.msra.mxu0 %v13546_v61  ;;  %10262 = vmatprep.subr.bf16.mxu1 %v13557_v0  ;;  %v13636_v61 = vld [vmem:[%s15678_s26 + $0x680] ss:$16 sps:$4 sm:$0xff]   ;;  %v13647_v0 = vld [vmem:[%s15678_s26 + $0x2ac] ss:$16 sps:$4 sm:$0xff]  }
 0x339   : > { %9660 = vmatprep.subr.bf16.mxu0 %v13554_v63  ;;  %v13644_v63 = vld [vmem:[%s15678_s26 + $0x6a4] ss:$16 sps:$4 sm:$0xff]  }
 0x33b   : > { %10263 = vmatpush1.bf16.msra.mxu1 %v13555_v26  ;;  %v13645_v26 = vld [vmem:[%s15678_s26 + $0x2a8] ss:$16 sps:$4 sm:$0xff]  }
 0x33c   : > { %9661 = vmatpush1.bf16.msra.mxu0 %v13552_v2  ;;  %10264 = vmatprep.subr.bf16.mxu1 %v13563_v4  ;;  %v13642_v2 = vld [vmem:[%s15678_s26 + $0x6a0] ss:$16 sps:$4 sm:$0xff]   ;;  %v13653_v4 = vld [vmem:[%s15678_s26 + $0x2cc] ss:$16 sps:$4 sm:$0xff]  }
 0x33d   : > { %9662 = vmatprep.subr.bf16.mxu0 %v13560_v3  ;;  %v13650_v3 = vld [vmem:[%s15678_s26 + $0x6c4] ss:$16 sps:$4 sm:$0xff]  }
 0x33f   : > { %10265 = vmatpush1.bf16.msra.mxu1 %v13561_v7  ;;  %v13651_v7 = vld [vmem:[%s15678_s26 + $0x2c8] ss:$16 sps:$4 sm:$0xff]  }
 0x340   : > { %9663 = vmatpush1.bf16.msra.mxu0 %v13558_v5  ;;  %10266 = vmatprep.subr.bf16.mxu1 %v13569_v11  ;;  %v13648_v5 = vld [vmem:[%s15678_s26 + $0x6c0] ss:$16 sps:$4 sm:$0xff]   ;;  %v13659_v11 = vld [vmem:[%s15678_s26 + $0x2ec] ss:$16 sps:$4 sm:$0xff]  }
 0x341   : > { %9664 = vmatprep.subr.bf16.mxu0 %v13566_v9  ;;  %v13656_v9 = vld [vmem:[%s15678_s26 + $0x6e4] ss:$16 sps:$4 sm:$0xff]  }
 0x343   : > { %10267 = vmatpush1.bf16.msra.mxu1 %v13567_v13  ;;  %v13657_v13 = vld [vmem:[%s15678_s26 + $0x2e8] ss:$16 sps:$4 sm:$0xff]  }
 0x344   : > { %9665 = vmatpush1.bf16.msra.mxu0 %v13564_v12  ;;  %10268 = vmatprep.subr.bf16.mxu1 %v13575_v28  ;;  %v13654_v12 = vld [vmem:[%s15678_s26 + $0x6e0] ss:$16 sps:$4 sm:$0xff]   ;;  %v13665_v28 = vld [vmem:[%s15678_s26 + $0x30c] ss:$16 sps:$4 sm:$0xff]  }
 0x345   : > { %9666 = vmatprep.subr.bf16.mxu0 %v13572_v14  ;;  %v13662_v14 = vld [vmem:[%s15678_s26 + $0x704] ss:$16 sps:$4 sm:$0xff]  }
 0x347   : > { %10269 = vmatpush1.bf16.msra.mxu1 %v13573_v16  ;;  %v13663_v16 = vld [vmem:[%s15678_s26 + $0x308] ss:$16 sps:$4 sm:$0xff]  }
 0x348   : > { %9667 = vmatpush1.bf16.msra.mxu0 %v13570_v15  ;;  %10270 = vmatprep.subr.bf16.mxu1 %v13581_v18  ;;  %v13660_v15 = vld [vmem:[%s15678_s26 + $0x700] ss:$16 sps:$4 sm:$0xff]   ;;  %v13671_v18 = vld [vmem:[%s15678_s26 + $0x32c] ss:$16 sps:$4 sm:$0xff]  }
 0x349   : > { %9668 = vmatprep.subr.bf16.mxu0 %v13578_v17  ;;  %v13668_v17 = vld [vmem:[%s15678_s26 + $0x724] ss:$16 sps:$4 sm:$0xff]  }
 0x34b   : > { %10271 = vmatpush1.bf16.msra.mxu1 %v13579_v21  ;;  %v13669_v21 = vld [vmem:[%s15678_s26 + $0x328] ss:$16 sps:$4 sm:$0xff]  }
 0x34c   : > { %9669 = vmatpush1.bf16.msra.mxu0 %v13576_v19  ;;  %10272 = vmatprep.subr.bf16.mxu1 %v13587_v23  ;;  %v13666_v19 = vld [vmem:[%s15678_s26 + $0x720] ss:$16 sps:$4 sm:$0xff]   ;;  %v13677_v23 = vld [vmem:[%s15678_s26 + $0x34c] ss:$16 sps:$4 sm:$0xff]  }
 0x34d   : > { %9670 = vmatprep.subr.bf16.mxu0 %v13584_v22  ;;  %v13674_v22 = vld [vmem:[%s15678_s26 + $0x744] ss:$16 sps:$4 sm:$0xff]  }
 0x34f   : > { %10273 = vmatpush1.bf16.msra.mxu1 %v13585_v24  ;;  %v13675_v24 = vld [vmem:[%s15678_s26 + $0x348] ss:$16 sps:$4 sm:$0xff]  }
 0x350   : > { %9671 = vmatpush1.bf16.msra.mxu0 %v13582_v46  ;;  %10274 = vmatprep.subr.bf16.mxu1 %v13593_v25  ;;  %v13672_v46 = vld [vmem:[%s15678_s26 + $0x740] ss:$16 sps:$4 sm:$0xff]   ;;  %v13683_v25 = vld [vmem:[%s15678_s26 + $0x36c] ss:$16 sps:$4 sm:$0xff]  }
 0x351   : > { %9672 = vmatprep.subr.bf16.mxu0 %v13590_v43  ;;  %v13680_v43 = vld [vmem:[%s15678_s26 + $0x764] ss:$16 sps:$4 sm:$0xff]  }
 0x353   : > { %10275 = vmatpush1.bf16.msra.mxu1 %v13591_v29  ;;  %v13681_v29 = vld [vmem:[%s15678_s26 + $0x368] ss:$16 sps:$4 sm:$0xff]  }
 0x354   : > { %9673 = vmatpush1.bf16.msra.mxu0 %v13588_v27  ;;  %10276 = vmatprep.subr.bf16.mxu1 %v13599_v31  ;;  %v13678_v27 = vld [vmem:[%s15678_s26 + $0x760] ss:$16 sps:$4 sm:$0xff]   ;;  %v13689_v31 = vld [vmem:[%s15678_s26 + $0x38c] ss:$16 sps:$4 sm:$0xff]  }
 0x355   : > { %9674 = vmatprep.subr.bf16.mxu0 %v13596_v30  ;;  %v13686_v30 = vld [vmem:[%s15678_s26 + $0x784] ss:$16 sps:$4 sm:$0xff]  }
 0x357   : > { %10277 = vmatpush1.bf16.msra.mxu1 %v13597_v33  ;;  %v13687_v33 = vld [vmem:[%s15678_s26 + $0x388] ss:$16 sps:$4 sm:$0xff]  }
 0x358   : > { %9675 = vmatpush1.bf16.msra.mxu0 %v13594_v32  ;;  %10278 = vmatprep.subr.bf16.mxu1 %v13605_v35  ;;  %v13684_v32 = vld [vmem:[%s15678_s26 + $0x780] ss:$16 sps:$4 sm:$0xff]   ;;  %v13695_v35 = vld [vmem:[%s15678_s26 + $0x3ac] ss:$16 sps:$4 sm:$0xff]  }
 0x359   : > { %9676 = vmatprep.subr.bf16.mxu0 %v13602_v34  ;;  %v13692_v34 = vld [vmem:[%s15678_s26 + $0x7a4] ss:$16 sps:$4 sm:$0xff]  }
 0x35b   : > { %10279 = vmatpush1.bf16.msra.mxu1 %v13603_v37  ;;  %v13693_v37 = vld [vmem:[%s15678_s26 + $0x3a8] ss:$16 sps:$4 sm:$0xff]  }
 0x35c   : > { %9677 = vmatpush1.bf16.msra.mxu0 %v13600_v36  ;;  %10280 = vmatprep.subr.bf16.mxu1 %v13611_v38  ;;  %v13690_v36 = vld [vmem:[%s15678_s26 + $0x7a0] ss:$16 sps:$4 sm:$0xff]   ;;  %v13701_v38 = vld [vmem:[%s15678_s26 + $0x3cc] ss:$16 sps:$4 sm:$0xff]  }
 0x35d   : > { %9678 = vmatprep.subr.bf16.mxu0 %v13608_v10  ;;  %v13698_v10 = vld [vmem:[%s15678_s26 + $0x7c4] ss:$16 sps:$4 sm:$0xff]  }
 0x35f   : > { %10281 = vmatpush1.bf16.msra.mxu1 %v13609_v41  ;;  %v13699_v41 = vld [vmem:[%s15678_s26 + $0x3c8] ss:$16 sps:$4 sm:$0xff]  }
 0x360   : > { %9679 = vmatpush1.bf16.msra.mxu0 %v13606_v40  ;;  %10293 = vmatprep.subr.bf16.mxu1 %v13617_v54  ;;  %v13696_v40 = vld [vmem:[%s15678_s26 + $0x7c0] ss:$16 sps:$4 sm:$0xff]   ;;  %v13707_v54 = vld [vmem:[%s15678_s26 + $0x3ec] ss:$16 sps:$4 sm:$0xff]  }
 0x361   : > { %9691 = vmatprep.subr.bf16.mxu0 %v13614_v42  ;;  %v13704_v42 = vld [vmem:[%s15678_s26 + $0x7e4] ss:$16 sps:$4 sm:$0xff]  }
 0x362   : > { %10283 = vmatmul.mubr.bf16.vlgmr.msra.gmra.mrb[4].mxu1 %v15894_v39  ;;  %v13624_v39 = vld [vmem:[%s15678_s26 + $0x640] ss:$16 sps:$4 sm:$0xff]  }
 0x363   : > { %9681 = vmatmul.mubr.bf16.vlgmr.msra.gmra.mrb[0].mxu0 %v15970_v45  ;;  %10294 = vmatpush1.bf16.msra.mxu1 %v13615_v6  ;;  %v13705_v6 = vld [vmem:[%s15678_s26 + $0x3e8] ss:$16 sps:$4 sm:$0xff]  }
 0x364   : > { %9692 = vmatpush1.bf16.msra.mxu0 %v13612_v44  ;;  %10295 = vmatprep.subr.bf16.mxu1 %v13623_v47  ;;  %v13702_v44 = vld [vmem:[%s15678_s26 + $0x7e0] ss:$16 sps:$4 sm:$0xff]   ;;  %v13713_v47 = vld [vmem:[%s15678_s26 + $0x40c] ss:$16 sps:$4 sm:$0xff]  }
 0x365   : > { %9693 = vmatprep.subr.bf16.mxu0 %v13620_v57  ;;  %9723 = vmatprep.mubr.bf16.mxu0 %v15977_v49  ;;  %v13710_v57 = vld [vmem:[%s15678_s26 + $0x804] ss:$16 sps:$4 sm:$0xff]  }
 0x366   : > { %10325 = vmatprep.mubr.bf16.mxu1 %v15872_v20  ;;  %v13638_v20 = vld [vmem:[%s15678_s26 + $0x684] ss:$16 sps:$4 sm:$0xff]  }
 0x367   : > { %10296 = vmatpush1.bf16.msra.mxu1 %v13621_v50  ;;  %v13711_v50 = vld [vmem:[%s15678_s26 + $0x408] ss:$16 sps:$4 sm:$0xff]  }
 0x368   : > { %9694 = vmatpush1.bf16.msra.mxu0 %v13618_v48  ;;  %10297 = vmatprep.subr.bf16.mxu1 %v13629_v8  ;;  %v13708_v48 = vld [vmem:[%s15678_s26 + $0x800] ss:$16 sps:$4 sm:$0xff]   ;;  %v13716_v8 = vld [vmem:[%s15678_s26 + $0x824] ss:$16 sps:$4 sm:$0xff]  }
 0x369   : > { %9695 = vmatprep.subr.bf16.mxu0 %v13626_v51  ;;  %v16042_v51 = vld [vmem:[#allocation2 + $0x30] sm:$0xff] }
 0x36b   : > { %10298 = vmatpush1.bf16.msra.mxu1 %v13627_v55  ;;  %v13714_v55 = vld [vmem:[%s15678_s26 + $0x820] ss:$16 sps:$4 sm:$0xff]  }
 0x36c   : > { %9696 = vmatpush1.bf16.msra.mxu0 %v13624_v39  ;;  %10299 = vmatprep.subr.bf16.mxu1 %v13635_v56  ;;  %v13719_v39 = vld [vmem:[%s15678_s26 + $0x42c] ss:$16 sps:$4 sm:$0xff]   ;;  %v13717_v56 = vld [vmem:[%s15678_s26 + $0x428] ss:$16 sps:$4 sm:$0xff]  }
 0x36d   : > { %9697 = vmatprep.subr.bf16.mxu0 %v13632_v52  ;;  %v16049_v52 = vld [vmem:[#allocation2 + $0x48] sm:$0xff] }
 0x36f   : > { %10300 = vmatpush1.bf16.msra.mxu1 %v13633_v59  ;;  %v13725_v59 = vld [vmem:[%s15678_s26 + $0x44c] ss:$16 sps:$4 sm:$0xff]  }
 0x370   : > { %9698 = vmatpush1.bf16.msra.mxu0 %v13630_v58  ;;  %10301 = vmatprep.subr.bf16.mxu1 %v13641_v60  ;;  %v13722_v58 = vld [vmem:[%s15678_s26 + $0x844] ss:$16 sps:$4 sm:$0xff]  }
 0x371   : > { %9699 = vmatprep.subr.bf16.mxu0 %v13638_v20  ;;  %v13723_v20 = vld [vmem:[%s15678_s26 + $0x448] ss:$16 sps:$4 sm:$0xff]   ;;  %v13728_v60 = vld [vmem:[%s15678_s26 + $0x864] ss:$16 sps:$4 sm:$0xff]  }
 0x373   : > { %10302 = vmatpush1.bf16.msra.mxu1 %v13639_v62  ;;  %v13726_v62 = vld [vmem:[%s15678_s26 + $0x860] ss:$16 sps:$4 sm:$0xff]  }
 0x374   : > { %9700 = vmatpush1.bf16.msra.mxu0 %v13636_v61  ;;  %10303 = vmatprep.subr.bf16.mxu1 %v13647_v0  ;;  %v13731_v61 = vld [vmem:[%s15678_s26 + $0x46c] ss:$16 sps:$4 sm:$0xff]  }
 0x375   : > { %9701 = vmatprep.subr.bf16.mxu0 %v13644_v63  ;;  %v13729_v63 = vld [vmem:[%s15678_s26 + $0x468] ss:$16 sps:$4 sm:$0xff]   ;;  %v13737_v0 = vld [vmem:[%s15678_s26 + $0x48c] ss:$16 sps:$4 sm:$0xff]  }
 0x377   : > { %10304 = vmatpush1.bf16.msra.mxu1 %v13645_v26  ;;  %v13735_v26 = vld [vmem:[%s15678_s26 + $0x488] ss:$16 sps:$4 sm:$0xff]  }
 0x378   : > { %9702 = vmatpush1.bf16.msra.mxu0 %v13642_v2  ;;  %10305 = vmatprep.subr.bf16.mxu1 %v13653_v4  ;;  %v13732_v2 = vld [vmem:[%s15678_s26 + $0x880] ss:$16 sps:$4 sm:$0xff]   ;;  %v13743_v4 = vld [vmem:[%s15678_s26 + $0x4ac] ss:$16 sps:$4 sm:$0xff]  }
 0x379   : > { %9703 = vmatprep.subr.bf16.mxu0 %v13650_v3  ;;  %v13740_v3 = vld [vmem:[%s15678_s26 + $0x8a4] ss:$16 sps:$4 sm:$0xff]  }
 0x37b   : > { %10306 = vmatpush1.bf16.msra.mxu1 %v13651_v7  ;;  %v13741_v7 = vld [vmem:[%s15678_s26 + $0x4a8] ss:$16 sps:$4 sm:$0xff]  }
 0x37c   : > { %9704 = vmatpush1.bf16.msra.mxu0 %v13648_v5  ;;  %10307 = vmatprep.subr.bf16.mxu1 %v13659_v11  ;;  %v13738_v5 = vld [vmem:[%s15678_s26 + $0x8a0] ss:$16 sps:$4 sm:$0xff]   ;;  %v13749_v11 = vld [vmem:[%s15678_s26 + $0x4cc] ss:$16 sps:$4 sm:$0xff]  }
 0x37d   : > { %9705 = vmatprep.subr.bf16.mxu0 %v13656_v9  ;;  %v13746_v9 = vld [vmem:[%s15678_s26 + $0x8c4] ss:$16 sps:$4 sm:$0xff]  }
 0x37f   : > { %10308 = vmatpush1.bf16.msra.mxu1 %v13657_v13  ;;  %v13747_v13 = vld [vmem:[%s15678_s26 + $0x4c8] ss:$16 sps:$4 sm:$0xff]  }
 0x380   : > { %9706 = vmatpush1.bf16.msra.mxu0 %v13654_v12  ;;  %10309 = vmatprep.subr.bf16.mxu1 %v13665_v28  ;;  %v13744_v12 = vld [vmem:[%s15678_s26 + $0x8c0] ss:$16 sps:$4 sm:$0xff]   ;;  %v13755_v28 = vld [vmem:[%s15678_s26 + $0x4ec] ss:$16 sps:$4 sm:$0xff]  }
 0x381   : > { %9707 = vmatprep.subr.bf16.mxu0 %v13662_v14  ;;  %v13752_v14 = vld [vmem:[%s15678_s26 + $0x8e4] ss:$16 sps:$4 sm:$0xff]  }
 0x383   : > { %10310 = vmatpush1.bf16.msra.mxu1 %v13663_v16  ;;  %v13753_v16 = vld [vmem:[%s15678_s26 + $0x4e8] ss:$16 sps:$4 sm:$0xff]  }
 0x384   : > { %9708 = vmatpush1.bf16.msra.mxu0 %v13660_v15  ;;  %10311 = vmatprep.subr.bf16.mxu1 %v13671_v18  ;;  %v13750_v15 = vld [vmem:[%s15678_s26 + $0x8e0] ss:$16 sps:$4 sm:$0xff]   ;;  %v13761_v18 = vld [vmem:[%s15678_s26 + $0x50c] ss:$16 sps:$4 sm:$0xff]  }
 0x385   : > { %9709 = vmatprep.subr.bf16.mxu0 %v13668_v17  ;;  %v13758_v17 = vld [vmem:[%s15678_s26 + $0x904] ss:$16 sps:$4 sm:$0xff]  }
 0x387   : > { %10312 = vmatpush1.bf16.msra.mxu1 %v13669_v21  ;;  %v13759_v21 = vld [vmem:[%s15678_s26 + $0x508] ss:$16 sps:$4 sm:$0xff]  }
 0x388   : > { %9710 = vmatpush1.bf16.msra.mxu0 %v13666_v19  ;;  %10313 = vmatprep.subr.bf16.mxu1 %v13677_v23  ;;  %v13756_v19 = vld [vmem:[%s15678_s26 + $0x900] ss:$16 sps:$4 sm:$0xff]   ;;  %v13767_v23 = vld [vmem:[%s15678_s26 + $0x52c] ss:$16 sps:$4 sm:$0xff]  }
 0x389   : > { %9711 = vmatprep.subr.bf16.mxu0 %v13674_v22  ;;  %v13764_v22 = vld [vmem:[%s15678_s26 + $0x924] ss:$16 sps:$4 sm:$0xff]  }
 0x38b   : > { %10314 = vmatpush1.bf16.msra.mxu1 %v13675_v24  ;;  %v13765_v24 = vld [vmem:[%s15678_s26 + $0x528] ss:$16 sps:$4 sm:$0xff]  }
 0x38c   : > { %9712 = vmatpush1.bf16.msra.mxu0 %v13672_v46  ;;  %10315 = vmatprep.subr.bf16.mxu1 %v13683_v25  ;;  %v13762_v46 = vld [vmem:[%s15678_s26 + $0x920] ss:$16 sps:$4 sm:$0xff]   ;;  %v13773_v25 = vld [vmem:[%s15678_s26 + $0x54c] ss:$16 sps:$4 sm:$0xff]  }
 0x38d   : > { %9713 = vmatprep.subr.bf16.mxu0 %v13680_v43  ;;  %v13770_v43 = vld [vmem:[%s15678_s26 + $0x944] ss:$16 sps:$4 sm:$0xff]  }
 0x38f   : > { %10316 = vmatpush1.bf16.msra.mxu1 %v13681_v29  ;;  %v13771_v29 = vld [vmem:[%s15678_s26 + $0x548] ss:$16 sps:$4 sm:$0xff]  }
 0x390   : > { %9714 = vmatpush1.bf16.msra.mxu0 %v13678_v27  ;;  %10317 = vmatprep.subr.bf16.mxu1 %v13689_v31  ;;  %v13768_v27 = vld [vmem:[%s15678_s26 + $0x940] ss:$16 sps:$4 sm:$0xff]   ;;  %v13779_v31 = vld [vmem:[%s15678_s26 + $0x56c] ss:$16 sps:$4 sm:$0xff]  }
 0x391   : > { %9715 = vmatprep.subr.bf16.mxu0 %v13686_v30  ;;  %v13776_v30 = vld [vmem:[%s15678_s26 + $0x964] ss:$16 sps:$4 sm:$0xff]  }
 0x393   : > { %10318 = vmatpush1.bf16.msra.mxu1 %v13687_v33  ;;  %v13777_v33 = vld [vmem:[%s15678_s26 + $0x568] ss:$16 sps:$4 sm:$0xff]  }
 0x394   : > { %9716 = vmatpush1.bf16.msra.mxu0 %v13684_v32  ;;  %10319 = vmatprep.subr.bf16.mxu1 %v13695_v35  ;;  %v13774_v32 = vld [vmem:[%s15678_s26 + $0x960] ss:$16 sps:$4 sm:$0xff]   ;;  %v13785_v35 = vld [vmem:[%s15678_s26 + $0x58c] ss:$16 sps:$4 sm:$0xff]  }
 0x395   : > { %9717 = vmatprep.subr.bf16.mxu0 %v13692_v34  ;;  %v13782_v34 = vld [vmem:[%s15678_s26 + $0x984] ss:$16 sps:$4 sm:$0xff]  }
 0x397   : > { %10320 = vmatpush1.bf16.msra.mxu1 %v13693_v37  ;;  %v13783_v37 = vld [vmem:[%s15678_s26 + $0x588] ss:$16 sps:$4 sm:$0xff]  }
 0x398   : > { %9718 = vmatpush1.bf16.msra.mxu0 %v13690_v36  ;;  %10321 = vmatprep.subr.bf16.mxu1 %v13701_v38  ;;  %v13780_v36 = vld [vmem:[%s15678_s26 + $0x980] ss:$16 sps:$4 sm:$0xff]   ;;  %v13791_v38 = vld [vmem:[%s15678_s26 + $0x5ac] ss:$16 sps:$4 sm:$0xff]  }
 0x399   : > { %9719 = vmatprep.subr.bf16.mxu0 %v13698_v10  ;;  %v13788_v10 = vld [vmem:[%s15678_s26 + $0x9a4] ss:$16 sps:$4 sm:$0xff]  }
 0x39b   : > { %10322 = vmatpush1.bf16.msra.mxu1 %v13699_v41  ;;  %v13789_v41 = vld [vmem:[%s15678_s26 + $0x5a8] ss:$16 sps:$4 sm:$0xff]  }
 0x39c   : > { %9720 = vmatpush1.bf16.msra.mxu0 %v13696_v40  ;;  %10323 = vmatprep.subr.bf16.mxu1 %v13707_v54  ;;  %v13786_v40 = vld [vmem:[%s15678_s26 + $0x9a0] ss:$16 sps:$4 sm:$0xff]   ;;  %v13797_v54 = vld [vmem:[%s15678_s26 + $0x5cc] ss:$16 sps:$4 sm:$0xff]  }
 0x39d   : > { %9721 = vmatprep.subr.bf16.mxu0 %v13704_v42  ;;  %v13794_v42 = vld [vmem:[%s15678_s26 + $0x9c4] ss:$16 sps:$4 sm:$0xff]  }
 0x39f   : > { %10324 = vmatpush1.bf16.msra.mxu1 %v13705_v6  ;;  %v13795_v6 = vld [vmem:[%s15678_s26 + $0x5c8] ss:$16 sps:$4 sm:$0xff]  }
 0x3a0   : > { %9722 = vmatpush1.bf16.msra.mxu0 %v13702_v44  ;;  %10336 = vmatprep.subr.bf16.mxu1 %v13713_v47  ;;  %v13792_v44 = vld [vmem:[%s15678_s26 + $0x9c0] ss:$16 sps:$4 sm:$0xff]   ;;  %v13803_v47 = vld [vmem:[%s15678_s26 + $0x5ec] ss:$16 sps:$4 sm:$0xff]  }
 0x3a1   : > { %9734 = vmatprep.subr.bf16.mxu0 %v13710_v57  ;;  %v13800_v57 = vld [vmem:[%s15678_s26 + $0x9e4] ss:$16 sps:$4 sm:$0xff]  }
 0x3a2   : > { %10326 = vmatmul.mubr.bf16.vlgmr.msra.gmra.mrb[4].mxu1 %v15898_v53  ;;  %v13720_v53 = vld [vmem:[%s15678_s26 + $0x840] ss:$16 sps:$4 sm:$0xff]  }
 0x3a3   : > { %9724 = vmatmul.mubr.bf16.vlgmr.msra.gmra.mrb[0].mxu0 %v16042_v51  ;;  %10337 = vmatpush1.bf16.msra.mxu1 %v13711_v50  ;;  %v13801_v50 = vld [vmem:[%s15678_s26 + $0x5e8] ss:$16 sps:$4 sm:$0xff]  }
 0x3a4   : > { %9735 = vmatpush1.bf16.msra.mxu0 %v13708_v48  ;;  %10338 = vmatprep.subr.bf16.mxu1 %v13719_v39  ;;  %v13798_v48 = vld [vmem:[%s15678_s26 + $0x9e0] ss:$16 sps:$4 sm:$0xff]   ;;  %v13809_v39 = vld [vmem:[%s15678_s26 + $0x60c] ss:$16 sps:$4 sm:$0xff]  }
 0x3a5   : > { %9736 = vmatprep.subr.bf16.mxu0 %v13716_v8  ;;  %9766 = vmatprep.mubr.bf16.mxu0 %v16049_v52  ;;  %v13806_v8 = vld [vmem:[%s15678_s26 + $0xa04] ss:$16 sps:$4 sm:$0xff]  }
 0x3a6   : > { %10368 = vmatprep.mubr.bf16.mxu1 %v15925_v1  ;;  %v13734_v1 = vld [vmem:[%s15678_s26 + $0x884] ss:$16 sps:$4 sm:$0xff]  }
 0x3a7   : > { %10339 = vmatpush1.bf16.msra.mxu1 %v13717_v56  ;;  %v13807_v56 = vld [vmem:[%s15678_s26 + $0x608] ss:$16 sps:$4 sm:$0xff]  }
 0x3a8   : > { %9737 = vmatpush1.bf16.msra.mxu0 %v13714_v55  ;;  %10340 = vmatprep.subr.bf16.mxu1 %v13725_v59  ;;  %v13804_v55 = vld [vmem:[%s15678_s26 + $0xa00] ss:$16 sps:$4 sm:$0xff]   ;;  %v13812_v59 = vld [vmem:[%s15678_s26 + $0xa24] ss:$16 sps:$4 sm:$0xff]  }
 0x3a9   : > { %9738 = vmatprep.subr.bf16.mxu0 %v13722_v58  ;;  %v3355_v58 = vld [vmem:[#allocation2 + $0x40] sm:$0xff] }
 0x3ab   : > { %10341 = vmatpush1.bf16.msra.mxu1 %v13723_v20  ;;  %v3358_v20 = vld [vmem:[#allocation2 + $0x58] sm:$0xff] }
 0x3ac   : > { %9739 = vmatpush1.bf16.msra.mxu0 %v13720_v53  ;;  %10342 = vmatprep.subr.bf16.mxu1 %v13731_v61  ;;  %v13815_v53 = vld [vmem:[%s15678_s26 + $0x62c] ss:$16 sps:$4 sm:$0xff]   ;;  %v13813_v61 = vld [vmem:[%s15678_s26 + $0x628] ss:$16 sps:$4 sm:$0xff]  }
 0x3ad   : > { %9740 = vmatprep.subr.bf16.mxu0 %v13728_v60  ;;  %v13810_v60 = vld [vmem:[%s15678_s26 + $0xa20] ss:$16 sps:$4 sm:$0xff]  }
 0x3af   : > { %10343 = vmatpush1.bf16.msra.mxu1 %v13729_v63  ;;  %v13821_v63 = vld [vmem:[%s15678_s26 + $0x64c] ss:$16 sps:$4 sm:$0xff]  }
 0x3b0   : > { %9741 = vmatpush1.bf16.msra.mxu0 %v13726_v62  ;;  %10344 = vmatprep.subr.bf16.mxu1 %v13737_v0  ;;  %v13818_v62 = vld [vmem:[%s15678_s26 + $0xa44] ss:$16 sps:$4 sm:$0xff]  }
 0x3b1   : > { %9742 = vmatprep.subr.bf16.mxu0 %v13734_v1  ;;  %v13816_v1 = vld [vmem:[%s15678_s26 + $0xa40] ss:$16 sps:$4 sm:$0xff]   ;;  %v13824_v0 = vld [vmem:[%s15678_s26 + $0xa64] ss:$16 sps:$4 sm:$0xff]  }
 0x3b3   : > { %10345 = vmatpush1.bf16.msra.mxu1 %v13735_v26  ;;  %v13822_v26 = vld [vmem:[%s15678_s26 + $0xa60] ss:$16 sps:$4 sm:$0xff]  }
 0x3b4   : > { %9743 = vmatpush1.bf16.msra.mxu0 %v13732_v2  ;;  %10346 = vmatprep.subr.bf16.mxu1 %v13743_v4  ;;  %v13827_v2 = vld [vmem:[%s15678_s26 + $0x66c] ss:$16 sps:$4 sm:$0xff]  }
 0x3b5   : > { %9744 = vmatprep.subr.bf16.mxu0 %v13740_v3  ;;  %v13825_v3 = vld [vmem:[%s15678_s26 + $0x668] ss:$16 sps:$4 sm:$0xff]   ;;  %v13833_v4 = vld [vmem:[%s15678_s26 + $0x68c] ss:$16 sps:$4 sm:$0xff]  }
 0x3b7   : > { %10347 = vmatpush1.bf16.msra.mxu1 %v13741_v7  ;;  %v13831_v7 = vld [vmem:[%s15678_s26 + $0x688] ss:$16 sps:$4 sm:$0xff]  }
 0x3b8   : > { %9745 = vmatpush1.bf16.msra.mxu0 %v13738_v5  ;;  %10348 = vmatprep.subr.bf16.mxu1 %v13749_v11  ;;  %v13828_v5 = vld [vmem:[%s15678_s26 + $0xa80] ss:$16 sps:$4 sm:$0xff]   ;;  %v13839_v11 = vld [vmem:[%s15678_s26 + $0x6ac] ss:$16 sps:$4 sm:$0xff]  }
 0x3b9   : > { %9746 = vmatprep.subr.bf16.mxu0 %v13746_v9  ;;  %v13836_v9 = vld [vmem:[%s15678_s26 + $0xaa4] ss:$16 sps:$4 sm:$0xff]  }
 0x3bb   : > { %10349 = vmatpush1.bf16.msra.mxu1 %v13747_v13  ;;  %v13837_v13 = vld [vmem:[%s15678_s26 + $0x6a8] ss:$16 sps:$4 sm:$0xff]  }
 0x3bc   : > { %9747 = vmatpush1.bf16.msra.mxu0 %v13744_v12  ;;  %10350 = vmatprep.subr.bf16.mxu1 %v13755_v28  ;;  %v13834_v12 = vld [vmem:[%s15678_s26 + $0xaa0] ss:$16 sps:$4 sm:$0xff]   ;;  %v13845_v28 = vld [vmem:[%s15678_s26 + $0x6cc] ss:$16 sps:$4 sm:$0xff]  }
 0x3bd   : > { %9748 = vmatprep.subr.bf16.mxu0 %v13752_v14  ;;  %v13842_v14 = vld [vmem:[%s15678_s26 + $0xac4] ss:$16 sps:$4 sm:$0xff]  }
 0x3bf   : > { %10351 = vmatpush1.bf16.msra.mxu1 %v13753_v16 }
 0x3c0   : > { %9749 = vmatpush1.bf16.msra.mxu0 %v13750_v15  ;;  %10352 = vmatprep.subr.bf16.mxu1 %v13761_v18  ;;  %v13840_v18 = vld [vmem:[%s15678_s26 + $0xac0] ss:$16 sps:$4 sm:$0xff]  }
 0x3c1   : > { %9750 = vmatprep.subr.bf16.mxu0 %v13758_v17 }
 0x3c3   : > { %10353 = vmatpush1.bf16.msra.mxu1 %v13759_v21 }
 0x3c4   : > { %9751 = vmatpush1.bf16.msra.mxu0 %v13756_v19  ;;  %10354 = vmatprep.subr.bf16.mxu1 %v13767_v23  ;;  %v13843_v19 = vld [vmem:[%s15678_s26 + $0x6c8] ss:$16 sps:$4 sm:$0xff]   ;;  %v13851_v23 = vld [vmem:[%s15678_s26 + $0x6ec] ss:$16 sps:$4 sm:$0xff]  }
 0x3c5   : > { %9752 = vmatprep.subr.bf16.mxu0 %v13764_v22  ;;  %v13848_v22 = vld [vmem:[%s15678_s26 + $0xae4] ss:$16 sps:$4 sm:$0xff]  }
 0x3c7   : > { %10355 = vmatpush1.bf16.msra.mxu1 %v13765_v24  ;;  %v13849_v24 = vld [vmem:[%s15678_s26 + $0x6e8] ss:$16 sps:$4 sm:$0xff]  }
 0x3c8   : > { %9753 = vmatpush1.bf16.msra.mxu0 %v13762_v46  ;;  %10356 = vmatprep.subr.bf16.mxu1 %v13773_v25  ;;  %v13846_v46 = vld [vmem:[%s15678_s26 + $0xae0] ss:$16 sps:$4 sm:$0xff]   ;;  %v13857_v25 = vld [vmem:[%s15678_s26 + $0x70c] ss:$16 sps:$4 sm:$0xff]  }
 0x3c9   : > { %9754 = vmatprep.subr.bf16.mxu0 %v13770_v43  ;;  %v13854_v43 = vld [vmem:[%s15678_s26 + $0xb04] ss:$16 sps:$4 sm:$0xff]  }
 0x3cb   : > { %10357 = vmatpush1.bf16.msra.mxu1 %v13771_v29  ;;  %v13855_v29 = vld [vmem:[%s15678_s26 + $0x708] ss:$16 sps:$4 sm:$0xff]  }
 0x3cc   : > { %9755 = vmatpush1.bf16.msra.mxu0 %v13768_v27  ;;  %10358 = vmatprep.subr.bf16.mxu1 %v13779_v31  ;;  %v13852_v27 = vld [vmem:[%s15678_s26 + $0xb00] ss:$16 sps:$4 sm:$0xff]   ;;  %v13863_v31 = vld [vmem:[%s15678_s26 + $0x72c] ss:$16 sps:$4 sm:$0xff]  }
 0x3cd   : > { %9756 = vmatprep.subr.bf16.mxu0 %v13776_v30  ;;  %v13860_v30 = vld [vmem:[%s15678_s26 + $0xb24] ss:$16 sps:$4 sm:$0xff]  }
 0x3cf   : > { %10359 = vmatpush1.bf16.msra.mxu1 %v13777_v33  ;;  %v13861_v33 = vld [vmem:[%s15678_s26 + $0x728] ss:$16 sps:$4 sm:$0xff]  }
 0x3d0   : > { %9757 = vmatpush1.bf16.msra.mxu0 %v13774_v32  ;;  %10360 = vmatprep.subr.bf16.mxu1 %v13785_v35  ;;  %v13858_v32 = vld [vmem:[%s15678_s26 + $0xb20] ss:$16 sps:$4 sm:$0xff]   ;;  %v13869_v35 = vld [vmem:[%s15678_s26 + $0x74c] ss:$16 sps:$4 sm:$0xff]  }
 0x3d1   : > { %9758 = vmatprep.subr.bf16.mxu0 %v13782_v34  ;;  %v13866_v34 = vld [vmem:[%s15678_s26 + $0xb44] ss:$16 sps:$4 sm:$0xff]  }
 0x3d3   : > { %10361 = vmatpush1.bf16.msra.mxu1 %v13783_v37  ;;  %v13867_v37 = vld [vmem:[%s15678_s26 + $0x748] ss:$16 sps:$4 sm:$0xff]  }
 0x3d4   : > { %9759 = vmatpush1.bf16.msra.mxu0 %v13780_v36  ;;  %10362 = vmatprep.subr.bf16.mxu1 %v13791_v38  ;;  %v13864_v36 = vld [vmem:[%s15678_s26 + $0xb40] ss:$16 sps:$4 sm:$0xff]   ;;  %v13875_v38 = vld [vmem:[%s15678_s26 + $0x76c] ss:$16 sps:$4 sm:$0xff]  }
 0x3d5   : > { %9760 = vmatprep.subr.bf16.mxu0 %v13788_v10  ;;  %v13872_v10 = vld [vmem:[%s15678_s26 + $0xb64] ss:$16 sps:$4 sm:$0xff]  }
 0x3d7   : > { %10363 = vmatpush1.bf16.msra.mxu1 %v13789_v41  ;;  %v13873_v41 = vld [vmem:[%s15678_s26 + $0x768] ss:$16 sps:$4 sm:$0xff]  }
 0x3d8   : > { %9761 = vmatpush1.bf16.msra.mxu0 %v13786_v40  ;;  %10364 = vmatprep.subr.bf16.mxu1 %v13797_v54  ;;  %v13870_v40 = vld [vmem:[%s15678_s26 + $0xb60] ss:$16 sps:$4 sm:$0xff]   ;;  %v13881_v54 = vld [vmem:[%s15678_s26 + $0x78c] ss:$16 sps:$4 sm:$0xff]  }
 0x3d9   : > { %9762 = vmatprep.subr.bf16.mxu0 %v13794_v42  ;;  %v13878_v42 = vld [vmem:[%s15678_s26 + $0xb84] ss:$16 sps:$4 sm:$0xff]  }
 0x3db   : > { %10365 = vmatpush1.bf16.msra.mxu1 %v13795_v6  ;;  %v13879_v6 = vld [vmem:[%s15678_s26 + $0x788] ss:$16 sps:$4 sm:$0xff]  }
 0x3dc   : > { %9763 = vmatpush1.bf16.msra.mxu0 %v13792_v44  ;;  %10366 = vmatprep.subr.bf16.mxu1 %v13803_v47  ;;  %v13876_v44 = vld [vmem:[%s15678_s26 + $0xb80] ss:$16 sps:$4 sm:$0xff]   ;;  %v13887_v47 = vld [vmem:[%s15678_s26 + $0x7ac] ss:$16 sps:$4 sm:$0xff]  }
 0x3dd   : > { %9764 = vmatprep.subr.bf16.mxu0 %v13800_v57  ;;  %v13884_v57 = vld [vmem:[%s15678_s26 + $0xba4] ss:$16 sps:$4 sm:$0xff]  }
 0x3df   : > { %10367 = vmatpush1.bf16.msra.mxu1 %v13801_v50  ;;  %v13885_v50 = vld [vmem:[%s15678_s26 + $0x7a8] ss:$16 sps:$4 sm:$0xff]  }
 0x3e0   : > { %9765 = vmatpush1.bf16.msra.mxu0 %v13798_v48  ;;  %10379 = vmatprep.subr.bf16.mxu1 %v13809_v39  ;;  %v13882_v48 = vld [vmem:[%s15678_s26 + $0xba0] ss:$16 sps:$4 sm:$0xff]   ;;  %v13893_v39 = vld [vmem:[%s15678_s26 + $0x7cc] ss:$16 sps:$4 sm:$0xff]  }
 0x3e1   : > { %9777 = vmatprep.subr.bf16.mxu0 %v13806_v8  ;;  %v13890_v8 = vld [vmem:[%s15678_s26 + $0xbc4] ss:$16 sps:$4 sm:$0xff]  }
 0x3e2   : > { %10369 = vmatmul.mubr.bf16.vlgmr.msra.gmra.mrb[4].mxu1 %v15970_v45  ;;  %v13819_v45 = vld [vmem:[%s15678_s26 + $0x648] ss:$16 sps:$4 sm:$0xff]  }
 0x3e3   : > { %9767 = vmatmul.mubr.bf16.vlgmr.msra.gmra.mrb[0].mxu0 %v3355_v58  ;;  %10380 = vmatpush1.bf16.msra.mxu1 %v13807_v56  ;;  %v13891_v56 = vld [vmem:[%s15678_s26 + $0x7c8] ss:$16 sps:$4 sm:$0xff]   ;;  %v13896_v58 = vld [vmem:[%s15678_s26 + $0xbe4] ss:$16 sps:$4 sm:$0xff]  }
 0x3e4   : > { %9778 = vmatpush1.bf16.msra.mxu0 %v13804_v55  ;;  %10381 = vmatprep.subr.bf16.mxu1 %v13815_v53  ;;  %v13888_v55 = vld [vmem:[%s15678_s26 + $0xbc0] ss:$16 sps:$4 sm:$0xff]  }
 0x3e5   : > { %9779 = vmatprep.subr.bf16.mxu0 %v13812_v59  ;;  %9809 = vmatprep.mubr.bf16.mxu0 %v3358_v20  ;;  %v13899_v59 = vld [vmem:[%s15678_s26 + $0x7ec] ss:$16 sps:$4 sm:$0xff]   ;;  %v13894_v53 = vld [vmem:[%s15678_s26 + $0xbe0] ss:$16 sps:$4 sm:$0xff]   ;;  %v13897_v20 = vld [vmem:[%s15678_s26 + $0x7e8] ss:$16 sps:$4 sm:$0xff]  }
 0x3e6   : > { %10411 = vmatprep.mubr.bf16.mxu1 %v15977_v49  ;;  %v13830_v49 = vld [vmem:[%s15678_s26 + $0xa84] ss:$16 sps:$4 sm:$0xff]  }
 0x3e7   : > { %10382 = vmatpush1.bf16.msra.mxu1 %v13813_v61  ;;  %v13905_v61 = vld [vmem:[%s15678_s26 + $0x80c] ss:$16 sps:$4 sm:$0xff]  }
 0x3e8   : > { %9780 = vmatpush1.bf16.msra.mxu0 %v13810_v60  ;;  %10383 = vmatprep.subr.bf16.mxu1 %v13821_v63  ;;  %v13902_v60 = vld [vmem:[%s15678_s26 + $0xc04] ss:$16 sps:$4 sm:$0xff]   ;;  %v13903_v63 = vld [vmem:[%s15678_s26 + $0x808] ss:$16 sps:$4 sm:$0xff]  }
 0x3e9   : > { %9781 = vmatprep.subr.bf16.mxu0 %v13818_v62  ;;  %v13900_v62 = vld [vmem:[%s15678_s26 + $0xc00] ss:$16 sps:$4 sm:$0xff]  }
 0x3eb   : > { %10384 = vmatpush1.bf16.msra.mxu1 %v13819_v45  ;;  %v13908_v45 = vld [vmem:[%s15678_s26 + $0xc24] ss:$16 sps:$4 sm:$0xff]  }
 0x3ec   : > { %9782 = vmatpush1.bf16.msra.mxu0 %v13816_v1  ;;  %10385 = vmatprep.subr.bf16.mxu1 %v13827_v2  ;;  %v3357_v1 = vld [vmem:[#allocation2 + $0x50] sm:$0xff]  ;;  %v3360_v2 = vld [vmem:[#allocation2 + $0x68] sm:$0xff] }
 0x3ed   : > { %9783 = vmatprep.subr.bf16.mxu0 %v13824_v0  ;;  %v13911_v0 = vld [vmem:[%s15678_s26 + $0x82c] ss:$16 sps:$4 sm:$0xff]  }
 0x3ef   : > { %10386 = vmatpush1.bf16.msra.mxu1 %v13825_v3  ;;  %v13909_v3 = vld [vmem:[%s15678_s26 + $0x828] ss:$16 sps:$4 sm:$0xff]  }
 0x3f0   : > { %9784 = vmatpush1.bf16.msra.mxu0 %v13822_v26  ;;  %10387 = vmatprep.subr.bf16.mxu1 %v13833_v4  ;;  %v13906_v26 = vld [vmem:[%s15678_s26 + $0xc20] ss:$16 sps:$4 sm:$0xff]   ;;  %v13917_v4 = vld [vmem:[%s15678_s26 + $0x84c] ss:$16 sps:$4 sm:$0xff]  }
 0x3f1   : > { %9785 = vmatprep.subr.bf16.mxu0 %v13830_v49  ;;  %v13914_v49 = vld [vmem:[%s15678_s26 + $0xc44] ss:$16 sps:$4 sm:$0xff]  }
 0x3f3   : > { %10388 = vmatpush1.bf16.msra.mxu1 %v13831_v7  ;;  %v13920_v7 = vld [vmem:[%s15678_s26 + $0xc64] ss:$16 sps:$4 sm:$0xff]  }
 0x3f4   : > { %9786 = vmatpush1.bf16.msra.mxu0 %v13828_v5  ;;  %10389 = vmatprep.subr.bf16.mxu1 %v13839_v11  ;;  %v13915_v5 = vld [vmem:[%s15678_s26 + $0x848] ss:$16 sps:$4 sm:$0xff]   ;;  %v13918_v11 = vld [vmem:[%s15678_s26 + $0xc60] ss:$16 sps:$4 sm:$0xff]  }
 0x3f5   : > { %9787 = vmatprep.subr.bf16.mxu0 %v13836_v9  ;;  %v16138_v15 = vpop.f32.mrb[0].mxu1  ;;  %v13923_v9 = vld [vmem:[%s15678_s26 + $0x86c] ss:$16 sps:$4 sm:$0xff]  }
 0x3f6   : > { %v16140_v16 = vpop.f32.mrb[1].mxu1 }
 0x3f7   : > { %v16142_v17 = vpop.f32.mrb[2].mxu1  ;;  %10390 = vmatpush1.bf16.msra.mxu1 %v13837_v13  ;;  %v13929_v13 = vld [vmem:[%s15678_s26 + $0x88c] ss:$16 sps:$4 sm:$0xff]  }
 0x3f8   : > { %9788 = vmatpush1.bf16.msra.mxu0 %v13834_v12  ;;  %v16146_v21 = vpop.f32.mrb[3].mxu1  ;;  %10391 = vmatprep.subr.bf16.mxu1 %v13845_v28  ;;  %v13921_v12 = vld [vmem:[%s15678_s26 + $0x868] ss:$16 sps:$4 sm:$0xff]  }
 0x3f9   : > { %9789 = vmatprep.subr.bf16.mxu0 %v13842_v14  ;;  %v13924_v14 = vld [vmem:[%s15678_s26 + $0xc80] ss:$16 sps:$4 sm:$0xff]   ;;  %v13927_v28 = vld [vmem:[%s15678_s26 + $0x888] ss:$16 sps:$4 sm:$0xff]  }
 0x3fb   : > { %10392 = vmatpush1.bf16.msra.mxu1 %v13843_v19  ;;  %v13935_v19 = vld [vmem:[%s15678_s26 + $0x8ac] ss:$16 sps:$4 sm:$0xff]  }
 0x3fc   : > { %9790 = vmatpush1.bf16.msra.mxu0 %v13840_v18  ;;  %10393 = vmatprep.subr.bf16.mxu1 %v13851_v23  ;;  %v13932_v18 = vld [vmem:[%s15678_s26 + $0xca4] ss:$16 sps:$4 sm:$0xff]   ;;  %v13933_v23 = vld [vmem:[%s15678_s26 + $0x8a8] ss:$16 sps:$4 sm:$0xff]  }
 0x3fd   : > { %9791 = vmatprep.subr.bf16.mxu0 %v13848_v22  ;;  %v13930_v22 = vld [vmem:[%s15678_s26 + $0xca0] ss:$16 sps:$4 sm:$0xff]  }
 0x3ff   : > { %10394 = vmatpush1.bf16.msra.mxu1 %v13849_v24  ;;  %v13941_v24 = vld [vmem:[%s15678_s26 + $0x8cc] ss:$16 sps:$4 sm:$0xff]  }
 0x400   : > { %9792 = vmatpush1.bf16.msra.mxu0 %v13846_v46  ;;  %10395 = vmatprep.subr.bf16.mxu1 %v13857_v25  ;;  %v13938_v46 = vld [vmem:[%s15678_s26 + $0xcc4] ss:$16 sps:$4 sm:$0xff]   ;;  %v13939_v25 = vld [vmem:[%s15678_s26 + $0x8c8] ss:$16 sps:$4 sm:$0xff]  }
 0x401   : > { %9793 = vmatprep.subr.bf16.mxu0 %v13854_v43  ;;  %v13936_v43 = vld [vmem:[%s15678_s26 + $0xcc0] ss:$16 sps:$4 sm:$0xff]  }
 0x403   : > { %10396 = vmatpush1.bf16.msra.mxu1 %v13855_v29  ;;  %v13947_v29 = vld [vmem:[%s15678_s26 + $0x8ec] ss:$16 sps:$4 sm:$0xff]  }
 0x404   : > { %9794 = vmatpush1.bf16.msra.mxu0 %v13852_v27  ;;  %10397 = vmatprep.subr.bf16.mxu1 %v13863_v31  ;;  %v13944_v27 = vld [vmem:[%s15678_s26 + $0xce4] ss:$16 sps:$4 sm:$0xff]   ;;  %v13945_v31 = vld [vmem:[%s15678_s26 + $0x8e8] ss:$16 sps:$4 sm:$0xff]  }
 0x405   : > { %9795 = vmatprep.subr.bf16.mxu0 %v13860_v30  ;;  %v13942_v30 = vld [vmem:[%s15678_s26 + $0xce0] ss:$16 sps:$4 sm:$0xff]  }
 0x407   : > { %10398 = vmatpush1.bf16.msra.mxu1 %v13861_v33  ;;  %v13953_v33 = vld [vmem:[%s15678_s26 + $0x90c] ss:$16 sps:$4 sm:$0xff]  }
 0x408   : > { %9796 = vmatpush1.bf16.msra.mxu0 %v13858_v32  ;;  %10399 = vmatprep.subr.bf16.mxu1 %v13869_v35  ;;  %v13950_v32 = vld [vmem:[%s15678_s26 + $0xd04] ss:$16 sps:$4 sm:$0xff]   ;;  %v13951_v35 = vld [vmem:[%s15678_s26 + $0x908] ss:$16 sps:$4 sm:$0xff]  }
 0x409   : > { %9797 = vmatprep.subr.bf16.mxu0 %v13866_v34  ;;  %v13948_v34 = vld [vmem:[%s15678_s26 + $0xd00] ss:$16 sps:$4 sm:$0xff]  }
 0x40b   : > { %10400 = vmatpush1.bf16.msra.mxu1 %v13867_v37  ;;  %v13959_v37 = vld [vmem:[%s15678_s26 + $0x92c] ss:$16 sps:$4 sm:$0xff]  }
 0x40c   : > { %9798 = vmatpush1.bf16.msra.mxu0 %v13864_v36  ;;  %10401 = vmatprep.subr.bf16.mxu1 %v13875_v38  ;;  %v13956_v36 = vld [vmem:[%s15678_s26 + $0xd24] ss:$16 sps:$4 sm:$0xff]   ;;  %v13957_v38 = vld [vmem:[%s15678_s26 + $0x928] ss:$16 sps:$4 sm:$0xff]  }
 0x40d   : > { %9799 = vmatprep.subr.bf16.mxu0 %v13872_v10  ;;  %v13954_v10 = vld [vmem:[%s15678_s26 + $0xd20] ss:$16 sps:$4 sm:$0xff]  }
 0x40f   : > { %10402 = vmatpush1.bf16.msra.mxu1 %v13873_v41  ;;  %v13965_v41 = vld [vmem:[%s15678_s26 + $0x94c] ss:$16 sps:$4 sm:$0xff]  }
 0x410   : > { %9800 = vmatpush1.bf16.msra.mxu0 %v13870_v40  ;;  %10403 = vmatprep.subr.bf16.mxu1 %v13881_v54  ;;  %v13962_v40 = vld [vmem:[%s15678_s26 + $0xd44] ss:$16 sps:$4 sm:$0xff]   ;;  %v13963_v54 = vld [vmem:[%s15678_s26 + $0x948] ss:$16 sps:$4 sm:$0xff]  }
 0x411   : > { %9801 = vmatprep.subr.bf16.mxu0 %v13878_v42  ;;  %v13960_v42 = vld [vmem:[%s15678_s26 + $0xd40] ss:$16 sps:$4 sm:$0xff]  }
 0x413   : > { %10404 = vmatpush1.bf16.msra.mxu1 %v13879_v6  ;;  %v13971_v6 = vld [vmem:[%s15678_s26 + $0x96c] ss:$16 sps:$4 sm:$0xff]  }
 0x414   : > { %9802 = vmatpush1.bf16.msra.mxu0 %v13876_v44  ;;  %10405 = vmatprep.subr.bf16.mxu1 %v13887_v47  ;;  %v13968_v44 = vld [vmem:[%s15678_s26 + $0xd64] ss:$16 sps:$4 sm:$0xff]   ;;  %v13969_v47 = vld [vmem:[%s15678_s26 + $0x968] ss:$16 sps:$4 sm:$0xff]  }
 0x415   : > { %9803 = vmatprep.subr.bf16.mxu0 %v13884_v57  ;;  %v13966_v57 = vld [vmem:[%s15678_s26 + $0xd60] ss:$16 sps:$4 sm:$0xff]  }
 0x417   : > { %10406 = vmatpush1.bf16.msra.mxu1 %v13885_v50  ;;  %v13977_v50 = vld [vmem:[%s15678_s26 + $0x98c] ss:$16 sps:$4 sm:$0xff]  }
 0x418   : > { %9804 = vmatpush1.bf16.msra.mxu0 %v13882_v48  ;;  %10407 = vmatprep.subr.bf16.mxu1 %v13893_v39  ;;  %v13974_v48 = vld [vmem:[%s15678_s26 + $0xd84] ss:$16 sps:$4 sm:$0xff]   ;;  %v13975_v39 = vld [vmem:[%s15678_s26 + $0x988] ss:$16 sps:$4 sm:$0xff]  }
 0x419   : > { %9805 = vmatprep.subr.bf16.mxu0 %v13890_v8  ;;  %v13972_v8 = vld [vmem:[%s15678_s26 + $0xd80] ss:$16 sps:$4 sm:$0xff]  }
 0x41b   : > { %10408 = vmatpush1.bf16.msra.mxu1 %v13891_v56  ;;  %v13983_v56 = vld [vmem:[%s15678_s26 + $0x9ac] ss:$16 sps:$4 sm:$0xff]  }
 0x41c   : > { %9806 = vmatpush1.bf16.msra.mxu0 %v13888_v55  ;;  %10409 = vmatprep.subr.bf16.mxu1 %v13899_v59  ;;  %v13980_v55 = vld [vmem:[%s15678_s26 + $0xda4] ss:$16 sps:$4 sm:$0xff]   ;;  %v13981_v59 = vld [vmem:[%s15678_s26 + $0x9a8] ss:$16 sps:$4 sm:$0xff]  }
 0x41d   : > { %9807 = vmatprep.subr.bf16.mxu0 %v13896_v58  ;;  %v13978_v58 = vld [vmem:[%s15678_s26 + $0xda0] ss:$16 sps:$4 sm:$0xff]  }
 0x41f   : > { %10410 = vmatpush1.bf16.msra.mxu1 %v13897_v20  ;;  %v13989_v20 = vld [vmem:[%s15678_s26 + $0x9cc] ss:$16 sps:$4 sm:$0xff]  }
 0x420   : > { %9808 = vmatpush1.bf16.msra.mxu0 %v13894_v53  ;;  %10422 = vmatprep.subr.bf16.mxu1 %v13905_v61  ;;  %v13986_v53 = vld [vmem:[%s15678_s26 + $0xdc4] ss:$16 sps:$4 sm:$0xff]   ;;  %v13987_v61 = vld [vmem:[%s15678_s26 + $0x9c8] ss:$16 sps:$4 sm:$0xff]  }
 0x421   : > { %9820 = vmatprep.subr.bf16.mxu0 %v13902_v60  ;;  %v13984_v60 = vld [vmem:[%s15678_s26 + $0xdc0] ss:$16 sps:$4 sm:$0xff]  }
 0x422   : > { %10412 = vmatmul.mubr.bf16.vlgmr.msra.gmra.mrb[4].mxu1 %v16042_v51  ;;  %v13912_v51 = vld [vmem:[%s15678_s26 + $0xc40] ss:$16 sps:$4 sm:$0xff]  }
 0x423   : > { %9810 = vmatmul.mubr.bf16.vlgmr.msra.gmra.mrb[0].mxu0 %v3357_v1  ;;  %10423 = vmatpush1.bf16.msra.mxu1 %v13903_v63  ;;  %v13995_v63 = vld [vmem:[%s15678_s26 + $0x9ec] ss:$16 sps:$4 sm:$0xff]   ;;  %v13990_v1 = vld [vmem:[%s15678_s26 + $0xde0] ss:$16 sps:$4 sm:$0xff]  }
 0x424   : > { %9821 = vmatpush1.bf16.msra.mxu0 %v13900_v62  ;;  %10424 = vmatprep.subr.bf16.mxu1 %v13911_v0  ;;  %v13992_v62 = vld [vmem:[%s15678_s26 + $0xde4] ss:$16 sps:$4 sm:$0xff]  }
 0x425   : > { %9822 = vmatprep.subr.bf16.mxu0 %v13908_v45  ;;  %9852 = vmatprep.mubr.bf16.mxu0 %v3360_v2  ;;  %v13993_v45 = vld [vmem:[%s15678_s26 + $0x9e8] ss:$16 sps:$4 sm:$0xff]   ;;  %v13998_v0 = vld [vmem:[%s15678_s26 + $0xe04] ss:$16 sps:$4 sm:$0xff]   ;;  %v14001_v2 = vld [vmem:[%s15678_s26 + $0xa0c] ss:$16 sps:$4 sm:$0xff]  }
 0x426   : > { %10454 = vmatprep.mubr.bf16.mxu1 %v16049_v52  ;;  %v13926_v52 = vld [vmem:[%s15678_s26 + $0xc84] ss:$16 sps:$4 sm:$0xff]  }
 0x427   : > { %10425 = vmatpush1.bf16.msra.mxu1 %v13909_v3  ;;  %v13999_v3 = vld [vmem:[%s15678_s26 + $0xa08] ss:$16 sps:$4 sm:$0xff]  }
 0x428   : > { %9823 = vmatpush1.bf16.msra.mxu0 %v13906_v26  ;;  %10426 = vmatprep.subr.bf16.mxu1 %v13917_v4  ;;  %v13996_v26 = vld [vmem:[%s15678_s26 + $0xe00] ss:$16 sps:$4 sm:$0xff]   ;;  %v14004_v4 = vld [vmem:[%s15678_s26 + $0xe24] ss:$16 sps:$4 sm:$0xff]  }
 0x429   : > { %9824 = vmatprep.subr.bf16.mxu0 %v13914_v49  ;;  %v3359_v49 = vld [vmem:[#allocation2 + $0x60] sm:$0xff] }
 0x42b   : > { %10427 = vmatpush1.bf16.msra.mxu1 %v13915_v5  ;;  %v3362_v5 = vld [vmem:[#allocation2 + $0x78] sm:$0xff] }
 0x42c   : > { %9825 = vmatpush1.bf16.msra.mxu0 %v13912_v51  ;;  %10428 = vmatprep.subr.bf16.mxu1 %v13923_v9  ;;  %v14007_v51 = vld [vmem:[%s15678_s26 + $0xa2c] ss:$16 sps:$4 sm:$0xff]   ;;  %v14002_v9 = vld [vmem:[%s15678_s26 + $0xe20] ss:$16 sps:$4 sm:$0xff]  }
 0x42d   : > { %9826 = vmatprep.subr.bf16.mxu0 %v13920_v7  ;;  %v15068_v7 = vld [vmem:[#allocation2 + $0x40] sm:$0xff] }
 0x42f   : > { %10429 = vmatpush1.bf16.msra.mxu1 %v13921_v12  ;;  %v14010_v12 = vld [vmem:[%s15678_s26 + $0xe44] ss:$16 sps:$4 sm:$0xff]  }
 0x430   : > { %9827 = vmatpush1.bf16.msra.mxu0 %v13918_v11  ;;  %10430 = vmatprep.subr.bf16.mxu1 %v13929_v13  ;;  %v14005_v11 = vld [vmem:[%s15678_s26 + $0xa28] ss:$16 sps:$4 sm:$0xff]   ;;  %v15069_v13 = vld [vmem:[#allocation2 + $0x58] sm:$0xff] }
 0x431   : > { %9828 = vmatprep.subr.bf16.mxu0 %v13926_v52  ;;  %v14013_v52 = vld [vmem:[%s15678_s26 + $0xa4c] ss:$16 sps:$4 sm:$0xff]  }
 0x433   : > { %10431 = vmatpush1.bf16.msra.mxu1 %v13927_v28  ;;  %v14011_v28 = vld [vmem:[%s15678_s26 + $0xa48] ss:$16 sps:$4 sm:$0xff]  }
 0x434   : > { %9829 = vmatpush1.bf16.msra.mxu0 %v13924_v14  ;;  %10432 = vmatprep.subr.bf16.mxu1 %v13935_v19  ;;  %v14008_v14 = vld [vmem:[%s15678_s26 + $0xe40] ss:$16 sps:$4 sm:$0xff]   ;;  %v14019_v19 = vld [vmem:[%s15678_s26 + $0xa6c] ss:$16 sps:$4 sm:$0xff]  }
 0x435   : > { %9830 = vmatprep.subr.bf16.mxu0 %v13932_v18  ;;  %v14016_v18 = vld [vmem:[%s15678_s26 + $0xe64] ss:$16 sps:$4 sm:$0xff]  }
 0x437   : > { %10433 = vmatpush1.bf16.msra.mxu1 %v13933_v23  ;;  %v14017_v23 = vld [vmem:[%s15678_s26 + $0xa68] ss:$16 sps:$4 sm:$0xff]  }
 0x438   : > { %9831 = vmatpush1.bf16.msra.mxu0 %v13930_v22  ;;  %10434 = vmatprep.subr.bf16.mxu1 %v13941_v24  ;;  %v14014_v22 = vld [vmem:[%s15678_s26 + $0xe60] ss:$16 sps:$4 sm:$0xff]   ;;  %v14025_v24 = vld [vmem:[%s15678_s26 + $0xa8c] ss:$16 sps:$4 sm:$0xff]  }
 0x439   : > { %9832 = vmatprep.subr.bf16.mxu0 %v13938_v46  ;;  %v14022_v46 = vld [vmem:[%s15678_s26 + $0xe84] ss:$16 sps:$4 sm:$0xff]  }
 0x43b   : > { %10435 = vmatpush1.bf16.msra.mxu1 %v13939_v25  ;;  %v14023_v25 = vld [vmem:[%s15678_s26 + $0xa88] ss:$16 sps:$4 sm:$0xff]  }
 0x43c   : > { %9833 = vmatpush1.bf16.msra.mxu0 %v13936_v43  ;;  %10436 = vmatprep.subr.bf16.mxu1 %v13947_v29  ;;  %v14020_v43 = vld [vmem:[%s15678_s26 + $0xe80] ss:$16 sps:$4 sm:$0xff]   ;;  %v14031_v29 = vld [vmem:[%s15678_s26 + $0xaac] ss:$16 sps:$4 sm:$0xff]  }
 0x43d   : > { %9834 = vmatprep.subr.bf16.mxu0 %v13944_v27  ;;  %v14028_v27 = vld [vmem:[%s15678_s26 + $0xea4] ss:$16 sps:$4 sm:$0xff]  }
 0x43f   : > { %10437 = vmatpush1.bf16.msra.mxu1 %v13945_v31  ;;  %v14029_v31 = vld [vmem:[%s15678_s26 + $0xaa8] ss:$16 sps:$4 sm:$0xff]  }
 0x440   : > { %9835 = vmatpush1.bf16.msra.mxu0 %v13942_v30  ;;  %10438 = vmatprep.subr.bf16.mxu1 %v13953_v33  ;;  %v14026_v30 = vld [vmem:[%s15678_s26 + $0xea0] ss:$16 sps:$4 sm:$0xff]   ;;  %v14037_v33 = vld [vmem:[%s15678_s26 + $0xacc] ss:$16 sps:$4 sm:$0xff]  }
 0x441   : > { %9836 = vmatprep.subr.bf16.mxu0 %v13950_v32  ;;  %v14034_v32 = vld [vmem:[%s15678_s26 + $0xec4] ss:$16 sps:$4 sm:$0xff]  }
 0x443   : > { %10439 = vmatpush1.bf16.msra.mxu1 %v13951_v35  ;;  %v14035_v35 = vld [vmem:[%s15678_s26 + $0xac8] ss:$16 sps:$4 sm:$0xff]  }
 0x444   : > { %9837 = vmatpush1.bf16.msra.mxu0 %v13948_v34  ;;  %10440 = vmatprep.subr.bf16.mxu1 %v13959_v37  ;;  %v14032_v34 = vld [vmem:[%s15678_s26 + $0xec0] ss:$16 sps:$4 sm:$0xff]   ;;  %v14043_v37 = vld [vmem:[%s15678_s26 + $0xaec] ss:$16 sps:$4 sm:$0xff]  }
 0x445   : > { %9838 = vmatprep.subr.bf16.mxu0 %v13956_v36  ;;  %v14040_v36 = vld [vmem:[%s15678_s26 + $0xee4] ss:$16 sps:$4 sm:$0xff]  }
 0x447   : > { %10441 = vmatpush1.bf16.msra.mxu1 %v13957_v38  ;;  %v14041_v38 = vld [vmem:[%s15678_s26 + $0xae8] ss:$16 sps:$4 sm:$0xff]  }
 0x448   : > { %9839 = vmatpush1.bf16.msra.mxu0 %v13954_v10  ;;  %10442 = vmatprep.subr.bf16.mxu1 %v13965_v41  ;;  %v14038_v10 = vld [vmem:[%s15678_s26 + $0xee0] ss:$16 sps:$4 sm:$0xff]   ;;  %v14049_v41 = vld [vmem:[%s15678_s26 + $0xb0c] ss:$16 sps:$4 sm:$0xff]  }
 0x449   : > { %9840 = vmatprep.subr.bf16.mxu0 %v13962_v40  ;;  %v14046_v40 = vld [vmem:[%s15678_s26 + $0xf04] ss:$16 sps:$4 sm:$0xff]  }
 0x44b   : > { %10443 = vmatpush1.bf16.msra.mxu1 %v13963_v54  ;;  %v14047_v54 = vld [vmem:[%s15678_s26 + $0xb08] ss:$16 sps:$4 sm:$0xff]  }
 0x44c   : > { %9841 = vmatpush1.bf16.msra.mxu0 %v13960_v42  ;;  %10444 = vmatprep.subr.bf16.mxu1 %v13971_v6  ;;  %v14044_v42 = vld [vmem:[%s15678_s26 + $0xf00] ss:$16 sps:$4 sm:$0xff]   ;;  %v14055_v6 = vld [vmem:[%s15678_s26 + $0xb2c] ss:$16 sps:$4 sm:$0xff]  }
 0x44d   : > { %9842 = vmatprep.subr.bf16.mxu0 %v13968_v44  ;;  %v14052_v44 = vld [vmem:[%s15678_s26 + $0xf24] ss:$16 sps:$4 sm:$0xff]  }
 0x44f   : > { %10445 = vmatpush1.bf16.msra.mxu1 %v13969_v47  ;;  %v14053_v47 = vld [vmem:[%s15678_s26 + $0xb28] ss:$16 sps:$4 sm:$0xff]  }
 0x450   : > { %9843 = vmatpush1.bf16.msra.mxu0 %v13966_v57  ;;  %10446 = vmatprep.subr.bf16.mxu1 %v13977_v50  ;;  %v14050_v57 = vld [vmem:[%s15678_s26 + $0xf20] ss:$16 sps:$4 sm:$0xff]   ;;  %v14061_v50 = vld [vmem:[%s15678_s26 + $0xb4c] ss:$16 sps:$4 sm:$0xff]  }
 0x451   : > { %9844 = vmatprep.subr.bf16.mxu0 %v13974_v48  ;;  %v14058_v48 = vld [vmem:[%s15678_s26 + $0xf44] ss:$16 sps:$4 sm:$0xff]  }
 0x453   : > { %10447 = vmatpush1.bf16.msra.mxu1 %v13975_v39  ;;  %v14059_v39 = vld [vmem:[%s15678_s26 + $0xb48] ss:$16 sps:$4 sm:$0xff]  }
 0x454   : > { %9845 = vmatpush1.bf16.msra.mxu0 %v13972_v8  ;;  %10448 = vmatprep.subr.bf16.mxu1 %v13983_v56  ;;  %v14056_v8 = vld [vmem:[%s15678_s26 + $0xf40] ss:$16 sps:$4 sm:$0xff]   ;;  %v14067_v56 = vld [vmem:[%s15678_s26 + $0xb6c] ss:$16 sps:$4 sm:$0xff]  }
 0x455   : > { %9846 = vmatprep.subr.bf16.mxu0 %v13980_v55  ;;  %v14064_v55 = vld [vmem:[%s15678_s26 + $0xf64] ss:$16 sps:$4 sm:$0xff]  }
 0x457   : > { %10449 = vmatpush1.bf16.msra.mxu1 %v13981_v59  ;;  %v14065_v59 = vld [vmem:[%s15678_s26 + $0xb68] ss:$16 sps:$4 sm:$0xff]  }
 0x458   : > { %9847 = vmatpush1.bf16.msra.mxu0 %v13978_v58  ;;  %10450 = vmatprep.subr.bf16.mxu1 %v13989_v20  ;;  %v14062_v58 = vld [vmem:[%s15678_s26 + $0xf60] ss:$16 sps:$4 sm:$0xff]   ;;  %v14073_v20 = vld [vmem:[%s15678_s26 + $0xb8c] ss:$16 sps:$4 sm:$0xff]  }
 0x459   : > { %9848 = vmatprep.subr.bf16.mxu0 %v13986_v53  ;;  %v14070_v53 = vld [vmem:[%s15678_s26 + $0xf84] ss:$16 sps:$4 sm:$0xff]  }
 0x45b   : > { %10451 = vmatpush1.bf16.msra.mxu1 %v13987_v61  ;;  %v14071_v61 = vld [vmem:[%s15678_s26 + $0xb88] ss:$16 sps:$4 sm:$0xff]  }
 0x45c   : > { %9849 = vmatpush1.bf16.msra.mxu0 %v13984_v60  ;;  %10452 = vmatprep.subr.bf16.mxu1 %v13995_v63  ;;  %v14068_v60 = vld [vmem:[%s15678_s26 + $0xf80] ss:$16 sps:$4 sm:$0xff]   ;;  %v14079_v63 = vld [vmem:[%s15678_s26 + $0xbac] ss:$16 sps:$4 sm:$0xff]  }
 0x45d   : > { %9850 = vmatprep.subr.bf16.mxu0 %v13992_v62  ;;  %v14076_v62 = vld [vmem:[%s15678_s26 + $0xfa4] ss:$16 sps:$4 sm:$0xff]  }
 0x45f   : > { %10453 = vmatpush1.bf16.msra.mxu1 %v13993_v45  ;;  %v14077_v45 = vld [vmem:[%s15678_s26 + $0xba8] ss:$16 sps:$4 sm:$0xff]  }
 0x460   : > { %9851 = vmatpush1.bf16.msra.mxu0 %v13990_v1  ;;  %10465 = vmatprep.subr.bf16.mxu1 %v14001_v2  ;;  %v14074_v1 = vld [vmem:[%s15678_s26 + $0xfa0] ss:$16 sps:$4 sm:$0xff]   ;;  %v14085_v2 = vld [vmem:[%s15678_s26 + $0xbcc] ss:$16 sps:$4 sm:$0xff]  }
 0x461   : > { %9863 = vmatprep.subr.bf16.mxu0 %v13998_v0  ;;  %v14082_v0 = vld [vmem:[%s15678_s26 + $0xfc4] ss:$16 sps:$4 sm:$0xff]  }
 0x462   : > { %10455 = vmatmul.mubr.bf16.vlgmr.msra.gmra.mrb[4].mxu1 %v15068_v7  ;;  %v14094_v7 = vld [vmem:[%s15678_s26 + $0x1004] ss:$16 sps:$4 sm:$0xff]  }
 0x463   : > { %9853 = vmatmul.mubr.bf16.vlgmr.msra.gmra.mrb[0].mxu0 %v3359_v49  ;;  %10466 = vmatpush1.bf16.msra.mxu1 %v13999_v3  ;;  %v14083_v3 = vld [vmem:[%s15678_s26 + $0xbc8] ss:$16 sps:$4 sm:$0xff]   ;;  %v14088_v49 = vld [vmem:[%s15678_s26 + $0xfe4] ss:$16 sps:$4 sm:$0xff]  }
 0x464   : > { %9864 = vmatpush1.bf16.msra.mxu0 %v13996_v26  ;;  %10467 = vmatprep.subr.bf16.mxu1 %v14007_v51  ;;  %v14080_v26 = vld [vmem:[%s15678_s26 + $0xfc0] ss:$16 sps:$4 sm:$0xff]  }
 0x465   : > { %9865 = vmatprep.subr.bf16.mxu0 %v14004_v4  ;;  %9895 = vmatprep.mubr.bf16.mxu0 %v3362_v5  ;;  %v14091_v4 = vld [vmem:[%s15678_s26 + $0xbec] ss:$16 sps:$4 sm:$0xff]   ;;  %v14086_v51 = vld [vmem:[%s15678_s26 + $0xfe0] ss:$16 sps:$4 sm:$0xff]   ;;  %v14089_v5 = vld [vmem:[%s15678_s26 + $0xbe8] ss:$16 sps:$4 sm:$0xff]  }
 0x466   : > { %10497 = vmatprep.mubr.bf16.mxu1 %v15069_v13  ;;  %v14100_v13 = vld [vmem:[%s15678_s26 + $0x1024] ss:$16 sps:$4 sm:$0xff]  }
 0x467   : > { %10468 = vmatpush1.bf16.msra.mxu1 %v14005_v11  ;;  %v14092_v11 = vld [vmem:[%s15678_s26 + $0x1000] ss:$16 sps:$4 sm:$0xff]  }
 0x468   : > { %9866 = vmatpush1.bf16.msra.mxu0 %v14002_v9  ;;  %10469 = vmatprep.subr.bf16.mxu1 %v14013_v52  ;;  %v14097_v9 = vld [vmem:[%s15678_s26 + $0xc0c] ss:$16 sps:$4 sm:$0xff]  }
 0x469   : > { %9867 = vmatprep.subr.bf16.mxu0 %v14010_v12  ;;  %v14095_v12 = vld [vmem:[%s15678_s26 + $0xc08] ss:$16 sps:$4 sm:$0xff]  }
 0x46a   : > { %v3361_v52 = vld [vmem:[#allocation2 + $0x70] sm:$0xff] }
 0x46b   : > { %10470 = vmatpush1.bf16.msra.mxu1 %v14011_v28  ;;  %v3364_v28 = vld [vmem:[#allocation2 + $0x88] sm:$0xff] }
 0x46c   : > { %9868 = vmatpush1.bf16.msra.mxu0 %v14008_v14  ;;  %10471 = vmatprep.subr.bf16.mxu1 %v14019_v19  ;;  %v14103_v14 = vld [vmem:[%s15678_s26 + $0xc2c] ss:$16 sps:$4 sm:$0xff]   ;;  %v14098_v19 = vld [vmem:[%s15678_s26 + $0x1020] ss:$16 sps:$4 sm:$0xff]  }
 0x46d   : > { %9869 = vmatprep.subr.bf16.mxu0 %v14016_v18  ;;  %v15070_v18 = vld [vmem:[#allocation2 + $0x50] sm:$0xff] }
 0x46f   : > { %10472 = vmatpush1.bf16.msra.mxu1 %v14017_v23  ;;  %v14106_v23 = vld [vmem:[%s15678_s26 + $0x1044] ss:$16 sps:$4 sm:$0xff]  }
 0x470   : > { %9870 = vmatpush1.bf16.msra.mxu0 %v14014_v22  ;;  %10473 = vmatprep.subr.bf16.mxu1 %v14025_v24  ;;  %v14101_v22 = vld [vmem:[%s15678_s26 + $0xc28] ss:$16 sps:$4 sm:$0xff]   ;;  %v15071_v24 = vld [vmem:[#allocation2 + $0x68] sm:$0xff] }
 0x471   : > { %9871 = vmatprep.subr.bf16.mxu0 %v14022_v46  ;;  %v14109_v46 = vld [vmem:[%s15678_s26 + $0xc4c] ss:$16 sps:$4 sm:$0xff]  }
 0x473   : > { %10474 = vmatpush1.bf16.msra.mxu1 %v14023_v25  ;;  %v14107_v25 = vld [vmem:[%s15678_s26 + $0xc48] ss:$16 sps:$4 sm:$0xff]  }
 0x474   : > { %9872 = vmatpush1.bf16.msra.mxu0 %v14020_v43  ;;  %10475 = vmatprep.subr.bf16.mxu1 %v14031_v29  ;;  %v14104_v43 = vld [vmem:[%s15678_s26 + $0x1040] ss:$16 sps:$4 sm:$0xff]   ;;  %v14115_v29 = vld [vmem:[%s15678_s26 + $0xc6c] ss:$16 sps:$4 sm:$0xff]  }
 0x475   : > { %9873 = vmatprep.subr.bf16.mxu0 %v14028_v27  ;;  %v14112_v27 = vld [vmem:[%s15678_s26 + $0x1064] ss:$16 sps:$4 sm:$0xff]  }
 0x477   : > { %10476 = vmatpush1.bf16.msra.mxu1 %v14029_v31  ;;  %v14113_v31 = vld [vmem:[%s15678_s26 + $0xc68] ss:$16 sps:$4 sm:$0xff]  }
 0x478   : > { %9874 = vmatpush1.bf16.msra.mxu0 %v14026_v30  ;;  %10477 = vmatprep.subr.bf16.mxu1 %v14037_v33  ;;  %v14110_v30 = vld [vmem:[%s15678_s26 + $0x1060] ss:$16 sps:$4 sm:$0xff]   ;;  %v14121_v33 = vld [vmem:[%s15678_s26 + $0xc8c] ss:$16 sps:$4 sm:$0xff]  }
 0x479   : > { %9875 = vmatprep.subr.bf16.mxu0 %v14034_v32  ;;  %v14118_v32 = vld [vmem:[%s15678_s26 + $0x1084] ss:$16 sps:$4 sm:$0xff]  }
 0x47b   : > { %10478 = vmatpush1.bf16.msra.mxu1 %v14035_v35  ;;  %v14119_v35 = vld [vmem:[%s15678_s26 + $0xc88] ss:$16 sps:$4 sm:$0xff]  }
 0x47c   : > { %9876 = vmatpush1.bf16.msra.mxu0 %v14032_v34  ;;  %10479 = vmatprep.subr.bf16.mxu1 %v14043_v37  ;;  %v14116_v34 = vld [vmem:[%s15678_s26 + $0x1080] ss:$16 sps:$4 sm:$0xff]   ;;  %v14127_v37 = vld [vmem:[%s15678_s26 + $0xcac] ss:$16 sps:$4 sm:$0xff]  }
 0x47d   : > { %9877 = vmatprep.subr.bf16.mxu0 %v14040_v36  ;;  %v14124_v36 = vld [vmem:[%s15678_s26 + $0x10a4] ss:$16 sps:$4 sm:$0xff]  }
 0x47f   : > { %10480 = vmatpush1.bf16.msra.mxu1 %v14041_v38  ;;  %v14125_v38 = vld [vmem:[%s15678_s26 + $0xca8] ss:$16 sps:$4 sm:$0xff]  }
 0x480   : > { %9878 = vmatpush1.bf16.msra.mxu0 %v14038_v10  ;;  %10481 = vmatprep.subr.bf16.mxu1 %v14049_v41  ;;  %v14122_v10 = vld [vmem:[%s15678_s26 + $0x10a0] ss:$16 sps:$4 sm:$0xff]   ;;  %v14133_v41 = vld [vmem:[%s15678_s26 + $0xccc] ss:$16 sps:$4 sm:$0xff]  }
 0x481   : > { %9879 = vmatprep.subr.bf16.mxu0 %v14046_v40  ;;  %v14130_v40 = vld [vmem:[%s15678_s26 + $0x10c4] ss:$16 sps:$4 sm:$0xff]  }
 0x483   : > { %10482 = vmatpush1.bf16.msra.mxu1 %v14047_v54  ;;  %v14131_v54 = vld [vmem:[%s15678_s26 + $0xcc8] ss:$16 sps:$4 sm:$0xff]  }
 0x484   : > { %9880 = vmatpush1.bf16.msra.mxu0 %v14044_v42  ;;  %10483 = vmatprep.subr.bf16.mxu1 %v14055_v6  ;;  %v14128_v42 = vld [vmem:[%s15678_s26 + $0x10c0] ss:$16 sps:$4 sm:$0xff]   ;;  %v14139_v6 = vld [vmem:[%s15678_s26 + $0xcec] ss:$16 sps:$4 sm:$0xff]  }
 0x485   : > { %9881 = vmatprep.subr.bf16.mxu0 %v14052_v44  ;;  %v14136_v44 = vld [vmem:[%s15678_s26 + $0x10e4] ss:$16 sps:$4 sm:$0xff]  }
 0x487   : > { %10484 = vmatpush1.bf16.msra.mxu1 %v14053_v47  ;;  %v14137_v47 = vld [vmem:[%s15678_s26 + $0xce8] ss:$16 sps:$4 sm:$0xff]  }
 0x488   : > { %9882 = vmatpush1.bf16.msra.mxu0 %v14050_v57  ;;  %10485 = vmatprep.subr.bf16.mxu1 %v14061_v50  ;;  %v14134_v57 = vld [vmem:[%s15678_s26 + $0x10e0] ss:$16 sps:$4 sm:$0xff]   ;;  %v14145_v50 = vld [vmem:[%s15678_s26 + $0xd0c] ss:$16 sps:$4 sm:$0xff]  }
 0x489   : > { %9883 = vmatprep.subr.bf16.mxu0 %v14058_v48  ;;  %v14142_v48 = vld [vmem:[%s15678_s26 + $0x1104] ss:$16 sps:$4 sm:$0xff]  }
 0x48b   : > { %10486 = vmatpush1.bf16.msra.mxu1 %v14059_v39  ;;  %v14143_v39 = vld [vmem:[%s15678_s26 + $0xd08] ss:$16 sps:$4 sm:$0xff]  }
 0x48c   : > { %9884 = vmatpush1.bf16.msra.mxu0 %v14056_v8  ;;  %10487 = vmatprep.subr.bf16.mxu1 %v14067_v56  ;;  %v14140_v8 = vld [vmem:[%s15678_s26 + $0x1100] ss:$16 sps:$4 sm:$0xff]   ;;  %v14151_v56 = vld [vmem:[%s15678_s26 + $0xd2c] ss:$16 sps:$4 sm:$0xff]  }
 0x48d   : > { %9885 = vmatprep.subr.bf16.mxu0 %v14064_v55  ;;  %v14148_v55 = vld [vmem:[%s15678_s26 + $0x1124] ss:$16 sps:$4 sm:$0xff]  }
 0x48f   : > { %10488 = vmatpush1.bf16.msra.mxu1 %v14065_v59  ;;  %v14149_v59 = vld [vmem:[%s15678_s26 + $0xd28] ss:$16 sps:$4 sm:$0xff]  }
 0x490   : > { %9886 = vmatpush1.bf16.msra.mxu0 %v14062_v58  ;;  %10489 = vmatprep.subr.bf16.mxu1 %v14073_v20  ;;  %v14146_v58 = vld [vmem:[%s15678_s26 + $0x1120] ss:$16 sps:$4 sm:$0xff]   ;;  %v14157_v20 = vld [vmem:[%s15678_s26 + $0xd4c] ss:$16 sps:$4 sm:$0xff]  }
 0x491   : > { %9887 = vmatprep.subr.bf16.mxu0 %v14070_v53  ;;  %v14154_v53 = vld [vmem:[%s15678_s26 + $0x1144] ss:$16 sps:$4 sm:$0xff]  }
 0x493   : > { %10490 = vmatpush1.bf16.msra.mxu1 %v14071_v61  ;;  %v14155_v61 = vld [vmem:[%s15678_s26 + $0xd48] ss:$16 sps:$4 sm:$0xff]  }
 0x494   : > { %9888 = vmatpush1.bf16.msra.mxu0 %v14068_v60  ;;  %10491 = vmatprep.subr.bf16.mxu1 %v14079_v63  ;;  %v14152_v60 = vld [vmem:[%s15678_s26 + $0x1140] ss:$16 sps:$4 sm:$0xff]   ;;  %v14163_v63 = vld [vmem:[%s15678_s26 + $0xd6c] ss:$16 sps:$4 sm:$0xff]  }
 0x495   : > { %9889 = vmatprep.subr.bf16.mxu0 %v14076_v62  ;;  %v14160_v62 = vld [vmem:[%s15678_s26 + $0x1164] ss:$16 sps:$4 sm:$0xff]  }
 0x497   : > { %10492 = vmatpush1.bf16.msra.mxu1 %v14077_v45  ;;  %v14161_v45 = vld [vmem:[%s15678_s26 + $0xd68] ss:$16 sps:$4 sm:$0xff]  }
 0x498   : > { %9890 = vmatpush1.bf16.msra.mxu0 %v14074_v1  ;;  %10493 = vmatprep.subr.bf16.mxu1 %v14085_v2  ;;  %v14158_v1 = vld [vmem:[%s15678_s26 + $0x1160] ss:$16 sps:$4 sm:$0xff]   ;;  %v14169_v2 = vld [vmem:[%s15678_s26 + $0xd8c] ss:$16 sps:$4 sm:$0xff]  }
 0x499   : > { %9891 = vmatprep.subr.bf16.mxu0 %v14082_v0  ;;  %v14166_v0 = vld [vmem:[%s15678_s26 + $0x1184] ss:$16 sps:$4 sm:$0xff]  }
 0x49b   : > { %10494 = vmatpush1.bf16.msra.mxu1 %v14083_v3  ;;  %v14167_v3 = vld [vmem:[%s15678_s26 + $0xd88] ss:$16 sps:$4 sm:$0xff]  }
 0x49c   : > { %9892 = vmatpush1.bf16.msra.mxu0 %v14080_v26  ;;  %10495 = vmatprep.subr.bf16.mxu1 %v14091_v4  ;;  %v14164_v26 = vld [vmem:[%s15678_s26 + $0x1180] ss:$16 sps:$4 sm:$0xff]   ;;  %v14175_v4 = vld [vmem:[%s15678_s26 + $0xdac] ss:$16 sps:$4 sm:$0xff]  }
 0x49d   : > { %9893 = vmatprep.subr.bf16.mxu0 %v14088_v49  ;;  %v14172_v49 = vld [vmem:[%s15678_s26 + $0x11a4] ss:$16 sps:$4 sm:$0xff]  }
 0x49f   : > { %10496 = vmatpush1.bf16.msra.mxu1 %v14089_v5  ;;  %v14173_v5 = vld [vmem:[%s15678_s26 + $0xda8] ss:$16 sps:$4 sm:$0xff]  }
 0x4a0   : > { %9894 = vmatpush1.bf16.msra.mxu0 %v14086_v51  ;;  %10508 = vmatprep.subr.bf16.mxu1 %v14097_v9  ;;  %v14170_v51 = vld [vmem:[%s15678_s26 + $0x11a0] ss:$16 sps:$4 sm:$0xff]   ;;  %v14181_v9 = vld [vmem:[%s15678_s26 + $0xdcc] ss:$16 sps:$4 sm:$0xff]  }
 0x4a1   : > { %9906 = vmatprep.subr.bf16.mxu0 %v14094_v7  ;;  %v14178_v7 = vld [vmem:[%s15678_s26 + $0x11c4] ss:$16 sps:$4 sm:$0xff]  }
 0x4a2   : > { %10498 = vmatmul.mubr.bf16.vlgmr.msra.gmra.mrb[4].mxu1 %v15070_v18  ;;  %v14190_v18 = vld [vmem:[%s15678_s26 + $0x1204] ss:$16 sps:$4 sm:$0xff]  }
 0x4a3   : > { %9896 = vmatmul.mubr.bf16.vlgmr.msra.gmra.mrb[0].mxu0 %v3361_v52  ;;  %10509 = vmatpush1.bf16.msra.mxu1 %v14095_v12  ;;  %v14179_v12 = vld [vmem:[%s15678_s26 + $0xdc8] ss:$16 sps:$4 sm:$0xff]   ;;  %v14184_v52 = vld [vmem:[%s15678_s26 + $0x11e4] ss:$16 sps:$4 sm:$0xff]  }
 0x4a4   : > { %9907 = vmatpush1.bf16.msra.mxu0 %v14092_v11  ;;  %10510 = vmatprep.subr.bf16.mxu1 %v14103_v14  ;;  %v14176_v11 = vld [vmem:[%s15678_s26 + $0x11c0] ss:$16 sps:$4 sm:$0xff]  }
 0x4a5   : > { %9908 = vmatprep.subr.bf16.mxu0 %v14100_v13  ;;  %9938 = vmatprep.mubr.bf16.mxu0 %v3364_v28  ;;  %v14187_v13 = vld [vmem:[%s15678_s26 + $0xdec] ss:$16 sps:$4 sm:$0xff]   ;;  %v14182_v14 = vld [vmem:[%s15678_s26 + $0x11e0] ss:$16 sps:$4 sm:$0xff]   ;;  %v14185_v28 = vld [vmem:[%s15678_s26 + $0xde8] ss:$16 sps:$4 sm:$0xff]  }
 0x4a6   : > { %10540 = vmatprep.mubr.bf16.mxu1 %v15071_v24  ;;  %v14196_v24 = vld [vmem:[%s15678_s26 + $0x1224] ss:$16 sps:$4 sm:$0xff]  }
 0x4a7   : > { %10511 = vmatpush1.bf16.msra.mxu1 %v14101_v22  ;;  %v14188_v22 = vld [vmem:[%s15678_s26 + $0x1200] ss:$16 sps:$4 sm:$0xff]  }
 0x4a8   : > { %9909 = vmatpush1.bf16.msra.mxu0 %v14098_v19  ;;  %10512 = vmatprep.subr.bf16.mxu1 %v14109_v46  ;;  %v14193_v19 = vld [vmem:[%s15678_s26 + $0xe0c] ss:$16 sps:$4 sm:$0xff]  }
 0x4a9   : > { %9910 = vmatprep.subr.bf16.mxu0 %v14106_v23  ;;  %v14191_v23 = vld [vmem:[%s15678_s26 + $0xe08] ss:$16 sps:$4 sm:$0xff]  }
 0x4aa   : > { %v16382_v46 = vld [vmem:[#allocation2 + $0x80] sm:$0xff] }
 0x4ab   : > { %10513 = vmatpush1.bf16.msra.mxu1 %v14107_v25  ;;  %v16386_v25 = vld [vmem:[#allocation2 + $0x98] sm:$0xff] }
 0x4ac   : > { %9911 = vmatpush1.bf16.msra.mxu0 %v14104_v43  ;;  %10514 = vmatprep.subr.bf16.mxu1 %v14115_v29  ;;  %v14199_v43 = vld [vmem:[%s15678_s26 + $0xe2c] ss:$16 sps:$4 sm:$0xff]   ;;  %v14194_v29 = vld [vmem:[%s15678_s26 + $0x1220] ss:$16 sps:$4 sm:$0xff]  }
 0x4ad   : > { %9912 = vmatprep.subr.bf16.mxu0 %v14112_v27  ;;  %v15072_v27 = vld [vmem:[#allocation2 + $0x60] sm:$0xff] }
 0x4af   : > { %10515 = vmatpush1.bf16.msra.mxu1 %v14113_v31  ;;  %v14202_v31 = vld [vmem:[%s15678_s26 + $0x1244] ss:$16 sps:$4 sm:$0xff]  }
 0x4b0   : > { %9913 = vmatpush1.bf16.msra.mxu0 %v14110_v30  ;;  %10516 = vmatprep.subr.bf16.mxu1 %v14121_v33  ;;  %v14197_v30 = vld [vmem:[%s15678_s26 + $0xe28] ss:$16 sps:$4 sm:$0xff]   ;;  %v15073_v33 = vld [vmem:[#allocation2 + $0x78] sm:$0xff] }
 0x4b1   : > { %9914 = vmatprep.subr.bf16.mxu0 %v14118_v32  ;;  %v14205_v32 = vld [vmem:[%s15678_s26 + $0xe4c] ss:$16 sps:$4 sm:$0xff]  }
 0x4b3   : > { %10517 = vmatpush1.bf16.msra.mxu1 %v14119_v35  ;;  %v14203_v35 = vld [vmem:[%s15678_s26 + $0xe48] ss:$16 sps:$4 sm:$0xff]  }
 0x4b4   : > { %9915 = vmatpush1.bf16.msra.mxu0 %v14116_v34  ;;  %10518 = vmatprep.subr.bf16.mxu1 %v14127_v37  ;;  %v14200_v34 = vld [vmem:[%s15678_s26 + $0x1240] ss:$16 sps:$4 sm:$0xff]   ;;  %v14211_v37 = vld [vmem:[%s15678_s26 + $0xe6c] ss:$16 sps:$4 sm:$0xff]  }
 0x4b5   : > { %9916 = vmatprep.subr.bf16.mxu0 %v14124_v36  ;;  %v14208_v36 = vld [vmem:[%s15678_s26 + $0x1264] ss:$16 sps:$4 sm:$0xff]  }
 0x4b7   : > { %10519 = vmatpush1.bf16.msra.mxu1 %v14125_v38  ;;  %v14209_v38 = vld [vmem:[%s15678_s26 + $0xe68] ss:$16 sps:$4 sm:$0xff]  }
 0x4b8   : > { %9917 = vmatpush1.bf16.msra.mxu0 %v14122_v10  ;;  %10520 = vmatprep.subr.bf16.mxu1 %v14133_v41  ;;  %v14206_v10 = vld [vmem:[%s15678_s26 + $0x1260] ss:$16 sps:$4 sm:$0xff]   ;;  %v14217_v41 = vld [vmem:[%s15678_s26 + $0xe8c] ss:$16 sps:$4 sm:$0xff]  }
 0x4b9   : > { %9918 = vmatprep.subr.bf16.mxu0 %v14130_v40  ;;  %v14214_v40 = vld [vmem:[%s15678_s26 + $0x1284] ss:$16 sps:$4 sm:$0xff]  }
 0x4bb   : > { %10521 = vmatpush1.bf16.msra.mxu1 %v14131_v54  ;;  %v14215_v54 = vld [vmem:[%s15678_s26 + $0xe88] ss:$16 sps:$4 sm:$0xff]  }
 0x4bc   : > { %9919 = vmatpush1.bf16.msra.mxu0 %v14128_v42  ;;  %10522 = vmatprep.subr.bf16.mxu1 %v14139_v6  ;;  %v14212_v42 = vld [vmem:[%s15678_s26 + $0x1280] ss:$16 sps:$4 sm:$0xff]   ;;  %v14223_v6 = vld [vmem:[%s15678_s26 + $0xeac] ss:$16 sps:$4 sm:$0xff]  }
 0x4bd   : > { %9920 = vmatprep.subr.bf16.mxu0 %v14136_v44  ;;  %v14220_v44 = vld [vmem:[%s15678_s26 + $0x12a4] ss:$16 sps:$4 sm:$0xff]  }
 0x4bf   : > { %10523 = vmatpush1.bf16.msra.mxu1 %v14137_v47  ;;  %v14221_v47 = vld [vmem:[%s15678_s26 + $0xea8] ss:$16 sps:$4 sm:$0xff]  }
 0x4c0   : > { %9921 = vmatpush1.bf16.msra.mxu0 %v14134_v57  ;;  %10524 = vmatprep.subr.bf16.mxu1 %v14145_v50  ;;  %v14218_v57 = vld [vmem:[%s15678_s26 + $0x12a0] ss:$16 sps:$4 sm:$0xff]   ;;  %v14229_v50 = vld [vmem:[%s15678_s26 + $0xecc] ss:$16 sps:$4 sm:$0xff]  }
 0x4c1   : > { %9922 = vmatprep.subr.bf16.mxu0 %v14142_v48  ;;  %v14226_v48 = vld [vmem:[%s15678_s26 + $0x12c4] ss:$16 sps:$4 sm:$0xff]  }
 0x4c3   : > { %10525 = vmatpush1.bf16.msra.mxu1 %v14143_v39  ;;  %v14227_v39 = vld [vmem:[%s15678_s26 + $0xec8] ss:$16 sps:$4 sm:$0xff]  }
 0x4c4   : > { %9923 = vmatpush1.bf16.msra.mxu0 %v14140_v8  ;;  %10526 = vmatprep.subr.bf16.mxu1 %v14151_v56  ;;  %v14224_v8 = vld [vmem:[%s15678_s26 + $0x12c0] ss:$16 sps:$4 sm:$0xff]   ;;  %v14235_v56 = vld [vmem:[%s15678_s26 + $0xeec] ss:$16 sps:$4 sm:$0xff]  }
 0x4c5   : > { %9924 = vmatprep.subr.bf16.mxu0 %v14148_v55  ;;  %v14232_v55 = vld [vmem:[%s15678_s26 + $0x12e4] ss:$16 sps:$4 sm:$0xff]  }
 0x4c7   : > { %10527 = vmatpush1.bf16.msra.mxu1 %v14149_v59  ;;  %v14233_v59 = vld [vmem:[%s15678_s26 + $0xee8] ss:$16 sps:$4 sm:$0xff]  }
 0x4c8   : > { %9925 = vmatpush1.bf16.msra.mxu0 %v14146_v58  ;;  %10528 = vmatprep.subr.bf16.mxu1 %v14157_v20  ;;  %v14230_v58 = vld [vmem:[%s15678_s26 + $0x12e0] ss:$16 sps:$4 sm:$0xff]   ;;  %v14241_v20 = vld [vmem:[%s15678_s26 + $0xf0c] ss:$16 sps:$4 sm:$0xff]  }
 0x4c9   : > { %9926 = vmatprep.subr.bf16.mxu0 %v14154_v53  ;;  %v14238_v53 = vld [vmem:[%s15678_s26 + $0x1304] ss:$16 sps:$4 sm:$0xff]  }
 0x4cb   : > { %10529 = vmatpush1.bf16.msra.mxu1 %v14155_v61  ;;  %v14239_v61 = vld [vmem:[%s15678_s26 + $0xf08] ss:$16 sps:$4 sm:$0xff]  }
 0x4cc   : > { %9927 = vmatpush1.bf16.msra.mxu0 %v14152_v60  ;;  %10530 = vmatprep.subr.bf16.mxu1 %v14163_v63  ;;  %v14236_v60 = vld [vmem:[%s15678_s26 + $0x1300] ss:$16 sps:$4 sm:$0xff]   ;;  %v14247_v63 = vld [vmem:[%s15678_s26 + $0xf2c] ss:$16 sps:$4 sm:$0xff]  }
 0x4cd   : > { %9928 = vmatprep.subr.bf16.mxu0 %v14160_v62  ;;  %v14244_v62 = vld [vmem:[%s15678_s26 + $0x1324] ss:$16 sps:$4 sm:$0xff]  }
 0x4cf   : > { %10531 = vmatpush1.bf16.msra.mxu1 %v14161_v45  ;;  %v14245_v45 = vld [vmem:[%s15678_s26 + $0xf28] ss:$16 sps:$4 sm:$0xff]  }
 0x4d0   : > { %9929 = vmatpush1.bf16.msra.mxu0 %v14158_v1  ;;  %10532 = vmatprep.subr.bf16.mxu1 %v14169_v2  ;;  %v14242_v1 = vld [vmem:[%s15678_s26 + $0x1320] ss:$16 sps:$4 sm:$0xff]   ;;  %v14253_v2 = vld [vmem:[%s15678_s26 + $0xf4c] ss:$16 sps:$4 sm:$0xff]  }
 0x4d1   : > { %9930 = vmatprep.subr.bf16.mxu0 %v14166_v0  ;;  %v14250_v0 = vld [vmem:[%s15678_s26 + $0x1344] ss:$16 sps:$4 sm:$0xff]  }
 0x4d3   : > { %10533 = vmatpush1.bf16.msra.mxu1 %v14167_v3  ;;  %v14251_v3 = vld [vmem:[%s15678_s26 + $0xf48] ss:$16 sps:$4 sm:$0xff]  }
 0x4d4   : > { %9931 = vmatpush1.bf16.msra.mxu0 %v14164_v26  ;;  %10534 = vmatprep.subr.bf16.mxu1 %v14175_v4  ;;  %v14248_v26 = vld [vmem:[%s15678_s26 + $0x1340] ss:$16 sps:$4 sm:$0xff]   ;;  %v14259_v4 = vld [vmem:[%s15678_s26 + $0xf6c] ss:$16 sps:$4 sm:$0xff]  }
 0x4d5   : > { %9932 = vmatprep.subr.bf16.mxu0 %v14172_v49  ;;  %v14256_v49 = vld [vmem:[%s15678_s26 + $0x1364] ss:$16 sps:$4 sm:$0xff]  }
 0x4d7   : > { %10535 = vmatpush1.bf16.msra.mxu1 %v14173_v5  ;;  %v14257_v5 = vld [vmem:[%s15678_s26 + $0xf68] ss:$16 sps:$4 sm:$0xff]  }
 0x4d8   : > { %9933 = vmatpush1.bf16.msra.mxu0 %v14170_v51  ;;  %10536 = vmatprep.subr.bf16.mxu1 %v14181_v9  ;;  %v14254_v51 = vld [vmem:[%s15678_s26 + $0x1360] ss:$16 sps:$4 sm:$0xff]   ;;  %v14265_v9 = vld [vmem:[%s15678_s26 + $0xf8c] ss:$16 sps:$4 sm:$0xff]  }
 0x4d9   : > { %9934 = vmatprep.subr.bf16.mxu0 %v14178_v7  ;;  %v14262_v7 = vld [vmem:[%s15678_s26 + $0x1384] ss:$16 sps:$4 sm:$0xff]  }
 0x4db   : > { %10537 = vmatpush1.bf16.msra.mxu1 %v14179_v12  ;;  %v14263_v12 = vld [vmem:[%s15678_s26 + $0xf88] ss:$16 sps:$4 sm:$0xff]  }
 0x4dc   : > { %9935 = vmatpush1.bf16.msra.mxu0 %v14176_v11  ;;  %10538 = vmatprep.subr.bf16.mxu1 %v14187_v13  ;;  %v14260_v11 = vld [vmem:[%s15678_s26 + $0x1380] ss:$16 sps:$4 sm:$0xff]   ;;  %v14271_v13 = vld [vmem:[%s15678_s26 + $0xfac] ss:$16 sps:$4 sm:$0xff]  }
 0x4dd   : > { %9936 = vmatprep.subr.bf16.mxu0 %v14184_v52  ;;  %v14268_v52 = vld [vmem:[%s15678_s26 + $0x13a4] ss:$16 sps:$4 sm:$0xff]  }
 0x4df   : > { %10539 = vmatpush1.bf16.msra.mxu1 %v14185_v28  ;;  %v14269_v28 = vld [vmem:[%s15678_s26 + $0xfa8] ss:$16 sps:$4 sm:$0xff]  }
 0x4e0   : > { %9937 = vmatpush1.bf16.msra.mxu0 %v14182_v14  ;;  %10551 = vmatprep.subr.bf16.mxu1 %v14193_v19  ;;  %v14266_v14 = vld [vmem:[%s15678_s26 + $0x13a0] ss:$16 sps:$4 sm:$0xff]   ;;  %v14277_v19 = vld [vmem:[%s15678_s26 + $0xfcc] ss:$16 sps:$4 sm:$0xff]  }
 0x4e1   : > { %9949 = vmatprep.subr.bf16.mxu0 %v14190_v18  ;;  %v14274_v18 = vld [vmem:[%s15678_s26 + $0x13c4] ss:$16 sps:$4 sm:$0xff]  }
 0x4e2   : > { %10541 = vmatmul.mubr.bf16.vlgmr.msra.gmra.mrb[4].mxu1 %v15072_v27  ;;  %v14278_v27 = vld [vmem:[%s15678_s26 + $0x13e0] ss:$16 sps:$4 sm:$0xff]  }
 0x4e3   : > { %9939 = vmatmul.mubr.bf16.vlgmr.msra.gmra.mrb[0].mxu0 %v16382_v46  ;;  %10552 = vmatpush1.bf16.msra.mxu1 %v14191_v23  ;;  %v14275_v23 = vld [vmem:[%s15678_s26 + $0xfc8] ss:$16 sps:$4 sm:$0xff]  }
 0x4e4   : > { %9950 = vmatpush1.bf16.msra.mxu0 %v14188_v22  ;;  %10553 = vmatprep.subr.bf16.mxu1 %v14199_v43  ;;  %v14272_v22 = vld [vmem:[%s15678_s26 + $0x13c0] ss:$16 sps:$4 sm:$0xff]   ;;  %v14283_v43 = vld [vmem:[%s15678_s26 + $0xfec] ss:$16 sps:$4 sm:$0xff]  }
 0x4e5   : > { %9951 = vmatprep.subr.bf16.mxu0 %v14196_v24  ;;  %9981 = vmatprep.mubr.bf16.mxu0 %v16386_v25  ;;  %v14280_v24 = vld [vmem:[%s15678_s26 + $0x13e4] ss:$16 sps:$4 sm:$0xff]  }
 0x4e6   : > { %10583 = vmatprep.mubr.bf16.mxu1 %v15073_v33  ;;  %v14287_v33 = vld [vmem:[%s15678_s26 + $0x1008] ss:$16 sps:$4 sm:$0xff]  }
 0x4e7   : > { %10554 = vmatpush1.bf16.msra.mxu1 %v14197_v30  ;;  %v14286_v30 = vld [vmem:[%s15678_s26 + $0x1404] ss:$16 sps:$4 sm:$0xff]  }
 0x4e8   : > { %9952 = vmatpush1.bf16.msra.mxu0 %v14194_v29  ;;  %10555 = vmatprep.subr.bf16.mxu1 %v14205_v32  ;;  %v14281_v29 = vld [vmem:[%s15678_s26 + $0xfe8] ss:$16 sps:$4 sm:$0xff]   ;;  %v14284_v32 = vld [vmem:[%s15678_s26 + $0x1400] ss:$16 sps:$4 sm:$0xff]  }
 0x4e9   : > { %9953 = vmatprep.subr.bf16.mxu0 %v14202_v31  ;;  %v14289_v31 = vld [vmem:[%s15678_s26 + $0x100c] ss:$16 sps:$4 sm:$0xff]  }
 0x4eb   : > { %10556 = vmatpush1.bf16.msra.mxu1 %v14203_v35  ;;  %v14292_v35 = vld [vmem:[%s15678_s26 + $0x1424] ss:$16 sps:$4 sm:$0xff]  }
 0x4ec   : > { %9954 = vmatpush1.bf16.msra.mxu0 %v14200_v34  ;;  %10557 = vmatprep.subr.bf16.mxu1 %v14211_v37  ;;  %v16452_v34 = vld [vmem:[#allocation2 + $0x90] sm:$0xff]  ;;  %v16456_v37 = vld [vmem:[#allocation2 + $0xa8] sm:$0xff] }
 0x4ed   : > { %9955 = vmatprep.subr.bf16.mxu0 %v14208_v36  ;;  %v14295_v36 = vld [vmem:[%s15678_s26 + $0x102c] ss:$16 sps:$4 sm:$0xff]  }
 0x4ef   : > { %10558 = vmatpush1.bf16.msra.mxu1 %v14209_v38  ;;  %v14290_v38 = vld [vmem:[%s15678_s26 + $0x1420] ss:$16 sps:$4 sm:$0xff]  }
 0x4f0   : > { %9956 = vmatpush1.bf16.msra.mxu0 %v14206_v10  ;;  %10559 = vmatprep.subr.bf16.mxu1 %v14217_v41  ;;  %v15074_v10 = vld [vmem:[#allocation2 + $0x70] sm:$0xff]  ;;  %v14298_v41 = vld [vmem:[%s15678_s26 + $0x1444] ss:$16 sps:$4 sm:$0xff]  }
 0x4f1   : > { %9957 = vmatprep.subr.bf16.mxu0 %v14214_v40  ;;  %v14293_v40 = vld [vmem:[%s15678_s26 + $0x1028] ss:$16 sps:$4 sm:$0xff]  }
 0x4f3   : > { %10560 = vmatpush1.bf16.msra.mxu1 %v14215_v54  ;;  %v15075_v54 = vld [vmem:[#allocation2 + $0x88] sm:$0xff] }
 0x4f4   : > { %9958 = vmatpush1.bf16.msra.mxu0 %v14212_v42  ;;  %10561 = vmatprep.subr.bf16.mxu1 %v14223_v6  ;;  %v14301_v42 = vld [vmem:[%s15678_s26 + $0x104c] ss:$16 sps:$4 sm:$0xff]   ;;  %v14299_v6 = vld [vmem:[%s15678_s26 + $0x1048] ss:$16 sps:$4 sm:$0xff]  }
 0x4f5   : > { %9959 = vmatprep.subr.bf16.mxu0 %v14220_v44  ;;  %v14296_v44 = vld [vmem:[%s15678_s26 + $0x1440] ss:$16 sps:$4 sm:$0xff]  }
 0x4f7   : > { %10562 = vmatpush1.bf16.msra.mxu1 %v14221_v47  ;;  %v14307_v47 = vld [vmem:[%s15678_s26 + $0x106c] ss:$16 sps:$4 sm:$0xff]  }
 0x4f8   : > { %9960 = vmatpush1.bf16.msra.mxu0 %v14218_v57  ;;  %10563 = vmatprep.subr.bf16.mxu1 %v14229_v50  ;;  %v14304_v57 = vld [vmem:[%s15678_s26 + $0x1464] ss:$16 sps:$4 sm:$0xff]   ;;  %v14305_v50 = vld [vmem:[%s15678_s26 + $0x1068] ss:$16 sps:$4 sm:$0xff]  }
 0x4f9   : > { %9961 = vmatprep.subr.bf16.mxu0 %v14226_v48  ;;  %v14302_v48 = vld [vmem:[%s15678_s26 + $0x1460] ss:$16 sps:$4 sm:$0xff]  }
 0x4fb   : > { %10564 = vmatpush1.bf16.msra.mxu1 %v14227_v39  ;;  %v14313_v39 = vld [vmem:[%s15678_s26 + $0x108c] ss:$16 sps:$4 sm:$0xff]  }
 0x4fc   : > { %9962 = vmatpush1.bf16.msra.mxu0 %v14224_v8  ;;  %10565 = vmatprep.subr.bf16.mxu1 %v14235_v56  ;;  %v14310_v8 = vld [vmem:[%s15678_s26 + $0x1484] ss:$16 sps:$4 sm:$0xff]   ;;  %v14311_v56 = vld [vmem:[%s15678_s26 + $0x1088] ss:$16 sps:$4 sm:$0xff]  }
 0x4fd   : > { %9963 = vmatprep.subr.bf16.mxu0 %v14232_v55  ;;  %v14308_v55 = vld [vmem:[%s15678_s26 + $0x1480] ss:$16 sps:$4 sm:$0xff]  }
 0x4ff   : > { %10566 = vmatpush1.bf16.msra.mxu1 %v14233_v59  ;;  %v14319_v59 = vld [vmem:[%s15678_s26 + $0x10ac] ss:$16 sps:$4 sm:$0xff]  }
 0x500   : > { %9964 = vmatpush1.bf16.msra.mxu0 %v14230_v58  ;;  %10567 = vmatprep.subr.bf16.mxu1 %v14241_v20  ;;  %v14316_v58 = vld [vmem:[%s15678_s26 + $0x14a4] ss:$16 sps:$4 sm:$0xff]   ;;  %v14317_v20 = vld [vmem:[%s15678_s26 + $0x10a8] ss:$16 sps:$4 sm:$0xff]  }
 0x501   : > { %9965 = vmatprep.subr.bf16.mxu0 %v14238_v53  ;;  %v14314_v53 = vld [vmem:[%s15678_s26 + $0x14a0] ss:$16 sps:$4 sm:$0xff]  }
 0x503   : > { %10568 = vmatpush1.bf16.msra.mxu1 %v14239_v61  ;;  %v14325_v61 = vld [vmem:[%s15678_s26 + $0x10cc] ss:$16 sps:$4 sm:$0xff]  }
 0x504   : > { %9966 = vmatpush1.bf16.msra.mxu0 %v14236_v60  ;;  %10569 = vmatprep.subr.bf16.mxu1 %v14247_v63  ;;  %v14322_v60 = vld [vmem:[%s15678_s26 + $0x14c4] ss:$16 sps:$4 sm:$0xff]   ;;  %v14323_v63 = vld [vmem:[%s15678_s26 + $0x10c8] ss:$16 sps:$4 sm:$0xff]  }
 0x505   : > { %9967 = vmatprep.subr.bf16.mxu0 %v14244_v62  ;;  %v14320_v62 = vld [vmem:[%s15678_s26 + $0x14c0] ss:$16 sps:$4 sm:$0xff]  }
 0x507   : > { %10570 = vmatpush1.bf16.msra.mxu1 %v14245_v45  ;;  %v14331_v45 = vld [vmem:[%s15678_s26 + $0x10ec] ss:$16 sps:$4 sm:$0xff]  }
 0x508   : > { %9968 = vmatpush1.bf16.msra.mxu0 %v14242_v1  ;;  %10571 = vmatprep.subr.bf16.mxu1 %v14253_v2  ;;  %v14328_v1 = vld [vmem:[%s15678_s26 + $0x14e4] ss:$16 sps:$4 sm:$0xff]   ;;  %v14329_v2 = vld [vmem:[%s15678_s26 + $0x10e8] ss:$16 sps:$4 sm:$0xff]  }
 0x509   : > { %9969 = vmatprep.subr.bf16.mxu0 %v14250_v0  ;;  %v14326_v0 = vld [vmem:[%s15678_s26 + $0x14e0] ss:$16 sps:$4 sm:$0xff]  }
 0x50b   : > { %10572 = vmatpush1.bf16.msra.mxu1 %v14251_v3  ;;  %v14337_v3 = vld [vmem:[%s15678_s26 + $0x110c] ss:$16 sps:$4 sm:$0xff]  }
 0x50c   : > { %9970 = vmatpush1.bf16.msra.mxu0 %v14248_v26  ;;  %10573 = vmatprep.subr.bf16.mxu1 %v14259_v4  ;;  %v14334_v26 = vld [vmem:[%s15678_s26 + $0x1504] ss:$16 sps:$4 sm:$0xff]   ;;  %v14335_v4 = vld [vmem:[%s15678_s26 + $0x1108] ss:$16 sps:$4 sm:$0xff]  }
 0x50d   : > { %9971 = vmatprep.subr.bf16.mxu0 %v14256_v49  ;;  %v14332_v49 = vld [vmem:[%s15678_s26 + $0x1500] ss:$16 sps:$4 sm:$0xff]  }
 0x50f   : > { %10574 = vmatpush1.bf16.msra.mxu1 %v14257_v5  ;;  %v14343_v5 = vld [vmem:[%s15678_s26 + $0x112c] ss:$16 sps:$4 sm:$0xff]  }
 0x510   : > { %9972 = vmatpush1.bf16.msra.mxu0 %v14254_v51  ;;  %10575 = vmatprep.subr.bf16.mxu1 %v14265_v9  ;;  %v14340_v51 = vld [vmem:[%s15678_s26 + $0x1524] ss:$16 sps:$4 sm:$0xff]   ;;  %v14341_v9 = vld [vmem:[%s15678_s26 + $0x1128] ss:$16 sps:$4 sm:$0xff]  }
 0x511   : > { %9973 = vmatprep.subr.bf16.mxu0 %v14262_v7  ;;  %v14338_v7 = vld [vmem:[%s15678_s26 + $0x1520] ss:$16 sps:$4 sm:$0xff]  }
 0x513   : > { %10576 = vmatpush1.bf16.msra.mxu1 %v14263_v12  ;;  %v14349_v12 = vld [vmem:[%s15678_s26 + $0x114c] ss:$16 sps:$4 sm:$0xff]  }
 0x514   : > { %9974 = vmatpush1.bf16.msra.mxu0 %v14260_v11  ;;  %10577 = vmatprep.subr.bf16.mxu1 %v14271_v13  ;;  %v14346_v11 = vld [vmem:[%s15678_s26 + $0x1544] ss:$16 sps:$4 sm:$0xff]   ;;  %v14347_v13 = vld [vmem:[%s15678_s26 + $0x1148] ss:$16 sps:$4 sm:$0xff]  }
 0x515   : > { %9975 = vmatprep.subr.bf16.mxu0 %v14268_v52  ;;  %v14344_v52 = vld [vmem:[%s15678_s26 + $0x1540] ss:$16 sps:$4 sm:$0xff]  }
 0x517   : > { %10578 = vmatpush1.bf16.msra.mxu1 %v14269_v28  ;;  %v14355_v28 = vld [vmem:[%s15678_s26 + $0x116c] ss:$16 sps:$4 sm:$0xff]  }
 0x518   : > { %9976 = vmatpush1.bf16.msra.mxu0 %v14266_v14  ;;  %10579 = vmatprep.subr.bf16.mxu1 %v14277_v19  ;;  %v14352_v14 = vld [vmem:[%s15678_s26 + $0x1564] ss:$16 sps:$4 sm:$0xff]   ;;  %v14353_v19 = vld [vmem:[%s15678_s26 + $0x1168] ss:$16 sps:$4 sm:$0xff]  }
 0x519   : > { %9977 = vmatprep.subr.bf16.mxu0 %v14274_v18  ;;  %v14350_v18 = vld [vmem:[%s15678_s26 + $0x1560] ss:$16 sps:$4 sm:$0xff]  }
 0x51b   : > { %10580 = vmatpush1.bf16.msra.mxu1 %v14275_v23  ;;  %v14361_v23 = vld [vmem:[%s15678_s26 + $0x118c] ss:$16 sps:$4 sm:$0xff]  }
 0x51c   : > { %9978 = vmatpush1.bf16.msra.mxu0 %v14272_v22  ;;  %10581 = vmatprep.subr.bf16.mxu1 %v14283_v43  ;;  %v14358_v22 = vld [vmem:[%s15678_s26 + $0x1584] ss:$16 sps:$4 sm:$0xff]   ;;  %v14359_v43 = vld [vmem:[%s15678_s26 + $0x1188] ss:$16 sps:$4 sm:$0xff]  }
 0x51d   : > { %9979 = vmatprep.subr.bf16.mxu0 %v14280_v24  ;;  %v14356_v24 = vld [vmem:[%s15678_s26 + $0x1580] ss:$16 sps:$4 sm:$0xff]  }
 0x51f   : > { %10582 = vmatpush1.bf16.msra.mxu1 %v14281_v29  ;;  %v14367_v29 = vld [vmem:[%s15678_s26 + $0x11ac] ss:$16 sps:$4 sm:$0xff]  }
 0x520   : > { %9980 = vmatpush1.bf16.msra.mxu0 %v14278_v27  ;;  %10594 = vmatprep.subr.bf16.mxu1 %v14289_v31  ;;  %v14364_v27 = vld [vmem:[%s15678_s26 + $0x15a4] ss:$16 sps:$4 sm:$0xff]   ;;  %v14365_v31 = vld [vmem:[%s15678_s26 + $0x11a8] ss:$16 sps:$4 sm:$0xff]  }
 0x521   : > { %9992 = vmatprep.subr.bf16.mxu0 %v14286_v30  ;;  %v14362_v30 = vld [vmem:[%s15678_s26 + $0x15a0] ss:$16 sps:$4 sm:$0xff]  }
 0x522   : > { %10584 = vmatmul.mubr.bf16.vlgmr.msra.gmra.mrb[4].mxu1 %v15074_v10  ;;  %v14376_v10 = vld [vmem:[%s15678_s26 + $0x15e4] ss:$16 sps:$4 sm:$0xff]  }
 0x523   : > { %9982 = vmatmul.mubr.bf16.vlgmr.msra.gmra.mrb[0].mxu0 %v16452_v34  ;;  %10595 = vmatpush1.bf16.msra.mxu1 %v14287_v33  ;;  %v14373_v33 = vld [vmem:[%s15678_s26 + $0x11cc] ss:$16 sps:$4 sm:$0xff]  }
 0x524   : > { %9993 = vmatpush1.bf16.msra.mxu0 %v14284_v32  ;;  %10596 = vmatprep.subr.bf16.mxu1 %v14295_v36  ;;  %v14370_v32 = vld [vmem:[%s15678_s26 + $0x15c4] ss:$16 sps:$4 sm:$0xff]   ;;  %v14371_v36 = vld [vmem:[%s15678_s26 + $0x11c8] ss:$16 sps:$4 sm:$0xff]  }
 0x525   : > { %9994 = vmatprep.subr.bf16.mxu0 %v14292_v35  ;;  %10024 = vmatprep.mubr.bf16.mxu0 %v16456_v37  ;;  %v14368_v35 = vld [vmem:[%s15678_s26 + $0x15c0] ss:$16 sps:$4 sm:$0xff]  }
 0x526   : > { %10626 = vmatprep.mubr.bf16.mxu1 %v15075_v54  ;;  %v14385_v54 = vld [vmem:[%s15678_s26 + $0x120c] ss:$16 sps:$4 sm:$0xff]  }
 0x527   : > { %10597 = vmatpush1.bf16.msra.mxu1 %v14293_v40  ;;  %v14374_v40 = vld [vmem:[%s15678_s26 + $0x15e0] ss:$16 sps:$4 sm:$0xff]  }
 0x528   : > { %9995 = vmatpush1.bf16.msra.mxu0 %v14290_v38  ;;  %10598 = vmatprep.subr.bf16.mxu1 %v14301_v42  ;;  %v14379_v38 = vld [vmem:[%s15678_s26 + $0x11ec] ss:$16 sps:$4 sm:$0xff]   ;;  %v14382_v42 = vld [vmem:[%s15678_s26 + $0x1604] ss:$16 sps:$4 sm:$0xff]  }
 0x529   : > { %9996 = vmatprep.subr.bf16.mxu0 %v14298_v41  ;;  %v14377_v41 = vld [vmem:[%s15678_s26 + $0x11e8] ss:$16 sps:$4 sm:$0xff]  }
 0x52b   : > { %10599 = vmatpush1.bf16.msra.mxu1 %v14299_v6  ;;  %v14383_v6 = vld [vmem:[%s15678_s26 + $0x1208] ss:$16 sps:$4 sm:$0xff]  }
 0x52c   : > { %9997 = vmatpush1.bf16.msra.mxu0 %v14296_v44  ;;  %10600 = vmatprep.subr.bf16.mxu1 %v14307_v47  ;;  %v14380_v44 = vld [vmem:[%s15678_s26 + $0x1600] ss:$16 sps:$4 sm:$0xff]   ;;  %v14388_v47 = vld [vmem:[%s15678_s26 + $0x1624] ss:$16 sps:$4 sm:$0xff]  }
 0x52d   : > { %9998 = vmatprep.subr.bf16.mxu0 %v14304_v57  ;;  %v16522_v57 = vld [vmem:[#allocation2 + $0xa0] sm:$0xff] }
 0x52f   : > { %10601 = vmatpush1.bf16.msra.mxu1 %v14305_v50  ;;  %v16528_v50 = vld [vmem:[#allocation2 + $0xb8] sm:$0xff] }
 0x530   : > { %9999 = vmatpush1.bf16.msra.mxu0 %v14302_v48  ;;  %10602 = vmatprep.subr.bf16.mxu1 %v14313_v39  ;;  %v14391_v48 = vld [vmem:[%s15678_s26 + $0x122c] ss:$16 sps:$4 sm:$0xff]   ;;  %v14389_v39 = vld [vmem:[%s15678_s26 + $0x1228] ss:$16 sps:$4 sm:$0xff]  }
 0x531   : > { %10000 = vmatprep.subr.bf16.mxu0 %v14310_v8  ;;  %v14386_v8 = vld [vmem:[%s15678_s26 + $0x1620] ss:$16 sps:$4 sm:$0xff]  }
 0x533   : > { %10603 = vmatpush1.bf16.msra.mxu1 %v14311_v56  ;;  %v14397_v56 = vld [vmem:[%s15678_s26 + $0x124c] ss:$16 sps:$4 sm:$0xff]  }
 0x534   : > { %10001 = vmatpush1.bf16.msra.mxu0 %v14308_v55  ;;  %10604 = vmatprep.subr.bf16.mxu1 %v14319_v59  ;;  %v14394_v55 = vld [vmem:[%s15678_s26 + $0x1644] ss:$16 sps:$4 sm:$0xff]  }
 0x535   : > { %10002 = vmatprep.subr.bf16.mxu0 %v14316_v58  ;;  %v14395_v58 = vld [vmem:[%s15678_s26 + $0x1248] ss:$16 sps:$4 sm:$0xff]   ;;  %v14400_v59 = vld [vmem:[%s15678_s26 + $0x1664] ss:$16 sps:$4 sm:$0xff]  }
 0x537   : > { %10605 = vmatpush1.bf16.msra.mxu1 %v14317_v20  ;;  %v14398_v20 = vld [vmem:[%s15678_s26 + $0x1660] ss:$16 sps:$4 sm:$0xff]  }
 0x538   : > { %10003 = vmatpush1.bf16.msra.mxu0 %v14314_v53  ;;  %10606 = vmatprep.subr.bf16.mxu1 %v14325_v61  ;;  %v14403_v53 = vld [vmem:[%s15678_s26 + $0x126c] ss:$16 sps:$4 sm:$0xff]  }
 0x539   : > { %10004 = vmatprep.subr.bf16.mxu0 %v14322_v60  ;;  %v14401_v60 = vld [vmem:[%s15678_s26 + $0x1268] ss:$16 sps:$4 sm:$0xff]   ;;  %v14409_v61 = vld [vmem:[%s15678_s26 + $0x128c] ss:$16 sps:$4 sm:$0xff]  }
 0x53b   : > { %10607 = vmatpush1.bf16.msra.mxu1 %v14323_v63  ;;  %v14407_v63 = vld [vmem:[%s15678_s26 + $0x1288] ss:$16 sps:$4 sm:$0xff]  }
 0x53c   : > { %10005 = vmatpush1.bf16.msra.mxu0 %v14320_v62  ;;  %10608 = vmatprep.subr.bf16.mxu1 %v14331_v45  ;;  %v14404_v62 = vld [vmem:[%s15678_s26 + $0x1680] ss:$16 sps:$4 sm:$0xff]   ;;  %v14415_v45 = vld [vmem:[%s15678_s26 + $0x12ac] ss:$16 sps:$4 sm:$0xff]  }
 0x53d   : > { %10006 = vmatprep.subr.bf16.mxu0 %v14328_v1  ;;  %v14412_v1 = vld [vmem:[%s15678_s26 + $0x16a4] ss:$16 sps:$4 sm:$0xff]  }
 0x53f   : > { %10609 = vmatpush1.bf16.msra.mxu1 %v14329_v2  ;;  %v14413_v2 = vld [vmem:[%s15678_s26 + $0x12a8] ss:$16 sps:$4 sm:$0xff]  }
 0x540   : > { %10007 = vmatpush1.bf16.msra.mxu0 %v14326_v0  ;;  %10610 = vmatprep.subr.bf16.mxu1 %v14337_v3  ;;  %v14410_v0 = vld [vmem:[%s15678_s26 + $0x16a0] ss:$16 sps:$4 sm:$0xff]   ;;  %v14421_v3 = vld [vmem:[%s15678_s26 + $0x12cc] ss:$16 sps:$4 sm:$0xff]  }
 0x541   : > { %10008 = vmatprep.subr.bf16.mxu0 %v14334_v26  ;;  %v14418_v26 = vld [vmem:[%s15678_s26 + $0x16c4] ss:$16 sps:$4 sm:$0xff]  }
 0x543   : > { %10611 = vmatpush1.bf16.msra.mxu1 %v14335_v4  ;;  %v14419_v4 = vld [vmem:[%s15678_s26 + $0x12c8] ss:$16 sps:$4 sm:$0xff]  }
 0x544   : > { %10009 = vmatpush1.bf16.msra.mxu0 %v14332_v49  ;;  %10612 = vmatprep.subr.bf16.mxu1 %v14343_v5  ;;  %v14416_v49 = vld [vmem:[%s15678_s26 + $0x16c0] ss:$16 sps:$4 sm:$0xff]   ;;  %v14427_v5 = vld [vmem:[%s15678_s26 + $0x12ec] ss:$16 sps:$4 sm:$0xff]  }
 0x545   : > { %10010 = vmatprep.subr.bf16.mxu0 %v14340_v51  ;;  %v14424_v51 = vld [vmem:[%s15678_s26 + $0x16e4] ss:$16 sps:$4 sm:$0xff]  }
 0x547   : > { %10613 = vmatpush1.bf16.msra.mxu1 %v14341_v9  ;;  %v14425_v9 = vld [vmem:[%s15678_s26 + $0x12e8] ss:$16 sps:$4 sm:$0xff]  }
 0x548   : > { %10011 = vmatpush1.bf16.msra.mxu0 %v14338_v7  ;;  %10614 = vmatprep.subr.bf16.mxu1 %v14349_v12  ;;  %v14422_v7 = vld [vmem:[%s15678_s26 + $0x16e0] ss:$16 sps:$4 sm:$0xff]   ;;  %v14433_v12 = vld [vmem:[%s15678_s26 + $0x130c] ss:$16 sps:$4 sm:$0xff]  }
 0x549   : > { %10012 = vmatprep.subr.bf16.mxu0 %v14346_v11  ;;  %v14430_v11 = vld [vmem:[%s15678_s26 + $0x1704] ss:$16 sps:$4 sm:$0xff]  }
 0x54b   : > { %10615 = vmatpush1.bf16.msra.mxu1 %v14347_v13  ;;  %v14431_v13 = vld [vmem:[%s15678_s26 + $0x1308] ss:$16 sps:$4 sm:$0xff]  }
 0x54c   : > { %10013 = vmatpush1.bf16.msra.mxu0 %v14344_v52  ;;  %10616 = vmatprep.subr.bf16.mxu1 %v14355_v28  ;;  %v14428_v52 = vld [vmem:[%s15678_s26 + $0x1700] ss:$16 sps:$4 sm:$0xff]   ;;  %v14439_v28 = vld [vmem:[%s15678_s26 + $0x132c] ss:$16 sps:$4 sm:$0xff]  }
 0x54d   : > { %10014 = vmatprep.subr.bf16.mxu0 %v14352_v14  ;;  %v14436_v14 = vld [vmem:[%s15678_s26 + $0x1724] ss:$16 sps:$4 sm:$0xff]  }
 0x54f   : > { %10617 = vmatpush1.bf16.msra.mxu1 %v14353_v19  ;;  %v14437_v19 = vld [vmem:[%s15678_s26 + $0x1328] ss:$16 sps:$4 sm:$0xff]  }
 0x550   : > { %10015 = vmatpush1.bf16.msra.mxu0 %v14350_v18  ;;  %10618 = vmatprep.subr.bf16.mxu1 %v14361_v23  ;;  %v14434_v18 = vld [vmem:[%s15678_s26 + $0x1720] ss:$16 sps:$4 sm:$0xff]   ;;  %v14445_v23 = vld [vmem:[%s15678_s26 + $0x134c] ss:$16 sps:$4 sm:$0xff]  }
 0x551   : > { %10016 = vmatprep.subr.bf16.mxu0 %v14358_v22  ;;  %v14442_v22 = vld [vmem:[%s15678_s26 + $0x1744] ss:$16 sps:$4 sm:$0xff]  }
 0x553   : > { %10619 = vmatpush1.bf16.msra.mxu1 %v14359_v43  ;;  %v14443_v43 = vld [vmem:[%s15678_s26 + $0x1348] ss:$16 sps:$4 sm:$0xff]  }
 0x554   : > { %10017 = vmatpush1.bf16.msra.mxu0 %v14356_v24  ;;  %10620 = vmatprep.subr.bf16.mxu1 %v14367_v29  ;;  %v14440_v24 = vld [vmem:[%s15678_s26 + $0x1740] ss:$16 sps:$4 sm:$0xff]   ;;  %v14451_v29 = vld [vmem:[%s15678_s26 + $0x136c] ss:$16 sps:$4 sm:$0xff]  }
 0x555   : > { %10018 = vmatprep.subr.bf16.mxu0 %v14364_v27  ;;  %v14448_v27 = vld [vmem:[%s15678_s26 + $0x1764] ss:$16 sps:$4 sm:$0xff]  }
 0x557   : > { %10621 = vmatpush1.bf16.msra.mxu1 %v14365_v31  ;;  %v14449_v31 = vld [vmem:[%s15678_s26 + $0x1368] ss:$16 sps:$4 sm:$0xff]  }
 0x558   : > { %10019 = vmatpush1.bf16.msra.mxu0 %v14362_v30  ;;  %10622 = vmatprep.subr.bf16.mxu1 %v14373_v33  ;;  %v14446_v30 = vld [vmem:[%s15678_s26 + $0x1760] ss:$16 sps:$4 sm:$0xff]   ;;  %v14457_v33 = vld [vmem:[%s15678_s26 + $0x138c] ss:$16 sps:$4 sm:$0xff]  }
 0x559   : > { %10020 = vmatprep.subr.bf16.mxu0 %v14370_v32  ;;  %v14454_v32 = vld [vmem:[%s15678_s26 + $0x1784] ss:$16 sps:$4 sm:$0xff]  }
 0x55b   : > { %10623 = vmatpush1.bf16.msra.mxu1 %v14371_v36  ;;  %v14455_v36 = vld [vmem:[%s15678_s26 + $0x1388] ss:$16 sps:$4 sm:$0xff]  }
 0x55c   : > { %10021 = vmatpush1.bf16.msra.mxu0 %v14368_v35  ;;  %10624 = vmatprep.subr.bf16.mxu1 %v14379_v38  ;;  %v14452_v35 = vld [vmem:[%s15678_s26 + $0x1780] ss:$16 sps:$4 sm:$0xff]   ;;  %v14463_v38 = vld [vmem:[%s15678_s26 + $0x13ac] ss:$16 sps:$4 sm:$0xff]  }
 0x55d   : > { %10022 = vmatprep.subr.bf16.mxu0 %v14376_v10  ;;  %v14460_v10 = vld [vmem:[%s15678_s26 + $0x17a4] ss:$16 sps:$4 sm:$0xff]  }
 0x55f   : > { %10625 = vmatpush1.bf16.msra.mxu1 %v14377_v41  ;;  %v14461_v41 = vld [vmem:[%s15678_s26 + $0x13a8] ss:$16 sps:$4 sm:$0xff]  }
 0x560   : > { %10023 = vmatpush1.bf16.msra.mxu0 %v14374_v40  ;;  %10637 = vmatprep.subr.bf16.mxu1 %v14385_v54  ;;  %v14458_v40 = vld [vmem:[%s15678_s26 + $0x17a0] ss:$16 sps:$4 sm:$0xff]   ;;  %v14469_v54 = vld [vmem:[%s15678_s26 + $0x13cc] ss:$16 sps:$4 sm:$0xff]  }
 0x561   : > { %10035 = vmatprep.subr.bf16.mxu0 %v14382_v42  ;;  %v14466_v42 = vld [vmem:[%s15678_s26 + $0x17c4] ss:$16 sps:$4 sm:$0xff]  }
 0x562   : > { %10627 = vmatmul.mubr.bf16.vlgmr.msra.gmra.mrb[4].mxu1 %v16382_v46  ;;  %v14392_v46 = vld [vmem:[%s15678_s26 + $0x1640] ss:$16 sps:$4 sm:$0xff]  }
 0x563   : > { %10025 = vmatmul.mubr.bf16.vlgmr.msra.gmra.mrb[0].mxu0 %v16522_v57  ;;  %10638 = vmatpush1.bf16.msra.mxu1 %v14383_v6  ;;  %v14467_v6 = vld [vmem:[%s15678_s26 + $0x13c8] ss:$16 sps:$4 sm:$0xff]  }
 0x564   : > { %10036 = vmatpush1.bf16.msra.mxu0 %v14380_v44  ;;  %10639 = vmatprep.subr.bf16.mxu1 %v14391_v48  ;;  %v14464_v44 = vld [vmem:[%s15678_s26 + $0x17c0] ss:$16 sps:$4 sm:$0xff]   ;;  %v14475_v48 = vld [vmem:[%s15678_s26 + $0x13ec] ss:$16 sps:$4 sm:$0xff]  }
 0x565   : > { %10037 = vmatprep.subr.bf16.mxu0 %v14388_v47  ;;  %10067 = vmatprep.mubr.bf16.mxu0 %v16528_v50  ;;  %v14472_v47 = vld [vmem:[%s15678_s26 + $0x17e4] ss:$16 sps:$4 sm:$0xff]  }
 0x566   : > { %10669 = vmatprep.mubr.bf16.mxu1 %v16386_v25  ;;  %v14406_v25 = vld [vmem:[%s15678_s26 + $0x1684] ss:$16 sps:$4 sm:$0xff]  }
 0x567   : > { %10640 = vmatpush1.bf16.msra.mxu1 %v14389_v39  ;;  %v14473_v39 = vld [vmem:[%s15678_s26 + $0x13e8] ss:$16 sps:$4 sm:$0xff]  }
 0x568   : > { %10038 = vmatpush1.bf16.msra.mxu0 %v14386_v8  ;;  %10641 = vmatprep.subr.bf16.mxu1 %v14397_v56  ;;  %v14470_v8 = vld [vmem:[%s15678_s26 + $0x17e0] ss:$16 sps:$4 sm:$0xff]   ;;  %v14481_v56 = vld [vmem:[%s15678_s26 + $0x140c] ss:$16 sps:$4 sm:$0xff]  }
 0x569   : > { %10039 = vmatprep.subr.bf16.mxu0 %v14394_v55  ;;  %v14478_v55 = vld [vmem:[%s15678_s26 + $0x1804] ss:$16 sps:$4 sm:$0xff]  }
 0x56b   : > { %10642 = vmatpush1.bf16.msra.mxu1 %v14395_v58  ;;  %v14479_v58 = vld [vmem:[%s15678_s26 + $0x1408] ss:$16 sps:$4 sm:$0xff]  }
 0x56c   : > { %10040 = vmatpush1.bf16.msra.mxu0 %v14392_v46  ;;  %10643 = vmatprep.subr.bf16.mxu1 %v14403_v53  ;;  %v14476_v46 = vld [vmem:[%s15678_s26 + $0x1800] ss:$16 sps:$4 sm:$0xff]   ;;  %v14484_v53 = vld [vmem:[%s15678_s26 + $0x1824] ss:$16 sps:$4 sm:$0xff]  }
 0x56d   : > { %10041 = vmatprep.subr.bf16.mxu0 %v14400_v59  ;;  %v16594_v59 = vld [vmem:[#allocation2 + $0xb0] sm:$0xff] }
 0x56f   : > { %10644 = vmatpush1.bf16.msra.mxu1 %v14401_v60  ;;  %v16600_v60 = vld [vmem:[#allocation2 + $0xc8] sm:$0xff] }
 0x570   : > { %10042 = vmatpush1.bf16.msra.mxu0 %v14398_v20  ;;  %10645 = vmatprep.subr.bf16.mxu1 %v14409_v61  ;;  %v14487_v20 = vld [vmem:[%s15678_s26 + $0x142c] ss:$16 sps:$4 sm:$0xff]   ;;  %v14485_v61 = vld [vmem:[%s15678_s26 + $0x1428] ss:$16 sps:$4 sm:$0xff]  }
 0x571   : > { %10043 = vmatprep.subr.bf16.mxu0 %v14406_v25  ;;  %v14482_v25 = vld [vmem:[%s15678_s26 + $0x1820] ss:$16 sps:$4 sm:$0xff]  }
 0x573   : > { %10646 = vmatpush1.bf16.msra.mxu1 %v14407_v63  ;;  %v14493_v63 = vld [vmem:[%s15678_s26 + $0x144c] ss:$16 sps:$4 sm:$0xff]  }
 0x574   : > { %10044 = vmatpush1.bf16.msra.mxu0 %v14404_v62  ;;  %10647 = vmatprep.subr.bf16.mxu1 %v14415_v45  ;;  %v14490_v62 = vld [vmem:[%s15678_s26 + $0x1844] ss:$16 sps:$4 sm:$0xff]  }
 0x575   : > { %10045 = vmatprep.subr.bf16.mxu0 %v14412_v1  ;;  %v14491_v1 = vld [vmem:[%s15678_s26 + $0x1448] ss:$16 sps:$4 sm:$0xff]   ;;  %v14496_v45 = vld [vmem:[%s15678_s26 + $0x1864] ss:$16 sps:$4 sm:$0xff]  }
 0x577   : > { %10648 = vmatpush1.bf16.msra.mxu1 %v14413_v2  ;;  %v14494_v2 = vld [vmem:[%s15678_s26 + $0x1860] ss:$16 sps:$4 sm:$0xff]  }
 0x578   : > { %10046 = vmatpush1.bf16.msra.mxu0 %v14410_v0  ;;  %10649 = vmatprep.subr.bf16.mxu1 %v14421_v3  ;;  %v14499_v0 = vld [vmem:[%s15678_s26 + $0x146c] ss:$16 sps:$4 sm:$0xff]  }
 0x579   : > { %10047 = vmatprep.subr.bf16.mxu0 %v14418_v26  ;;  %v14497_v26 = vld [vmem:[%s15678_s26 + $0x1468] ss:$16 sps:$4 sm:$0xff]   ;;  %v14505_v3 = vld [vmem:[%s15678_s26 + $0x148c] ss:$16 sps:$4 sm:$0xff]  }
 0x57b   : > { %10650 = vmatpush1.bf16.msra.mxu1 %v14419_v4  ;;  %v14503_v4 = vld [vmem:[%s15678_s26 + $0x1488] ss:$16 sps:$4 sm:$0xff]  }
 0x57c   : > { %10048 = vmatpush1.bf16.msra.mxu0 %v14416_v49  ;;  %10651 = vmatprep.subr.bf16.mxu1 %v14427_v5  ;;  %v14500_v49 = vld [vmem:[%s15678_s26 + $0x1880] ss:$16 sps:$4 sm:$0xff]   ;;  %v14511_v5 = vld [vmem:[%s15678_s26 + $0x14ac] ss:$16 sps:$4 sm:$0xff]  }
 0x57d   : > { %10049 = vmatprep.subr.bf16.mxu0 %v14424_v51  ;;  %v14508_v51 = vld [vmem:[%s15678_s26 + $0x18a4] ss:$16 sps:$4 sm:$0xff]  }
 0x57f   : > { %10652 = vmatpush1.bf16.msra.mxu1 %v14425_v9  ;;  %v14509_v9 = vld [vmem:[%s15678_s26 + $0x14a8] ss:$16 sps:$4 sm:$0xff]  }
 0x580   : > { %10050 = vmatpush1.bf16.msra.mxu0 %v14422_v7  ;;  %10653 = vmatprep.subr.bf16.mxu1 %v14433_v12  ;;  %v14506_v7 = vld [vmem:[%s15678_s26 + $0x18a0] ss:$16 sps:$4 sm:$0xff]   ;;  %v14517_v12 = vld [vmem:[%s15678_s26 + $0x14cc] ss:$16 sps:$4 sm:$0xff]  }
 0x581   : > { %10051 = vmatprep.subr.bf16.mxu0 %v14430_v11  ;;  %v14514_v11 = vld [vmem:[%s15678_s26 + $0x18c4] ss:$16 sps:$4 sm:$0xff]  }
 0x583   : > { %10654 = vmatpush1.bf16.msra.mxu1 %v14431_v13  ;;  %v14515_v13 = vld [vmem:[%s15678_s26 + $0x14c8] ss:$16 sps:$4 sm:$0xff]  }
 0x584   : > { %10052 = vmatpush1.bf16.msra.mxu0 %v14428_v52  ;;  %10655 = vmatprep.subr.bf16.mxu1 %v14439_v28  ;;  %v14512_v52 = vld [vmem:[%s15678_s26 + $0x18c0] ss:$16 sps:$4 sm:$0xff]   ;;  %v14523_v28 = vld [vmem:[%s15678_s26 + $0x14ec] ss:$16 sps:$4 sm:$0xff]  }
 0x585   : > { %10053 = vmatprep.subr.bf16.mxu0 %v14436_v14  ;;  %v14520_v14 = vld [vmem:[%s15678_s26 + $0x18e4] ss:$16 sps:$4 sm:$0xff]  }
 0x587   : > { %10656 = vmatpush1.bf16.msra.mxu1 %v14437_v19  ;;  %v14521_v19 = vld [vmem:[%s15678_s26 + $0x14e8] ss:$16 sps:$4 sm:$0xff]  }
 0x588   : > { %10054 = vmatpush1.bf16.msra.mxu0 %v14434_v18  ;;  %10657 = vmatprep.subr.bf16.mxu1 %v14445_v23  ;;  %v14518_v18 = vld [vmem:[%s15678_s26 + $0x18e0] ss:$16 sps:$4 sm:$0xff]   ;;  %v14529_v23 = vld [vmem:[%s15678_s26 + $0x150c] ss:$16 sps:$4 sm:$0xff]  }
 0x589   : > { %10055 = vmatprep.subr.bf16.mxu0 %v14442_v22  ;;  %v14526_v22 = vld [vmem:[%s15678_s26 + $0x1904] ss:$16 sps:$4 sm:$0xff]  }
 0x58b   : > { %10658 = vmatpush1.bf16.msra.mxu1 %v14443_v43  ;;  %v14527_v43 = vld [vmem:[%s15678_s26 + $0x1508] ss:$16 sps:$4 sm:$0xff]  }
 0x58c   : > { %10056 = vmatpush1.bf16.msra.mxu0 %v14440_v24  ;;  %10659 = vmatprep.subr.bf16.mxu1 %v14451_v29  ;;  %v14524_v24 = vld [vmem:[%s15678_s26 + $0x1900] ss:$16 sps:$4 sm:$0xff]   ;;  %v14535_v29 = vld [vmem:[%s15678_s26 + $0x152c] ss:$16 sps:$4 sm:$0xff]  }
 0x58d   : > { %10057 = vmatprep.subr.bf16.mxu0 %v14448_v27  ;;  %v14532_v27 = vld [vmem:[%s15678_s26 + $0x1924] ss:$16 sps:$4 sm:$0xff]  }
 0x58f   : > { %10660 = vmatpush1.bf16.msra.mxu1 %v14449_v31  ;;  %v14533_v31 = vld [vmem:[%s15678_s26 + $0x1528] ss:$16 sps:$4 sm:$0xff]  }
 0x590   : > { %10058 = vmatpush1.bf16.msra.mxu0 %v14446_v30  ;;  %10661 = vmatprep.subr.bf16.mxu1 %v14457_v33  ;;  %v14530_v30 = vld [vmem:[%s15678_s26 + $0x1920] ss:$16 sps:$4 sm:$0xff]   ;;  %v14541_v33 = vld [vmem:[%s15678_s26 + $0x154c] ss:$16 sps:$4 sm:$0xff]  }
 0x591   : > { %10059 = vmatprep.subr.bf16.mxu0 %v14454_v32  ;;  %v14538_v32 = vld [vmem:[%s15678_s26 + $0x1944] ss:$16 sps:$4 sm:$0xff]  }
 0x593   : > { %10662 = vmatpush1.bf16.msra.mxu1 %v14455_v36  ;;  %v14539_v36 = vld [vmem:[%s15678_s26 + $0x1548] ss:$16 sps:$4 sm:$0xff]  }
 0x594   : > { %10060 = vmatpush1.bf16.msra.mxu0 %v14452_v35  ;;  %10663 = vmatprep.subr.bf16.mxu1 %v14463_v38  ;;  %v14536_v35 = vld [vmem:[%s15678_s26 + $0x1940] ss:$16 sps:$4 sm:$0xff]   ;;  %v14547_v38 = vld [vmem:[%s15678_s26 + $0x156c] ss:$16 sps:$4 sm:$0xff]  }
 0x595   : > { %10061 = vmatprep.subr.bf16.mxu0 %v14460_v10  ;;  %v14544_v10 = vld [vmem:[%s15678_s26 + $0x1964] ss:$16 sps:$4 sm:$0xff]  }
 0x597   : > { %10664 = vmatpush1.bf16.msra.mxu1 %v14461_v41  ;;  %v14545_v41 = vld [vmem:[%s15678_s26 + $0x1568] ss:$16 sps:$4 sm:$0xff]  }
 0x598   : > { %10062 = vmatpush1.bf16.msra.mxu0 %v14458_v40  ;;  %10665 = vmatprep.subr.bf16.mxu1 %v14469_v54  ;;  %v14542_v40 = vld [vmem:[%s15678_s26 + $0x1960] ss:$16 sps:$4 sm:$0xff]   ;;  %v14553_v54 = vld [vmem:[%s15678_s26 + $0x158c] ss:$16 sps:$4 sm:$0xff]  }
 0x599   : > { %10063 = vmatprep.subr.bf16.mxu0 %v14466_v42  ;;  %v14550_v42 = vld [vmem:[%s15678_s26 + $0x1984] ss:$16 sps:$4 sm:$0xff]  }
 0x59b   : > { %10666 = vmatpush1.bf16.msra.mxu1 %v14467_v6  ;;  %v14551_v6 = vld [vmem:[%s15678_s26 + $0x1588] ss:$16 sps:$4 sm:$0xff]  }
 0x59c   : > { %10064 = vmatpush1.bf16.msra.mxu0 %v14464_v44  ;;  %10667 = vmatprep.subr.bf16.mxu1 %v14475_v48  ;;  %v14548_v44 = vld [vmem:[%s15678_s26 + $0x1980] ss:$16 sps:$4 sm:$0xff]   ;;  %v14559_v48 = vld [vmem:[%s15678_s26 + $0x15ac] ss:$16 sps:$4 sm:$0xff]  }
 0x59d   : > { %10065 = vmatprep.subr.bf16.mxu0 %v14472_v47  ;;  %v14556_v47 = vld [vmem:[%s15678_s26 + $0x19a4] ss:$16 sps:$4 sm:$0xff]  }
 0x59f   : > { %10668 = vmatpush1.bf16.msra.mxu1 %v14473_v39  ;;  %v14557_v39 = vld [vmem:[%s15678_s26 + $0x15a8] ss:$16 sps:$4 sm:$0xff]  }
 0x5a0   : > { %10066 = vmatpush1.bf16.msra.mxu0 %v14470_v8  ;;  %10680 = vmatprep.subr.bf16.mxu1 %v14481_v56  ;;  %v14554_v8 = vld [vmem:[%s15678_s26 + $0x19a0] ss:$16 sps:$4 sm:$0xff]   ;;  %v14565_v56 = vld [vmem:[%s15678_s26 + $0x15cc] ss:$16 sps:$4 sm:$0xff]  }
 0x5a1   : > { %10078 = vmatprep.subr.bf16.mxu0 %v14478_v55  ;;  %v14562_v55 = vld [vmem:[%s15678_s26 + $0x19c4] ss:$16 sps:$4 sm:$0xff]  }
 0x5a2   : > { %10670 = vmatmul.mubr.bf16.vlgmr.msra.gmra.mrb[4].mxu1 %v16452_v34  ;;  %v14488_v34 = vld [vmem:[%s15678_s26 + $0x1840] ss:$16 sps:$4 sm:$0xff]  }
 0x5a3   : > { %10068 = vmatmul.mubr.bf16.vlgmr.msra.gmra.mrb[0].mxu0 %v16594_v59  ;;  %10681 = vmatpush1.bf16.msra.mxu1 %v14479_v58  ;;  %v14563_v58 = vld [vmem:[%s15678_s26 + $0x15c8] ss:$16 sps:$4 sm:$0xff]  }
 0x5a4   : > { %10079 = vmatpush1.bf16.msra.mxu0 %v14476_v46  ;;  %10682 = vmatprep.subr.bf16.mxu1 %v14487_v20  ;;  %v14560_v46 = vld [vmem:[%s15678_s26 + $0x19c0] ss:$16 sps:$4 sm:$0xff]   ;;  %v14571_v20 = vld [vmem:[%s15678_s26 + $0x15ec] ss:$16 sps:$4 sm:$0xff]  }
 0x5a5   : > { %10080 = vmatprep.subr.bf16.mxu0 %v14484_v53  ;;  %10110 = vmatprep.mubr.bf16.mxu0 %v16600_v60  ;;  %v14568_v53 = vld [vmem:[%s15678_s26 + $0x19e4] ss:$16 sps:$4 sm:$0xff]  }
 0x5a6   : > { %10712 = vmatprep.mubr.bf16.mxu1 %v16456_v37  ;;  %v14502_v37 = vld [vmem:[%s15678_s26 + $0x1884] ss:$16 sps:$4 sm:$0xff]  }
 0x5a7   : > { %10683 = vmatpush1.bf16.msra.mxu1 %v14485_v61  ;;  %v14569_v61 = vld [vmem:[%s15678_s26 + $0x15e8] ss:$16 sps:$4 sm:$0xff]  }
 0x5a8   : > { %10081 = vmatpush1.bf16.msra.mxu0 %v14482_v25  ;;  %10684 = vmatprep.subr.bf16.mxu1 %v14493_v63  ;;  %v14566_v25 = vld [vmem:[%s15678_s26 + $0x19e0] ss:$16 sps:$4 sm:$0xff]   ;;  %v14577_v63 = vld [vmem:[%s15678_s26 + $0x160c] ss:$16 sps:$4 sm:$0xff]  }
 0x5a9   : > { %10082 = vmatprep.subr.bf16.mxu0 %v14490_v62  ;;  %v14574_v62 = vld [vmem:[%s15678_s26 + $0x1a04] ss:$16 sps:$4 sm:$0xff]  }
 0x5ab   : > { %10685 = vmatpush1.bf16.msra.mxu1 %v14491_v1  ;;  %v14575_v1 = vld [vmem:[%s15678_s26 + $0x1608] ss:$16 sps:$4 sm:$0xff]  }
 0x5ac   : > { %10083 = vmatpush1.bf16.msra.mxu0 %v14488_v34  ;;  %10686 = vmatprep.subr.bf16.mxu1 %v14499_v0  ;;  %v14572_v34 = vld [vmem:[%s15678_s26 + $0x1a00] ss:$16 sps:$4 sm:$0xff]   ;;  %v14580_v0 = vld [vmem:[%s15678_s26 + $0x1a24] ss:$16 sps:$4 sm:$0xff]  }
 0x5ad   : > { %10084 = vmatprep.subr.bf16.mxu0 %v14496_v45  ;;  %v16666_v45 = vld [vmem:[#allocation2 + $0xc0] sm:$0xff] }
 0x5af   : > { %10687 = vmatpush1.bf16.msra.mxu1 %v14497_v26  ;;  %v16672_v26 = vld [vmem:[#allocation2 + $0xd8] sm:$0xff] }
 0x5b0   : > { %10085 = vmatpush1.bf16.msra.mxu0 %v14494_v2  ;;  %10688 = vmatprep.subr.bf16.mxu1 %v14505_v3  ;;  %v14583_v2 = vld [vmem:[%s15678_s26 + $0x162c] ss:$16 sps:$4 sm:$0xff]   ;;  %v14581_v3 = vld [vmem:[%s15678_s26 + $0x1628] ss:$16 sps:$4 sm:$0xff]  }
 0x5b1   : > { %10086 = vmatprep.subr.bf16.mxu0 %v14502_v37  ;;  %v14578_v37 = vld [vmem:[%s15678_s26 + $0x1a20] ss:$16 sps:$4 sm:$0xff]  }
 0x5b3   : > { %10689 = vmatpush1.bf16.msra.mxu1 %v14503_v4  ;;  %v14589_v4 = vld [vmem:[%s15678_s26 + $0x164c] ss:$16 sps:$4 sm:$0xff]  }
 0x5b4   : > { %10087 = vmatpush1.bf16.msra.mxu0 %v14500_v49  ;;  %10690 = vmatprep.subr.bf16.mxu1 %v14511_v5  ;;  %v14586_v49 = vld [vmem:[%s15678_s26 + $0x1a44] ss:$16 sps:$4 sm:$0xff]  }
 0x5b5   : > { %10088 = vmatprep.subr.bf16.mxu0 %v14508_v51  ;;  %v14587_v51 = vld [vmem:[%s15678_s26 + $0x1648] ss:$16 sps:$4 sm:$0xff]   ;;  %v14592_v5 = vld [vmem:[%s15678_s26 + $0x1a64] ss:$16 sps:$4 sm:$0xff]  }
 0x5b7   : > { %10691 = vmatpush1.bf16.msra.mxu1 %v14509_v9  ;;  %v14590_v9 = vld [vmem:[%s15678_s26 + $0x1a60] ss:$16 sps:$4 sm:$0xff]  }
 0x5b8   : > { %10089 = vmatpush1.bf16.msra.mxu0 %v14506_v7  ;;  %10692 = vmatprep.subr.bf16.mxu1 %v14517_v12  ;;  %v14595_v7 = vld [vmem:[%s15678_s26 + $0x166c] ss:$16 sps:$4 sm:$0xff]  }
 0x5b9   : > { %10090 = vmatprep.subr.bf16.mxu0 %v14514_v11  ;;  %v14593_v11 = vld [vmem:[%s15678_s26 + $0x1668] ss:$16 sps:$4 sm:$0xff]   ;;  %v14601_v12 = vld [vmem:[%s15678_s26 + $0x168c] ss:$16 sps:$4 sm:$0xff]  }
 0x5bb   : > { %10693 = vmatpush1.bf16.msra.mxu1 %v14515_v13  ;;  %v14599_v13 = vld [vmem:[%s15678_s26 + $0x1688] ss:$16 sps:$4 sm:$0xff]  }
 0x5bc   : > { %10091 = vmatpush1.bf16.msra.mxu0 %v14512_v52  ;;  %10694 = vmatprep.subr.bf16.mxu1 %v14523_v28  ;;  %v14596_v52 = vld [vmem:[%s15678_s26 + $0x1a80] ss:$16 sps:$4 sm:$0xff]   ;;  %v14607_v28 = vld [vmem:[%s15678_s26 + $0x16ac] ss:$16 sps:$4 sm:$0xff]  }
 0x5bd   : > { %10092 = vmatprep.subr.bf16.mxu0 %v14520_v14  ;;  %v14604_v14 = vld [vmem:[%s15678_s26 + $0x1aa4] ss:$16 sps:$4 sm:$0xff]  }
 0x5bf   : > { %10695 = vmatpush1.bf16.msra.mxu1 %v14521_v19  ;;  %v14605_v19 = vld [vmem:[%s15678_s26 + $0x16a8] ss:$16 sps:$4 sm:$0xff]  }
 0x5c0   : > { %10093 = vmatpush1.bf16.msra.mxu0 %v14518_v18  ;;  %10696 = vmatprep.subr.bf16.mxu1 %v14529_v23  ;;  %v14602_v18 = vld [vmem:[%s15678_s26 + $0x1aa0] ss:$16 sps:$4 sm:$0xff]   ;;  %v14613_v23 = vld [vmem:[%s15678_s26 + $0x16cc] ss:$16 sps:$4 sm:$0xff]  }
 0x5c1   : > { %10094 = vmatprep.subr.bf16.mxu0 %v14526_v22  ;;  %v14610_v22 = vld [vmem:[%s15678_s26 + $0x1ac4] ss:$16 sps:$4 sm:$0xff]  }
 0x5c3   : > { %10697 = vmatpush1.bf16.msra.mxu1 %v14527_v43  ;;  %v14611_v43 = vld [vmem:[%s15678_s26 + $0x16c8] ss:$16 sps:$4 sm:$0xff]  }
 0x5c4   : > { %10095 = vmatpush1.bf16.msra.mxu0 %v14524_v24  ;;  %10698 = vmatprep.subr.bf16.mxu1 %v14535_v29  ;;  %v14608_v24 = vld [vmem:[%s15678_s26 + $0x1ac0] ss:$16 sps:$4 sm:$0xff]   ;;  %v14619_v29 = vld [vmem:[%s15678_s26 + $0x16ec] ss:$16 sps:$4 sm:$0xff]  }
 0x5c5   : > { %10096 = vmatprep.subr.bf16.mxu0 %v14532_v27  ;;  %v14616_v27 = vld [vmem:[%s15678_s26 + $0x1ae4] ss:$16 sps:$4 sm:$0xff]  }
 0x5c7   : > { %10699 = vmatpush1.bf16.msra.mxu1 %v14533_v31  ;;  %v14617_v31 = vld [vmem:[%s15678_s26 + $0x16e8] ss:$16 sps:$4 sm:$0xff]  }
 0x5c8   : > { %10097 = vmatpush1.bf16.msra.mxu0 %v14530_v30  ;;  %10700 = vmatprep.subr.bf16.mxu1 %v14541_v33  ;;  %v14614_v30 = vld [vmem:[%s15678_s26 + $0x1ae0] ss:$16 sps:$4 sm:$0xff]   ;;  %v14625_v33 = vld [vmem:[%s15678_s26 + $0x170c] ss:$16 sps:$4 sm:$0xff]  }
 0x5c9   : > { %10098 = vmatprep.subr.bf16.mxu0 %v14538_v32  ;;  %v14622_v32 = vld [vmem:[%s15678_s26 + $0x1b04] ss:$16 sps:$4 sm:$0xff]  }
 0x5cb   : > { %10701 = vmatpush1.bf16.msra.mxu1 %v14539_v36  ;;  %v14623_v36 = vld [vmem:[%s15678_s26 + $0x1708] ss:$16 sps:$4 sm:$0xff]  }
 0x5cc   : > { %10099 = vmatpush1.bf16.msra.mxu0 %v14536_v35  ;;  %10702 = vmatprep.subr.bf16.mxu1 %v14547_v38  ;;  %v14620_v35 = vld [vmem:[%s15678_s26 + $0x1b00] ss:$16 sps:$4 sm:$0xff]   ;;  %v14631_v38 = vld [vmem:[%s15678_s26 + $0x172c] ss:$16 sps:$4 sm:$0xff]  }
 0x5cd   : > { %10100 = vmatprep.subr.bf16.mxu0 %v14544_v10  ;;  %v14628_v10 = vld [vmem:[%s15678_s26 + $0x1b24] ss:$16 sps:$4 sm:$0xff]  }
 0x5cf   : > { %10703 = vmatpush1.bf16.msra.mxu1 %v14545_v41  ;;  %v14629_v41 = vld [vmem:[%s15678_s26 + $0x1728] ss:$16 sps:$4 sm:$0xff]  }
 0x5d0   : > { %10101 = vmatpush1.bf16.msra.mxu0 %v14542_v40  ;;  %10704 = vmatprep.subr.bf16.mxu1 %v14553_v54  ;;  %v14626_v40 = vld [vmem:[%s15678_s26 + $0x1b20] ss:$16 sps:$4 sm:$0xff]   ;;  %v14637_v54 = vld [vmem:[%s15678_s26 + $0x174c] ss:$16 sps:$4 sm:$0xff]  }
 0x5d1   : > { %10102 = vmatprep.subr.bf16.mxu0 %v14550_v42  ;;  %v14634_v42 = vld [vmem:[%s15678_s26 + $0x1b44] ss:$16 sps:$4 sm:$0xff]  }
 0x5d3   : > { %10705 = vmatpush1.bf16.msra.mxu1 %v14551_v6  ;;  %v14635_v6 = vld [vmem:[%s15678_s26 + $0x1748] ss:$16 sps:$4 sm:$0xff]  }
 0x5d4   : > { %10103 = vmatpush1.bf16.msra.mxu0 %v14548_v44  ;;  %10706 = vmatprep.subr.bf16.mxu1 %v14559_v48  ;;  %v14632_v44 = vld [vmem:[%s15678_s26 + $0x1b40] ss:$16 sps:$4 sm:$0xff]   ;;  %v14643_v48 = vld [vmem:[%s15678_s26 + $0x176c] ss:$16 sps:$4 sm:$0xff]  }
 0x5d5   : > { %10104 = vmatprep.subr.bf16.mxu0 %v14556_v47  ;;  %v14640_v47 = vld [vmem:[%s15678_s26 + $0x1b64] ss:$16 sps:$4 sm:$0xff]  }
 0x5d7   : > { %10707 = vmatpush1.bf16.msra.mxu1 %v14557_v39  ;;  %v14641_v39 = vld [vmem:[%s15678_s26 + $0x1768] ss:$16 sps:$4 sm:$0xff]  }
 0x5d8   : > { %10105 = vmatpush1.bf16.msra.mxu0 %v14554_v8  ;;  %10708 = vmatprep.subr.bf16.mxu1 %v14565_v56  ;;  %v14638_v8 = vld [vmem:[%s15678_s26 + $0x1b60] ss:$16 sps:$4 sm:$0xff]   ;;  %v14649_v56 = vld [vmem:[%s15678_s26 + $0x178c] ss:$16 sps:$4 sm:$0xff]  }
 0x5d9   : > { %10106 = vmatprep.subr.bf16.mxu0 %v14562_v55  ;;  %v14646_v55 = vld [vmem:[%s15678_s26 + $0x1b84] ss:$16 sps:$4 sm:$0xff]  }
 0x5db   : > { %10709 = vmatpush1.bf16.msra.mxu1 %v14563_v58  ;;  %v14647_v58 = vld [vmem:[%s15678_s26 + $0x1788] ss:$16 sps:$4 sm:$0xff]  }
 0x5dc   : > { %10107 = vmatpush1.bf16.msra.mxu0 %v14560_v46  ;;  %10710 = vmatprep.subr.bf16.mxu1 %v14571_v20  ;;  %v14644_v46 = vld [vmem:[%s15678_s26 + $0x1b80] ss:$16 sps:$4 sm:$0xff]   ;;  %v14655_v20 = vld [vmem:[%s15678_s26 + $0x17ac] ss:$16 sps:$4 sm:$0xff]  }
 0x5dd   : > { %10108 = vmatprep.subr.bf16.mxu0 %v14568_v53  ;;  %v14652_v53 = vld [vmem:[%s15678_s26 + $0x1ba4] ss:$16 sps:$4 sm:$0xff]  }
 0x5df   : > { %10711 = vmatpush1.bf16.msra.mxu1 %v14569_v61  ;;  %v14653_v61 = vld [vmem:[%s15678_s26 + $0x17a8] ss:$16 sps:$4 sm:$0xff]  }
 0x5e0   : > { %10109 = vmatpush1.bf16.msra.mxu0 %v14566_v25  ;;  %10723 = vmatprep.subr.bf16.mxu1 %v14577_v63  ;;  %v14650_v25 = vld [vmem:[%s15678_s26 + $0x1ba0] ss:$16 sps:$4 sm:$0xff]   ;;  %v14661_v63 = vld [vmem:[%s15678_s26 + $0x17cc] ss:$16 sps:$4 sm:$0xff]  }
 0x5e1   : > { %10121 = vmatprep.subr.bf16.mxu0 %v14574_v62  ;;  %v14658_v62 = vld [vmem:[%s15678_s26 + $0x1bc4] ss:$16 sps:$4 sm:$0xff]  }
 0x5e2   : > { %10713 = vmatmul.mubr.bf16.vlgmr.msra.gmra.mrb[4].mxu1 %v16522_v57  ;;  %v14584_v57 = vld [vmem:[%s15678_s26 + $0x1a40] ss:$16 sps:$4 sm:$0xff]  }
 0x5e3   : > { %10111 = vmatmul.mubr.bf16.vlgmr.msra.gmra.mrb[0].mxu0 %v16666_v45  ;;  %10724 = vmatpush1.bf16.msra.mxu1 %v14575_v1  ;;  %v14659_v1 = vld [vmem:[%s15678_s26 + $0x17c8] ss:$16 sps:$4 sm:$0xff]  }
 0x5e4   : > { %10122 = vmatpush1.bf16.msra.mxu0 %v14572_v34  ;;  %10725 = vmatprep.subr.bf16.mxu1 %v14583_v2  ;;  %v14656_v34 = vld [vmem:[%s15678_s26 + $0x1bc0] ss:$16 sps:$4 sm:$0xff]   ;;  %v14667_v2 = vld [vmem:[%s15678_s26 + $0x17ec] ss:$16 sps:$4 sm:$0xff]  }
 0x5e5   : > { %10123 = vmatprep.subr.bf16.mxu0 %v14580_v0  ;;  %10153 = vmatprep.mubr.bf16.mxu0 %v16672_v26  ;;  %v14664_v0 = vld [vmem:[%s15678_s26 + $0x1be4] ss:$16 sps:$4 sm:$0xff]  }
 0x5e6   : > { %10755 = vmatprep.mubr.bf16.mxu1 %v16528_v50  ;;  %v14598_v50 = vld [vmem:[%s15678_s26 + $0x1a84] ss:$16 sps:$4 sm:$0xff]  }
 0x5e7   : > { %10726 = vmatpush1.bf16.msra.mxu1 %v14581_v3  ;;  %v14665_v3 = vld [vmem:[%s15678_s26 + $0x17e8] ss:$16 sps:$4 sm:$0xff]  }
 0x5e8   : > { %10124 = vmatpush1.bf16.msra.mxu0 %v14578_v37  ;;  %10727 = vmatprep.subr.bf16.mxu1 %v14589_v4  ;;  %v14662_v37 = vld [vmem:[%s15678_s26 + $0x1be0] ss:$16 sps:$4 sm:$0xff]   ;;  %v14673_v4 = vld [vmem:[%s15678_s26 + $0x180c] ss:$16 sps:$4 sm:$0xff]  }
 0x5e9   : > { %10125 = vmatprep.subr.bf16.mxu0 %v14586_v49  ;;  %v14670_v49 = vld [vmem:[%s15678_s26 + $0x1c04] ss:$16 sps:$4 sm:$0xff]  }
 0x5eb   : > { %10728 = vmatpush1.bf16.msra.mxu1 %v14587_v51  ;;  %v14671_v51 = vld [vmem:[%s15678_s26 + $0x1808] ss:$16 sps:$4 sm:$0xff]  }
 0x5ec   : > { %10126 = vmatpush1.bf16.msra.mxu0 %v14584_v57  ;;  %10729 = vmatprep.subr.bf16.mxu1 %v14595_v7  ;;  %v14668_v57 = vld [vmem:[%s15678_s26 + $0x1c00] ss:$16 sps:$4 sm:$0xff]   ;;  %v14676_v7 = vld [vmem:[%s15678_s26 + $0x1c24] ss:$16 sps:$4 sm:$0xff]  }
 0x5ed   : > { %10127 = vmatprep.subr.bf16.mxu0 %v14592_v5  ;;  %v16738_v5 = vld [vmem:[#allocation2 + $0xd0] sm:$0xff] }
 0x5ef   : > { %10730 = vmatpush1.bf16.msra.mxu1 %v14593_v11  ;;  %v16744_v11 = vld [vmem:[#allocation2 + $0xe8] sm:$0xff] }
 0x5f0   : > { %10128 = vmatpush1.bf16.msra.mxu0 %v14590_v9  ;;  %10731 = vmatprep.subr.bf16.mxu1 %v14601_v12  ;;  %v14679_v9 = vld [vmem:[%s15678_s26 + $0x182c] ss:$16 sps:$4 sm:$0xff]   ;;  %v14677_v12 = vld [vmem:[%s15678_s26 + $0x1828] ss:$16 sps:$4 sm:$0xff]  }
 0x5f1   : > { %10129 = vmatprep.subr.bf16.mxu0 %v14598_v50  ;;  %v14674_v50 = vld [vmem:[%s15678_s26 + $0x1c20] ss:$16 sps:$4 sm:$0xff]  }
 0x5f3   : > { %10732 = vmatpush1.bf16.msra.mxu1 %v14599_v13  ;;  %v14685_v13 = vld [vmem:[%s15678_s26 + $0x184c] ss:$16 sps:$4 sm:$0xff]  }
 0x5f4   : > { %10130 = vmatpush1.bf16.msra.mxu0 %v14596_v52  ;;  %10733 = vmatprep.subr.bf16.mxu1 %v14607_v28  ;;  %v14682_v52 = vld [vmem:[%s15678_s26 + $0x1c44] ss:$16 sps:$4 sm:$0xff]  }
 0x5f5   : > { %10131 = vmatprep.subr.bf16.mxu0 %v14604_v14  ;;  %v14683_v14 = vld [vmem:[%s15678_s26 + $0x1848] ss:$16 sps:$4 sm:$0xff]   ;;  %v14688_v28 = vld [vmem:[%s15678_s26 + $0x1c64] ss:$16 sps:$4 sm:$0xff]  }
 0x5f7   : > { %10734 = vmatpush1.bf16.msra.mxu1 %v14605_v19  ;;  %v14686_v19 = vld [vmem:[%s15678_s26 + $0x1c60] ss:$16 sps:$4 sm:$0xff]  }
 0x5f8   : > { %10132 = vmatpush1.bf16.msra.mxu0 %v14602_v18  ;;  %10735 = vmatprep.subr.bf16.mxu1 %v14613_v23  ;;  %v14691_v18 = vld [vmem:[%s15678_s26 + $0x186c] ss:$16 sps:$4 sm:$0xff]  }
 0x5f9   : > { %10133 = vmatprep.subr.bf16.mxu0 %v14610_v22  ;;  %v14689_v22 = vld [vmem:[%s15678_s26 + $0x1868] ss:$16 sps:$4 sm:$0xff]   ;;  %v14697_v23 = vld [vmem:[%s15678_s26 + $0x188c] ss:$16 sps:$4 sm:$0xff]  }
 0x5fb   : > { %10736 = vmatpush1.bf16.msra.mxu1 %v14611_v43  ;;  %v14695_v43 = vld [vmem:[%s15678_s26 + $0x1888] ss:$16 sps:$4 sm:$0xff]  }
 0x5fc   : > { %10134 = vmatpush1.bf16.msra.mxu0 %v14608_v24  ;;  %10737 = vmatprep.subr.bf16.mxu1 %v14619_v29  ;;  %v14692_v24 = vld [vmem:[%s15678_s26 + $0x1c80] ss:$16 sps:$4 sm:$0xff]   ;;  %v14703_v29 = vld [vmem:[%s15678_s26 + $0x18ac] ss:$16 sps:$4 sm:$0xff]  }
 0x5fd   : > { %10135 = vmatprep.subr.bf16.mxu0 %v14616_v27  ;;  %v14700_v27 = vld [vmem:[%s15678_s26 + $0x1ca4] ss:$16 sps:$4 sm:$0xff]  }
 0x5ff   : > { %10738 = vmatpush1.bf16.msra.mxu1 %v14617_v31  ;;  %v14701_v31 = vld [vmem:[%s15678_s26 + $0x18a8] ss:$16 sps:$4 sm:$0xff]  }
 0x600   : > { %10136 = vmatpush1.bf16.msra.mxu0 %v14614_v30  ;;  %10739 = vmatprep.subr.bf16.mxu1 %v14625_v33  ;;  %v14698_v30 = vld [vmem:[%s15678_s26 + $0x1ca0] ss:$16 sps:$4 sm:$0xff]   ;;  %v14709_v33 = vld [vmem:[%s15678_s26 + $0x18cc] ss:$16 sps:$4 sm:$0xff]  }
 0x601   : > { %10137 = vmatprep.subr.bf16.mxu0 %v14622_v32  ;;  %v14706_v32 = vld [vmem:[%s15678_s26 + $0x1cc4] ss:$16 sps:$4 sm:$0xff]  }
 0x603   : > { %10740 = vmatpush1.bf16.msra.mxu1 %v14623_v36  ;;  %v14707_v36 = vld [vmem:[%s15678_s26 + $0x18c8] ss:$16 sps:$4 sm:$0xff]  }
 0x604   : > { %10138 = vmatpush1.bf16.msra.mxu0 %v14620_v35  ;;  %10741 = vmatprep.subr.bf16.mxu1 %v14631_v38  ;;  %v14704_v35 = vld [vmem:[%s15678_s26 + $0x1cc0] ss:$16 sps:$4 sm:$0xff]   ;;  %v14715_v38 = vld [vmem:[%s15678_s26 + $0x18ec] ss:$16 sps:$4 sm:$0xff]  }
 0x605   : > { %10139 = vmatprep.subr.bf16.mxu0 %v14628_v10  ;;  %v14712_v10 = vld [vmem:[%s15678_s26 + $0x1ce4] ss:$16 sps:$4 sm:$0xff]  }
 0x607   : > { %10742 = vmatpush1.bf16.msra.mxu1 %v14629_v41  ;;  %v14713_v41 = vld [vmem:[%s15678_s26 + $0x18e8] ss:$16 sps:$4 sm:$0xff]  }
 0x608   : > { %10140 = vmatpush1.bf16.msra.mxu0 %v14626_v40  ;;  %10743 = vmatprep.subr.bf16.mxu1 %v14637_v54  ;;  %v14710_v40 = vld [vmem:[%s15678_s26 + $0x1ce0] ss:$16 sps:$4 sm:$0xff]   ;;  %v14721_v54 = vld [vmem:[%s15678_s26 + $0x190c] ss:$16 sps:$4 sm:$0xff]  }
 0x609   : > { %10141 = vmatprep.subr.bf16.mxu0 %v14634_v42  ;;  %v14718_v42 = vld [vmem:[%s15678_s26 + $0x1d04] ss:$16 sps:$4 sm:$0xff]  }
 0x60b   : > { %10744 = vmatpush1.bf16.msra.mxu1 %v14635_v6  ;;  %v14719_v6 = vld [vmem:[%s15678_s26 + $0x1908] ss:$16 sps:$4 sm:$0xff]  }
 0x60c   : > { %10142 = vmatpush1.bf16.msra.mxu0 %v14632_v44  ;;  %10745 = vmatprep.subr.bf16.mxu1 %v14643_v48  ;;  %v14716_v44 = vld [vmem:[%s15678_s26 + $0x1d00] ss:$16 sps:$4 sm:$0xff]   ;;  %v14727_v48 = vld [vmem:[%s15678_s26 + $0x192c] ss:$16 sps:$4 sm:$0xff]  }
 0x60d   : > { %10143 = vmatprep.subr.bf16.mxu0 %v14640_v47  ;;  %v14724_v47 = vld [vmem:[%s15678_s26 + $0x1d24] ss:$16 sps:$4 sm:$0xff]  }
 0x60f   : > { %10746 = vmatpush1.bf16.msra.mxu1 %v14641_v39  ;;  %v14725_v39 = vld [vmem:[%s15678_s26 + $0x1928] ss:$16 sps:$4 sm:$0xff]  }
 0x610   : > { %10144 = vmatpush1.bf16.msra.mxu0 %v14638_v8  ;;  %10747 = vmatprep.subr.bf16.mxu1 %v14649_v56  ;;  %v14722_v8 = vld [vmem:[%s15678_s26 + $0x1d20] ss:$16 sps:$4 sm:$0xff]   ;;  %v14733_v56 = vld [vmem:[%s15678_s26 + $0x194c] ss:$16 sps:$4 sm:$0xff]  }
 0x611   : > { %10145 = vmatprep.subr.bf16.mxu0 %v14646_v55  ;;  %v14730_v55 = vld [vmem:[%s15678_s26 + $0x1d44] ss:$16 sps:$4 sm:$0xff]  }
 0x613   : > { %10748 = vmatpush1.bf16.msra.mxu1 %v14647_v58  ;;  %v14731_v58 = vld [vmem:[%s15678_s26 + $0x1948] ss:$16 sps:$4 sm:$0xff]  }
 0x614   : > { %10146 = vmatpush1.bf16.msra.mxu0 %v14644_v46  ;;  %10749 = vmatprep.subr.bf16.mxu1 %v14655_v20  ;;  %v14728_v46 = vld [vmem:[%s15678_s26 + $0x1d40] ss:$16 sps:$4 sm:$0xff]   ;;  %v14739_v20 = vld [vmem:[%s15678_s26 + $0x196c] ss:$16 sps:$4 sm:$0xff]  }
 0x615   : > { %10147 = vmatprep.subr.bf16.mxu0 %v14652_v53  ;;  %v14736_v53 = vld [vmem:[%s15678_s26 + $0x1d64] ss:$16 sps:$4 sm:$0xff]  }
 0x617   : > { %10750 = vmatpush1.bf16.msra.mxu1 %v14653_v61  ;;  %v14737_v61 = vld [vmem:[%s15678_s26 + $0x1968] ss:$16 sps:$4 sm:$0xff]  }
 0x618   : > { %10148 = vmatpush1.bf16.msra.mxu0 %v14650_v25  ;;  %10751 = vmatprep.subr.bf16.mxu1 %v14661_v63  ;;  %v14734_v25 = vld [vmem:[%s15678_s26 + $0x1d60] ss:$16 sps:$4 sm:$0xff]   ;;  %v14745_v63 = vld [vmem:[%s15678_s26 + $0x198c] ss:$16 sps:$4 sm:$0xff]  }
 0x619   : > { %10149 = vmatprep.subr.bf16.mxu0 %v14658_v62  ;;  %v14742_v62 = vld [vmem:[%s15678_s26 + $0x1d84] ss:$16 sps:$4 sm:$0xff]  }
 0x61b   : > { %10752 = vmatpush1.bf16.msra.mxu1 %v14659_v1  ;;  %v14743_v1 = vld [vmem:[%s15678_s26 + $0x1988] ss:$16 sps:$4 sm:$0xff]  }
 0x61c   : > { %10150 = vmatpush1.bf16.msra.mxu0 %v14656_v34  ;;  %10753 = vmatprep.subr.bf16.mxu1 %v14667_v2  ;;  %v14740_v34 = vld [vmem:[%s15678_s26 + $0x1d80] ss:$16 sps:$4 sm:$0xff]   ;;  %v14751_v2 = vld [vmem:[%s15678_s26 + $0x19ac] ss:$16 sps:$4 sm:$0xff]  }
 0x61d   : > { %10151 = vmatprep.subr.bf16.mxu0 %v14664_v0  ;;  %v14748_v0 = vld [vmem:[%s15678_s26 + $0x1da4] ss:$16 sps:$4 sm:$0xff]  }
 0x61f   : > { %10754 = vmatpush1.bf16.msra.mxu1 %v14665_v3  ;;  %v14749_v3 = vld [vmem:[%s15678_s26 + $0x19a8] ss:$16 sps:$4 sm:$0xff]  }
 0x620   : > { %10152 = vmatpush1.bf16.msra.mxu0 %v14662_v37  ;;  %10766 = vmatprep.subr.bf16.mxu1 %v14673_v4  ;;  %v14746_v37 = vld [vmem:[%s15678_s26 + $0x1da0] ss:$16 sps:$4 sm:$0xff]   ;;  %v14757_v4 = vld [vmem:[%s15678_s26 + $0x19cc] ss:$16 sps:$4 sm:$0xff]  }
 0x621   : > { %10164 = vmatprep.subr.bf16.mxu0 %v14670_v49  ;;  %v14754_v49 = vld [vmem:[%s15678_s26 + $0x1dc4] ss:$16 sps:$4 sm:$0xff]  }
 0x622   : > { %10756 = vmatmul.mubr.bf16.vlgmr.msra.gmra.mrb[4].mxu1 %v16594_v59  ;;  %v14680_v59 = vld [vmem:[%s15678_s26 + $0x1c40] ss:$16 sps:$4 sm:$0xff]  }
 0x623   : > { %10154 = vmatmul.mubr.bf16.vlgmr.msra.gmra.mrb[0].mxu0 %v16738_v5  ;;  %10767 = vmatpush1.bf16.msra.mxu1 %v14671_v51  ;;  %v14755_v51 = vld [vmem:[%s15678_s26 + $0x19c8] ss:$16 sps:$4 sm:$0xff]  }
 0x624   : > { %10165 = vmatpush1.bf16.msra.mxu0 %v14668_v57  ;;  %10768 = vmatprep.subr.bf16.mxu1 %v14679_v9  ;;  %v14752_v57 = vld [vmem:[%s15678_s26 + $0x1dc0] ss:$16 sps:$4 sm:$0xff]   ;;  %v14763_v9 = vld [vmem:[%s15678_s26 + $0x19ec] ss:$16 sps:$4 sm:$0xff]  }
 0x625   : > { %10166 = vmatprep.subr.bf16.mxu0 %v14676_v7  ;;  %10196 = vmatprep.mubr.bf16.mxu0 %v16744_v11  ;;  %v14760_v7 = vld [vmem:[%s15678_s26 + $0x1de4] ss:$16 sps:$4 sm:$0xff]  }
 0x626   : > { %10798 = vmatprep.mubr.bf16.mxu1 %v16600_v60  ;;  %v14694_v60 = vld [vmem:[%s15678_s26 + $0x1c84] ss:$16 sps:$4 sm:$0xff]  }
 0x627   : > { %10769 = vmatpush1.bf16.msra.mxu1 %v14677_v12  ;;  %v14761_v12 = vld [vmem:[%s15678_s26 + $0x19e8] ss:$16 sps:$4 sm:$0xff]  }
 0x628   : > { %10167 = vmatpush1.bf16.msra.mxu0 %v14674_v50  ;;  %10770 = vmatprep.subr.bf16.mxu1 %v14685_v13  ;;  %v14758_v50 = vld [vmem:[%s15678_s26 + $0x1de0] ss:$16 sps:$4 sm:$0xff]   ;;  %v14769_v13 = vld [vmem:[%s15678_s26 + $0x1a0c] ss:$16 sps:$4 sm:$0xff]  }
 0x629   : > { %10168 = vmatprep.subr.bf16.mxu0 %v14682_v52  ;;  %v14766_v52 = vld [vmem:[%s15678_s26 + $0x1e04] ss:$16 sps:$4 sm:$0xff]  }
 0x62b   : > { %10771 = vmatpush1.bf16.msra.mxu1 %v14683_v14  ;;  %v14767_v14 = vld [vmem:[%s15678_s26 + $0x1a08] ss:$16 sps:$4 sm:$0xff]  }
 0x62c   : > { %10169 = vmatpush1.bf16.msra.mxu0 %v14680_v59  ;;  %10772 = vmatprep.subr.bf16.mxu1 %v14691_v18  ;;  %v14764_v59 = vld [vmem:[%s15678_s26 + $0x1e00] ss:$16 sps:$4 sm:$0xff]   ;;  %v14772_v18 = vld [vmem:[%s15678_s26 + $0x1e24] ss:$16 sps:$4 sm:$0xff]  }
 0x62d   : > { %10170 = vmatprep.subr.bf16.mxu0 %v14688_v28  ;;  %v16810_v28 = vld [vmem:[#allocation2 + $0xe0] sm:$0xff] }
 0x62f   : > { %10773 = vmatpush1.bf16.msra.mxu1 %v14689_v22  ;;  %v16816_v22 = vld [vmem:[#allocation2 + $0xf8] sm:$0xff] }
 0x630   : > { %10171 = vmatpush1.bf16.msra.mxu0 %v14686_v19  ;;  %10774 = vmatprep.subr.bf16.mxu1 %v14697_v23  ;;  %v14775_v19 = vld [vmem:[%s15678_s26 + $0x1a2c] ss:$16 sps:$4 sm:$0xff]   ;;  %v14773_v23 = vld [vmem:[%s15678_s26 + $0x1a28] ss:$16 sps:$4 sm:$0xff]  }
 0x631   : > { %10172 = vmatprep.subr.bf16.mxu0 %v14694_v60  ;;  %v14770_v60 = vld [vmem:[%s15678_s26 + $0x1e20] ss:$16 sps:$4 sm:$0xff]  }
 0x633   : > { %10775 = vmatpush1.bf16.msra.mxu1 %v14695_v43  ;;  %v14781_v43 = vld [vmem:[%s15678_s26 + $0x1a4c] ss:$16 sps:$4 sm:$0xff]  }
 0x634   : > { %10173 = vmatpush1.bf16.msra.mxu0 %v14692_v24  ;;  %10776 = vmatprep.subr.bf16.mxu1 %v14703_v29  ;;  %v14778_v24 = vld [vmem:[%s15678_s26 + $0x1e44] ss:$16 sps:$4 sm:$0xff]  }
 0x635   : > { %10174 = vmatprep.subr.bf16.mxu0 %v14700_v27  ;;  %v14779_v27 = vld [vmem:[%s15678_s26 + $0x1a48] ss:$16 sps:$4 sm:$0xff]   ;;  %v14784_v29 = vld [vmem:[%s15678_s26 + $0x1e64] ss:$16 sps:$4 sm:$0xff]  }
 0x637   : > { %10777 = vmatpush1.bf16.msra.mxu1 %v14701_v31  ;;  %v14782_v31 = vld [vmem:[%s15678_s26 + $0x1e60] ss:$16 sps:$4 sm:$0xff]  }
 0x638   : > { %10175 = vmatpush1.bf16.msra.mxu0 %v14698_v30  ;;  %10778 = vmatprep.subr.bf16.mxu1 %v14709_v33  ;;  %v14787_v30 = vld [vmem:[%s15678_s26 + $0x1a6c] ss:$16 sps:$4 sm:$0xff]  }
 0x639   : > { %10176 = vmatprep.subr.bf16.mxu0 %v14706_v32  ;;  %v14785_v32 = vld [vmem:[%s15678_s26 + $0x1a68] ss:$16 sps:$4 sm:$0xff]   ;;  %v14793_v33 = vld [vmem:[%s15678_s26 + $0x1a8c] ss:$16 sps:$4 sm:$0xff]  }
 0x63b   : > { %10779 = vmatpush1.bf16.msra.mxu1 %v14707_v36  ;;  %v14791_v36 = vld [vmem:[%s15678_s26 + $0x1a88] ss:$16 sps:$4 sm:$0xff]  }
 0x63c   : > { %10177 = vmatpush1.bf16.msra.mxu0 %v14704_v35  ;;  %10780 = vmatprep.subr.bf16.mxu1 %v14715_v38  ;;  %v14788_v35 = vld [vmem:[%s15678_s26 + $0x1e80] ss:$16 sps:$4 sm:$0xff]   ;;  %v14799_v38 = vld [vmem:[%s15678_s26 + $0x1aac] ss:$16 sps:$4 sm:$0xff]  }
 0x63d   : > { %10178 = vmatprep.subr.bf16.mxu0 %v14712_v10  ;;  %v14796_v10 = vld [vmem:[%s15678_s26 + $0x1ea4] ss:$16 sps:$4 sm:$0xff]  }
 0x63f   : > { %10781 = vmatpush1.bf16.msra.mxu1 %v14713_v41  ;;  %v14797_v41 = vld [vmem:[%s15678_s26 + $0x1aa8] ss:$16 sps:$4 sm:$0xff]  }
 0x640   : > { %10179 = vmatpush1.bf16.msra.mxu0 %v14710_v40  ;;  %10782 = vmatprep.subr.bf16.mxu1 %v14721_v54  ;;  %v14794_v40 = vld [vmem:[%s15678_s26 + $0x1ea0] ss:$16 sps:$4 sm:$0xff]   ;;  %v14805_v54 = vld [vmem:[%s15678_s26 + $0x1acc] ss:$16 sps:$4 sm:$0xff]  }
 0x641   : > { %10180 = vmatprep.subr.bf16.mxu0 %v14718_v42  ;;  %v14802_v42 = vld [vmem:[%s15678_s26 + $0x1ec4] ss:$16 sps:$4 sm:$0xff]  }
 0x643   : > { %10783 = vmatpush1.bf16.msra.mxu1 %v14719_v6  ;;  %v14803_v6 = vld [vmem:[%s15678_s26 + $0x1ac8] ss:$16 sps:$4 sm:$0xff]  }
 0x644   : > { %10181 = vmatpush1.bf16.msra.mxu0 %v14716_v44  ;;  %10784 = vmatprep.subr.bf16.mxu1 %v14727_v48  ;;  %v14800_v44 = vld [vmem:[%s15678_s26 + $0x1ec0] ss:$16 sps:$4 sm:$0xff]   ;;  %v14811_v48 = vld [vmem:[%s15678_s26 + $0x1aec] ss:$16 sps:$4 sm:$0xff]  }
 0x645   : > { %10182 = vmatprep.subr.bf16.mxu0 %v14724_v47  ;;  %v14808_v47 = vld [vmem:[%s15678_s26 + $0x1ee4] ss:$16 sps:$4 sm:$0xff]  }
 0x647   : > { %10785 = vmatpush1.bf16.msra.mxu1 %v14725_v39  ;;  %v14809_v39 = vld [vmem:[%s15678_s26 + $0x1ae8] ss:$16 sps:$4 sm:$0xff]  }
 0x648   : > { %10183 = vmatpush1.bf16.msra.mxu0 %v14722_v8  ;;  %10786 = vmatprep.subr.bf16.mxu1 %v14733_v56  ;;  %v14806_v8 = vld [vmem:[%s15678_s26 + $0x1ee0] ss:$16 sps:$4 sm:$0xff]   ;;  %v14817_v56 = vld [vmem:[%s15678_s26 + $0x1b0c] ss:$16 sps:$4 sm:$0xff]  }
 0x649   : > { %10184 = vmatprep.subr.bf16.mxu0 %v14730_v55  ;;  %v14814_v55 = vld [vmem:[%s15678_s26 + $0x1f04] ss:$16 sps:$4 sm:$0xff]  }
 0x64b   : > { %10787 = vmatpush1.bf16.msra.mxu1 %v14731_v58  ;;  %v14815_v58 = vld [vmem:[%s15678_s26 + $0x1b08] ss:$16 sps:$4 sm:$0xff]  }
 0x64c   : > { %10185 = vmatpush1.bf16.msra.mxu0 %v14728_v46  ;;  %10788 = vmatprep.subr.bf16.mxu1 %v14739_v20  ;;  %v14812_v46 = vld [vmem:[%s15678_s26 + $0x1f00] ss:$16 sps:$4 sm:$0xff]   ;;  %v14823_v20 = vld [vmem:[%s15678_s26 + $0x1b2c] ss:$16 sps:$4 sm:$0xff]  }
 0x64d   : > { %10186 = vmatprep.subr.bf16.mxu0 %v14736_v53  ;;  %v14820_v53 = vld [vmem:[%s15678_s26 + $0x1f24] ss:$16 sps:$4 sm:$0xff]  }
 0x64f   : > { %10789 = vmatpush1.bf16.msra.mxu1 %v14737_v61  ;;  %v14821_v61 = vld [vmem:[%s15678_s26 + $0x1b28] ss:$16 sps:$4 sm:$0xff]  }
 0x650   : > { %10187 = vmatpush1.bf16.msra.mxu0 %v14734_v25  ;;  %10790 = vmatprep.subr.bf16.mxu1 %v14745_v63  ;;  %v14818_v25 = vld [vmem:[%s15678_s26 + $0x1f20] ss:$16 sps:$4 sm:$0xff]   ;;  %v14829_v63 = vld [vmem:[%s15678_s26 + $0x1b4c] ss:$16 sps:$4 sm:$0xff]  }
 0x651   : > { %10188 = vmatprep.subr.bf16.mxu0 %v14742_v62  ;;  %v14826_v62 = vld [vmem:[%s15678_s26 + $0x1f44] ss:$16 sps:$4 sm:$0xff]  }
 0x653   : > { %10791 = vmatpush1.bf16.msra.mxu1 %v14743_v1  ;;  %v14827_v1 = vld [vmem:[%s15678_s26 + $0x1b48] ss:$16 sps:$4 sm:$0xff]  }
 0x654   : > { %10189 = vmatpush1.bf16.msra.mxu0 %v14740_v34  ;;  %10792 = vmatprep.subr.bf16.mxu1 %v14751_v2  ;;  %v14824_v34 = vld [vmem:[%s15678_s26 + $0x1f40] ss:$16 sps:$4 sm:$0xff]   ;;  %v14835_v2 = vld [vmem:[%s15678_s26 + $0x1b6c] ss:$16 sps:$4 sm:$0xff]  }
 0x655   : > { %10190 = vmatprep.subr.bf16.mxu0 %v14748_v0  ;;  %v14832_v0 = vld [vmem:[%s15678_s26 + $0x1f64] ss:$16 sps:$4 sm:$0xff]  }
 0x657   : > { %10793 = vmatpush1.bf16.msra.mxu1 %v14749_v3  ;;  %v14833_v3 = vld [vmem:[%s15678_s26 + $0x1b68] ss:$16 sps:$4 sm:$0xff]  }
 0x658   : > { %10191 = vmatpush1.bf16.msra.mxu0 %v14746_v37  ;;  %10794 = vmatprep.subr.bf16.mxu1 %v14757_v4  ;;  %v14830_v37 = vld [vmem:[%s15678_s26 + $0x1f60] ss:$16 sps:$4 sm:$0xff]   ;;  %v14841_v4 = vld [vmem:[%s15678_s26 + $0x1b8c] ss:$16 sps:$4 sm:$0xff]  }
 0x659   : > { %10192 = vmatprep.subr.bf16.mxu0 %v14754_v49  ;;  %v14838_v49 = vld [vmem:[%s15678_s26 + $0x1f84] ss:$16 sps:$4 sm:$0xff]  }
 0x65b   : > { %10795 = vmatpush1.bf16.msra.mxu1 %v14755_v51  ;;  %v14839_v51 = vld [vmem:[%s15678_s26 + $0x1b88] ss:$16 sps:$4 sm:$0xff]  }
 0x65c   : > { %10193 = vmatpush1.bf16.msra.mxu0 %v14752_v57  ;;  %10796 = vmatprep.subr.bf16.mxu1 %v14763_v9  ;;  %v14836_v57 = vld [vmem:[%s15678_s26 + $0x1f80] ss:$16 sps:$4 sm:$0xff]   ;;  %v14847_v9 = vld [vmem:[%s15678_s26 + $0x1bac] ss:$16 sps:$4 sm:$0xff]  }
 0x65d   : > { %10194 = vmatprep.subr.bf16.mxu0 %v14760_v7  ;;  %v14844_v7 = vld [vmem:[%s15678_s26 + $0x1fa4] ss:$16 sps:$4 sm:$0xff]  }
 0x65f   : > { %10797 = vmatpush1.bf16.msra.mxu1 %v14761_v12  ;;  %v14845_v12 = vld [vmem:[%s15678_s26 + $0x1ba8] ss:$16 sps:$4 sm:$0xff]  }
 0x660   : > { %10195 = vmatpush1.bf16.msra.mxu0 %v14758_v50  ;;  %10809 = vmatprep.subr.bf16.mxu1 %v14769_v13  ;;  %v14842_v50 = vld [vmem:[%s15678_s26 + $0x1fa0] ss:$16 sps:$4 sm:$0xff]   ;;  %v14853_v13 = vld [vmem:[%s15678_s26 + $0x1bcc] ss:$16 sps:$4 sm:$0xff]  }
 0x661   : > { %10207 = vmatprep.subr.bf16.mxu0 %v14766_v52  ;;  %v14850_v52 = vld [vmem:[%s15678_s26 + $0x1fc4] ss:$16 sps:$4 sm:$0xff]  }
 0x662   : > { %10799 = vmatmul.mubr.bf16.vlgmr.msra.gmra.mrb[4].mxu1 %v16666_v45  ;;  %v14776_v45 = vld [vmem:[%s15678_s26 + $0x1e40] ss:$16 sps:$4 sm:$0xff]  }
 0x663   : > { %10197 = vmatmul.mubr.bf16.vlgmr.msra.gmra.mrb[0].mxu0 %v16810_v28  ;;  %10810 = vmatpush1.bf16.msra.mxu1 %v14767_v14  ;;  %v14851_v14 = vld [vmem:[%s15678_s26 + $0x1bc8] ss:$16 sps:$4 sm:$0xff]  }
 0x664   : > { %10208 = vmatpush1.bf16.msra.mxu0 %v14764_v59  ;;  %10811 = vmatprep.subr.bf16.mxu1 %v14775_v19  ;;  %v14848_v59 = vld [vmem:[%s15678_s26 + $0x1fc0] ss:$16 sps:$4 sm:$0xff]   ;;  %v14859_v19 = vld [vmem:[%s15678_s26 + $0x1bec] ss:$16 sps:$4 sm:$0xff]  }
 0x665   : > { %10209 = vmatprep.subr.bf16.mxu0 %v14772_v18  ;;  %10239 = vmatprep.mubr.bf16.mxu0 %v16816_v22  ;;  %v14856_v18 = vld [vmem:[%s15678_s26 + $0x1fe4] ss:$16 sps:$4 sm:$0xff]  }
 0x666   : > { %10841 = vmatprep.mubr.bf16.mxu1 %v16672_v26  ;;  %v14790_v26 = vld [vmem:[%s15678_s26 + $0x1e84] ss:$16 sps:$4 sm:$0xff]  }
 0x667   : > { %10812 = vmatpush1.bf16.msra.mxu1 %v14773_v23  ;;  %v14857_v23 = vld [vmem:[%s15678_s26 + $0x1be8] ss:$16 sps:$4 sm:$0xff]  }
 0x668   : > { %10210 = vmatpush1.bf16.msra.mxu0 %v14770_v60  ;;  %10813 = vmatprep.subr.bf16.mxu1 %v14781_v43  ;;  %v14854_v60 = vld [vmem:[%s15678_s26 + $0x1fe0] ss:$16 sps:$4 sm:$0xff]   ;;  %v16879_v43 = vld [vmem:[#allocation2 + $0xf0] sm:$0xff] }
 0x669   : > { %10211 = vmatprep.subr.bf16.mxu0 %v14778_v24  ;;  %v14862_v24 = vld [vmem:[%s15678_s26 + $0x1c0c] ss:$16 sps:$4 sm:$0xff]  }
 0x66b   : > { %10814 = vmatpush1.bf16.msra.mxu1 %v14779_v27  ;;  %v14865_v27 = vld [vmem:[%s15678_s26 + $0x1c2c] ss:$16 sps:$4 sm:$0xff]  }
 0x66c   : > { %10212 = vmatpush1.bf16.msra.mxu0 %v14776_v45  ;;  %10815 = vmatprep.subr.bf16.mxu1 %v14787_v30  ;;  %v14860_v45 = vld [vmem:[%s15678_s26 + $0x1c08] ss:$16 sps:$4 sm:$0xff]   ;;  %v14958_v30 = vld [vmem:[%s15686_s11 + $0x4] ss:$8 sps:$4 sm:$0xff]  }
 0x66d   : > { %10213 = vmatprep.subr.bf16.mxu0 %v14784_v29  ;;  %v14956_v29 = vld [vmem:[%s15686_s11] ss:$8 sps:$4 sm:$0xff]  }
 0x66f   : > { %10816 = vmatpush1.bf16.msra.mxu1 %v14785_v32  ;;  %v14961_v32 = vld [vmem:[%s15686_s11 + $0x14] ss:$8 sps:$4 sm:$0xff]  }
 0x670   : > { %10214 = vmatpush1.bf16.msra.mxu0 %v14782_v31  ;;  %10817 = vmatprep.subr.bf16.mxu1 %v14793_v33  ;;  %v14863_v31 = vld [vmem:[%s15678_s26 + $0x1c28] ss:$16 sps:$4 sm:$0xff]  }
 0x671   : > { %10215 = vmatprep.subr.bf16.mxu0 %v14790_v26  ;;  %v14868_v26 = vld [vmem:[%s15678_s26 + $0x1c4c] ss:$16 sps:$4 sm:$0xff]   ;;  %v14959_v33 = vld [vmem:[%s15686_s11 + $0x10] ss:$8 sps:$4 sm:$0xff]  }
 0x673   : > { %10818 = vmatpush1.bf16.msra.mxu1 %v14791_v36  ;;  %v14871_v36 = vld [vmem:[%s15678_s26 + $0x1c6c] ss:$16 sps:$4 sm:$0xff]  }
 0x674   : > { %10216 = vmatpush1.bf16.msra.mxu0 %v14788_v35  ;;  %10819 = vmatprep.subr.bf16.mxu1 %v14799_v38  ;;  %v14866_v35 = vld [vmem:[%s15678_s26 + $0x1c48] ss:$16 sps:$4 sm:$0xff]  }
 0x675   : > { %10217 = vmatprep.subr.bf16.mxu0 %v14796_v10  ;;  %v14967_v10 = vld [vmem:[%s15686_s11 + $0x34] ss:$8 sps:$4 sm:$0xff]   ;;  %v14869_v38 = vld [vmem:[%s15678_s26 + $0x1c68] ss:$16 sps:$4 sm:$0xff]  }
 0x677   : > { %10820 = vmatpush1.bf16.msra.mxu1 %v14797_v41  ;;  %v14965_v41 = vld [vmem:[%s15686_s11 + $0x30] ss:$8 sps:$4 sm:$0xff]  }
 0x678   : > { %10218 = vmatpush1.bf16.msra.mxu0 %v14794_v40  ;;  %10821 = vmatprep.subr.bf16.mxu1 %v14805_v54  ;;  %v14874_v40 = vld [vmem:[%s15678_s26 + $0x1c8c] ss:$16 sps:$4 sm:$0xff]   ;;  %v14872_v54 = vld [vmem:[%s15678_s26 + $0x1c88] ss:$16 sps:$4 sm:$0xff]  }
 0x679   : > { %10219 = vmatprep.subr.bf16.mxu0 %v14802_v42  ;;  %v14970_v42 = vld [vmem:[%s15686_s11 + $0x44] ss:$8 sps:$4 sm:$0xff]  }
 0x67b   : > { %10822 = vmatpush1.bf16.msra.mxu1 %v14803_v6  ;;  %v14968_v6 = vld [vmem:[%s15686_s11 + $0x40] ss:$8 sps:$4 sm:$0xff]  }
 0x67c   : > { %10220 = vmatpush1.bf16.msra.mxu0 %v14800_v44  ;;  %10823 = vmatprep.subr.bf16.mxu1 %v14811_v48  ;;  %v14877_v44 = vld [vmem:[%s15678_s26 + $0x1cac] ss:$16 sps:$4 sm:$0xff]   ;;  %v14875_v48 = vld [vmem:[%s15678_s26 + $0x1ca8] ss:$16 sps:$4 sm:$0xff]  }
 0x67d   : > { %10221 = vmatprep.subr.bf16.mxu0 %v14808_v47  ;;  %v14973_v47 = vld [vmem:[%s15686_s11 + $0x54] ss:$8 sps:$4 sm:$0xff]  }
 0x67f   : > { %10824 = vmatpush1.bf16.msra.mxu1 %v14809_v39  ;;  %v14971_v39 = vld [vmem:[%s15686_s11 + $0x50] ss:$8 sps:$4 sm:$0xff]  }
 0x680   : > { %10222 = vmatpush1.bf16.msra.mxu0 %v14806_v8  ;;  %10825 = vmatprep.subr.bf16.mxu1 %v14817_v56  ;;  %v14880_v8 = vld [vmem:[%s15678_s26 + $0x1ccc] ss:$16 sps:$4 sm:$0xff]   ;;  %v14878_v56 = vld [vmem:[%s15678_s26 + $0x1cc8] ss:$16 sps:$4 sm:$0xff]  }
 0x681   : > { %10223 = vmatprep.subr.bf16.mxu0 %v14814_v55  ;;  %v14976_v55 = vld [vmem:[%s15686_s11 + $0x64] ss:$8 sps:$4 sm:$0xff]  }
 0x683   : > { %10826 = vmatpush1.bf16.msra.mxu1 %v14815_v58  ;;  %v14974_v58 = vld [vmem:[%s15686_s11 + $0x60] ss:$8 sps:$4 sm:$0xff]  }
 0x684   : > { %10224 = vmatpush1.bf16.msra.mxu0 %v14812_v46  ;;  %10827 = vmatprep.subr.bf16.mxu1 %v14823_v20  ;;  %v14883_v46 = vld [vmem:[%s15678_s26 + $0x1cec] ss:$16 sps:$4 sm:$0xff]   ;;  %v14881_v20 = vld [vmem:[%s15678_s26 + $0x1ce8] ss:$16 sps:$4 sm:$0xff]  }
 0x685   : > { %10225 = vmatprep.subr.bf16.mxu0 %v14820_v53  ;;  %v14979_v53 = vld [vmem:[%s15686_s11 + $0x74] ss:$8 sps:$4 sm:$0xff]  }
 0x687   : > { %10828 = vmatpush1.bf16.msra.mxu1 %v14821_v61  ;;  %v14977_v61 = vld [vmem:[%s15686_s11 + $0x70] ss:$8 sps:$4 sm:$0xff]  }
 0x688   : > { %10226 = vmatpush1.bf16.msra.mxu0 %v14818_v25  ;;  %10829 = vmatprep.subr.bf16.mxu1 %v14829_v63  ;;  %v14886_v25 = vld [vmem:[%s15678_s26 + $0x1d0c] ss:$16 sps:$4 sm:$0xff]   ;;  %v14884_v63 = vld [vmem:[%s15678_s26 + $0x1d08] ss:$16 sps:$4 sm:$0xff]  }
 0x689   : > { %10227 = vmatprep.subr.bf16.mxu0 %v14826_v62  ;;  %v14982_v62 = vld [vmem:[%s15686_s11 + $0x84] ss:$8 sps:$4 sm:$0xff]  }
 0x68b   : > { %10830 = vmatpush1.bf16.msra.mxu1 %v14827_v1  ;;  %v14980_v1 = vld [vmem:[%s15686_s11 + $0x80] ss:$8 sps:$4 sm:$0xff]  }
 0x68c   : > { %10228 = vmatpush1.bf16.msra.mxu0 %v14824_v34  ;;  %10831 = vmatprep.subr.bf16.mxu1 %v14835_v2  ;;  %v14889_v34 = vld [vmem:[%s15678_s26 + $0x1d2c] ss:$16 sps:$4 sm:$0xff]   ;;  %v14887_v2 = vld [vmem:[%s15678_s26 + $0x1d28] ss:$16 sps:$4 sm:$0xff]  }
 0x68d   : > { %10229 = vmatprep.subr.bf16.mxu0 %v14832_v0  ;;  %v14985_v0 = vld [vmem:[%s15686_s11 + $0x94] ss:$8 sps:$4 sm:$0xff]  }
 0x68f   : > { %10832 = vmatpush1.bf16.msra.mxu1 %v14833_v3  ;;  %v14983_v3 = vld [vmem:[%s15686_s11 + $0x90] ss:$8 sps:$4 sm:$0xff]  }
 0x690   : > { %10230 = vmatpush1.bf16.msra.mxu0 %v14830_v37  ;;  %10833 = vmatprep.subr.bf16.mxu1 %v14841_v4  ;;  %v14892_v37 = vld [vmem:[%s15678_s26 + $0x1d4c] ss:$16 sps:$4 sm:$0xff]  }
 0x691   : > { %10231 = vmatprep.subr.bf16.mxu0 %v14838_v49  ;;  %v14890_v49 = vld [vmem:[%s15678_s26 + $0x1d48] ss:$16 sps:$4 sm:$0xff]   ;;  %v14895_v4 = vld [vmem:[%s15678_s26 + $0x1d6c] ss:$16 sps:$4 sm:$0xff]  }
 0x693   : > { %10834 = vmatpush1.bf16.msra.mxu1 %v14839_v51  ;;  %v14898_v51 = vld [vmem:[%s15678_s26 + $0x1d8c] ss:$16 sps:$4 sm:$0xff]  }
 0x694   : > { %10232 = vmatpush1.bf16.msra.mxu0 %v14836_v57  ;;  %10835 = vmatprep.subr.bf16.mxu1 %v14847_v9  ;;  %v14893_v57 = vld [vmem:[%s15678_s26 + $0x1d68] ss:$16 sps:$4 sm:$0xff]   ;;  %v14901_v9 = vld [vmem:[%s15678_s26 + $0x1dac] ss:$16 sps:$4 sm:$0xff]  }
 0x695   : > { %10233 = vmatprep.subr.bf16.mxu0 %v14844_v7  ;;  %v14896_v7 = vld [vmem:[%s15678_s26 + $0x1d88] ss:$16 sps:$4 sm:$0xff]  }
 0x697   : > { %10836 = vmatpush1.bf16.msra.mxu1 %v14845_v12  ;;  %v14904_v12 = vld [vmem:[%s15678_s26 + $0x1dcc] ss:$16 sps:$4 sm:$0xff]  }
 0x698   : > { %10234 = vmatpush1.bf16.msra.mxu0 %v14842_v50  ;;  %10837 = vmatprep.subr.bf16.mxu1 %v14853_v13  ;;  %v14899_v50 = vld [vmem:[%s15678_s26 + $0x1da8] ss:$16 sps:$4 sm:$0xff]   ;;  %v14907_v13 = vld [vmem:[%s15678_s26 + $0x1dec] ss:$16 sps:$4 sm:$0xff]  }
 0x699   : > { %10235 = vmatprep.subr.bf16.mxu0 %v14850_v52  ;;  %v14902_v52 = vld [vmem:[%s15678_s26 + $0x1dc8] ss:$16 sps:$4 sm:$0xff]  }
 0x69b   : > { %10838 = vmatpush1.bf16.msra.mxu1 %v14851_v14  ;;  %v14910_v14 = vld [vmem:[%s15678_s26 + $0x1e0c] ss:$16 sps:$4 sm:$0xff]  }
 0x69c   : > { %10236 = vmatpush1.bf16.msra.mxu0 %v14848_v59  ;;  %10839 = vmatprep.subr.bf16.mxu1 %v14859_v19  ;;  %v14905_v59 = vld [vmem:[%s15678_s26 + $0x1de8] ss:$16 sps:$4 sm:$0xff]   ;;  %v14913_v19 = vld [vmem:[%s15678_s26 + $0x1e2c] ss:$16 sps:$4 sm:$0xff]  }
 0x69d   : > { %10237 = vmatprep.subr.bf16.mxu0 %v14856_v18  ;;  %v14908_v18 = vld [vmem:[%s15678_s26 + $0x1e08] ss:$16 sps:$4 sm:$0xff]  }
 0x69f   : > { %10840 = vmatpush1.bf16.msra.mxu1 %v14857_v23  ;;  %v14916_v23 = vld [vmem:[%s15678_s26 + $0x1e4c] ss:$16 sps:$4 sm:$0xff]  }
 0x6a0   : > { %10238 = vmatpush1.bf16.msra.mxu0 %v14854_v60  ;;  %10852 = vmatprep.subr.bf16.mxu1 %v14862_v24  ;;  %v14911_v60 = vld [vmem:[%s15678_s26 + $0x1e28] ss:$16 sps:$4 sm:$0xff]  }
 0x6a1   : > { %11366 = vmatprep.subr.bf16.mxu0 %v14958_v30  ;;  %v14914_v24 = vld [vmem:[%s15678_s26 + $0x1e48] ss:$16 sps:$4 sm:$0xff]  }
 0x6a2   : > { %10842 = vmatmul.mubr.bf16.vlgmr.msra.gmra.mrb[4].mxu1 %v16738_v5  ;;  %v14964_v5 = vld [vmem:[%s15686_s11 + $0x24] ss:$8 sps:$4 sm:$0xff]   ;;  %v14923_v30 = vld [vmem:[%s15678_s26 + $0x1ea8] ss:$16 sps:$4 sm:$0xff]  }
 0x6a3   : > { %10240 = vmatmul.mubr.bf16.vlgmr.msra.gmra.mrb[0].mxu0 %v16879_v43  ;;  %10853 = vmatpush1.bf16.msra.mxu1 %v14860_v45  ;;  %v14919_v45 = vld [vmem:[%s15678_s26 + $0x1e6c] ss:$16 sps:$4 sm:$0xff]  }
 0x6a4   : > { %10884 = vmatprep.mubr.bf16.mxu1 %v16744_v11  ;;  %10854 = vmatprep.subr.bf16.mxu1 %v14865_v27  ;;  %v14962_v11 = vld [vmem:[%s15686_s11 + $0x20] ss:$8 sps:$4 sm:$0xff]  }
 0x6a5   : > { %11367 = vmatpush1.bf16.msra.mxu0 %v14956_v29  ;;  %v14917_v27 = vld [vmem:[%s15678_s26 + $0x1e68] ss:$16 sps:$4 sm:$0xff]  }
 0x6a6   : > { %11368 = vmatprep.subr.bf16.mxu0 %v14961_v32  ;;  %v14920_v29 = vld [vmem:[%s15678_s26 + $0x1e88] ss:$16 sps:$4 sm:$0xff]   ;;  %v14988_v32 = vld [vmem:[%s15686_s11 + $0xa4] ss:$8 sps:$4 sm:$0xff]  }
 0x6a7   : > { %10855 = vmatpush1.bf16.msra.mxu1 %v14863_v31  ;;  %v14928_v31 = vld [vmem:[%s15678_s26 + $0x1ecc] ss:$16 sps:$4 sm:$0xff]  }
 0x6a8   : > { %10856 = vmatprep.subr.bf16.mxu1 %v14868_v26  ;;  %v14986_v26 = vld [vmem:[%s15686_s11 + $0xa0] ss:$8 sps:$4 sm:$0xff]  }
 0x6a9   : > { %11369 = vmatpush1.bf16.msra.mxu0 %v14959_v33  ;;  %v14926_v33 = vld [vmem:[%s15678_s26 + $0x1ec8] ss:$16 sps:$4 sm:$0xff]  }
 0x6aa   : > { %11370 = vmatprep.subr.bf16.mxu0 %v14964_v5  ;;  %v14931_v5 = vld [vmem:[%s15678_s26 + $0x1eec] ss:$16 sps:$4 sm:$0xff]  }
 0x6ab   : > { %10857 = vmatpush1.bf16.msra.mxu1 %v14866_v35  ;;  %v14991_v35 = vld [vmem:[%s15686_s11 + $0xb4] ss:$8 sps:$4 sm:$0xff]  }
 0x6ac   : > { %10858 = vmatprep.subr.bf16.mxu1 %v14871_v36  ;;  %v14989_v36 = vld [vmem:[%s15686_s11 + $0xb0] ss:$8 sps:$4 sm:$0xff]  }
 0x6ad   : > { %11371 = vmatpush1.bf16.msra.mxu0 %v14962_v11  ;;  %v14929_v11 = vld [vmem:[%s15678_s26 + $0x1ee8] ss:$16 sps:$4 sm:$0xff]  }
 0x6ae   : > { %11372 = vmatprep.subr.bf16.mxu0 %v14967_v10  ;;  %v14934_v10 = vld [vmem:[%s15678_s26 + $0x1f0c] ss:$16 sps:$4 sm:$0xff]  }
 0x6af   : > { %10859 = vmatpush1.bf16.msra.mxu1 %v14869_v38  ;;  %v14994_v38 = vld [vmem:[%s15686_s11 + $0xc4] ss:$8 sps:$4 sm:$0xff]  }
 0x6b0   : > { %10860 = vmatprep.subr.bf16.mxu1 %v14874_v40  ;;  %v14992_v40 = vld [vmem:[%s15686_s11 + $0xc0] ss:$8 sps:$4 sm:$0xff]  }
 0x6b1   : > { %11373 = vmatpush1.bf16.msra.mxu0 %v14965_v41  ;;  %v14932_v41 = vld [vmem:[%s15678_s26 + $0x1f08] ss:$16 sps:$4 sm:$0xff]  }
 0x6b2   : > { %11374 = vmatprep.subr.bf16.mxu0 %v14970_v42  ;;  %v14937_v42 = vld [vmem:[%s15678_s26 + $0x1f2c] ss:$16 sps:$4 sm:$0xff]  }
 0x6b3   : > { %10861 = vmatpush1.bf16.msra.mxu1 %v14872_v54  ;;  %v14997_v54 = vld [vmem:[%s15686_s11 + $0xd4] ss:$8 sps:$4 sm:$0xff]  }
 0x6b4   : > { %10862 = vmatprep.subr.bf16.mxu1 %v14877_v44  ;;  %v14995_v44 = vld [vmem:[%s15686_s11 + $0xd0] ss:$8 sps:$4 sm:$0xff]  }
 0x6b5   : > { %11375 = vmatpush1.bf16.msra.mxu0 %v14968_v6  ;;  %v14935_v6 = vld [vmem:[%s15678_s26 + $0x1f28] ss:$16 sps:$4 sm:$0xff]  }
 0x6b6   : > { %11376 = vmatprep.subr.bf16.mxu0 %v14973_v47  ;;  %v14940_v47 = vld [vmem:[%s15678_s26 + $0x1f4c] ss:$16 sps:$4 sm:$0xff]  }
 0x6b7   : > { %10863 = vmatpush1.bf16.msra.mxu1 %v14875_v48  ;;  %v15000_v48 = vld [vmem:[%s15686_s11 + $0xe4] ss:$8 sps:$4 sm:$0xff]  }
 0x6b8   : > { %10864 = vmatprep.subr.bf16.mxu1 %v14880_v8  ;;  %v14998_v8 = vld [vmem:[%s15686_s11 + $0xe0] ss:$8 sps:$4 sm:$0xff]  }
 0x6b9   : > { %11377 = vmatpush1.bf16.msra.mxu0 %v14971_v39  ;;  %v14938_v39 = vld [vmem:[%s15678_s26 + $0x1f48] ss:$16 sps:$4 sm:$0xff]  }
 0x6ba   : > { %11378 = vmatprep.subr.bf16.mxu0 %v14976_v55  ;;  %v14943_v55 = vld [vmem:[%s15678_s26 + $0x1f6c] ss:$16 sps:$4 sm:$0xff]  }
 0x6bb   : > { %10865 = vmatpush1.bf16.msra.mxu1 %v14878_v56  ;;  %v15003_v56 = vld [vmem:[%s15686_s11 + $0xf4] ss:$8 sps:$4 sm:$0xff]  }
 0x6bc   : > { %10866 = vmatprep.subr.bf16.mxu1 %v14883_v46  ;;  %v15001_v46 = vld [vmem:[%s15686_s11 + $0xf0] ss:$8 sps:$4 sm:$0xff]  }
 0x6bd   : > { %11379 = vmatpush1.bf16.msra.mxu0 %v14974_v58  ;;  %v14941_v58 = vld [vmem:[%s15678_s26 + $0x1f68] ss:$16 sps:$4 sm:$0xff]  }
 0x6be   : > { %11380 = vmatprep.subr.bf16.mxu0 %v14979_v53  ;;  %v14946_v53 = vld [vmem:[%s15678_s26 + $0x1f8c] ss:$16 sps:$4 sm:$0xff]  }
 0x6bf   : > { %10867 = vmatpush1.bf16.msra.mxu1 %v14881_v20  ;;  %v14944_v20 = vld [vmem:[%s15678_s26 + $0x1f88] ss:$16 sps:$4 sm:$0xff]  }
 0x6c0   : > { %10868 = vmatprep.subr.bf16.mxu1 %v14886_v25  ;;  %v15006_v25 = vld [vmem:[%s15686_s11 + $0x104] ss:$8 sps:$4 sm:$0xff]  }
 0x6c1   : > { %11381 = vmatpush1.bf16.msra.mxu0 %v14977_v61  ;;  %v14949_v61 = vld [vmem:[%s15678_s26 + $0x1fac] ss:$16 sps:$4 sm:$0xff]  }
 0x6c2   : > { %11382 = vmatprep.subr.bf16.mxu0 %v14982_v62  ;;  %v14947_v62 = vld [vmem:[%s15678_s26 + $0x1fa8] ss:$16 sps:$4 sm:$0xff]  }
 0x6c3   : > { %10869 = vmatpush1.bf16.msra.mxu1 %v14884_v63  ;;  %v14952_v63 = vld [vmem:[%s15678_s26 + $0x1fcc] ss:$16 sps:$4 sm:$0xff]  }
 0x6c4   : > { %10870 = vmatprep.subr.bf16.mxu1 %v14889_v34  ;;  %v14950_v34 = vld [vmem:[%s15678_s26 + $0x1fc8] ss:$16 sps:$4 sm:$0xff]  }
 0x6c5   : > { %11383 = vmatpush1.bf16.msra.mxu0 %v14980_v1  ;;  %v14955_v1 = vld [vmem:[%s15678_s26 + $0x1fec] ss:$16 sps:$4 sm:$0xff]  }
 0x6c6   : > { %11384 = vmatprep.subr.bf16.mxu0 %v14985_v0  ;;  %v14953_v0 = vld [vmem:[%s15678_s26 + $0x1fe8] ss:$16 sps:$4 sm:$0xff]  }
 0x6c7   : > { %10871 = vmatpush1.bf16.msra.mxu1 %v14887_v2  ;;  %v4406_v2 = vlaneseq }
 0x6c8   : > { %10872 = vmatprep.subr.bf16.mxu1 %v14892_v37 }
 0x6c9   : > { %11385 = vmatpush1.bf16.msra.mxu0 %v14983_v3  ;;  %v16983_v37 = vshrl.u32 %v4406_v2, 7  ;;  %v4403_v3 = vld [vmem:[%s15684_s12] sm:$0xf]  ;;  %v15034_v2 = vld [vmem:[%s15686_s11 + $0x1a0] ss:$8 sps:$4 sm:$0xff]  }
 0x6ca   : > { %11386 = vmatprep.subr.bf16.mxu0 %v14988_v32 }
 0x6cb   : > { %10873 = vmatpush1.bf16.msra.mxu1 %v14890_v49  ;;  %v16986_v49 = vunpack.c.l.bf16 %v4403_v3  ;;  %v15039_v3 = vld [vmem:[%s15686_s11 + $0x1b4] ss:$8 sps:$4 sm:$0xff]  }
 0x6cc   : > { %10874 = vmatprep.subr.bf16.mxu1 %v14895_v4  ;;  %v16989_v4 = vsub.s32 0, %v16983_v37 }
 0x6cd   : > { %11387 = vmatpush1.bf16.msra.mxu0 %v14986_v26 }
 0x6ce   : > { %11388 = vmatprep.subr.bf16.mxu0 %v14991_v35 }
 0x6cf   : > { %10875 = vmatpush1.bf16.msra.mxu1 %v14893_v57  ;;  %v4412_v57 = vsub.s32 2, %v16983_v37 }
 0x6d0   : > { %10876 = vmatprep.subr.bf16.mxu1 %v14898_v51  ;;  %v4409_v51 = vrot.slane %v16986_v49, %v16989_v4 }
 0x6d1   : > { %11389 = vmatpush1.bf16.msra.mxu0 %v14989_v36 }
 0x6d2   : > { %11390 = vmatprep.subr.bf16.mxu0 %v14994_v38 }
 0x6d3   : > { %10877 = vmatpush1.bf16.msra.mxu1 %v14896_v7  ;;  %v4413_v7 = vrot.slane %v16986_v49, %v4412_v57 }
 0x6d4   : > { %10878 = vmatprep.subr.bf16.mxu1 %v14901_v9 }
 0x6d5   : > { %11391 = vmatpush1.bf16.msra.mxu0 %v14992_v40  ;;  %v4433_v9 = vrot.slane %v4413_v7, %v16989_v4  ;;  %v15042_v7 = vld [vmem:[%s15686_s11 + $0x1c4] ss:$8 sps:$4 sm:$0xff]  }
 0x6d6   : > { %11392 = vmatprep.subr.bf16.mxu0 %v14997_v54  ;;  %v15004_v54 = vld [vmem:[%s15686_s11 + $0x100] ss:$8 sps:$4 sm:$0xff]  }
 0x6d7   : > { %10879 = vmatpush1.bf16.msra.mxu1 %v14899_v50 }
 0x6d8   : > { %10880 = vmatprep.subr.bf16.mxu1 %v14904_v12  ;;  %v9599_v12 = vadd.f32 %v16140_v16, %v4433_v9 }
 0x6d9   : > { %11393 = vmatpush1.bf16.msra.mxu0 %v14995_v44  ;;  %v15009_v44 = vld [vmem:[%s15686_s11 + $0x114] ss:$8 sps:$4 sm:$0xff]  }
 0x6da   : > { %11394 = vmatprep.subr.bf16.mxu0 %v15000_v48  ;;  %v15010_v48 = vld [vmem:[%s15686_s11 + $0x120] ss:$8 sps:$4 sm:$0xff]  }
 0x6db   : > { %10881 = vmatpush1.bf16.msra.mxu1 %v14902_v52 }
 0x6dc   : > { %10882 = vmatprep.subr.bf16.mxu1 %v14907_v13 }
 0x6dd   : > { %11395 = vmatpush1.bf16.msra.mxu0 %v14998_v8  ;;  %v15015_v8 = vld [vmem:[%s15686_s11 + $0x134] ss:$8 sps:$4 sm:$0xff]  }
 0x6de   : > { %11396 = vmatprep.subr.bf16.mxu0 %v15003_v56  ;;  %v15016_v56 = vld [vmem:[%s15686_s11 + $0x140] ss:$8 sps:$4 sm:$0xff]  }
 0x6df   : > { %10883 = vmatpush1.bf16.msra.mxu1 %v14905_v59 }
 0x6e0   : > { %10895 = vmatprep.subr.bf16.mxu1 %v14910_v14 }
 0x6e1   : > { %11397 = vmatpush1.bf16.msra.mxu0 %v15001_v46  ;;  %v15021_v46 = vld [vmem:[%s15686_s11 + $0x154] ss:$8 sps:$4 sm:$0xff]  }
 0x6e2   : > { %10885 = vmatmul.mubr.bf16.vlgmr.msra.gmra.mrb[4].mxu1 %v16810_v28  ;;  %v14922_v28 = vld [vmem:[%s15678_s26 + $0x1e8c] ss:$16 sps:$4 sm:$0xff]   ;;  %11409 = vmatprep.subr.bf16.mxu0 %v15006_v25 }
 0x6e3   : > { %10896 = vmatpush1.bf16.msra.mxu1 %v14908_v18  ;;  %10927 = vmatprep.mubr.bf16.mxu1 %v16816_v22  ;;  %v14925_v22 = vld [vmem:[%s15678_s26 + $0x1eac] ss:$16 sps:$4 sm:$0xff]   ;;  %v9603_v18 = vadd.f32 %v16146_v21, %v4433_v9 }
 0x6e4   : > { %10897 = vmatprep.subr.bf16.mxu1 %v14913_v19  ;;  %v15027_v25 = vld [vmem:[%s15686_s11 + $0x174] ss:$8 sps:$4 sm:$0xff]  }
 0x6e5   : > { %v15045_v9 = vld [vmem:[%s15686_s11 + $0x1d4] ss:$8 sps:$4 sm:$0xff]  }
 0x6e7   : > { %10898 = vmatpush1.bf16.msra.mxu1 %v14911_v60 }
 0x6e8   : > { %10899 = vmatprep.subr.bf16.mxu1 %v14916_v23 }
 0x6eb   : > { %10900 = vmatpush1.bf16.msra.mxu1 %v14914_v24 }
 0x6ec   : > { %10901 = vmatprep.subr.bf16.mxu1 %v14919_v45 }
 0x6ef   : > { %10902 = vmatpush1.bf16.msra.mxu1 %v14917_v27 }
 0x6f0   : > { %10903 = vmatprep.subr.bf16.mxu1 %v14922_v28 }
 0x6f3   : > { %10904 = vmatpush1.bf16.msra.mxu1 %v14920_v29 }
 0x6f4   : > { %10905 = vmatprep.subr.bf16.mxu1 %v14925_v22 }
 0x6f7   : > { %10906 = vmatpush1.bf16.msra.mxu1 %v14923_v30 }
 0x6f8   : > { %10907 = vmatprep.subr.bf16.mxu1 %v14928_v31 }
 0x6fb   : > { %10908 = vmatpush1.bf16.msra.mxu1 %v14926_v33 }
 0x6fc   : > { %10909 = vmatprep.subr.bf16.mxu1 %v14931_v5 }
 0x6ff   : > { %10910 = vmatpush1.bf16.msra.mxu1 %v14929_v11 }
 0x700   : > { %10911 = vmatprep.subr.bf16.mxu1 %v14934_v10 }
 0x703   : > { %10912 = vmatpush1.bf16.msra.mxu1 %v14932_v41 }
 0x704   : > { %10913 = vmatprep.subr.bf16.mxu1 %v14937_v42 }
 0x707   : > { %10914 = vmatpush1.bf16.msra.mxu1 %v14935_v6  ;;  %v15007_v6 = vld [vmem:[%s15686_s11 + $0x110] ss:$8 sps:$4 sm:$0xff]  }
 0x708   : > { %10915 = vmatprep.subr.bf16.mxu1 %v14940_v47  ;;  %v15012_v47 = vld [vmem:[%s15686_s11 + $0x124] ss:$8 sps:$4 sm:$0xff]  }
 0x70b   : > { %10916 = vmatpush1.bf16.msra.mxu1 %v14938_v39  ;;  %v15013_v39 = vld [vmem:[%s15686_s11 + $0x130] ss:$8 sps:$4 sm:$0xff]  }
 0x70c   : > { %10917 = vmatprep.subr.bf16.mxu1 %v14943_v55  ;;  %v15018_v55 = vld [vmem:[%s15686_s11 + $0x144] ss:$8 sps:$4 sm:$0xff]  }
 0x70f   : > { %10918 = vmatpush1.bf16.msra.mxu1 %v14941_v58  ;;  %v15019_v58 = vld [vmem:[%s15686_s11 + $0x150] ss:$8 sps:$4 sm:$0xff]  }
 0x710   : > { %10919 = vmatprep.subr.bf16.mxu1 %v14946_v53  ;;  %v15024_v53 = vld [vmem:[%s15686_s11 + $0x164] ss:$8 sps:$4 sm:$0xff]  }
 0x713   : > { %10920 = vmatpush1.bf16.msra.mxu1 %v14944_v20  ;;  %v15022_v20 = vld [vmem:[%s15686_s11 + $0x160] ss:$8 sps:$4 sm:$0xff]  }
 0x714   : > { %10921 = vmatprep.subr.bf16.mxu1 %v14949_v61  ;;  %v15025_v61 = vld [vmem:[%s15686_s11 + $0x170] ss:$8 sps:$4 sm:$0xff]  }
 0x717   : > { %10922 = vmatpush1.bf16.msra.mxu1 %v14947_v62  ;;  %v15030_v62 = vld [vmem:[%s15686_s11 + $0x184] ss:$8 sps:$4 sm:$0xff]  }
 0x718   : > { %10923 = vmatprep.subr.bf16.mxu1 %v14952_v63  ;;  %v15028_v63 = vld [vmem:[%s15686_s11 + $0x180] ss:$8 sps:$4 sm:$0xff]  }
 0x71b   : > { %10924 = vmatpush1.bf16.msra.mxu1 %v14950_v34  ;;  %v15033_v34 = vld [vmem:[%s15686_s11 + $0x194] ss:$8 sps:$4 sm:$0xff]  }
 0x71c   : > { %10925 = vmatprep.subr.bf16.mxu1 %v14955_v1  ;;  %v15031_v1 = vld [vmem:[%s15686_s11 + $0x190] ss:$8 sps:$4 sm:$0xff]  }
 0x71f   : > { %10926 = vmatpush1.bf16.msra.mxu1 %v14953_v0  ;;  %v15036_v0 = vld [vmem:[%s15686_s11 + $0x1a4] ss:$8 sps:$4 sm:$0xff]  }
 0x722   : > { %10928 = vmatmul.mubr.bf16.vlgmr.msra.gmra.mrb[4].mxu1 %v16879_v43  ;;  %v4429_v43 = vrot.slane %v4409_v51, %v16989_v4  ;;  %v15037_v51 = vld [vmem:[%s15686_s11 + $0x1b0] ss:$8 sps:$4 sm:$0xff]  }
 0x724   : > { %v9597_v50 = vadd.f32 %v16138_v15, %v4429_v43  ;;  %v9601_v13 = vadd.f32 %v16142_v17, %v4429_v43  ;;  %v15040_v43 = vld [vmem:[%s15686_s11 + $0x1c0] ss:$8 sps:$4 sm:$0xff]  }
 0x776   : > { %v10241_v52 = vpop.f32.mrb[0].mxu0 }
 0x777   : > { %v13051_v59 = vadd.f32 %v10241_v52, %v9597_v50  ;;  %v10243_v14 = vpop.f32.mrb[1].mxu0  ;;  %v15043_v50 = vld [vmem:[%s15686_s11 + $0x1d0] ss:$8 sps:$4 sm:$0xff]   ;;  %v15046_v52 = vld [vmem:[%s15686_s11 + $0x1e0] ss:$8 sps:$4 sm:$0xff]  }
 0x778   : > { %v13053_v19 = vadd.f32 %v10243_v14, %v9599_v12  ;;  %v10245_v60 = vpop.f32.mrb[2].mxu0  ;;  %v15048_v12 = vld [vmem:[%s15686_s11 + $0x1e4] ss:$8 sps:$4 sm:$0xff]   ;;  %v4416_v14 = vsub.s32 4, %v16983_v37 }
 0x779   : > { %v10946_v23 = vmul.f32 0.70710677, %v13051_v59  ;;  %v13055_v24 = vadd.f32 %v10245_v60, %v9601_v13  ;;  %v10247_v45 = vpop.f32.mrb[3].mxu0  ;;  %v10938_v32 = vmul.f32 0.5, %v13051_v59  ;;  %v15051_v13 = vld [vmem:[%s15686_s11 + $0x1f4] ss:$8 sps:$4 sm:$0xff]  }
 0x77a   : > { %v10947_v27 = vmul.f32 0.70710677, %v13053_v19  ;;  %v13057_v28 = vadd.f32 %v10247_v45, %v9603_v18  ;;  %v10939_v5 = vmul.f32 0.5, %v13053_v19  ;;  %v15049_v59 = vld [vmem:[%s15686_s11 + $0x1f0] ss:$8 sps:$4 sm:$0xff]   ;;  %v4420_v18 = vsub.s32 6, %v16983_v37 }
 0x77b   : > { %15052 = verf.f32 %v10946_v23  ;;  %v10950_v29 = vmul.f32 0.70710677, %v13055_v24  ;;  %v10942_v26 = vmul.f32 0.5, %v13055_v24  ;;  %v4417_v19 = vrot.slane %v16986_v49, %v4416_v14 }
 0x77c   : > { %15054 = verf.f32 %v10947_v27  ;;  %v10951_v15 = vmul.f32 0.70710677, %v13057_v28  ;;  %v10943_v35 = vmul.f32 0.5, %v13057_v28  ;;  %v4421_v60 = vrot.slane %v16986_v49, %v4420_v18 }
 0x77d   : > { %15056 = verf.f32 %v10950_v29  ;;  %v4437_v23 = vrot.slane %v4417_v19, %v16989_v4 }
 0x77e   : > { %15058 = verf.f32 %v10951_v15  ;;  %v4441_v24 = vrot.slane %v4421_v60, %v16989_v4 }
 0x785   : > { %v15053_v16 = vpop.eup %15052 }
 0x786   : > { %v15055_v22 = vpop.eup %15054  ;;  %v10962_v17 = vadd.f32 1.0, %v15053_v16 }
 0x787   : > { %v15057_v30 = vpop.eup %15056  ;;  %v10963_v21 = vadd.f32 1.0, %v15055_v22 }
 0x788   : > { %v15059_v31 = vpop.eup %15058  ;;  %v10966_v33 = vadd.f32 1.0, %v15057_v30  ;;  %v10970_v11 = vmul.f32 %v10962_v17, %v10938_v32 }
 0x789   : > { %v10967_v36 = vadd.f32 1.0, %v15059_v31  ;;  %v10971_v38 = vmul.f32 %v10963_v21, %v10939_v5 }
 0x78a   : > { %v10974_v10 = vmul.f32 %v10966_v33, %v10942_v26 }
 0x78b   : > { %v10975_v40 = vmul.f32 %v10967_v36, %v10943_v35 }
 0x78c   : > { %v10978_v41 = vpack.c.bf16 %v10974_v10, %v10970_v11 }
 0x78d   : > { %v10979_v42 = vpack.c.bf16 %v10975_v40, %v10971_v38 }
 0x78f   : > { %11398 = vmatprep.mubr.bf16.mxu0 %v10979_v42 }
 0x790   : > { %11399 = vmatmul.mubr.bf16.vlgmr.msra.gmra.mrb[4].mxu0 %v10978_v41 }
 0x791   : > { %11410 = vmatpush1.bf16.msra.mxu0 %v15004_v54 }
 0x792   : > { %11411 = vmatprep.subr.bf16.mxu0 %v15009_v44 }
 0x795   : > { %11412 = vmatpush1.bf16.msra.mxu0 %v15007_v6 }
 0x796   : > { %11413 = vmatprep.subr.bf16.mxu0 %v15012_v47 }
 0x799   : > { %11414 = vmatpush1.bf16.msra.mxu0 %v15010_v48 }
 0x79a   : > { %11415 = vmatprep.subr.bf16.mxu0 %v15015_v8 }
 0x79d   : > { %11416 = vmatpush1.bf16.msra.mxu0 %v15013_v39 }
 0x79e   : > { %11417 = vmatprep.subr.bf16.mxu0 %v15018_v55 }
 0x7a1   : > { %11418 = vmatpush1.bf16.msra.mxu0 %v15016_v56 }
 0x7a2   : > { %11419 = vmatprep.subr.bf16.mxu0 %v15021_v46 }
 0x7a5   : > { %11420 = vmatpush1.bf16.msra.mxu0 %v15019_v58 }
 0x7a6   : > { %11421 = vmatprep.subr.bf16.mxu0 %v15024_v53 }
 0x7a9   : > { %11422 = vmatpush1.bf16.msra.mxu0 %v15022_v20 }
 0x7aa   : > { %11423 = vmatprep.subr.bf16.mxu0 %v15027_v25 }
 0x7ad   : > { %11424 = vmatpush1.bf16.msra.mxu0 %v15025_v61 }
 0x7ae   : > { %11425 = vmatprep.subr.bf16.mxu0 %v15030_v62 }
 0x7b1   : > { %11426 = vmatpush1.bf16.msra.mxu0 %v15028_v63 }
 0x7b2   : > { %11427 = vmatprep.subr.bf16.mxu0 %v15033_v34 }
 0x7b5   : > { %11428 = vmatpush1.bf16.msra.mxu0 %v15031_v1 }
 0x7b6   : > { %11429 = vmatprep.subr.bf16.mxu0 %v15036_v0 }
 0x7b9   : > { %11430 = vmatpush1.bf16.msra.mxu0 %v15034_v2 }
 0x7ba   : > { %11431 = vmatprep.subr.bf16.mxu0 %v15039_v3 }
 0x7bd   : > { %11432 = vmatpush1.bf16.msra.mxu0 %v15037_v51 }
 0x7be   : > { %11433 = vmatprep.subr.bf16.mxu0 %v15042_v7 }
 0x7c1   : > { %11434 = vmatpush1.bf16.msra.mxu0 %v15040_v43 }
 0x7c2   : > { %11435 = vmatprep.subr.bf16.mxu0 %v15045_v9 }
 0x7c5   : > { %11436 = vmatpush1.bf16.msra.mxu0 %v15043_v50 }
 0x7c6   : > { %11437 = vmatprep.subr.bf16.mxu0 %v15048_v12 }
 0x7c9   : > { %11438 = vmatpush1.bf16.msra.mxu0 %v15046_v52 }
 0x7ca   : > { %11439 = vmatprep.subr.bf16.mxu0 %v15051_v13 }
 0x7cd   : > { %11440 = vmatpush1.bf16.msra.mxu0 %v15049_v59 }
 0x7f5   : > { %v10929_v45 = vpop.f32.mrb[4].mxu1 }
 0x7f6   : > { %v13058_v27 = vadd.f32 %v10929_v45, %v4437_v23  ;;  %v10931_v28 = vpop.f32.mrb[5].mxu1 }
 0x7f7   : > { %v13059_v29 = vadd.f32 %v10931_v28, %v4441_v24  ;;  %v10933_v15 = vpop.f32.mrb[6].mxu1 }
 0x7f8   : > { %v10948_v16 = vmul.f32 0.70710677, %v13058_v27  ;;  %v13060_v22 = vadd.f32 %v10933_v15, %v4437_v23  ;;  %v10935_v17 = vpop.f32.mrb[7].mxu1  ;;  %v10940_v11 = vmul.f32 0.5, %v13058_v27 }
 0x7f9   : > { %v10949_v30 = vmul.f32 0.70710677, %v13059_v29  ;;  %v13061_v21 = vadd.f32 %v10935_v17, %v4441_v24  ;;  %v10941_v40 = vmul.f32 0.5, %v13059_v29 }
 0x7fa   : > { %15060 = verf.f32 %v10948_v16  ;;  %v10952_v31 = vmul.f32 0.70710677, %v13060_v22  ;;  %v10944_v10 = vmul.f32 0.5, %v13060_v22 }
 0x7fb   : > { %15062 = verf.f32 %v10949_v30  ;;  %v10953_v32 = vmul.f32 0.70710677, %v13061_v21  ;;  %v10945_v41 = vmul.f32 0.5, %v13061_v21 }
 0x7fc   : > { %15064 = verf.f32 %v10952_v31 }
 0x7fd   : > { %15066 = verf.f32 %v10953_v32 }
 0x804   : > { %v15061_v49 = vpop.eup %15060 }
 0x805   : > { %v15063_v26 = vpop.eup %15062  ;;  %v10964_v33 = vadd.f32 1.0, %v15061_v49 }
 0x806   : > { %v15065_v5 = vpop.eup %15064  ;;  %v10965_v35 = vadd.f32 1.0, %v15063_v26 }
 0x807   : > { %v15067_v36 = vpop.eup %15066  ;;  %v10968_v38 = vadd.f32 1.0, %v15065_v5  ;;  %v10972_v54 = vmul.f32 %v10964_v33, %v10940_v11 }
 0x808   : > { %v10969_v42 = vadd.f32 1.0, %v15067_v36  ;;  %v10973_v6 = vmul.f32 %v10965_v35, %v10941_v40 }
 0x809   : > { %v10976_v44 = vmul.f32 %v10968_v38, %v10944_v10 }
 0x80a   : > { %v10977_v47 = vmul.f32 %v10969_v42, %v10945_v41 }
 0x80b   : > { %v10980_v48 = vpack.c.bf16 %v10976_v44, %v10972_v54 }
 0x80c   : > { %v10981_v8 = vpack.c.bf16 %v10977_v47, %v10973_v6 }
 0x80e   : > { %11441 = vmatprep.mubr.bf16.mxu0 %v10981_v8 }
 0x80f   : > { %11442 = vmatmul.mubr.bf16.vlgmr.msra.gmra.mrb[4].mxu0 %v10980_v48 }
 0x8df   : > { %11454 = sbr.rel (%p17139_p1) target bundleno = 2279 (0x8e7), region = 84 }
 0x8e2   : > { %v11443_v39 = vpop.f32.mrb[4].mxu0 }
 0x8e3   : > { %v11445_v55 = vpop.f32.mrb[5].mxu0  ;;  %11455 = vst [vmem:[#allocation3] sm:$0xff] (!%p17139_p1), %v11443_v39 }
 0x8e4   : > { %v11447_v56 = vpop.f32.mrb[6].mxu0  ;;  %11456 = vst [vmem:[#allocation3 + $0x8] sm:$0xff] (!%p17139_p1), %v11445_v55 }
 0x8e5   : > { %v11449_v46 = vpop.f32.mrb[7].mxu0  ;;  %11457 = vst [vmem:[#allocation3 + $0x10] sm:$0xff] (!%p17139_p1), %v11447_v56 }
 0x8e6   : > { %11458 = vst [vmem:[#allocation3 + $0x18] sm:$0xff] %v11449_v46 }
 0x8e7 PF: > { %p13036_p2 = scmp.le.s32.totalorder %s15438_s28, 0 }
 0x8e9   : > { %11462 = sbr.rel (%p13036_p2) target bundleno = 2289 (0x8f1), region = 88 }
 0x8eb   : > { %v11463_v58 = vld [vmem:[#allocation3] sm:$0xff] (!%p13036_p2) }
 0x8ec   : > { %v11464_v53 = vld [vmem:[#allocation3 + $0x8] sm:$0xff] (!%p13036_p2)  ;;  %v11467_v25 = vadd.f32 (!%p13036_p2), %v11463_v58, %v11443_v39 }
 0x8ed   : > { %v11465_v20 = vld [vmem:[#allocation3 + $0x10] sm:$0xff] (!%p13036_p2)  ;;  %v11468_v61 = vadd.f32 (!%p13036_p2), %v11464_v53, %v11445_v55  ;;  %v11466_v63 = vld [vmem:[#allocation3 + $0x18] sm:$0xff] (!%p13036_p2) }
 0x8ee   : > { %v11469_v62 = vadd.f32 (!%p13036_p2), %v11465_v20, %v11447_v56  ;;  %v11470_v34 = vadd.f32 (!%p13036_p2), %v11466_v63, %v11449_v46  ;;  %11471 = vst [vmem:[#allocation3] sm:$0xff] (!%p13036_p2), %v11467_v25 }
 0x8ef   : > { %11472 = vst [vmem:[#allocation3 + $0x8] sm:$0xff] (!%p13036_p2), %v11468_v61 }
 0x8f0   : > { %11473 = vst [vmem:[#allocation3 + $0x10] sm:$0xff] %v11469_v62  ;;  %11474 = vst [vmem:[#allocation3 + $0x18] sm:$0xff] %v11470_v34 }
 0x8f1 PF: > { %p13037_p4 = scmp.ne.s32.totalorder %s15438_s28, 5 }
 0x8f2   : > { %v11483_v1 = vld [vmem:[#allocation15] sm:$0x3] (!%p13037_p4) }
 0x8f3   : > { %11478 = sbr.rel (%p13037_p4) target bundleno = 2302 (0x8fe), region = 92  ;;  %v11484_v0 = vunpack.c.l.bf16 (!%p13037_p4), %v11483_v1 }
 0x8f5   : > { %v11489_v3 = vrot.slane (!%p13037_p4), %v11484_v0, %v16989_v4  ;;  %v11493_v51 = vrot.slane (!%p13037_p4), %v11484_v0, %v4412_v57 }
 0x8f6   : > { %v11479_v2 = vld [vmem:[#allocation3] sm:$0xff] (!%p13037_p4) }
 0x8f7   : > { %v11480_v7 = vld [vmem:[#allocation3 + $0x8] sm:$0xff] (!%p13037_p4)  ;;  %v11481_v43 = vld [vmem:[#allocation3 + $0x10] sm:$0xff] (!%p13037_p4)  ;;  %v11482_v9 = vld [vmem:[#allocation3 + $0x18] sm:$0xff] (!%p13037_p4)  ;;  %v11499_v50 = vrot.slane (!%p13037_p4), %v11489_v3, %v16989_v4  ;;  %v11503_v12 = vrot.slane (!%p13037_p4), %v11493_v51, %v16989_v4 }
 0x8f9   : > { %v11504_v52 = vadd.f32 (!%p13037_p4), %v11499_v50, %v11479_v2  ;;  %v11505_v13 = vadd.f32 (!%p13037_p4), %v11503_v12, %v11480_v7  ;;  %v11506_v59 = vadd.f32 (!%p13037_p4), %v11499_v50, %v11481_v43  ;;  %v11507_v14 = vadd.f32 (!%p13037_p4), %v11503_v12, %v11482_v9 }
 0x8fb   : > { %v13048_v18 = vpack.c.bf16 %v11505_v13, %v11504_v52  ;;  %v13049_v19 = vpack.c.bf16 %v11507_v14, %v11506_v59 }
 0x8fd   : > { %11520 = vst [vmem:[#allocation16] sm:$0xff] %v13048_v18  ;;  %11521 = vst [vmem:[#allocation16 + $0x8] sm:$0xff] %v13049_v19 }
 0x8fe PF: > { %p13240_p6 = scmp.eq.s32.totalorder %s15438_s28, 5  ;;  %s15376_s29 = smov [#allocation16]  }
 0x8ff   : > { %s11528_s17 = sshll.u32 %s15376_s29, 4  ;;  %s11529_s17 = int_to_ptr.vmem [resolvable:$true] %s11528_s17 }
 0x900   : > { %s15278_s23 = scalar_lea.vmem %s11529_s17, 256  ;;  %p15285_p12 = scmp.lt.s32.totalorder %s11529_s17, %s11529_s17 }
 0x901   : > { %p15279_p9 = scmp.ne.s32.totalorder %s11529_s17, %s15278_s23  ;;  %p15286_p0 = scmp.lt.s32.totalorder %s15278_s23, %s15278_s23 }
 0x903   : > { %p15280_p11 = pnand %p15279_p9, %p13240_p6  ;;  %p15287_p3 = por %p15286_p0, %p15285_p12 }
 0x905   : > { %p15281_p5 = pneg %p15280_p11 }
 0x907   : > { %p15288_p8 = pnand %p15287_p3, %p15281_p5 }
 0x909   : > { %15291 = shalt.err (!%p15288_p8)
}
 0x90a   : > { %s15292_s13 = scalar_lea.hbm %s17092_s7, 256 }
 0x90b   : > { %p15293_p7 = scmp.ne.s32.totalorder %s17092_s7, %s15292_s13  ;;  %p15298_p1 = scmp.lt.u32.totalorder %s15292_s13, %s17092_s7 }
 0x90d   : > { %p15294_p10 = pnand %p15293_p7, %p13240_p6 }
 0x90f   : > { %p15295_p13 = pneg %p15294_p10 }
 0x911   : > { %p15300_p2 = pnand %p15298_p1, %p15295_p13 }
 0x913   : > { %15303 = shalt.err (!%p15300_p2)
}
 0x914   : > { %s15377_s16 = smov 128   ;;  %s15378_s3 = smov 8  }
 0x915   : > { %13205 = dma.vmem_to_hbm [thread:$0]  (%p13240_p6), %s11529_s17, 256, %s17092_s7, [#allocation6], %s15377_s16, %s15377_s16, %s15378_s3  }
 0x916   : > { %15341 = dma.done.wait (%p13240_p6), [#allocation6], 256  }
 0x917   : > { %15343 = vsyncadd (%p13240_p6), [#allocation6], 4294967040 }
 0x918 PF: > { %s17140_s27 = sld [smem:[#allocation24_spill]]  ;;  %s17141_s9 = sld [smem:[#allocation23_spill]] }
 0x919   : > { %s17142_s26 = sld [smem:[#allocation25_spill]]  ;;  %s17143_s24 = smov %s15350_s25 }
 0x91e   : > { %p23_p4 = scmp.ge.s32.totalorder %s17140_s27, 8   ;;  %s17144_s25 = smov %s17141_s9 }
 0x920   :  { %25 = sbr.rel (!%p23_p4) target bundleno = 12 (0xc), region = 142 }
 0x927   :  { %11544 = vsyncpa [#allocation5], 1 }
 0x928   :  { %11546 = vsyncpa [#allocation5 + $0x1], 1 }
 0x929   :  { %11547 = vsyncpa [#allocation8], 1 }
 0x92a   :  { %11548 = vsyncpa [#allocation11], 1 }
 0x92b   :  { %11550 = vsyncpa [#allocation11 + $0x1], 1 }
 0x92c   :  { %11551 = vsyncpa [#allocation14], 1 }
 0x92d   :  { %11553 = vsyncpa [#allocation14 + $0x1], 1 }
 0x92e   :  { %11554 = vsyncpa [#allocation6], 1 }
 0x92f   :  { %11556 = vsyncpa [#allocation6 + $0x1], 1 }

</bundles_post_ra>
